<compile_context>
chip_gen: v7x
topology: tpu7x:2x2x1
jax: 0.10.0
libtpu: 0.0.40
codegen_flags: <defaults>
</compile_context>

<pallas_src>
import functools
import math

import jax
import jax.numpy as jnp
from jax.experimental import pallas as pl
from jax.experimental.pallas import tpu as pltpu


def san_kernel(u_ref, base_ref, wu_ref,
               aq_ref, bq_ref, ak_ref, bk_ref, av_ref, bv_ref,
               ao_ref, bo_ref, a1_ref, b1_ref, a2_ref, b2_ref,
               o_ref, *, seq, dm, scale, eps):
    f32 = jnp.float32
    rows = u_ref.shape[0]              # tn * seq flattened (node-major) rows
    tn = rows // seq
    hid = a1_ref.shape[1]

    # --- Linear(2,16) on cat([e, u]); the e-column + bias are prefolded into
    #     base_ref, so only u's column remains in-kernel (pure VPU). ---------
    h0 = u_ref[...] * wu_ref[...] + base_ref[...]                     # (rows, dm)

    # --- mha_norm: LayerNorm (affine folded into the q/k/v projections). ---
    mu = jnp.mean(h0, axis=-1, keepdims=True)
    var = jnp.mean(jnp.square(h0 - mu), axis=-1, keepdims=True)
    xh = (h0 - mu) * jax.lax.rsqrt(var + eps)                         # (rows, dm)

    # --- single-head self-attention over the seq (=input_dim) axis. --------
    q = jnp.dot(xh, aq_ref[...], preferred_element_type=f32) + bq_ref[...]
    kp = jnp.dot(xh, ak_ref[...], preferred_element_type=f32) + bk_ref[...]
    v = jnp.dot(xh, av_ref[...], preferred_element_type=f32) + bv_ref[...]
    q3 = q.reshape(tn, seq, dm)
    k3 = kp.reshape(tn, seq, dm)
    v3 = v.reshape(tn, seq, dm)

    s = jnp.einsum("nqd,nkd->nqk", q3, k3,
                   preferred_element_type=f32) * scale                # (tn,seq,seq)
    s = s - jnp.max(s, axis=-1, keepdims=True)
    p = jnp.exp(s)
    p = p / jnp.sum(p, axis=-1, keepdims=True)
    att = jnp.einsum("nqk,nkd->nqd", p, v3,
                     preferred_element_type=f32)                      # (tn,seq,dm)

    o = jnp.dot(att.reshape(rows, dm), ao_ref[...],
                preferred_element_type=f32) + bo_ref[...]             # out_proj

    # --- ffn_norm: LayerNorm (affine folded into ffn layer-1 weights). -----
    mu2 = jnp.mean(o, axis=-1, keepdims=True)
    var2 = jnp.mean(jnp.square(o - mu2), axis=-1, keepdims=True)
    oh = (o - mu2) * jax.lax.rsqrt(var2 + eps)

    # --- MLP layer 1 + ReLU; sum over seq BEFORE the (linear) layer 2. -----
    z = jnp.maximum(
        jnp.dot(oh, a1_ref[...], preferred_element_type=f32) + b1_ref[...], 0.0)
    zs = jnp.sum(z.reshape(tn, seq, hid), axis=1)                     # (tn, hid)
    o_ref[...] = jnp.dot(zs, a2_ref[...],
                         preferred_element_type=f32) + b2_ref[...]    # bias = seq*b2


def san_forward(e, u, params, *, tn=64):
    """e:(k,), u:(N,k)  ->  (N, hidden)."""
    f32 = jnp.float32
    N, k = u.shape
    w_lin = params["w_lin"].astype(f32)                # (dm, 2)
    dm = w_lin.shape[0]
    hid = params["w1"].shape[0]

    tn = min(tn, N)
    assert N % tn == 0 and tn % 8 == 0, "node tile must divide N and be 8-aligned"
    rows = tn * k

    # ---------- wrapper-side algebraic folds (hoisted out of the kernel) ----
    e32 = e.astype(f32)
    base = e32[:, None] * w_lin[:, 0][None, :] + params["b_lin"].astype(f32)[None, :]
    base_t = jnp.tile(base, (tn, 1))                   # (rows, dm), grid-invariant
    wu = w_lin[:, 1].reshape(1, dm)

    g1 = params["ln1_g"].astype(f32)
    be1 = params["ln1_b"].astype(f32)

    def fold_proj(w, b):                               # LN affine into projection
        w = w.astype(f32)
        return g1[:, None] * w.T, (w @ be1 + b.astype(f32)).reshape(1, -1)

    aq, bq = fold_proj(params["wq"], params["bq"])
    ak, bk = fold_proj(params["wk"], params["bk"])
    av, bv = fold_proj(params["wv"], params["bv"])
    ao = params["wo"].astype(f32).T
    bo = params["bo"].astype(f32).reshape(1, dm)

    g2 = params["ln2_g"].astype(f32)
    be2 = params["ln2_b"].astype(f32)
    w1 = params["w1"].astype(f32)
    w2 = params["w2"].astype(f32)
    a1 = g2[:, None] * w1.T                            # (dm, hid)
    b1 = (w1 @ be2 + params["b1"].astype(f32)).reshape(1, hid)
    a2 = w2.T                                          # (hid, hid)
    b2s = (float(k) * params["b2"].astype(f32)).reshape(1, hid)   # sum-over-seq bias

    u_col = u.astype(f32).reshape(N * k, 1)            # node-major flattened rows

    kernel = functools.partial(san_kernel, seq=k, dm=dm,
                               scale=1.0 / math.sqrt(dm), eps=1e-5)

    out = pl.pallas_call(
        kernel,
        out_shape=jax.ShapeDtypeStruct((N, hid), f32),
        grid_spec=pltpu.PrefetchScalarGridSpec(
            num_scalar_prefetch=0,
            grid=(N // tn,),
            in_specs=[
                pl.BlockSpec((rows, 1), lambda i: (i, 0)),     # u (streamed)
                pl.BlockSpec((rows, dm), lambda i: (0, 0)),    # base (e-fold, tiled)
                pl.BlockSpec((1, dm), lambda i: (0, 0)),       # u-column of Linear(2,16)
                pl.BlockSpec((dm, dm), lambda i: (0, 0)),      # Wq (LN1 folded)
                pl.BlockSpec((1, dm), lambda i: (0, 0)),       # bq
                pl.BlockSpec((dm, dm), lambda i: (0, 0)),      # Wk
                pl.BlockSpec((1, dm), lambda i: (0, 0)),       # bk
                pl.BlockSpec((dm, dm), lambda i: (0, 0)),      # Wv
                pl.BlockSpec((1, dm), lambda i: (0, 0)),       # bv
                pl.BlockSpec((dm, dm), lambda i: (0, 0)),      # Wo (out_proj)
                pl.BlockSpec((1, dm), lambda i: (0, 0)),       # bo
                pl.BlockSpec((dm, hid), lambda i: (0, 0)),     # W1 (LN2 folded)
                pl.BlockSpec((1, hid), lambda i: (0, 0)),      # b1
                pl.BlockSpec((hid, hid), lambda i: (0, 0)),    # W2
                pl.BlockSpec((1, hid), lambda i: (0, 0)),      # seq * b2
            ],
            out_specs=pl.BlockSpec((tn, hid), lambda i: (i, 0)),
        ),
        compiler_params=pltpu.CompilerParams(
            dimension_semantics=("parallel",)),
    )(u_col, base_t, wu, aq, bq, ak, bk, av, bv, ao, bo, a1, b1, a2, b2s)
    return out


def san_reference(e, u, p, *, eps=1e-5):
    """Pure-JAX reference mirroring the PyTorch SAN.forward exactly."""
    N, k = u.shape
    h = jnp.stack([jnp.broadcast_to(e[None, :], (N, k)), u], axis=2)   # (N,k,2)
    h = h @ p["w_lin"].T + p["b_lin"]                                  # (N,k,16)

    def layer_norm(x, g, b):
        m = jnp.mean(x, axis=-1, keepdims=True)
        v = jnp.mean(jnp.square(x - m), axis=-1, keepdims=True)
        return (x - m) / jnp.sqrt(v + eps) * g + b

    mh = layer_norm(h, p["ln1_g"], p["ln1_b"])
    q = mh @ p["wq"].T + p["bq"]
    kk = mh @ p["wk"].T + p["bk"]
    v = mh @ p["wv"].T + p["bv"]
    s = jnp.einsum("nqd,nkd->nqk", q, kk) / jnp.sqrt(float(q.shape[-1]))
    a = jax.nn.softmax(s, axis=-1)
    o = jnp.einsum("nqk,nkd->nqd", a, v)
    o = o @ p["wo"].T + p["bo"]
    fh = layer_norm(o, p["ln2_g"], p["ln2_b"])
    z = jnp.maximum(fh @ p["w1"].T + p["b1"], 0.0)
    z = z @ p["w2"].T + p["b2"]
    return jnp.sum(z, axis=1)                                          # (N, H)


if __name__ == "__main__":
    INPUT_DIM = 8      # k: eigen channels == attention sequence length
    HIDDEN = 32        # hidden_dim (ffn is MLP(16, H, H))
    DM = 16            # embed dim fixed by the module (Linear(2,16), LN(16), MHA(16))
    N = 128            # number of nodes
    TN = 64            # nodes per grid step -> grid=(2,)

    key = jax.random.PRNGKey(0)
    ks = jax.random.split(key, 20)
    uni = lambda kk, shape, b: jax.random.uniform(kk, shape, jnp.float32, -b, b)

    e = jax.random.uniform(ks[0], (INPUT_DIM,), jnp.float32, 0.0, 2.0)
    u = jax.random.normal(ks[1], (N, INPUT_DIM), jnp.float32)

    b_lin = 1.0 / math.sqrt(2.0)
    b_dm = 1.0 / math.sqrt(DM)
    b_h = 1.0 / math.sqrt(HIDDEN)
    params = dict(
        w_lin=uni(ks[2], (DM, 2), b_lin), b_lin=uni(ks[3], (DM,), b_lin),
        wq=uni(ks[4], (DM, DM), b_dm), bq=uni(ks[5], (DM,), b_dm),
        wk=uni(ks[6], (DM, DM), b_dm), bk=uni(ks[7], (DM,), b_dm),
        wv=uni(ks[8], (DM, DM), b_dm), bv=uni(ks[9], (DM,), b_dm),
        wo=uni(ks[10], (DM, DM), b_dm), bo=uni(ks[11], (DM,), b_dm),
        ln1_g=1.0 + uni(ks[12], (DM,), 0.2), ln1_b=uni(ks[13], (DM,), 0.2),
        ln2_g=1.0 + uni(ks[14], (DM,), 0.2), ln2_b=uni(ks[15], (DM,), 0.2),
        w1=uni(ks[16], (HIDDEN, DM), b_dm), b1=uni(ks[17], (HIDDEN,), b_dm),
        w2=uni(ks[18], (HIDDEN, HIDDEN), b_h), b2=uni(ks[19], (HIDDEN,), b_h),
    )

    out = san_forward(e, u, params, tn=TN)
    out = jax.block_until_ready(out)

    ref = san_reference(e, u, params)
    assert out.shape == (N, HIDDEN), out.shape
    max_err = float(jnp.max(jnp.abs(out - ref)))
    assert jnp.allclose(out, ref, rtol=2e-3, atol=2e-3), max_err

    print("KERNEL_OK")
</pallas_src>

<mosaic_0001>
module attributes {stable_mosaic.version = 11 : i64} {
  func.func @san_kernel(%arg0: i32, %arg1: memref<512x1xf32, #tpu.memory_space<vmem>>, %arg2: memref<512x16xf32, #tpu.memory_space<vmem>>, %arg3: memref<1x16xf32, #tpu.memory_space<vmem>>, %arg4: memref<16x16xf32, #tpu.memory_space<vmem>>, %arg5: memref<1x16xf32, #tpu.memory_space<vmem>>, %arg6: memref<16x16xf32, #tpu.memory_space<vmem>>, %arg7: memref<1x16xf32, #tpu.memory_space<vmem>>, %arg8: memref<16x16xf32, #tpu.memory_space<vmem>>, %arg9: memref<1x16xf32, #tpu.memory_space<vmem>>, %arg10: memref<16x16xf32, #tpu.memory_space<vmem>>, %arg11: memref<1x16xf32, #tpu.memory_space<vmem>>, %arg12: memref<16x32xf32, #tpu.memory_space<vmem>>, %arg13: memref<1x32xf32, #tpu.memory_space<vmem>>, %arg14: memref<32x32xf32, #tpu.memory_space<vmem>>, %arg15: memref<1x32xf32, #tpu.memory_space<vmem>>, %arg16: memref<64x32xf32, #tpu.memory_space<vmem>>) attributes {dimension_semantics = [#tpu.dimension_semantics<parallel>], iteration_bounds = array<i64: 2>, scalar_prefetch = 0 : i64, scratch_operands = 0 : i64, tpu.core_type = #tpu.core_type<tc>, window_params = [{transform_indices = @transform_0, window_bounds = array<i64: 512, 1>}, {pipeline_mode = #tpu.pipeline_mode<synchronous>, transform_indices = @transform_1, window_bounds = array<i64: 512, 16>}, {pipeline_mode = #tpu.pipeline_mode<synchronous>, transform_indices = @transform_2, window_bounds = array<i64: 1, 16>}, {pipeline_mode = #tpu.pipeline_mode<synchronous>, transform_indices = @transform_3, window_bounds = array<i64: 16, 16>}, {pipeline_mode = #tpu.pipeline_mode<synchronous>, transform_indices = @transform_4, window_bounds = array<i64: 1, 16>}, {pipeline_mode = #tpu.pipeline_mode<synchronous>, transform_indices = @transform_5, window_bounds = array<i64: 16, 16>}, {pipeline_mode = #tpu.pipeline_mode<synchronous>, transform_indices = @transform_6, window_bounds = array<i64: 1, 16>}, {pipeline_mode = #tpu.pipeline_mode<synchronous>, transform_indices = @transform_7, window_bounds = array<i64: 16, 16>}, {pipeline_mode = #tpu.pipeline_mode<synchronous>, transform_indices = @transform_8, window_bounds = array<i64: 1, 16>}, {pipeline_mode = #tpu.pipeline_mode<synchronous>, transform_indices = @transform_9, window_bounds = array<i64: 16, 16>}, {pipeline_mode = #tpu.pipeline_mode<synchronous>, transform_indices = @transform_10, window_bounds = array<i64: 1, 16>}, {pipeline_mode = #tpu.pipeline_mode<synchronous>, transform_indices = @transform_11, window_bounds = array<i64: 16, 32>}, {pipeline_mode = #tpu.pipeline_mode<synchronous>, transform_indices = @transform_12, window_bounds = array<i64: 1, 32>}, {pipeline_mode = #tpu.pipeline_mode<synchronous>, transform_indices = @transform_13, window_bounds = array<i64: 32, 32>}, {pipeline_mode = #tpu.pipeline_mode<synchronous>, transform_indices = @transform_14, window_bounds = array<i64: 1, 32>}, {transform_indices = @transform_15, window_bounds = array<i64: 64, 32>}]} {
    %c0 = arith.constant 0 : index
    %c0_0 = arith.constant 0 : index
    %0 = vector.load %arg1[%c0, %c0_0] : memref<512x1xf32, #tpu.memory_space<vmem>>, vector<512x1xf32>
    %c0_1 = arith.constant 0 : index
    %c0_2 = arith.constant 0 : index
    %1 = vector.load %arg3[%c0_1, %c0_2] : memref<1x16xf32, #tpu.memory_space<vmem>>, vector<1x16xf32>
    %2 = vector.broadcast %0 : vector<512x1xf32> to vector<512x16xf32>
    %3 = vector.broadcast %1 : vector<1x16xf32> to vector<512x16xf32>
    %4 = arith.mulf %2, %3 : vector<512x16xf32>
    %c0_3 = arith.constant 0 : index
    %c0_4 = arith.constant 0 : index
    %5 = vector.load %arg2[%c0_3, %c0_4] : memref<512x16xf32, #tpu.memory_space<vmem>>, vector<512x16xf32>
    %6 = arith.addf %4, %5 : vector<512x16xf32>
    %cst = arith.constant dense<0.000000e+00> : vector<512xf32>
    %7 = vector.multi_reduction <add>, %6, %cst [1] : vector<512x16xf32> to vector<512xf32>
    %8 = vector.shape_cast %7 : vector<512xf32> to vector<512x1xf32>
    %cst_5 = arith.constant 1.600000e+01 : f32
    %9 = vector.broadcast %cst_5 : f32 to vector<512x1xf32>
    %10 = arith.divf %8, %9 : vector<512x1xf32>
    %11 = vector.broadcast %10 : vector<512x1xf32> to vector<512x16xf32>
    %12 = arith.subf %6, %11 : vector<512x16xf32>
    %13 = arith.mulf %12, %12 : vector<512x16xf32>
    %cst_6 = arith.constant dense<0.000000e+00> : vector<512xf32>
    %14 = vector.multi_reduction <add>, %13, %cst_6 [1] : vector<512x16xf32> to vector<512xf32>
    %15 = vector.shape_cast %14 : vector<512xf32> to vector<512x1xf32>
    %cst_7 = arith.constant 1.600000e+01 : f32
    %16 = vector.broadcast %cst_7 : f32 to vector<512x1xf32>
    %17 = arith.divf %15, %16 : vector<512x1xf32>
    %18 = vector.broadcast %10 : vector<512x1xf32> to vector<512x16xf32>
    %19 = arith.subf %6, %18 : vector<512x16xf32>
    %cst_8 = arith.constant 9.99999974E-6 : f32
    %20 = vector.broadcast %cst_8 : f32 to vector<512x1xf32>
    %21 = arith.addf %17, %20 : vector<512x1xf32>
    %22 = math.rsqrt %21 : vector<512x1xf32>
    %23 = vector.broadcast %22 : vector<512x1xf32> to vector<512x16xf32>
    %24 = arith.mulf %19, %23 : vector<512x16xf32>
    %c0_9 = arith.constant 0 : index
    %c0_10 = arith.constant 0 : index
    %25 = vector.load %arg4[%c0_9, %c0_10] : memref<16x16xf32, #tpu.memory_space<vmem>>, vector<16x16xf32>
    %cst_11 = arith.constant dense<0.000000e+00> : vector<512x16xf32>
    %26 = tpu.matmul %24, %25, %cst_11 {dimension_numbers = #tpu.dot_dimension_numbers<[1], [0], [0], [1], [0, 0, 1, 1], [], []>} : vector<512x16xf32>, vector<16x16xf32>, vector<512x16xf32> -> vector<512x16xf32>
    %c0_12 = arith.constant 0 : index
    %c0_13 = arith.constant 0 : index
    %27 = vector.load %arg5[%c0_12, %c0_13] : memref<1x16xf32, #tpu.memory_space<vmem>>, vector<1x16xf32>
    %28 = vector.broadcast %27 : vector<1x16xf32> to vector<512x16xf32>
    %29 = arith.addf %26, %28 : vector<512x16xf32>
    %c0_14 = arith.constant 0 : index
    %c0_15 = arith.constant 0 : index
    %30 = vector.load %arg6[%c0_14, %c0_15] : memref<16x16xf32, #tpu.memory_space<vmem>>, vector<16x16xf32>
    %cst_16 = arith.constant dense<0.000000e+00> : vector<512x16xf32>
    %31 = tpu.matmul %24, %30, %cst_16 {dimension_numbers = #tpu.dot_dimension_numbers<[1], [0], [0], [1], [0, 0, 1, 1], [], []>} : vector<512x16xf32>, vector<16x16xf32>, vector<512x16xf32> -> vector<512x16xf32>
    %c0_17 = arith.constant 0 : index
    %c0_18 = arith.constant 0 : index
    %32 = vector.load %arg7[%c0_17, %c0_18] : memref<1x16xf32, #tpu.memory_space<vmem>>, vector<1x16xf32>
    %33 = vector.broadcast %32 : vector<1x16xf32> to vector<512x16xf32>
    %34 = arith.addf %31, %33 : vector<512x16xf32>
    %c0_19 = arith.constant 0 : index
    %c0_20 = arith.constant 0 : index
    %35 = vector.load %arg8[%c0_19, %c0_20] : memref<16x16xf32, #tpu.memory_space<vmem>>, vector<16x16xf32>
    %cst_21 = arith.constant dense<0.000000e+00> : vector<512x16xf32>
    %36 = tpu.matmul %24, %35, %cst_21 {dimension_numbers = #tpu.dot_dimension_numbers<[1], [0], [0], [1], [0, 0, 1, 1], [], []>} : vector<512x16xf32>, vector<16x16xf32>, vector<512x16xf32> -> vector<512x16xf32>
    %c0_22 = arith.constant 0 : index
    %c0_23 = arith.constant 0 : index
    %37 = vector.load %arg9[%c0_22, %c0_23] : memref<1x16xf32, #tpu.memory_space<vmem>>, vector<1x16xf32>
    %38 = vector.broadcast %37 : vector<1x16xf32> to vector<512x16xf32>
    %39 = arith.addf %36, %38 : vector<512x16xf32>
    %40 = vector.shape_cast %29 : vector<512x16xf32> to vector<64x8x16xf32>
    %41 = vector.shape_cast %34 : vector<512x16xf32> to vector<64x8x16xf32>
    %42 = vector.shape_cast %39 : vector<512x16xf32> to vector<64x8x16xf32>
    "tpu.trace_start"() <{level = 10 : i32, message = "nqd,nkd->nqk"}> : () -> ()
    %cst_24 = arith.constant dense<0.000000e+00> : vector<64x8x8xf32>
    %43 = tpu.matmul %40, %41, %cst_24 {dimension_numbers = #tpu.dot_dimension_numbers<[2], [2], [1], [1], [0, 0, 0, 1, 1, 1], [0], [0]>} : vector<64x8x16xf32>, vector<64x8x16xf32>, vector<64x8x8xf32> -> vector<64x8x8xf32>
    "tpu.trace_stop"() : () -> ()
    %cst_25 = arith.constant 2.500000e-01 : f32
    %44 = vector.broadcast %cst_25 : f32 to vector<64x8x8xf32>
    %45 = arith.mulf %43, %44 : vector<64x8x8xf32>
    %cst_26 = arith.constant dense<0xFF800000> : vector<64x8xf32>
    %46 = vector.multi_reduction <maximumf>, %45, %cst_26 [2] : vector<64x8x8xf32> to vector<64x8xf32>
    %47 = vector.shape_cast %46 : vector<64x8xf32> to vector<64x8x1xf32>
    %48 = vector.broadcast %47 : vector<64x8x1xf32> to vector<64x8x8xf32>
    %49 = arith.subf %45, %48 : vector<64x8x8xf32>
    %50 = math.exp %49 : vector<64x8x8xf32>
    %cst_27 = arith.constant dense<0.000000e+00> : vector<64x8xf32>
    %51 = vector.multi_reduction <add>, %50, %cst_27 [2] : vector<64x8x8xf32> to vector<64x8xf32>
    %52 = vector.shape_cast %51 : vector<64x8xf32> to vector<64x8x1xf32>
    %53 = vector.broadcast %52 : vector<64x8x1xf32> to vector<64x8x8xf32>
    %54 = arith.divf %50, %53 : vector<64x8x8xf32>
    "tpu.trace_start"() <{level = 10 : i32, message = "nqk,nkd->nqd"}> : () -> ()
    %cst_28 = arith.constant dense<0.000000e+00> : vector<64x8x16xf32>
    %55 = tpu.matmul %54, %42, %cst_28 {dimension_numbers = #tpu.dot_dimension_numbers<[2], [1], [1], [2], [0, 0, 0, 1, 1, 2], [0], [0]>} : vector<64x8x8xf32>, vector<64x8x16xf32>, vector<64x8x16xf32> -> vector<64x8x16xf32>
    "tpu.trace_stop"() : () -> ()
    %56 = vector.shape_cast %55 : vector<64x8x16xf32> to vector<512x16xf32>
    %c0_29 = arith.constant 0 : index
    %c0_30 = arith.constant 0 : index
    %57 = vector.load %arg10[%c0_29, %c0_30] : memref<16x16xf32, #tpu.memory_space<vmem>>, vector<16x16xf32>
    %cst_31 = arith.constant dense<0.000000e+00> : vector<512x16xf32>
    %58 = tpu.matmul %56, %57, %cst_31 {dimension_numbers = #tpu.dot_dimension_numbers<[1], [0], [0], [1], [0, 0, 1, 1], [], []>} : vector<512x16xf32>, vector<16x16xf32>, vector<512x16xf32> -> vector<512x16xf32>
    %c0_32 = arith.constant 0 : index
    %c0_33 = arith.constant 0 : index
    %59 = vector.load %arg11[%c0_32, %c0_33] : memref<1x16xf32, #tpu.memory_space<vmem>>, vector<1x16xf32>
    %60 = vector.broadcast %59 : vector<1x16xf32> to vector<512x16xf32>
    %61 = arith.addf %58, %60 : vector<512x16xf32>
    %cst_34 = arith.constant dense<0.000000e+00> : vector<512xf32>
    %62 = vector.multi_reduction <add>, %61, %cst_34 [1] : vector<512x16xf32> to vector<512xf32>
    %63 = vector.shape_cast %62 : vector<512xf32> to vector<512x1xf32>
    %cst_35 = arith.constant 1.600000e+01 : f32
    %64 = vector.broadcast %cst_35 : f32 to vector<512x1xf32>
    %65 = arith.divf %63, %64 : vector<512x1xf32>
    %66 = vector.broadcast %65 : vector<512x1xf32> to vector<512x16xf32>
    %67 = arith.subf %61, %66 : vector<512x16xf32>
    %68 = arith.mulf %67, %67 : vector<512x16xf32>
    %cst_36 = arith.constant dense<0.000000e+00> : vector<512xf32>
    %69 = vector.multi_reduction <add>, %68, %cst_36 [1] : vector<512x16xf32> to vector<512xf32>
    %70 = vector.shape_cast %69 : vector<512xf32> to vector<512x1xf32>
    %cst_37 = arith.constant 1.600000e+01 : f32
    %71 = vector.broadcast %cst_37 : f32 to vector<512x1xf32>
    %72 = arith.divf %70, %71 : vector<512x1xf32>
    %73 = vector.broadcast %65 : vector<512x1xf32> to vector<512x16xf32>
    %74 = arith.subf %61, %73 : vector<512x16xf32>
    %cst_38 = arith.constant 9.99999974E-6 : f32
    %75 = vector.broadcast %cst_38 : f32 to vector<512x1xf32>
    %76 = arith.addf %72, %75 : vector<512x1xf32>
    %77 = math.rsqrt %76 : vector<512x1xf32>
    %78 = vector.broadcast %77 : vector<512x1xf32> to vector<512x16xf32>
    %79 = arith.mulf %74, %78 : vector<512x16xf32>
    %c0_39 = arith.constant 0 : index
    %c0_40 = arith.constant 0 : index
    %80 = vector.load %arg12[%c0_39, %c0_40] : memref<16x32xf32, #tpu.memory_space<vmem>>, vector<16x32xf32>
    %cst_41 = arith.constant dense<0.000000e+00> : vector<512x32xf32>
    %81 = tpu.matmul %79, %80, %cst_41 {dimension_numbers = #tpu.dot_dimension_numbers<[1], [0], [0], [1], [0, 0, 1, 1], [], []>} : vector<512x16xf32>, vector<16x32xf32>, vector<512x32xf32> -> vector<512x32xf32>
    %c0_42 = arith.constant 0 : index
    %c0_43 = arith.constant 0 : index
    %82 = vector.load %arg13[%c0_42, %c0_43] : memref<1x32xf32, #tpu.memory_space<vmem>>, vector<1x32xf32>
    %83 = vector.broadcast %82 : vector<1x32xf32> to vector<512x32xf32>
    %84 = arith.addf %81, %83 : vector<512x32xf32>
    %cst_44 = arith.constant 0.000000e+00 : f32
    %85 = vector.broadcast %cst_44 : f32 to vector<512x32xf32>
    %86 = arith.maximumf %84, %85 : vector<512x32xf32>
    %87 = vector.shape_cast %86 : vector<512x32xf32> to vector<64x8x32xf32>
    %cst_45 = arith.constant dense<0.000000e+00> : vector<64x32xf32>
    %88 = vector.multi_reduction <add>, %87, %cst_45 [1] : vector<64x8x32xf32> to vector<64x32xf32>
    %c0_46 = arith.constant 0 : index
    %c0_47 = arith.constant 0 : index
    %89 = vector.load %arg14[%c0_46, %c0_47] : memref<32x32xf32, #tpu.memory_space<vmem>>, vector<32x32xf32>
    %cst_48 = arith.constant dense<0.000000e+00> : vector<64x32xf32>
    %90 = tpu.matmul %88, %89, %cst_48 {dimension_numbers = #tpu.dot_dimension_numbers<[1], [0], [0], [1], [0, 0, 1, 1], [], []>} : vector<64x32xf32>, vector<32x32xf32>, vector<64x32xf32> -> vector<64x32xf32>
    %c0_49 = arith.constant 0 : index
    %c0_50 = arith.constant 0 : index
    %91 = vector.load %arg15[%c0_49, %c0_50] : memref<1x32xf32, #tpu.memory_space<vmem>>, vector<1x32xf32>
    %92 = vector.broadcast %91 : vector<1x32xf32> to vector<64x32xf32>
    %93 = arith.addf %90, %92 : vector<64x32xf32>
    %c0_51 = arith.constant 0 : index
    %c0_52 = arith.constant 0 : index
    %94 = vector.load %arg16[%c0_51, %c0_52] : memref<64x32xf32, #tpu.memory_space<vmem>>, vector<64x32xf32>
    tpu.vector_store %arg16[%c0_51, %c0_52], %93 {strides = array<i32>} : memref<64x32xf32, #tpu.memory_space<vmem>>, vector<64x32xf32>,
    return
  }
  func.func @transform_0(%arg0: i32) -> (i32, i32) {
    %c0_i32 = arith.constant 0 : i32
    %c0_i32_0 = arith.constant 0 : i32
    return %arg0, %c0_i32 : i32, i32
  }
  func.func @transform_1(%arg0: i32) -> (i32, i32) {
    %c0_i32 = arith.constant 0 : i32
    %c0_i32_0 = arith.constant 0 : i32
    %c0_i32_1 = arith.constant 0 : i32
    return %c0_i32, %c0_i32_0 : i32, i32
  }
  func.func @transform_2(%arg0: i32) -> (i32, i32) {
    %c0_i32 = arith.constant 0 : i32
    %c0_i32_0 = arith.constant 0 : i32
    %c0_i32_1 = arith.constant 0 : i32
    return %c0_i32, %c0_i32_0 : i32, i32
  }
  func.func @transform_3(%arg0: i32) -> (i32, i32) {
    %c0_i32 = arith.constant 0 : i32
    %c0_i32_0 = arith.constant 0 : i32
    %c0_i32_1 = arith.constant 0 : i32
    return %c0_i32, %c0_i32_0 : i32, i32
  }
  func.func @transform_4(%arg0: i32) -> (i32, i32) {
    %c0_i32 = arith.constant 0 : i32
    %c0_i32_0 = arith.constant 0 : i32
    %c0_i32_1 = arith.constant 0 : i32
    return %c0_i32, %c0_i32_0 : i32, i32
  }
  func.func @transform_5(%arg0: i32) -> (i32, i32) {
    %c0_i32 = arith.constant 0 : i32
    %c0_i32_0 = arith.constant 0 : i32
    %c0_i32_1 = arith.constant 0 : i32
    return %c0_i32, %c0_i32_0 : i32, i32
  }
  func.func @transform_6(%arg0: i32) -> (i32, i32) {
    %c0_i32 = arith.constant 0 : i32
    %c0_i32_0 = arith.constant 0 : i32
    %c0_i32_1 = arith.constant 0 : i32
    return %c0_i32, %c0_i32_0 : i32, i32
  }
  func.func @transform_7(%arg0: i32) -> (i32, i32) {
    %c0_i32 = arith.constant 0 : i32
    %c0_i32_0 = arith.constant 0 : i32
    %c0_i32_1 = arith.constant 0 : i32
    return %c0_i32, %c0_i32_0 : i32, i32
  }
  func.func @transform_8(%arg0: i32) -> (i32, i32) {
    %c0_i32 = arith.constant 0 : i32
    %c0_i32_0 = arith.constant 0 : i32
    %c0_i32_1 = arith.constant 0 : i32
    return %c0_i32, %c0_i32_0 : i32, i32
  }
  func.func @transform_9(%arg0: i32) -> (i32, i32) {
    %c0_i32 = arith.constant 0 : i32
    %c0_i32_0 = arith.constant 0 : i32
    %c0_i32_1 = arith.constant 0 : i32
    return %c0_i32, %c0_i32_0 : i32, i32
  }
  func.func @transform_10(%arg0: i32) -> (i32, i32) {
    %c0_i32 = arith.constant 0 : i32
    %c0_i32_0 = arith.constant 0 : i32
    %c0_i32_1 = arith.constant 0 : i32
    return %c0_i32, %c0_i32_0 : i32, i32
  }
  func.func @transform_11(%arg0: i32) -> (i32, i32) {
    %c0_i32 = arith.constant 0 : i32
    %c0_i32_0 = arith.constant 0 : i32
    %c0_i32_1 = arith.constant 0 : i32
    return %c0_i32, %c0_i32_0 : i32, i32
  }
  func.func @transform_12(%arg0: i32) -> (i32, i32) {
    %c0_i32 = arith.constant 0 : i32
    %c0_i32_0 = arith.constant 0 : i32
    %c0_i32_1 = arith.constant 0 : i32
    return %c0_i32, %c0_i32_0 : i32, i32
  }
  func.func @transform_13(%arg0: i32) -> (i32, i32) {
    %c0_i32 = arith.constant 0 : i32
    %c0_i32_0 = arith.constant 0 : i32
    %c0_i32_1 = arith.constant 0 : i32
    return %c0_i32, %c0_i32_0 : i32, i32
  }
  func.func @transform_14(%arg0: i32) -> (i32, i32) {
    %c0_i32 = arith.constant 0 : i32
    %c0_i32_0 = arith.constant 0 : i32
    %c0_i32_1 = arith.constant 0 : i32
    return %c0_i32, %c0_i32_0 : i32, i32
  }
  func.func @transform_15(%arg0: i32) -> (i32, i32) {
    %c0_i32 = arith.constant 0 : i32
    %c0_i32_0 = arith.constant 0 : i32
    return %arg0, %c0_i32 : i32, i32
  }
}

</mosaic_0001>

<bundles_post_ra>
// kernel: tpu_custom_call.1
= control target key start
LH: loop header
LB: loop body
LE: loop exit
PB: predicated region body
PF: predicated region fallthrough
CT: control target
= control target key end

     0   :  { %s19383_s18 = smov 0   ;;  %s24044_s0 = inlined_call_operand.vmem [shape: f32[1024,1], index: 0, kind: input, shape index: {}]   ;;  %s24045_s1 = inlined_call_operand.vmem [shape: f32[512,16], index: 1, kind: input, shape index: {}]   ;;  %s24046_s2 = inlined_call_operand.vmem [shape: f32[1,16], index: 2, kind: input, shape index: {}]   ;;  %s24047_s3 = inlined_call_operand.vmem [shape: f32[16,16], index: 3, kind: input, shape index: {}]   ;;  %s24048_s4 = inlined_call_operand.vmem [shape: f32[1,16], index: 4, kind: input, shape index: {}]   ;;  %s24049_s5 = inlined_call_operand.vmem [shape: f32[16,16], index: 5, kind: input, shape index: {}]   ;;  %s24050_s6 = inlined_call_operand.vmem [shape: f32[1,16], index: 6, kind: input, shape index: {}]   ;;  %s24051_s7 = inlined_call_operand.vmem [shape: f32[16,16], index: 7, kind: input, shape index: {}]   ;;  %s24052_s8 = inlined_call_operand.vmem [shape: f32[1,16], index: 8, kind: input, shape index: {}]   ;;  %s24053_s9 = inlined_call_operand.vmem [shape: f32[16,16], index: 9, kind: input, shape index: {}]   ;;  %s24054_s10 = inlined_call_operand.vmem [shape: f32[1,16], index: 10, kind: input, shape index: {}]   ;;  %s24055_s11 = inlined_call_operand.vmem [shape: f32[16,32], index: 11, kind: input, shape index: {}]   ;;  %s24056_s12 = inlined_call_operand.vmem [shape: f32[1,32], index: 12, kind: input, shape index: {}]   ;;  %s24057_s13 = inlined_call_operand.vmem [shape: f32[32,32], index: 13, kind: input, shape index: {}]   ;;  %s24058_s14 = inlined_call_operand.vmem [shape: f32[1,32], index: 14, kind: input, shape index: {}]   ;;  %s24059_s15 = inlined_call_operand.vmem [shape: f32[128,32], index: 15, kind: output, shape index: {}]  }
   0x1 LB: > { %s16434_s19 = sadd.s32 4294967295, %s19298_s18   ;;  %p16438_p0 = scmp.ge.s32.totalorder %s19298_s18, 1  ;;  %s19298_s18 = sphi %s19383_s18, %s25_s18  }
   0x2   : > { %p438_p1 = scmp.lt.s32.totalorder %s19298_s18, 3 }
   0x4   : > { %p439_p2 = pnand %p16438_p0, %p438_p1 }
   0x6   : > { %442 = sbr.rel (%p439_p2) target bundleno = 3217 (0xc91), region = 80 }
   0xd   : > { %s16439_s20 = sshll.u32 %s16434_s19, 6  ;;  %v19300_v0 = vmov 0   ;;  %v19413_v13 = vld [vmem:[%s24046_s2] ss:$0 sm:$0xff]  ;;  %v1015_v17 = vld [vmem:[%s24045_s1 + $0x1f0] sm:$0xff]  ;;  %vm1081_vm0 = vcmask 130048  }
   0xe   : > { %18772 = vset.pattern.permute.xlu1 %v19300_v0  ;;  %18771 = vset.pattern.permute.xlu0 %v19300_v0  ;;  %p487_p3 = scmp.lt.s32.totalorder %s16439_s20, 127  ;;  %v1013_v16 = vld [vmem:[%s24045_s1 + $0x1e0] sm:$0xff]  ;;  %v1014_v24 = vld [vmem:[%s24045_s1 + $0x1e8] sm:$0xff]  ;;  %v1016_v28 = vld [vmem:[%s24045_s1 + $0x1f8] sm:$0xff]  ;;  %vm19302_vm1 = vmmov 0   ;;  %vm8217_vm2 = vcmask 64512  }
   0xf   : > { %v953_v34 = vld [vmem:[%s24045_s1] sm:$0xff]  ;;  %v954_v38 = vld [vmem:[%s24045_s1 + $0x8] sm:$0xff]  ;;  %v955_v43 = vld [vmem:[%s24045_s1 + $0x10] sm:$0xff]  ;;  %vm15662_vm3 = vcmask 261120   ;;  %vm16186_vm4 = vcmask 1041409   ;;  %vm16188_vm5 = vcmask 1042434  }
  0x10   : > { %s24425_s20 = smov (!%p487_p3, %s16439_s20), 127  ;;  %v956_v48 = vld [vmem:[%s24045_s1 + $0x18] sm:$0xff]  ;;  %v957_v53 = vld [vmem:[%s24045_s1 + $0x20] sm:$0xff]  ;;  %v958_v58 = vld [vmem:[%s24045_s1 + $0x28] sm:$0xff]  ;;  %vm16190_vm6 = vcmask 1043459   ;;  %vm16192_vm7 = vcmask 1044484  }
  0x11   : > { %s16440_s21 = sshll.u32 %s24425_s20, 3  ;;  %v959_v63 = vld [vmem:[%s24045_s1 + $0x30] sm:$0xff]  ;;  %vm16194_vm8 = vcmask 1045509   ;;  %vm16196_vm9 = vcmask 1046534   ;;  %vm16198_vm10 = vcmask 1047559   ;;  %s16441_s30 = sshll.u32 %s16434_s19, 3 }
  0x12   : > { %s19396_s24 = scalar_lea.vmem %s24044_s0, %s16440_s21  ;;  %p493_p4 = scmp.lt.s32.totalorder %s16441_s30, 15 }
  0x13   : > { %v560_v1 = vld [vmem:[%s19396_s24 + $0x1f0] sm:$0xff]  ;;  %v558_v2 = vld [vmem:[%s19396_s24 + $0x1e0] sm:$0xff]  ;;  %v561_v3 = vld [vmem:[%s19396_s24 + $0x1f8] sm:$0xff] }
  0x14   : > { %875 = vperm.xlu1 %18772, %v560_v1   ;;  %865 = vperm.xlu0 %18771, %v558_v2   ;;  %v559_v4 = vld [vmem:[%s19396_s24 + $0x1e8] sm:$0xff]  ;;  %v498_v6 = vld [vmem:[%s19396_s24] sm:$0xff]  ;;  %v501_v7 = vld [vmem:[%s19396_s24 + $0x18] sm:$0xff]  ;;  %s24427_s30 = smov (!%p493_p4, %s16441_s30), 15 }
  0x15   : > { %v499_v5 = vld [vmem:[%s19396_s24 + $0x8] sm:$0xff]  ;;  %v500_v8 = vld [vmem:[%s19396_s24 + $0x10] sm:$0xff]  ;;  %v502_v10 = vld [vmem:[%s19396_s24 + $0x20] sm:$0xff]  ;;  %s16442_s16 = sshll.u32 %s24427_s30, 3 }
  0x16   : > { %v503_v9 = vld [vmem:[%s19396_s24 + $0x28] sm:$0xff]  ;;  %v505_v11 = vld [vmem:[%s19396_s24 + $0x38] sm:$0xff]  ;;  %v504_v12 = vld [vmem:[%s19396_s24 + $0x30] sm:$0xff]  ;;  %s496_s23 = scalar_lea.vmem %s24059_s15, %s16442_s16 }
  0x18   : > { %880 = vperm.xlu1 %18772, %v561_v3   ;;  %870 = vperm.xlu0 %18771, %v559_v4   ;;  %v960_v4 = vld [vmem:[%s24045_s1 + $0x38] sm:$0xff] }
  0x1c   : > { %570 = vperm.xlu1 %18772, %v499_v5   ;;  %565 = vperm.xlu0 %18771, %v498_v6  }
  0x20   : > { %580 = vperm.xlu1 %18772, %v501_v7   ;;  %575 = vperm.xlu0 %18771, %v500_v8  }
  0x24   : > { %590 = vperm.xlu1 %18772, %v503_v9   ;;  %585 = vperm.xlu0 %18771, %v502_v10   ;;  %v506_v10 = vld [vmem:[%s19396_s24 + $0x40] sm:$0xff] }
  0x28   : > { %600 = vperm.xlu1 %18772, %v505_v11   ;;  %595 = vperm.xlu0 %18771, %v504_v12   ;;  %v508_v11 = vld [vmem:[%s19396_s24 + $0x50] sm:$0xff]  ;;  %v510_v12 = vld [vmem:[%s19396_s24 + $0x60] sm:$0xff] }
  0x93   : > { %v876_v14 = vpop.permute.xlu1 %875  ;;  %v866_v15 = vpop.permute.xlu0 %865 }
  0x94   : > { %v951_v18 = vmul.f32 %v19413_v13, %v876_v14  ;;  %v949_v19 = vmul.f32 %v19413_v13, %v866_v15  ;;  %v512_v14 = vld [vmem:[%s19396_s24 + $0x70] sm:$0xff]  ;;  %v514_v15 = vld [vmem:[%s19396_s24 + $0x80] sm:$0xff] }
  0x96   : > { %v19423_v20 = vadd.f32 %v1013_v16, %v949_v19  ;;  %v19425_v21 = vadd.f32 %v1015_v17, %v951_v18  ;;  %v517_v16 = vld [vmem:[%s19396_s24 + $0x98] sm:$0xff]  ;;  %v519_v17 = vld [vmem:[%s19396_s24 + $0xa8] sm:$0xff] }
  0x97   : > { %v881_v22 = vpop.permute.xlu1 %880  ;;  %v871_v23 = vpop.permute.xlu0 %870  ;;  %v521_v18 = vld [vmem:[%s19396_s24 + $0xb8] sm:$0xff]  ;;  %v523_v19 = vld [vmem:[%s19396_s24 + $0xc8] sm:$0xff] }
  0x98   : > { %v952_v25 = vmul.f32 %v19413_v13, %v881_v22  ;;  %v950_v26 = vmul.f32 %v19413_v13, %v871_v23  ;;  %v1262_v27 = vsel %vm1081_vm0, %v19423_v20, 0.0  ;;  %v1268_v30 = vsel %vm1081_vm0, %v19425_v21, 0.0 }
  0x99   : > { %1263 = vadd.xlane.f32.xlu0 %v1262_v27 }
  0x9a   : > { %v19437_v29 = vadd.f32 %v1014_v24, %v950_v26  ;;  %v19441_v33 = vadd.f32 %v1016_v28, %v952_v25 }
  0x9b   : > { %v571_v31 = vpop.permute.xlu1 %570  ;;  %v566_v32 = vpop.permute.xlu0 %565 }
  0x9c   : > { %v890_v35 = vmul.f32 %v19413_v13, %v571_v31  ;;  %v889_v36 = vmul.f32 %v19413_v13, %v566_v32  ;;  %v1265_v37 = vsel %vm1081_vm0, %v19437_v29, 0.0  ;;  %v1271_v42 = vsel %vm1081_vm0, %v19441_v33, 0.0  ;;  %v961_v31 = vld [vmem:[%s24045_s1 + $0x40] sm:$0xff] }
  0x9d   : > { %1266 = vadd.xlane.f32.xlu1 %v1265_v37  ;;  %1269 = vadd.xlane.f32.xlu0 %v1268_v30  ;;  %v509_v37 = vld [vmem:[%s19396_s24 + $0x58] sm:$0xff] }
  0x9e   : > { %v19453_v39 = vadd.f32 %v953_v34, %v889_v36  ;;  %v19464_v47 = vadd.f32 %v954_v38, %v890_v35  ;;  %v507_v36 = vld [vmem:[%s19396_s24 + $0x48] sm:$0xff] }
  0x9f   : > { %v581_v40 = vpop.permute.xlu1 %580  ;;  %v576_v41 = vpop.permute.xlu0 %575  ;;  %v511_v38 = vld [vmem:[%s19396_s24 + $0x68] sm:$0xff] }
  0xa0   : > { %v892_v44 = vmul.f32 %v19413_v13, %v581_v40  ;;  %v891_v45 = vmul.f32 %v19413_v13, %v576_v41  ;;  %v1082_v46 = vsel %vm1081_vm0, %v19453_v39, 0.0  ;;  %v1085_v56 = vsel %vm1081_vm0, %v19464_v47, 0.0  ;;  %v513_v40 = vld [vmem:[%s19396_s24 + $0x78] sm:$0xff]  ;;  %v515_v41 = vld [vmem:[%s19396_s24 + $0x88] sm:$0xff] }
  0xa1   : > { %1272 = vadd.xlane.f32.xlu1 %v1271_v42  ;;  %1083 = vadd.xlane.f32.xlu0 %v1082_v46  ;;  %v516_v42 = vld [vmem:[%s19396_s24 + $0x90] sm:$0xff] }
  0xa2   : > { %v19469_v49 = vadd.f32 %v955_v43, %v891_v45  ;;  %v19471_v52 = vadd.f32 %v956_v48, %v892_v44  ;;  %v518_v43 = vld [vmem:[%s19396_s24 + $0xa0] sm:$0xff]  ;;  %v520_v44 = vld [vmem:[%s19396_s24 + $0xb0] sm:$0xff] }
  0xa3   : > { %v591_v50 = vpop.permute.xlu1 %590  ;;  %v586_v51 = vpop.permute.xlu0 %585  ;;  %v522_v45 = vld [vmem:[%s19396_s24 + $0xc0] sm:$0xff]  ;;  %v524_v46 = vld [vmem:[%s19396_s24 + $0xd0] sm:$0xff] }
  0xa4   : > { %v894_v54 = vmul.f32 %v19413_v13, %v591_v50  ;;  %v893_v55 = vmul.f32 %v19413_v13, %v586_v51  ;;  %v1088_v57 = vsel %vm1081_vm0, %v19469_v49, 0.0  ;;  %v1091_v62 = vsel %vm1081_vm0, %v19471_v52, 0.0 }
  0xa5   : > { %1086 = vadd.xlane.f32.xlu0 %v1085_v56  ;;  %1089 = vadd.xlane.f32.xlu1 %v1088_v57  ;;  %v965_v57 = vld [vmem:[%s24045_s1 + $0x60] sm:$0xff] }
  0xa6   : > { %v19485_v59 = vadd.f32 %v957_v53, %v893_v55  ;;  %v19496_v3 = vadd.f32 %v958_v58, %v894_v54  ;;  %v963_v53 = vld [vmem:[%s24045_s1 + $0x50] sm:$0xff] }
  0xa7   : > { %v601_v60 = vpop.permute.xlu1 %600  ;;  %v596_v61 = vpop.permute.xlu0 %595 }
  0xa8   : > { %v896_v0 = vmul.f32 %v19413_v13, %v601_v60  ;;  %v895_v1 = vmul.f32 %v19413_v13, %v596_v61  ;;  %v1094_v2 = vsel %vm1081_vm0, %v19485_v59, 0.0  ;;  %v1097_v6 = vsel %vm1081_vm0, %v19496_v3, 0.0 }
  0xa9   : > { %1092 = vadd.xlane.f32.xlu0 %v1091_v62  ;;  %1095 = vadd.xlane.f32.xlu1 %v1094_v2 }
  0xaa   : > { %v19501_v5 = vadd.f32 %v959_v63, %v895_v1  ;;  %v19507_v8 = vadd.f32 %v960_v4, %v896_v0  ;;  %v967_v63 = vld [vmem:[%s24045_s1 + $0x70] sm:$0xff] }
  0xac   : > { %v1100_v7 = vsel %vm1081_vm0, %v19501_v5, 0.0  ;;  %v1103_v9 = vsel %vm1081_vm0, %v19507_v8, 0.0 }
  0xad   : > { %1098 = vadd.xlane.f32.xlu0 %v1097_v6  ;;  %1101 = vadd.xlane.f32.xlu1 %v1100_v7  ;;  %v969_v7 = vld [vmem:[%s24045_s1 + $0x80] sm:$0xff] }
  0xb1   : > { %1104 = vadd.xlane.f32.xlu0 %v1103_v9 }
  0xc7   : > { %605 = vperm.xlu0 %18771, %v506_v10  }
  0xcb   : > { %615 = vperm.xlu0 %18771, %v508_v11  }
  0xcf   : > { %625 = vperm.xlu0 %18771, %v510_v12  }
  0xd3   : > { %635 = vperm.xlu0 %18771, %v512_v14  }
  0xd7   : > { %645 = vperm.xlu0 %18771, %v514_v15  }
  0xdb   : > { %660 = vperm.xlu0 %18771, %v517_v16  }
  0xdf   : > { %670 = vperm.xlu0 %18771, %v519_v17  }
  0xe3   : > { %680 = vperm.xlu0 %18771, %v521_v18  }
  0xe7   : > { %690 = vperm.xlu0 %18771, %v523_v19  }
 0x126   : > { %v1264_v22 = vpop.xlane.xlu0 %1263 }
 0x127   : > { %v1335_v0 = vmul.f32 0.0625, %v1264_v22 }
 0x129   : > { %v19577_v9 = vsub.f32 %v19423_v20, %v1335_v0 }
 0x12a   : > { %v19520_v23 = vpop.xlane.xlu0 %1269  ;;  %v1267_v6 = vpop.xlane.xlu1 %1266 }
 0x12b   : > { %v1336_v10 = vmul.f32 0.0625, %v1267_v6  ;;  %v1463_v16 = vmul.f32 %v19577_v9, %v19577_v9  ;;  %v968_v6 = vld [vmem:[%s24045_s1 + $0x78] sm:$0xff] }
 0x12d   : > { %v19584_v14 = vsub.f32 %v19437_v29, %v1336_v10  ;;  %v1647_v22 = vsel %vm1081_vm0, %v1463_v16, 0.0  ;;  %v972_v29 = vld [vmem:[%s24045_s1 + $0x98] sm:$0xff] }
 0x12e   : > { %v19522_v24 = vpop.xlane.xlu0 %1083  ;;  %v1273_v17 = vpop.xlane.xlu1 %1272 }
 0x12f   : > { %v1338_v20 = vmul.f32 0.0625, %v1273_v17  ;;  %v970_v17 = vld [vmem:[%s24045_s1 + $0x88] sm:$0xff] }
 0x132   : > { %v19524_v25 = vpop.xlane.xlu0 %1086 }
 0x136   : > { %v19526_v26 = vpop.xlane.xlu0 %1092 }
 0x13a   : > { %v19528_v27 = vpop.xlane.xlu0 %1098 }
 0x13e   : > { %v19530_v28 = vpop.xlane.xlu0 %1104 }
 0x146   : > { %v606_v30 = vpop.permute.xlu0 %605 }
 0x147   : > { %v897_v32 = vmul.f32 %v19413_v13, %v606_v30  ;;  %v1464_v30 = vmul.f32 %v19584_v14, %v19584_v14 }
 0x149   : > { %v19536_v34 = vadd.f32 %v961_v31, %v897_v32  ;;  %v19598_v31 = vsub.f32 %v19441_v33, %v1338_v20  ;;  %v1650_v32 = vsel %vm1081_vm0, %v1464_v30, 0.0  ;;  %v1915_v33 = vld [vmem:[%s24047_s3] sm:$0xff]  ;;  %v1275_v30 = vmul.f32 0.0625, %v19522_v24 }
 0x14a   : > { %v616_v48 = vpop.permute.xlu0 %615 }
 0x14b   : > { %v1106_v35 = vsel %vm1081_vm0, %v19536_v34, 0.0  ;;  %v899_v51 = vmul.f32 %v19413_v13, %v616_v48  ;;  %v962_v48 = vld [vmem:[%s24045_s1 + $0x48] sm:$0xff] }
 0x14c   : > { %1107 = vadd.xlane.f32.xlu1 %v1106_v35 }
 0x14d   : > { %v19555_v56 = vadd.f32 %v963_v53, %v899_v51 }
 0x14e   : > { %v626_v50 = vpop.permute.xlu0 %625 }
 0x14f   : > { %v901_v55 = vmul.f32 %v19413_v13, %v626_v50  ;;  %v1112_v60 = vsel %vm1081_vm0, %v19555_v56, 0.0 }
 0x151   : > { %v19563_v61 = vadd.f32 %v965_v57, %v901_v55 }
 0x152   : > { %v636_v54 = vpop.permute.xlu0 %635 }
 0x153   : > { %v903_v58 = vmul.f32 %v19413_v13, %v636_v54  ;;  %v1118_v2 = vsel %vm1081_vm0, %v19563_v61, 0.0  ;;  %v964_v54 = vld [vmem:[%s24045_s1 + $0x58] sm:$0xff] }
 0x155   : > { %v19571_v4 = vadd.f32 %v967_v63, %v903_v58 }
 0x156   : > { %v646_v62 = vpop.permute.xlu0 %645 }
 0x157   : > { %v905_v1 = vmul.f32 %v19413_v13, %v646_v62  ;;  %v1124_v11 = vsel %vm1081_vm0, %v19571_v4, 0.0  ;;  %v966_v62 = vld [vmem:[%s24045_s1 + $0x68] sm:$0xff] }
 0x159   : > { %v19581_v12 = vadd.f32 %v969_v7, %v905_v1 }
 0x15a   : > { %v661_v18 = vpop.permute.xlu0 %660 }
 0x15b   : > { %v1130_v15 = vsel %vm1081_vm0, %v19581_v12, 0.0  ;;  %v908_v19 = vmul.f32 %v19413_v13, %v661_v18 }
 0x15d   : > { %610 = vperm.xlu1 %18772, %v507_v36   ;;  %v19601_v35 = vadd.f32 %v972_v29, %v908_v19 }
 0x15f   : > { %v1139_v36 = vsel %vm1081_vm0, %v19601_v35, 0.0 }
 0x161   : > { %620 = vperm.xlu1 %18772, %v509_v37   ;;  %v1466_v37 = vmul.f32 %v19598_v31, %v19598_v31 }
 0x165   : > { %630 = vperm.xlu1 %18772, %v511_v38   ;;  %v1656_v38 = vsel %vm1081_vm0, %v1466_v37, 0.0  ;;  %v671_v37 = vpop.permute.xlu0 %670 }
 0x169   : > { %640 = vperm.xlu1 %18772, %v513_v40   ;;  %v1090_v40 = vpop.xlane.xlu1 %1089 }
 0x16d   : > { %650 = vperm.xlu1 %18772, %v515_v41   ;;  %v19608_v41 = vpop.xlane.xlu1 %1095 }
 0x171   : > { %655 = vperm.xlu1 %18772, %v516_v42   ;;  %v1916_v42 = vld [vmem:[%s24047_s3 + $0x8] sm:$0xff] }
 0x175   : > { %665 = vperm.xlu1 %18772, %v518_v43   ;;  %v18730_v43 = vpack.c.bf16 %v1916_v42, %v1915_v33  ;;  %v19672_v33 = vsub.f32 %v19453_v39, %v1275_v30  ;;  %v973_v42 = vld [vmem:[%s24045_s1 + $0xa0] sm:$0xff]  ;;  %v974_v39 = vld [vmem:[%s24045_s1 + $0xa8] sm:$0xff] }
 0x177   : > { %18758 = vmatprep.subr.bf16.mxu1 %v18730_v43  ;;  %18731 = vmatprep.subr.bf16.mxu0 %v18730_v43 }
 0x178   : > { %18759 = vmatpush3.bf16.msra.mxu1 %v18730_v43  ;;  %18733 = vmatpush3.bf16.msra.mxu0 %v18730_v43  ;;  %v1276_v43 = vmul.f32 0.0625, %v19524_v25  ;;  %v1403_v25 = vmul.f32 %v19672_v33, %v19672_v33 }
 0x179   : > { %675 = vperm.xlu1 %18772, %v520_v44   ;;  %v19616_v44 = vpop.xlane.xlu1 %1101 }
 0x17d   : > { %685 = vperm.xlu1 %18772, %v522_v45  }
 0x181   : > { %695 = vperm.xlu1 %18772, %v524_v46  }
 0x1a5   : > { %1113 = vadd.xlane.f32.xlu1 %v1112_v60 }
 0x1a9   : > { %1119 = vadd.xlane.f32.xlu1 %v1118_v2 }
 0x1ad   : > { %1125 = vadd.xlane.f32.xlu1 %v1124_v11 }
 0x1b1   : > { %1131 = vadd.xlane.f32.xlu1 %v1130_v15  ;;  %v1337_v15 = vmul.f32 0.0625, %v19520_v23  ;;  %v971_v23 = vld [vmem:[%s24045_s1 + $0x90] sm:$0xff] }
 0x1b5   : > { %1648 = vadd.xlane.f32.xlu1 %v1647_v22  ;;  %v19660_v22 = vsub.f32 %v19425_v21, %v1337_v15 }
 0x1b7   : > { %v1465_v24 = vmul.f32 %v19660_v22, %v19660_v22 }
 0x1b9   : > { %1651 = vadd.xlane.f32.xlu1 %v1650_v32 }
 0x1bd   : > { %1140 = vadd.xlane.f32.xlu1 %v1139_v36 }
 0x1c1   : > { %1657 = vadd.xlane.f32.xlu1 %v1656_v38 }
 0x1d9   : > { %v19618_v45 = vpop.xlane.xlu1 %1107 }
 0x1dd   : > { %v611_v46 = vpop.permute.xlu1 %610 }
 0x1de   : > { %v898_v50 = vmul.f32 %v19413_v13, %v611_v46  ;;  %v910_v46 = vmul.f32 %v19413_v13, %v671_v37 }
 0x1e0   : > { %v19624_v51 = vadd.f32 %v962_v48, %v898_v50 }
 0x1e1   : > { %v621_v53 = vpop.permute.xlu1 %620 }
 0x1e2   : > { %v900_v55 = vmul.f32 %v19413_v13, %v621_v53  ;;  %v1109_v57 = vsel %vm1081_vm0, %v19624_v51, 0.0 }
 0x1e3   : > { %1110 = vadd.xlane.f32.xlu0 %v1109_v57  ;;  %v1653_v57 = vsel %vm1081_vm0, %v1465_v24, 0.0 }
 0x1e4   : > { %v19632_v58 = vadd.f32 %v964_v54, %v900_v55  ;;  %v1277_v54 = vmul.f32 0.0625, %v1090_v40  ;;  %v975_v40 = vld [vmem:[%s24045_s1 + $0xb0] sm:$0xff] }
 0x1e5   : > { %v631_v60 = vpop.permute.xlu1 %630 }
 0x1e6   : > { %v902_v63 = vmul.f32 %v19413_v13, %v631_v60  ;;  %v1115_v0 = vsel %vm1081_vm0, %v19632_v58, 0.0  ;;  %v19693_v60 = vsub.f32 %v19464_v47, %v1276_v43  ;;  %v1278_v47 = vmul.f32 0.0625, %v19526_v26 }
 0x1e7   : > { %1116 = vadd.xlane.f32.xlu0 %v1115_v0  ;;  %v19698_v0 = vadd.f32 %v974_v39, %v910_v46  ;;  %v1279_v26 = vmul.f32 0.0625, %v19608_v41 }
 0x1e8   : > { %v19640_v1 = vadd.f32 %v966_v62, %v902_v63 }
 0x1e9   : > { %v641_v2 = vpop.permute.xlu1 %640  ;;  %v1145_v15 = vsel %vm1081_vm0, %v19698_v0, 0.0  ;;  %v19734_v41 = vsub.f32 %v19485_v59, %v1279_v26  ;;  %v978_v59 = vld [vmem:[%s24045_s1 + $0xc8] sm:$0xff] }
 0x1ea   : > { %v904_v7 = vmul.f32 %v19413_v13, %v641_v2  ;;  %v1121_v10 = vsel %vm1081_vm0, %v19640_v1, 0.0  ;;  %v681_v2 = vpop.permute.xlu0 %680  ;;  %v2502_v26 = vld [vmem:[%s24049_s5 + $0x8] sm:$0xff] }
 0x1eb   : > { %1122 = vadd.xlane.f32.xlu0 %v1121_v10  ;;  %v912_v10 = vmul.f32 %v19413_v13, %v681_v2  ;;  %v1282_v2 = vmul.f32 0.0625, %v19530_v28 }
 0x1ec   : > { %v19648_v11 = vadd.f32 %v968_v6, %v904_v7  ;;  %v19704_v6 = vsub.f32 %v19469_v49, %v1277_v54  ;;  %v1467_v7 = vsel %vm1081_vm0, %v1403_v25, 0.0  ;;  %v976_v49 = vld [vmem:[%s24045_s1 + $0xb8] sm:$0xff]  ;;  %v1407_v54 = vmul.f32 %v19734_v41, %v19734_v41 }
 0x1ed   : > { %v651_v16 = vpop.permute.xlu1 %650 }
 0x1ee   : > { %v906_v18 = vmul.f32 %v19413_v13, %v651_v16  ;;  %v1127_v20 = vsel %vm1081_vm0, %v19648_v11, 0.0  ;;  %v1404_v16 = vmul.f32 %v19693_v60, %v19693_v60  ;;  %v1405_v30 = vmul.f32 %v19704_v6, %v19704_v6  ;;  %v691_v37 = vpop.permute.xlu0 %690 }
 0x1ef   : > { %1128 = vadd.xlane.f32.xlu0 %v1127_v20  ;;  %v19720_v20 = vsub.f32 %v19471_v52, %v1278_v47  ;;  %v977_v52 = vld [vmem:[%s24045_s1 + $0xc0] sm:$0xff] }
 0x1f0   : > { %v19657_v19 = vadd.f32 %v970_v17, %v906_v18  ;;  %v1473_v24 = vsel %vm1081_vm0, %v1405_v30, 0.0 }
 0x1f1   : > { %v656_v29 = vpop.permute.xlu1 %655  ;;  %v1406_v46 = vmul.f32 %v19720_v20, %v19720_v20 }
 0x1f2   : > { %v907_v32 = vmul.f32 %v19413_v13, %v656_v29  ;;  %v1133_v36 = vsel %vm1081_vm0, %v19657_v19, 0.0 }
 0x1f3   : > { %1134 = vadd.xlane.f32.xlu0 %v1133_v36  ;;  %v19728_v36 = vadd.f32 %v976_v49, %v912_v10  ;;  %v19775_v10 = vsub.f32 %v19507_v8, %v1282_v2  ;;  %v2501_v49 = vld [vmem:[%s24049_s5] sm:$0xff] }
 0x1f4   : > { %v19669_v38 = vadd.f32 %v971_v23, %v907_v32  ;;  %v1470_v23 = vsel %vm1081_vm0, %v1404_v16, 0.0  ;;  %v18734_v30 = vpack.c.bf16 %v2502_v26, %v2501_v49  ;;  %v554_v49 = vld [vmem:[%s19396_s24 + $0x1c0] sm:$0xff]  ;;  %v556_v26 = vld [vmem:[%s19396_s24 + $0x1d0] sm:$0xff] }
 0x1f5   : > { %v666_v21 = vpop.permute.xlu1 %665  ;;  %v1151_v43 = vsel %vm1081_vm0, %v19728_v36, 0.0 }
 0x1f6   : > { %v909_v48 = vmul.f32 %v19413_v13, %v666_v21  ;;  %v1136_v50 = vsel %vm1081_vm0, %v19669_v38, 0.0  ;;  %v1280_v21 = vmul.f32 0.0625, %v19528_v27  ;;  %v1281_v27 = vmul.f32 0.0625, %v19616_v44  ;;  %v979_v44 = vld [vmem:[%s24045_s1 + $0xd0] sm:$0xff]  ;;  %18735 = vmatprep.subr.bf16.mxu1 %v18734_v30 }
 0x1f7   : > { %1137 = vadd.xlane.f32.xlu0 %v1136_v50 }
 0x1f8   : > { %v19687_v53 = vadd.f32 %v973_v42, %v909_v48  ;;  %v914_v42 = vmul.f32 %v19413_v13, %v691_v37  ;;  %v19750_v39 = vsub.f32 %v19496_v3, %v1280_v21  ;;  %v19764_v3 = vsub.f32 %v19501_v5, %v1281_v27 }
 0x1f9   : > { %v676_v55 = vpop.permute.xlu1 %675 }
 0x1fa   : > { %v911_v62 = vmul.f32 %v19413_v13, %v676_v55  ;;  %v1142_v63 = vsel %vm1081_vm0, %v19687_v53, 0.0  ;;  %v1408_v47 = vmul.f32 %v19750_v39, %v19750_v39  ;;  %v1409_v28 = vmul.f32 %v19764_v3, %v19764_v3 }
 0x1fb   : > { %1654 = vadd.xlane.f32.xlu0 %v1653_v57  ;;  %1143 = vadd.xlane.f32.xlu1 %v1142_v63  ;;  %v1476_v57 = vsel %vm1081_vm0, %v1406_v46, 0.0  ;;  %v1479_v63 = vsel %vm1081_vm0, %v1407_v54, 0.0 }
 0x1fc   : > { %v19713_v17 = vadd.f32 %v975_v40, %v911_v62  ;;  %v19758_v62 = vadd.f32 %v978_v59, %v914_v42  ;;  %v1482_v5 = vsel %vm1081_vm0, %v1408_v47, 0.0  ;;  %v1485_v16 = vsel %vm1081_vm0, %v1409_v28, 0.0  ;;  %v542_v47 = vld [vmem:[%s19396_s24 + $0x160] sm:$0xff]  ;;  %v544_v28 = vld [vmem:[%s19396_s24 + $0x170] sm:$0xff] }
 0x1fd   : > { %v686_v18 = vpop.permute.xlu1 %685 }
 0x1fe   : > { %v913_v29 = vmul.f32 %v19413_v13, %v686_v18  ;;  %v1148_v32 = vsel %vm1081_vm0, %v19713_v17, 0.0  ;;  %v1157_v40 = vsel %vm1081_vm0, %v19758_v62, 0.0  ;;  %v1410_v18 = vmul.f32 %v19775_v10, %v19775_v10 }
 0x1ff   : > { %1468 = vadd.xlane.f32.xlu0 %v1467_v7  ;;  %1146 = vadd.xlane.f32.xlu1 %v1145_v15 }
 0x200   : > { %v19743_v48 = vadd.f32 %v977_v52, %v913_v29  ;;  %v1488_v8 = vsel %vm1081_vm0, %v1410_v18, 0.0  ;;  %v525_v29 = vld [vmem:[%s19396_s24 + $0xd8] sm:$0xff]  ;;  %v550_v18 = vld [vmem:[%s19396_s24 + $0x1a0] sm:$0xff] }
 0x201   : > { %v696_v50 = vpop.permute.xlu1 %695  ;;  %v529_v52 = vld [vmem:[%s19396_s24 + $0xf8] sm:$0xff] }
 0x202   : > { %v915_v55 = vmul.f32 %v19413_v13, %v696_v50  ;;  %v1154_v25 = vsel %vm1081_vm0, %v19743_v48, 0.0  ;;  %v534_v50 = vld [vmem:[%s19396_s24 + $0x120] sm:$0xff] }
 0x203   : > { %1471 = vadd.xlane.f32.xlu0 %v1470_v23  ;;  %1149 = vadd.xlane.f32.xlu1 %v1148_v32  ;;  %v527_v32 = vld [vmem:[%s19396_s24 + $0xe8] sm:$0xff] }
 0x204   : > { %v19772_v7 = vadd.f32 %v979_v44, %v915_v55  ;;  %v536_v55 = vld [vmem:[%s19396_s24 + $0x130] sm:$0xff]  ;;  %v538_v44 = vld [vmem:[%s19396_s24 + $0x140] sm:$0xff] }
 0x206   : > { %v1160_v15 = vsel %vm1081_vm0, %v19772_v7, 0.0 }
 0x207   : > { %1474 = vadd.xlane.f32.xlu0 %v1473_v24  ;;  %1152 = vadd.xlane.f32.xlu1 %v1151_v43  ;;  %v530_v24 = vld [vmem:[%s19396_s24 + $0x100] sm:$0xff]  ;;  %v532_v43 = vld [vmem:[%s19396_s24 + $0x110] sm:$0xff] }
 0x20b   : > { %1477 = vadd.xlane.f32.xlu0 %v1476_v57  ;;  %1155 = vadd.xlane.f32.xlu1 %v1154_v25 }
 0x20f   : > { %1480 = vadd.xlane.f32.xlu0 %v1479_v63  ;;  %1158 = vadd.xlane.f32.xlu1 %v1157_v40  ;;  %v540_v63 = vld [vmem:[%s19396_s24 + $0x150] sm:$0xff] }
 0x213   : > { %1483 = vadd.xlane.f32.xlu0 %v1482_v5  ;;  %1161 = vadd.xlane.f32.xlu1 %v1160_v15 }
 0x217   : > { %1486 = vadd.xlane.f32.xlu0 %v1485_v16  ;;  %v548_v16 = vld [vmem:[%s19396_s24 + $0x190] sm:$0xff] }
 0x21b   : > { %1489 = vadd.xlane.f32.xlu0 %v1488_v8  ;;  %v552_v8 = vld [vmem:[%s19396_s24 + $0x1b0] sm:$0xff] }
 0x231   : > { %700 = vperm.xlu0 %18771, %v525_v29  }
 0x232   : > { %v19793_v23 = vpop.xlane.xlu1 %1113 }
 0x235   : > { %710 = vperm.xlu0 %18771, %v527_v32  }
 0x236   : > { %v19796_v37 = vpop.xlane.xlu1 %1119 }
 0x239   : > { %720 = vperm.xlu0 %18771, %v529_v52  }
 0x23a   : > { %v19799_v21 = vpop.xlane.xlu1 %1125 }
 0x23d   : > { %725 = vperm.xlu0 %18771, %v530_v24  }
 0x23e   : > { %v19802_v42 = vpop.xlane.xlu1 %1131 }
 0x241   : > { %735 = vperm.xlu0 %18771, %v532_v43  }
 0x242   : > { %v1649_v46 = vpop.xlane.xlu1 %1648 }
 0x243   : > { %v1719_v59 = vmul.f32 0.0625, %v1649_v46  ;;  %v1283_v46 = vmul.f32 0.0625, %v19618_v45 }
 0x245   : > { %v1783_v27 = vadd.f32 1e-05, %v1719_v59  ;;  %745 = vperm.xlu0 %18771, %v534_v50  }
 0x246   : > { %v1652_v54 = vpop.xlane.xlu1 %1651 }
 0x247   : > { %18773 = vrsqrt.f32 %v1783_v27  ;;  %v1720_v57 = vmul.f32 0.0625, %v1652_v54  ;;  %v19841_v27 = vsub.f32 %v19536_v34, %v1283_v46 }
 0x249   : > { %v1784_v25 = vadd.f32 1e-05, %v1720_v57  ;;  %755 = vperm.xlu0 %18771, %v536_v55  }
 0x24a   : > { %v19831_v52 = vpop.xlane.xlu1 %1140 }
 0x24b   : > { %18775 = vrsqrt.f32 %v1784_v25 }
 0x24d   : > { %765 = vperm.xlu0 %18771, %v538_v44  }
 0x24e   : > { %v1658_v43 = vpop.xlane.xlu1 %1657 }
 0x24f   : > { %v1722_v50 = vmul.f32 0.0625, %v1658_v43 }
 0x251   : > { %v18774_v2 = vpop.eup %18773  ;;  %775 = vperm.xlu0 %18771, %v540_v63   ;;  %v1786_v55 = vadd.f32 1e-05, %v1722_v50 }
 0x252   : > { %v19810_v40 = vmul.f32 %v18774_v2, %v19577_v9  ;;  %v546_v9 = vld [vmem:[%s19396_s24 + $0x180] sm:$0xff]  ;;  %v1411_v2 = vmul.f32 %v19841_v27, %v19841_v27 }
 0x253   : > { %18777 = vrsqrt.f32 %v1786_v55 }
 0x254   : > { %24129 = vst [vmem:[#allocation2_spill] sm:$0xff] %v19810_v40  ;;  %17664 = vmatprep.mubr.msk.f32.mxu1 %vm1081_vm0, %v19810_v40 }
 0x255   : > { %v18776_v5 = vpop.eup %18775  ;;  %785 = vperm.xlu0 %18771, %v542_v47  }
 0x256   : > { %v19816_v15 = vmul.f32 %v18776_v5, %v19584_v14 }
 0x258   : > { %24130 = vst [vmem:[#allocation3_spill] sm:$0xff] %v19816_v15  ;;  %17665 = vmatmul.mubr.msk.f32.vlgmr.msra.gmra.mrb[0].mxu1 %vm1081_vm0, %v19816_v15 }
 0x259   : > { %795 = vperm.xlu0 %18771, %v544_v28   ;;  %18737 = vmatpush3.bf16.msra.mxu1 %v18734_v30  ;;  %v1491_v28 = vsel %vm1081_vm0, %v1411_v2, 0.0 }
 0x25d   : > { %805 = vperm.xlu0 %18771, %v546_v9  }
 0x261   : > { %815 = vperm.xlu0 %18771, %v548_v16  }
 0x265   : > { %825 = vperm.xlu0 %18771, %v550_v18  }
 0x269   : > { %835 = vperm.xlu0 %18771, %v552_v8  }
 0x26d   : > { %845 = vperm.xlu0 %18771, %v554_v49  }
 0x270   : > { %v1111_v29 = vpop.xlane.xlu0 %1110 }
 0x271   : > { %855 = vperm.xlu0 %18771, %v556_v26   ;;  %v1284_v54 = vmul.f32 0.0625, %v1111_v29  ;;  %v18778_v26 = vpop.eup %18777 }
 0x272   : > { %v19856_v55 = vmul.f32 %v18778_v26, %v19598_v31 }
 0x273   : > { %v19844_v44 = vsub.f32 %v19624_v51, %v1284_v54 }
 0x274   : > { %v19827_v14 = vpop.xlane.xlu0 %1116  ;;  %24132 = vst [vmem:[#allocation5_spill] sm:$0xff] %v19856_v55 }
 0x275   : > { %v1412_v34 = vmul.f32 %v19844_v44, %v19844_v44 }
 0x277   : > { %v1494_v18 = vsel %vm1081_vm0, %v1412_v34, 0.0 }
 0x278   : > { %v19829_v32 = vpop.xlane.xlu0 %1122 }
 0x27c   : > { %v19833_v30 = vpop.xlane.xlu0 %1128 }
 0x280   : > { %v19835_v24 = vpop.xlane.xlu0 %1134 }
 0x284   : > { %v19838_v59 = vpop.xlane.xlu0 %1137 }
 0x288   : > { %v1655_v57 = vpop.xlane.xlu0 %1654 }
 0x289   : > { %v1721_v25 = vmul.f32 0.0625, %v1655_v57 }
 0x28b   : > { %v1785_v63 = vadd.f32 1e-05, %v1721_v25 }
 0x28c   : > { %v1469_v47 = vpop.xlane.xlu0 %1468 }
 0x28d   : > { %18779 = vrsqrt.f32 %v1785_v63  ;;  %v1659_v45 = vmul.f32 0.0625, %v1469_v47 }
 0x28f   : > { %v1723_v5 = vadd.f32 1e-05, %v1659_v45 }
 0x290   : > { %1492 = vadd.xlane.f32.xlu0 %v1491_v28  ;;  %v1472_v9 = vpop.xlane.xlu0 %1471 }
 0x291   : > { %18781 = vrsqrt.f32 %v1723_v5  ;;  %v1660_v16 = vmul.f32 0.0625, %v1472_v9 }
 0x293   : > { %v1724_v51 = vadd.f32 1e-05, %v1660_v16 }
 0x294   : > { %1495 = vadd.xlane.f32.xlu0 %v1494_v18  ;;  %v1475_v8 = vpop.xlane.xlu0 %1474 }
 0x295   : > { %18783 = vrsqrt.f32 %v1724_v51  ;;  %v1661_v49 = vmul.f32 0.0625, %v1475_v8 }
 0x297   : > { %v18780_v29 = vpop.eup %18779  ;;  %v1725_v43 = vadd.f32 1e-05, %v1661_v49 }
 0x298   : > { %v1478_v46 = vpop.xlane.xlu0 %1477  ;;  %v19853_v50 = vmul.f32 %v18780_v29, %v19660_v22 }
 0x299   : > { %18785 = vrsqrt.f32 %v1725_v43  ;;  %v1662_v54 = vmul.f32 0.0625, %v1478_v46 }
 0x29a   : > { %24131 = vst [vmem:[#allocation4_spill] sm:$0xff] %v19853_v50  ;;  %17667 = vmatprep.mubr.msk.f32.mxu1 %vm1081_vm0, %v19853_v50 }
 0x29b   : > { %v18782_v57 = vpop.eup %18781  ;;  %v1726_v25 = vadd.f32 1e-05, %v1662_v54  ;;  %17668 = vmatmul.mubr.msk.f32.gmra.mrb[2].mxu1 %vm1081_vm0, %v19856_v55 }
 0x29c   : > { %v1481_v63 = vpop.xlane.xlu0 %1480  ;;  %v19863_v2 = vmul.f32 %v18782_v57, %v19672_v33  ;;  %v980_v57 = vld [vmem:[%s24045_s1 + $0xd8] sm:$0xff] }
 0x29d   : > { %18787 = vrsqrt.f32 %v1726_v25  ;;  %v1663_v22 = vmul.f32 0.0625, %v1481_v63 }
 0x29e   : > { %24133 = vst [vmem:[#allocation6_spill] sm:$0xff] %v19863_v2  ;;  %17574 = vmatprep.mubr.msk.f32.mxu0 %vm1081_vm0, %v19863_v2  ;;  %17674 = vmatprep.mubr.msk.f32.mxu1 %vm1081_vm0, %v19863_v2 }
 0x29f   : > { %v18784_v31 = vpop.eup %18783  ;;  %v1727_v47 = vadd.f32 1e-05, %v1663_v22 }
 0x2a0   : > { %v1484_v45 = vpop.xlane.xlu0 %1483  ;;  %v19870_v5 = vmul.f32 %v18784_v31, %v19693_v60  ;;  %v982_v31 = vld [vmem:[%s24045_s1 + $0xe8] sm:$0xff] }
 0x2a1   : > { %18789 = vrsqrt.f32 %v1727_v47  ;;  %v1664_v28 = vmul.f32 0.0625, %v1484_v45 }
 0x2a2   : > { %24134 = vst [vmem:[#allocation7_spill] sm:$0xff] %v19870_v5  ;;  %17575 = vmatmul.mubr.msk.f32.vlgmr.msra.gmra.mrb[0].mxu0 %vm1081_vm0, %v19870_v5  ;;  %17675 = vmatmul.mubr.msk.f32.vlgmr.msra.gmra.mrb[4].mxu1 %vm1081_vm0, %v19870_v5  ;;  %v983_v5 = vld [vmem:[%s24045_s1 + $0xf0] sm:$0xff] }
 0x2a3   : > { %v18786_v33 = vpop.eup %18785  ;;  %v1728_v34 = vadd.f32 1e-05, %v1664_v28 }
 0x2a4   : > { %v1487_v9 = vpop.xlane.xlu0 %1486  ;;  %v19877_v16 = vmul.f32 %v18786_v33, %v19704_v6 }
 0x2a5   : > { %18791 = vrsqrt.f32 %v1728_v34  ;;  %v1665_v51 = vmul.f32 0.0625, %v1487_v9  ;;  %v526_v9 = vld [vmem:[%s19396_s24 + $0xe0] sm:$0xff] }
 0x2a6   : > { %24135 = vst [vmem:[#allocation8_spill] sm:$0xff] %v19877_v16  ;;  %17577 = vmatprep.mubr.msk.f32.mxu0 %vm1081_vm0, %v19877_v16  ;;  %17677 = vmatprep.mubr.msk.f32.mxu1 %vm1081_vm0, %v19877_v16 }
 0x2a7   : > { %v18788_v60 = vpop.eup %18787  ;;  %v1729_v18 = vadd.f32 1e-05, %v1665_v51  ;;  %v528_v51 = vld [vmem:[%s19396_s24 + $0xf0] sm:$0xff] }
 0x2a8   : > { %v1490_v8 = vpop.xlane.xlu0 %1489  ;;  %v19884_v49 = vmul.f32 %v18788_v60, %v19720_v20  ;;  %v531_v60 = vld [vmem:[%s19396_s24 + $0x108] sm:$0xff] }
 0x2a9   : > { %18793 = vrsqrt.f32 %v1729_v18  ;;  %v1666_v26 = vmul.f32 0.0625, %v1490_v8  ;;  %v533_v8 = vld [vmem:[%s19396_s24 + $0x118] sm:$0xff] }
 0x2aa   : > { %24136 = vst [vmem:[#allocation9_spill] sm:$0xff] %v19884_v49  ;;  %17578 = vmatmul.mubr.msk.f32.gmra.mrb[2].mxu0 %vm1081_vm0, %v19884_v49  ;;  %17678 = vmatmul.mubr.msk.f32.gmra.mrb[6].mxu1 %vm1081_vm0, %v19884_v49 }
 0x2ab   : > { %v18790_v6 = vpop.eup %18789  ;;  %v1730_v29 = vadd.f32 1e-05, %v1666_v26  ;;  %v535_v26 = vld [vmem:[%s19396_s24 + $0x128] sm:$0xff] }
 0x2ac   : > { %v19891_v43 = vmul.f32 %v18790_v6, %v19734_v41 }
 0x2ad   : > { %18795 = vrsqrt.f32 %v1730_v29  ;;  %v537_v29 = vld [vmem:[%s19396_s24 + $0x138] sm:$0xff] }
 0x2ae   : > { %24137 = vst [vmem:[#allocation10_spill] sm:$0xff] %v19891_v43  ;;  %17580 = vmatprep.mubr.msk.f32.mxu0 %vm1081_vm0, %v19891_v43  ;;  %17680 = vmatprep.mubr.msk.f32.mxu1 %vm1081_vm0, %v19891_v43 }
 0x2af   : > { %v18792_v20 = vpop.eup %18791 }
 0x2b0   : > { %v701_v46 = vpop.permute.xlu0 %700  ;;  %v19898_v54 = vmul.f32 %v18792_v20, %v19750_v39 }
 0x2b1   : > { %v916_v25 = vmul.f32 %v19413_v13, %v701_v46  ;;  %v539_v46 = vld [vmem:[%s19396_s24 + $0x148] sm:$0xff] }
 0x2b2   : > { %24138 = vst [vmem:[#allocation11_spill] sm:$0xff] %v19898_v54  ;;  %17581 = vmatmul.mubr.msk.f32.gmra.mrb[4].mxu0 %vm1081_vm0, %v19898_v54  ;;  %17681 = vmatmul.mubr.msk.f32.gmra.mrb[8].mxu1 %vm1081_vm0, %v19898_v54 }
 0x2b3   : > { %v18794_v41 = vpop.eup %18793  ;;  %v19908_v63 = vadd.f32 %v980_v57, %v916_v25  ;;  %v541_v57 = vld [vmem:[%s19396_s24 + $0x158] sm:$0xff] }
 0x2b4   : > { %v711_v22 = vpop.permute.xlu0 %710  ;;  %v19911_v39 = vmul.f32 %v18794_v41, %v19764_v3  ;;  %v543_v41 = vld [vmem:[%s19396_s24 + $0x168] sm:$0xff] }
 0x2b5   : > { %v918_v47 = vmul.f32 %v19413_v13, %v711_v22  ;;  %v1163_v45 = vsel %vm1081_vm0, %v19908_v63, 0.0 }
 0x2b6   : > { %24139 = vst [vmem:[#allocation12_spill] sm:$0xff] %v19911_v39  ;;  %17583 = vmatprep.mubr.msk.f32.mxu0 %vm1081_vm0, %v19911_v39  ;;  %17683 = vmatprep.mubr.msk.f32.mxu1 %vm1081_vm0, %v19911_v39 }
 0x2b7   : > { %v18796_v28 = vpop.eup %18795  ;;  %1164 = vadd.xlane.f32.xlu1 %v1163_v45  ;;  %v19923_v3 = vadd.f32 %v982_v31, %v918_v47  ;;  %v545_v31 = vld [vmem:[%s19396_s24 + $0x178] sm:$0xff]  ;;  %v547_v47 = vld [vmem:[%s19396_s24 + $0x188] sm:$0xff] }
 0x2b8   : > { %v19926_v33 = vmul.f32 %v18796_v28, %v19775_v10  ;;  %v19934_v34 = vpop.permute.xlu0 %720  ;;  %v549_v28 = vld [vmem:[%s19396_s24 + $0x198] sm:$0xff] }
 0x2b9   : > { %v1169_v13 = vsel %vm1081_vm0, %v19923_v3, 0.0 }
 0x2ba   : > { %24140 = vst [vmem:[#allocation13_spill] sm:$0xff] %v19926_v33  ;;  %17584 = vmatmul.mubr.msk.f32.gmra.mrb[6].mxu0 %vm1081_vm0, %v19926_v33  ;;  %17684 = vmatmul.mubr.msk.f32.gmra.mrb[10].mxu1 %vm1081_vm0, %v19926_v33 }
 0x2bb   : > { %1170 = vadd.xlane.f32.xlu0 %v1169_v13 }
 0x2bc   : > { %v19938_v10 = vpop.permute.xlu0 %725 }
 0x2c0   : > { %v19941_v18 = vpop.permute.xlu0 %735 }
 0x2c4   : > { %v19945_v6 = vpop.permute.xlu0 %745 }
 0x2c8   : > { %705 = vperm.xlu1 %18772, %v526_v9   ;;  %v19948_v20 = vpop.permute.xlu0 %755  ;;  %v551_v9 = vld [vmem:[%s19396_s24 + $0x1a8] sm:$0xff] }
 0x2cc   : > { %715 = vperm.xlu1 %18772, %v528_v51   ;;  %v19952_v25 = vpop.permute.xlu0 %765  ;;  %v553_v51 = vld [vmem:[%s19396_s24 + $0x1b8] sm:$0xff] }
 0x2d0   : > { %730 = vperm.xlu1 %18772, %v531_v60   ;;  %v19955_v22 = vpop.permute.xlu0 %775  ;;  %v24060_v60 = vmov 0.0  }
 0x2d1   : > { %17870 = vmatprep.subr.mxu1 %v24060_v60 }
 0x2d4   : > { %740 = vperm.xlu1 %18772, %v533_v8   ;;  %v19959_v45 = vpop.permute.xlu0 %785 }
 0x2d8   : > { %750 = vperm.xlu1 %18772, %v535_v26   ;;  %v19962_v13 = vpop.permute.xlu0 %795  ;;  %v555_v26 = vld [vmem:[%s19396_s24 + $0x1c8] sm:$0xff] }
 0x2dc   : > { %760 = vperm.xlu1 %18772, %v537_v29   ;;  %v19967_v8 = vpop.permute.xlu0 %805 }
 0x2e0   : > { %770 = vperm.xlu1 %18772, %v539_v46   ;;  %v19970_v29 = vpop.permute.xlu0 %815  ;;  %v557_v46 = vld [vmem:[%s19396_s24 + $0x1d8] sm:$0xff] }
 0x2e4   : > { %780 = vperm.xlu1 %18772, %v541_v57   ;;  %v19973_v57 = vpop.permute.xlu0 %825 }
 0x2e8   : > { %790 = vperm.xlu1 %18772, %v543_v41   ;;  %v19975_v41 = vpop.permute.xlu0 %835 }
 0x2ec   : > { %800 = vperm.xlu1 %18772, %v545_v31   ;;  %v19977_v31 = vpop.permute.xlu0 %845 }
 0x2f0   : > { %810 = vperm.xlu1 %18772, %v547_v47   ;;  %v19979_v47 = vpop.permute.xlu0 %855 }
 0x2f4   : > { %820 = vperm.xlu1 %18772, %v549_v28   ;;  %v19981_v28 = vpop.xlane.xlu1 %1143 }
 0x2f8   : > { %830 = vperm.xlu1 %18772, %v551_v9   ;;  %v19983_v39 = vpop.xlane.xlu1 %1146 }
 0x2fc   : > { %840 = vperm.xlu1 %18772, %v553_v51  }
 0x300   : > { %850 = vperm.xlu1 %18772, %v555_v26  }
 0x304   : > { %860 = vperm.xlu1 %18772, %v557_v46   ;;  %v19985_v46 = vpop.xlane.xlu1 %1149 }
 0x308   : > { %v19994_v50 = vpop.xlane.xlu1 %1152 }
 0x31d   : > { %v1493_v9 = vpop.xlane.xlu0 %1492 }
 0x31e   : > { %v1667_v60 = vmul.f32 0.0625, %v1493_v9  ;;  %v1285_v9 = vmul.f32 0.0625, %v19793_v23 }
 0x320   : > { %v1731_v33 = vadd.f32 1e-05, %v1667_v60 }
 0x321   : > { %v1496_v51 = vpop.xlane.xlu0 %1495 }
 0x322   : > { %18797 = vrsqrt.f32 %v1731_v33  ;;  %v1668_v26 = vmul.f32 0.0625, %v1496_v51 }
 0x324   : > { %v1732_v54 = vadd.f32 1e-05, %v1668_v26  ;;  %v20017_v26 = vsub.f32 %v19555_v56, %v1285_v9 }
 0x326   : > { %18799 = vrsqrt.f32 %v1732_v54  ;;  %24145 = vst [vmem:[#allocation18_spill] sm:$0xff] %v20017_v26  ;;  %v1413_v9 = vmul.f32 %v20017_v26, %v20017_v26 }
 0x32b   : > { %v19987_v43 = vpop.f32.mrb[0].mxu1 }
 0x32c   : > { %24141 = vst [vmem:[#allocation14_spill] sm:$0xff] %v19987_v43  ;;  %v18798_v49 = vpop.eup %18797  ;;  %v19989_v55 = vpop.f32.mrb[1].mxu1  ;;  %v20026_v43 = vld [vmem:[%s24046_s2] ss:$0 sm:$0xff] }
 0x32d   : > { %24142 = vst [vmem:[#allocation15_spill] sm:$0xff] %v19989_v55  ;;  %v19992_v16 = vmul.f32 %v18798_v49, %v19841_v27  ;;  %v20007_v27 = vpop.xlane.xlu1 %1155  ;;  %v1286_v55 = vmul.f32 0.0625, %v19827_v14  ;;  %v920_v15 = vmul.f32 %v20026_v43, %v19934_v34  ;;  %v1497_v34 = vsel %vm1081_vm0, %v1413_v9, 0.0 }
 0x32f   : > { %24143 = vst [vmem:[#allocation16_spill] sm:$0xff] %v19992_v16  ;;  %17586 = vmatprep.mubr.msk.f32.mxu0 %vm1081_vm0, %v19992_v16  ;;  %17686 = vmatprep.mubr.msk.f32.mxu1 %vm1081_vm0, %v19992_v16  ;;  %v1287_v16 = vmul.f32 0.0625, %v19796_v37  ;;  %v20038_v14 = vsub.f32 %v19632_v58, %v1286_v55  ;;  %v984_v37 = vld [vmem:[%s24045_s1 + $0xf8] sm:$0xff]  ;;  %v1288_v58 = vmul.f32 0.0625, %v19829_v32 }
 0x330   : > { %v18800_v33 = vpop.eup %18799  ;;  %v20061_v26 = vadd.f32 %v984_v37, %v920_v15  ;;  %v1289_v37 = vmul.f32 0.0625, %v19799_v21  ;;  %v988_v21 = vld [vmem:[%s24045_s1 + $0x118] sm:$0xff] }
 0x331   : > { %v20001_v54 = vmul.f32 %v18800_v33, %v19844_v44  ;;  %v20009_v49 = vpop.xlane.xlu1 %1158  ;;  %v981_v33 = vld [vmem:[%s24045_s1 + $0xe0] sm:$0xff]  ;;  %v20051_v2 = vsub.f32 %v19563_v61, %v1287_v16  ;;  %v1414_v40 = vmul.f32 %v20038_v14, %v20038_v14  ;;  %v20067_v32 = vsub.f32 %v19640_v1, %v1288_v58  ;;  %v986_v1 = vld [vmem:[%s24045_s1 + $0x108] sm:$0xff] }
 0x332   : > { %v985_v61 = vld [vmem:[%s24045_s1 + $0x100] sm:$0xff]  ;;  %v1175_v15 = vsel %vm1081_vm0, %v20061_v26, 0.0 }
 0x333   : > { %24144 = vst [vmem:[#allocation17_spill] sm:$0xff] %v20001_v54  ;;  %17587 = vmatmul.mubr.msk.f32.gmra.mrb[8].mxu0 %vm1081_vm0, %v20001_v54  ;;  %17687 = vmatmul.mubr.msk.f32.gmra.mrb[12].mxu1 %vm1081_vm0, %v20001_v54  ;;  %v1415_v16 = vmul.f32 %v20051_v2, %v20051_v2  ;;  %v1500_v9 = vsel %vm1081_vm0, %v1414_v40, 0.0  ;;  %v923_v40 = vmul.f32 %v20026_v43, %v19941_v18  ;;  %v1290_v18 = vmul.f32 0.0625, %v19833_v30 }
 0x335   : > { %v20011_v60 = vpop.xlane.xlu1 %1161  ;;  %v20114_v30 = vsub.f32 %v19648_v11, %v1290_v18  ;;  %v990_v11 = vld [vmem:[%s24045_s1 + $0x128] sm:$0xff] }
 0x344   : > { %v20014_v51 = vpop.xlane.xlu1 %1164 }
 0x348   : > { %v706_v44 = vpop.permute.xlu1 %705 }
 0x349   : > { %v917_v54 = vmul.f32 %v20026_v43, %v706_v44 }
 0x34b   : > { %v20029_v23 = vadd.f32 %v981_v33, %v917_v54 }
 0x34c   : > { %v716_v56 = vpop.permute.xlu1 %715 }
 0x34d   : > { %v919_v44 = vmul.f32 %v20026_v43, %v716_v56  ;;  %v1166_v54 = vsel %vm1081_vm0, %v20029_v23, 0.0  ;;  %v921_v56 = vmul.f32 %v20026_v43, %v19938_v10 }
 0x34e   : > { %1167 = vadd.xlane.f32.xlu1 %v1166_v54 }
 0x34f   : > { %v20048_v33 = vadd.f32 %v983_v5, %v919_v44  ;;  %v20075_v44 = vadd.f32 %v985_v61, %v921_v56 }
 0x350   : > { %v731_v55 = vpop.permute.xlu1 %730 }
 0x351   : > { %v1172_v54 = vsel %vm1081_vm0, %v20048_v33, 0.0  ;;  %v922_v10 = vmul.f32 %v20026_v43, %v731_v55  ;;  %v1416_v55 = vmul.f32 %v20067_v32, %v20067_v32 }
 0x352   : > { %1498 = vadd.xlane.f32.xlu1 %v1497_v34  ;;  %1173 = vadd.xlane.f32.xlu0 %v1172_v54  ;;  %v1503_v34 = vsel %vm1081_vm0, %v1415_v16, 0.0  ;;  %v1178_v54 = vsel %vm1081_vm0, %v20075_v44, 0.0  ;;  %v987_v16 = vld [vmem:[%s24045_s1 + $0x110] sm:$0xff] }
 0x353   : > { %v20089_v61 = vadd.f32 %v986_v1, %v922_v10  ;;  %v925_v10 = vmul.f32 %v20026_v43, %v19945_v6 }
 0x354   : > { %v741_v5 = vpop.permute.xlu1 %740 }
 0x355   : > { %v924_v56 = vmul.f32 %v20026_v43, %v741_v5  ;;  %v1181_v1 = vsel %vm1081_vm0, %v20089_v61, 0.0 }
 0x356   : > { %1501 = vadd.xlane.f32.xlu1 %v1500_v9  ;;  %1176 = vadd.xlane.f32.xlu0 %v1175_v15  ;;  %v20098_v9 = vsub.f32 %v19571_v4, %v1289_v37  ;;  %v1506_v15 = vsel %vm1081_vm0, %v1416_v55, 0.0  ;;  %v989_v4 = vld [vmem:[%s24045_s1 + $0x120] sm:$0xff] }
 0x358   : > { %v751_v58 = vpop.permute.xlu1 %750  ;;  %v1417_v37 = vmul.f32 %v20098_v9, %v20098_v9 }
 0x359   : > { %v926_v6 = vmul.f32 %v20026_v43, %v751_v58  ;;  %v1418_v58 = vmul.f32 %v20114_v30, %v20114_v30 }
 0x35a   : > { %1504 = vadd.xlane.f32.xlu0 %v1503_v34  ;;  %1179 = vadd.xlane.f32.xlu1 %v1178_v54  ;;  %v20106_v34 = vadd.f32 %v988_v21, %v924_v56  ;;  %v20108_v54 = vadd.f32 %v987_v16, %v923_v40  ;;  %v20123_v56 = vadd.f32 %v989_v4, %v925_v10  ;;  %v1291_v16 = vmul.f32 0.0625, %v19802_v42  ;;  %v992_v42 = vld [vmem:[%s24045_s1 + $0x138] sm:$0xff] }
 0x35b   : > { %v1509_v18 = vsel %vm1081_vm0, %v1417_v37, 0.0  ;;  %v20137_v4 = vadd.f32 %v990_v11, %v926_v6  ;;  %v991_v37 = vld [vmem:[%s24045_s1 + $0x130] sm:$0xff]  ;;  %v929_v6 = vmul.f32 %v20026_v43, %v19952_v25 }
 0x35c   : > { %v761_v5 = vpop.permute.xlu1 %760  ;;  %v1187_v55 = vsel %vm1081_vm0, %v20106_v34, 0.0  ;;  %v1184_v40 = vsel %vm1081_vm0, %v20108_v54, 0.0 }
 0x35d   : > { %v928_v10 = vmul.f32 %v20026_v43, %v761_v5  ;;  %v1193_v11 = vsel %vm1081_vm0, %v20137_v4, 0.0 }
 0x35e   : > { %1507 = vadd.xlane.f32.xlu0 %v1506_v15  ;;  %1182 = vadd.xlane.f32.xlu1 %v1181_v1  ;;  %v927_v15 = vmul.f32 %v20026_v43, %v19948_v20  ;;  %v1190_v1 = vsel %vm1081_vm0, %v20123_v56, 0.0  ;;  %v1292_v20 = vmul.f32 0.0625, %v19835_v24 }
 0x360   : > { %v771_v21 = vpop.permute.xlu1 %770  ;;  %v20162_v24 = vsub.f32 %v19657_v19, %v1292_v20  ;;  %v994_v19 = vld [vmem:[%s24045_s1 + $0x148] sm:$0xff] }
 0x361   : > { %v930_v25 = vmul.f32 %v20026_v43, %v771_v21  ;;  %v1293_v21 = vmul.f32 0.0625, %v19838_v59  ;;  %v996_v59 = vld [vmem:[%s24045_s1 + $0x158] sm:$0xff] }
 0x362   : > { %1188 = vadd.xlane.f32.xlu0 %v1187_v55  ;;  %1185 = vadd.xlane.f32.xlu1 %v1184_v40  ;;  %v20146_v55 = vsub.f32 %v19581_v12, %v1291_v16  ;;  %v1512_v40 = vsel %vm1081_vm0, %v1418_v58, 0.0  ;;  %v993_v12 = vld [vmem:[%s24045_s1 + $0x140] sm:$0xff]  ;;  %24147 = vst [vmem:[#allocation20_spill] sm:$0xff] %v20162_v24 }
 0x364   : > { %24146 = vst [vmem:[#allocation19_spill] sm:$0xff] %v20146_v55  ;;  %v781_v5 = vpop.permute.xlu1 %780  ;;  %v1419_v16 = vmul.f32 %v20146_v55, %v20146_v55 }
 0x366   : > { %1510 = vadd.xlane.f32.xlu0 %v1509_v18  ;;  %1191 = vadd.xlane.f32.xlu1 %v1190_v1  ;;  %v20154_v18 = vadd.f32 %v992_v42, %v928_v10  ;;  %v20156_v1 = vadd.f32 %v991_v37, %v927_v15  ;;  %v20171_v10 = vadd.f32 %v993_v12, %v929_v6 }
 0x367   : > { %v931_v6 = vmul.f32 %v20026_v43, %v19955_v22  ;;  %v932_v12 = vmul.f32 %v20026_v43, %v781_v5  ;;  %v20199_v22 = vsub.f32 %v19669_v38, %v1293_v21 }
 0x368   : > { %v1199_v58 = vsel %vm1081_vm0, %v20154_v18, 0.0  ;;  %v1196_v15 = vsel %vm1081_vm0, %v20156_v1, 0.0  ;;  %v791_v42 = vpop.permute.xlu1 %790 }
 0x36a   : > { %1513 = vadd.xlane.f32.xlu0 %v1512_v40  ;;  %1194 = vadd.xlane.f32.xlu1 %v1193_v11  ;;  %v1515_v40 = vsel %vm1081_vm0, %v1419_v16, 0.0  ;;  %v1420_v11 = vmul.f32 %v20162_v24, %v20162_v24  ;;  %v995_v16 = vld [vmem:[%s24045_s1 + $0x150] sm:$0xff]  ;;  %v20213_v24 = vadd.f32 %v996_v59, %v932_v12  ;;  %v934_v12 = vmul.f32 %v20026_v43, %v791_v42 }
 0x36b   : > { %v20215_v38 = vadd.f32 %v995_v16, %v931_v6  ;;  %v1295_v42 = vmul.f32 0.0625, %v19981_v28 }
 0x36c   : > { %v801_v5 = vpop.permute.xlu1 %800  ;;  %v1211_v6 = vsel %vm1081_vm0, %v20213_v24, 0.0 }
 0x36d   : > { %v1208_v59 = vsel %vm1081_vm0, %v20215_v38, 0.0 }
 0x36e   : > { %1200 = vadd.xlane.f32.xlu0 %v1199_v58  ;;  %1197 = vadd.xlane.f32.xlu1 %v1196_v15  ;;  %v20173_v37 = vpop.f32.mrb[2].mxu1  ;;  %v1202_v58 = vsel %vm1081_vm0, %v20171_v10, 0.0  ;;  %v20189_v15 = vadd.f32 %v994_v19, %v930_v25  ;;  %v16509_v25 = vld [vmem:[%s24050_s6] ss:$0 sm:$0xff]  ;;  %v1518_v19 = vsel %vm1081_vm0, %v1420_v11, 0.0 }
 0x36f   : > { %24148 = vst [vmem:[#allocation21_spill] sm:$0xff] %v20173_v37  ;;  %v20178_v20 = vpop.f32.mrb[3].mxu1 }
 0x370   : > { %24149 = vst [vmem:[#allocation22_spill] sm:$0xff] %v20178_v20  ;;  %v1294_v20 = vmul.f32 0.0625, %v19831_v52  ;;  %v1205_v52 = vsel %vm1081_vm0, %v20189_v15, 0.0 }
 0x372   : > { %1516 = vadd.xlane.f32.xlu0 %v1515_v40  ;;  %1203 = vadd.xlane.f32.xlu1 %v1202_v58  ;;  %v933_v40 = vmul.f32 %v20026_v43, %v19959_v45  ;;  %v997_v45 = vld [vmem:[%s24045_s1 + $0x160] sm:$0xff] }
 0x374   : > { %v20233_v16 = vadd.f32 %v997_v45, %v933_v40  ;;  %v935_v40 = vmul.f32 %v20026_v43, %v19962_v13  ;;  %v1000_v13 = vld [vmem:[%s24045_s1 + $0x178] sm:$0xff] }
 0x375   : > { %v20207_v58 = vpop.f32.mrb[0].mxu0  ;;  %v20209_v37 = vpop.f32.mrb[4].mxu1 }
 0x376   : > { %24150 = vst [vmem:[#allocation23_spill] sm:$0xff] %v20207_v58  ;;  %24151 = vst [vmem:[#allocation24_spill] sm:$0xff] %v20209_v37  ;;  %1519 = vadd.xlane.f32.xlu0 %v1518_v19  ;;  %1206 = vadd.xlane.f32.xlu1 %v1205_v52  ;;  %v20217_v21 = vpop.f32.mrb[1].mxu0  ;;  %v2576_v55 = vpop.f32.mrb[5].mxu1  ;;  %v20223_v58 = vsub.f32 %v19601_v35, %v1294_v20  ;;  %v1421_v37 = vmul.f32 %v20199_v22, %v20199_v22  ;;  %v998_v35 = vld [vmem:[%s24045_s1 + $0x168] sm:$0xff] }
 0x377   : > { %24152 = vst [vmem:[#allocation25_spill] sm:$0xff] %v20217_v21  ;;  %v2577_v11 = vadd.f32 %v16509_v25, %v2576_v55  ;;  %v24153_v55 = vmov 0.0   ;;  %v811_v20 = vpop.permute.xlu1 %810  ;;  %v936_v52 = vmul.f32 %v20026_v43, %v801_v5  ;;  %v999_v5 = vld [vmem:[%s24045_s1 + $0x170] sm:$0xff] }
 0x378   : > { %v1521_v25 = vsel %vm1081_vm0, %v1421_v37, 0.0  ;;  %v1422_v19 = vmul.f32 %v20223_v58, %v20223_v58 }
 0x379   : > { %17871 = vmatpush3.xpose.msk.msra.mxu1 %vm1081_vm0, %v2577_v11 }
 0x37a   : > { %1212 = vadd.xlane.f32.xlu0 %v1211_v6  ;;  %1209 = vadd.xlane.f32.xlu1 %v1208_v59  ;;  %v1214_v6 = vsel %vm1081_vm0, %v20233_v16, 0.0  ;;  %v20252_v59 = vadd.f32 %v998_v35, %v934_v12  ;;  %v1296_v12 = vmul.f32 0.0625, %v19983_v39  ;;  %v1524_v35 = vsel %vm1081_vm0, %v1422_v19, 0.0 }
 0x37b   : > { %17875 = vmatprep.subr.mxu1 %v24153_v55  ;;  %v938_v19 = vmul.f32 %v20026_v43, %v811_v20  ;;  %v1002_v20 = vld [vmem:[%s24045_s1 + $0x188] sm:$0xff] }
 0x37c   : > { %v20281_v39 = vsub.f32 %v19698_v0, %v1296_v12 }
 0x37d   : > { %v20246_v45 = vpop.f32.mrb[2].mxu0  ;;  %v20248_v11 = vpop.f32.mrb[6].mxu1 }
 0x37e   : > { %24154 = vst [vmem:[#allocation26_spill] sm:$0xff] %v20246_v45  ;;  %24155 = vst [vmem:[#allocation27_spill] sm:$0xff] %v20248_v11  ;;  %1522 = vadd.xlane.f32.xlu0 %v1521_v25  ;;  %1215 = vadd.xlane.f32.xlu1 %v1214_v6  ;;  %v20254_v28 = vpop.f32.mrb[3].mxu0  ;;  %v20256_v37 = vpop.f32.mrb[7].mxu1  ;;  %v20265_v45 = vsub.f32 %v19687_v53, %v1295_v42  ;;  %v937_v25 = vmul.f32 %v20026_v43, %v19967_v8  ;;  %v1217_v6 = vsel %vm1081_vm0, %v20252_v59, 0.0  ;;  %v1001_v53 = vld [vmem:[%s24045_s1 + $0x180] sm:$0xff] }
 0x37f   : > { %24156 = vst [vmem:[#allocation28_spill] sm:$0xff] %v20254_v28  ;;  %24157 = vst [vmem:[#allocation29_spill] sm:$0xff] %v20256_v37  ;;  %v20273_v11 = vadd.f32 %v1000_v13, %v936_v52  ;;  %v20275_v28 = vadd.f32 %v999_v5, %v935_v40  ;;  %v821_v42 = vpop.permute.xlu1 %820 }
 0x380   : > { %v1423_v8 = vmul.f32 %v20265_v45, %v20265_v45  ;;  %v20294_v5 = vadd.f32 %v1001_v53, %v937_v25  ;;  %v939_v25 = vmul.f32 %v20026_v43, %v19970_v29  ;;  %v940_v53 = vmul.f32 %v20026_v43, %v821_v42 }
 0x381   : > { %v1223_v40 = vsel %vm1081_vm0, %v20273_v11, 0.0  ;;  %v1220_v13 = vsel %vm1081_vm0, %v20275_v28, 0.0  ;;  %v1298_v29 = vmul.f32 0.0625, %v19994_v50 }
 0x382   : > { %1525 = vadd.xlane.f32.xlu0 %v1524_v35  ;;  %1218 = vadd.xlane.f32.xlu1 %v1217_v6  ;;  %v1297_v35 = vmul.f32 0.0625, %v19985_v46  ;;  %v1527_v6 = vsel %vm1081_vm0, %v1423_v8, 0.0  ;;  %v1004_v46 = vld [vmem:[%s24045_s1 + $0x198] sm:$0xff]  ;;  %v1003_v8 = vld [vmem:[%s24045_s1 + $0x190] sm:$0xff] }
 0x383   : > { %v831_v42 = vpop.permute.xlu1 %830  ;;  %v20335_v21 = vadd.f32 %v1003_v8, %v939_v25 }
 0x385   : > { %v20286_v37 = vpop.f32.mrb[4].mxu0  ;;  %v20288_v52 = vpop.f32.mrb[8].mxu1  ;;  %v1232_v25 = vsel %vm1081_vm0, %v20335_v21, 0.0 }
 0x386   : > { %24158 = vst [vmem:[#allocation30_spill] sm:$0xff] %v20286_v37  ;;  %24159 = vst [vmem:[#allocation31_spill] sm:$0xff] %v20288_v52  ;;  %1224 = vadd.xlane.f32.xlu0 %v1223_v40  ;;  %1221 = vadd.xlane.f32.xlu1 %v1220_v13  ;;  %v20296_v0 = vpop.f32.mrb[5].mxu0  ;;  %v20298_v12 = vpop.f32.mrb[9].mxu1  ;;  %v1424_v37 = vmul.f32 %v20281_v39, %v20281_v39  ;;  %v1226_v40 = vsel %vm1081_vm0, %v20294_v5, 0.0  ;;  %v20312_v13 = vadd.f32 %v1002_v20, %v938_v19 }
 0x387   : > { %24160 = vst [vmem:[#allocation32_spill] sm:$0xff] %v20296_v0  ;;  %24161 = vst [vmem:[#allocation33_spill] sm:$0xff] %v20298_v12  ;;  %v20321_v52 = vsub.f32 %v19713_v17, %v1297_v35  ;;  %v941_v19 = vmul.f32 %v20026_v43, %v19973_v57  ;;  %v20333_v12 = vadd.f32 %v1004_v46, %v940_v53  ;;  %v1005_v57 = vld [vmem:[%s24045_s1 + $0x1a0] sm:$0xff]  ;;  %v841_v8 = vpop.permute.xlu1 %840 }
 0x388   : > { %v1530_v0 = vsel %vm1081_vm0, %v1424_v37, 0.0  ;;  %v20345_v37 = vsub.f32 %v19728_v36, %v1298_v29  ;;  %v942_v53 = vmul.f32 %v20026_v43, %v831_v42  ;;  %v1006_v36 = vld [vmem:[%s24045_s1 + $0x1a8] sm:$0xff]  ;;  %v1299_v29 = vmul.f32 0.0625, %v20007_v27  ;;  %v1008_v27 = vld [vmem:[%s24045_s1 + $0x1b8] sm:$0xff] }
 0x389   : > { %v1425_v35 = vmul.f32 %v20321_v52, %v20321_v52  ;;  %v20354_v46 = vadd.f32 %v1005_v57, %v941_v19  ;;  %v944_v19 = vmul.f32 %v20026_v43, %v841_v8 }
 0x38a   : > { %1528 = vadd.xlane.f32.xlu0 %v1527_v6  ;;  %1227 = vadd.xlane.f32.xlu1 %v1226_v40  ;;  %v1229_v40 = vsel %vm1081_vm0, %v20312_v13, 0.0  ;;  %v1426_v42 = vmul.f32 %v20345_v37, %v20345_v37 }
 0x38b   : > { %v1238_v57 = vsel %vm1081_vm0, %v20354_v46, 0.0  ;;  %v851_v8 = vpop.permute.xlu1 %850 }
 0x38d   : > { %v20327_v20 = vpop.f32.mrb[6].mxu0  ;;  %v20329_v6 = vpop.f32.mrb[10].mxu1 }
 0x38e   : > { %24162 = vst [vmem:[#allocation34_spill] sm:$0xff] %v20327_v20  ;;  %24163 = vst [vmem:[#allocation35_spill] sm:$0xff] %v20329_v6  ;;  %1531 = vadd.xlane.f32.xlu0 %v1530_v0  ;;  %1230 = vadd.xlane.f32.xlu1 %v1229_v40  ;;  %v20337_v17 = vpop.f32.mrb[7].mxu0  ;;  %v20339_v50 = vpop.f32.mrb[11].mxu1  ;;  %v1235_v0 = vsel %vm1081_vm0, %v20333_v12, 0.0  ;;  %v1533_v40 = vsel %vm1081_vm0, %v1425_v35, 0.0  ;;  %v943_v20 = vmul.f32 %v20026_v43, %v19975_v41 }
 0x38f   : > { %24164 = vst [vmem:[#allocation36_spill] sm:$0xff] %v20337_v17  ;;  %24165 = vst [vmem:[#allocation37_spill] sm:$0xff] %v20339_v50  ;;  %v1007_v35 = vld [vmem:[%s24045_s1 + $0x1b0] sm:$0xff]  ;;  %v1300_v41 = vmul.f32 0.0625, %v20009_v49  ;;  %v1536_v6 = vsel %vm1081_vm0, %v1426_v42, 0.0 }
 0x391   : > { %v20393_v49 = vsub.f32 %v19758_v62, %v1300_v41  ;;  %v1010_v62 = vld [vmem:[%s24045_s1 + $0x1c8] sm:$0xff] }
 0x392   : > { %1236 = vadd.xlane.f32.xlu0 %v1235_v0  ;;  %1233 = vadd.xlane.f32.xlu1 %v1232_v25  ;;  %v20368_v0 = vadd.f32 %v1006_v36, %v942_v53  ;;  %v20377_v25 = vsub.f32 %v19743_v48, %v1299_v29  ;;  %v945_v53 = vmul.f32 %v20026_v43, %v19977_v31  ;;  %v1009_v48 = vld [vmem:[%s24045_s1 + $0x1c0] sm:$0xff] }
 0x393   : > { %v946_v31 = vmul.f32 %v20026_v43, %v851_v8  ;;  %v1428_v8 = vmul.f32 %v20393_v49, %v20393_v49 }
 0x394   : > { %v1241_v36 = vsel %vm1081_vm0, %v20368_v0, 0.0  ;;  %v1427_v29 = vmul.f32 %v20377_v25, %v20377_v25 }
 0x396   : > { %1534 = vadd.xlane.f32.xlu0 %v1533_v40  ;;  %1239 = vadd.xlane.f32.xlu1 %v1238_v57  ;;  %v20385_v40 = vadd.f32 %v1008_v27, %v944_v19  ;;  %v20387_v57 = vadd.f32 %v1007_v35, %v943_v20  ;;  %v861_v19 = vpop.permute.xlu1 %860  ;;  %v1301_v27 = vmul.f32 0.0625, %v20011_v60  ;;  %v947_v35 = vmul.f32 %v20026_v43, %v19979_v47  ;;  %v1011_v60 = vld [vmem:[%s24045_s1 + $0x1d0] sm:$0xff]  ;;  %v1012_v47 = vld [vmem:[%s24045_s1 + $0x1d8] sm:$0xff] }
 0x397   : > { %v1539_v41 = vsel %vm1081_vm0, %v1427_v29, 0.0 }
 0x398   : > { %v1247_v42 = vsel %vm1081_vm0, %v20385_v40, 0.0  ;;  %v1244_v20 = vsel %vm1081_vm0, %v20387_v57, 0.0  ;;  %v20429_v29 = vadd.f32 %v1011_v60, %v947_v35 }
 0x39a   : > { %1537 = vadd.xlane.f32.xlu0 %v1536_v6  ;;  %1242 = vadd.xlane.f32.xlu1 %v1241_v36  ;;  %v20402_v6 = vadd.f32 %v1009_v48, %v945_v53  ;;  %v1302_v53 = vmul.f32 0.0625, %v20014_v51  ;;  %v948_v36 = vmul.f32 %v20026_v43, %v861_v19  ;;  %v20426_v51 = vsub.f32 %v19772_v7, %v1301_v27 }
 0x39b   : > { %v1542_v43 = vsel %vm1081_vm0, %v1428_v8, 0.0 }
 0x39c   : > { %v1250_v48 = vsel %vm1081_vm0, %v20402_v6, 0.0 }
 0x39e   : > { %1248 = vadd.xlane.f32.xlu0 %v1247_v42  ;;  %1245 = vadd.xlane.f32.xlu1 %v1244_v20  ;;  %v20417_v42 = vadd.f32 %v1010_v62, %v946_v31  ;;  %v1171_v20 = vpop.xlane.xlu0 %1170  ;;  %v20432_v31 = vsub.f32 %v19908_v63, %v1302_v53  ;;  %v1256_v63 = vsel %vm1081_vm0, %v20429_v29, 0.0 }
 0x39f   : > { %v1304_v19 = vmul.f32 0.0625, %v1171_v20 }
 0x3a0   : > { %v1253_v62 = vsel %vm1081_vm0, %v20417_v42, 0.0  ;;  %v1430_v35 = vmul.f32 %v20432_v31, %v20432_v31 }
 0x3a1   : > { %v20441_v7 = vsub.f32 %v19923_v3, %v1304_v19 }
 0x3a2   : > { %1540 = vadd.xlane.f32.xlu0 %v1539_v41  ;;  %1251 = vadd.xlane.f32.xlu1 %v1250_v48  ;;  %v20436_v41 = vadd.f32 %v1012_v47, %v948_v36  ;;  %v1429_v48 = vmul.f32 %v20426_v51, %v20426_v51  ;;  %v1548_v8 = vsel %vm1081_vm0, %v1430_v35, 0.0 }
 0x3a3   : > { %v1432_v36 = vmul.f32 %v20441_v7, %v20441_v7 }
 0x3a4   : > { %v1259_v27 = vsel %vm1081_vm0, %v20436_v41, 0.0  ;;  %v1545_v53 = vsel %vm1081_vm0, %v1429_v48, 0.0 }
 0x3a5   : > { %v1554_v3 = vsel %vm1081_vm0, %v1432_v36, 0.0 }
 0x3a6   : > { %1543 = vadd.xlane.f32.xlu0 %v1542_v43  ;;  %1254 = vadd.xlane.f32.xlu1 %v1253_v62 }
 0x3aa   : > { %1260 = vadd.xlane.f32.xlu0 %v1259_v27  ;;  %1257 = vadd.xlane.f32.xlu1 %v1256_v63 }
 0x3ae   : > { %1549 = vadd.xlane.f32.xlu0 %v1548_v8  ;;  %1546 = vadd.xlane.f32.xlu1 %v1545_v53 }
 0x3b2   : > { %1555 = vadd.xlane.f32.xlu0 %v1554_v3 }
 0x3db   : > { %v1168_v60 = vpop.xlane.xlu1 %1167 }
 0x3dc   : > { %v1303_v20 = vmul.f32 0.0625, %v1168_v60 }
 0x3de   : > { %v20455_v47 = vsub.f32 %v20029_v23, %v1303_v20 }
 0x3df   : > { %v1499_v43 = vpop.xlane.xlu1 %1498  ;;  %v1174_v19 = vpop.xlane.xlu0 %1173 }
 0x3e0   : > { %v1669_v62 = vmul.f32 0.0625, %v1499_v43  ;;  %v1305_v27 = vmul.f32 0.0625, %v1174_v19  ;;  %v1431_v48 = vmul.f32 %v20455_v47, %v20455_v47 }
 0x3e2   : > { %v1733_v63 = vadd.f32 1e-05, %v1669_v62  ;;  %v20460_v35 = vsub.f32 %v20048_v33, %v1305_v27  ;;  %v1551_v8 = vsel %vm1081_vm0, %v1431_v48, 0.0 }
 0x3e3   : > { %v1502_v53 = vpop.xlane.xlu1 %1501  ;;  %1552 = vadd.xlane.f32.xlu1 %v1551_v8  ;;  %v1177_v36 = vpop.xlane.xlu0 %1176 }
 0x3e4   : > { %18801 = vrsqrt.f32 %v1733_v63  ;;  %v1670_v3 = vmul.f32 0.0625, %v1502_v53  ;;  %v1306_v23 = vmul.f32 0.0625, %v1177_v36  ;;  %v1433_v60 = vmul.f32 %v20460_v35, %v20460_v35 }
 0x3e6   : > { %v1734_v20 = vadd.f32 1e-05, %v1670_v3  ;;  %v20466_v43 = vsub.f32 %v20061_v26, %v1306_v23  ;;  %v1557_v19 = vsel %vm1081_vm0, %v1433_v60, 0.0 }
 0x3e7   : > { %v1180_v62 = vpop.xlane.xlu1 %1179  ;;  %1558 = vadd.xlane.f32.xlu1 %v1557_v19  ;;  %v1505_v33 = vpop.xlane.xlu0 %1504 }
 0x3e8   : > { %18803 = vrsqrt.f32 %v1734_v20  ;;  %v1307_v27 = vmul.f32 0.0625, %v1180_v62  ;;  %v1671_v48 = vmul.f32 0.0625, %v1505_v33  ;;  %v1434_v63 = vmul.f32 %v20466_v43, %v20466_v43 }
 0x3ea   : > { %v20472_v8 = vsub.f32 %v20075_v44, %v1307_v27  ;;  %v1735_v53 = vadd.f32 1e-05, %v1671_v48  ;;  %v1560_v36 = vsel %vm1081_vm0, %v1434_v63, 0.0  ;;  %v24166_v63 = vld [vmem:[#allocation18_spill] sm:$0xff] }
 0x3eb   : > { %v1183_v3 = vpop.xlane.xlu1 %1182  ;;  %1561 = vadd.xlane.f32.xlu0 %v1560_v36  ;;  %v1508_v26 = vpop.xlane.xlu0 %1507 }
 0x3ec   : > { %18805 = vrsqrt.f32 %v1735_v53  ;;  %v1308_v23 = vmul.f32 0.0625, %v1183_v3  ;;  %v1672_v60 = vmul.f32 0.0625, %v1508_v26  ;;  %v1435_v20 = vmul.f32 %v20472_v8, %v20472_v8 }
 0x3ee   : > { %v18802_v19 = vpop.eup %18801  ;;  %v20478_v62 = vsub.f32 %v20089_v61, %v1308_v23  ;;  %v1736_v33 = vadd.f32 1e-05, %v1672_v60  ;;  %v1563_v44 = vsel %vm1081_vm0, %v1435_v20, 0.0 }
 0x3ef   : > { %v1186_v27 = vpop.xlane.xlu1 %1185  ;;  %1564 = vadd.xlane.f32.xlu1 %v1563_v44  ;;  %v1189_v48 = vpop.xlane.xlu0 %1188  ;;  %v20482_v17 = vmul.f32 %v18802_v19, %v24166_v63 }
 0x3f0   : > { %18807 = vrsqrt.f32 %v1736_v33  ;;  %v1309_v53 = vmul.f32 0.0625, %v1186_v27  ;;  %v1310_v36 = vmul.f32 0.0625, %v1189_v48  ;;  %v1436_v3 = vmul.f32 %v20478_v62, %v20478_v62 }
 0x3f1   : > { %17589 = vmatprep.mubr.msk.f32.mxu0 %vm1081_vm0, %v20482_v17  ;;  %17689 = vmatprep.mubr.msk.f32.mxu1 %vm1081_vm0, %v20482_v17 }
 0x3f2   : > { %v18804_v61 = vpop.eup %18803  ;;  %v20491_v26 = vsub.f32 %v20108_v54, %v1309_v53  ;;  %v20494_v23 = vsub.f32 %v20106_v34, %v1310_v36  ;;  %v1566_v60 = vsel %vm1081_vm0, %v1436_v3, 0.0 }
 0x3f3   : > { %v1192_v20 = vpop.xlane.xlu1 %1191  ;;  %1567 = vadd.xlane.f32.xlu0 %v1566_v60  ;;  %v1511_v19 = vpop.xlane.xlu0 %1510  ;;  %v20498_v33 = vmul.f32 %v18804_v61, %v20038_v14 }
 0x3f4   : > { %v1311_v44 = vmul.f32 0.0625, %v1192_v20  ;;  %v1673_v27 = vmul.f32 0.0625, %v1511_v19  ;;  %v1437_v48 = vmul.f32 %v20491_v26, %v20491_v26  ;;  %v1438_v54 = vmul.f32 %v20494_v23, %v20494_v23 }
 0x3f5   : > { %17590 = vmatmul.mubr.msk.f32.gmra.mrb[10].mxu0 %vm1081_vm0, %v20498_v33  ;;  %17690 = vmatmul.mubr.msk.f32.gmra.mrb[14].mxu1 %vm1081_vm0, %v20498_v33 }
 0x3f6   : > { %v18806_v34 = vpop.eup %18805  ;;  %v20509_v63 = vsub.f32 %v20123_v56, %v1311_v44  ;;  %v1737_v14 = vadd.f32 1e-05, %v1673_v27  ;;  %v1569_v53 = vsel %vm1081_vm0, %v1437_v48, 0.0  ;;  %v1572_v36 = vsel %vm1081_vm0, %v1438_v54, 0.0 }
 0x3f7   : > { %v1195_v3 = vpop.xlane.xlu1 %1194  ;;  %1570 = vadd.xlane.f32.xlu1 %v1569_v53  ;;  %1573 = vadd.xlane.f32.xlu0 %v1572_v36  ;;  %v1514_v61 = vpop.xlane.xlu0 %1513  ;;  %v20514_v60 = vmul.f32 %v18806_v34, %v20051_v2 }
 0x3f8   : > { %18809 = vrsqrt.f32 %v1737_v14  ;;  %v1312_v20 = vmul.f32 0.0625, %v1195_v3  ;;  %v1674_v19 = vmul.f32 0.0625, %v1514_v61  ;;  %v1439_v50 = vmul.f32 %v20509_v63, %v20509_v63 }
 0x3f9   : > { %17592 = vmatprep.mubr.msk.f32.mxu0 %vm1081_vm0, %v20514_v60  ;;  %17692 = vmatprep.mubr.msk.f32.mxu1 %vm1081_vm0, %v20514_v60 }
 0x3fa   : > { %v18808_v56 = vpop.eup %18807  ;;  %v20523_v44 = vsub.f32 %v20137_v4, %v1312_v20  ;;  %v1738_v27 = vadd.f32 1e-05, %v1674_v19  ;;  %v1575_v2 = vsel %vm1081_vm0, %v1439_v50, 0.0 }
 0x3fb   : > { %v1198_v48 = vpop.xlane.xlu1 %1197  ;;  %1576 = vadd.xlane.f32.xlu1 %v1575_v2  ;;  %v1201_v54 = vpop.xlane.xlu0 %1200  ;;  %v20527_v34 = vmul.f32 %v18808_v56, %v20067_v32 }
 0x3fc   : > { %18811 = vrsqrt.f32 %v1738_v27  ;;  %v1313_v14 = vmul.f32 0.0625, %v1198_v48  ;;  %v1314_v53 = vmul.f32 0.0625, %v1201_v54  ;;  %v1440_v36 = vmul.f32 %v20523_v44, %v20523_v44 }
 0x3fd   : > { %17593 = vmatmul.mubr.msk.f32.gmra.mrb[12].mxu0 %vm1081_vm0, %v20527_v34  ;;  %17693 = vmatmul.mubr.msk.f32.gmra.mrb[16].mxu1 %vm1081_vm0, %v20527_v34 }
 0x3fe   : > { %v20536_v4 = vsub.f32 %v20156_v1, %v1313_v14  ;;  %v20539_v50 = vsub.f32 %v20154_v18, %v1314_v53  ;;  %v1578_v32 = vsel %vm1081_vm0, %v1440_v36, 0.0 }
 0x3ff   : > { %v1204_v3 = vpop.xlane.xlu1 %1203  ;;  %1579 = vadd.xlane.f32.xlu0 %v1578_v32  ;;  %v1517_v61 = vpop.xlane.xlu0 %1516 }
 0x400   : > { %v1315_v20 = vmul.f32 0.0625, %v1204_v3  ;;  %v1675_v19 = vmul.f32 0.0625, %v1517_v61  ;;  %v1441_v56 = vmul.f32 %v20536_v4, %v20536_v4  ;;  %v1442_v27 = vmul.f32 %v20539_v50, %v20539_v50 }
 0x402   : > { %v18810_v2 = vpop.eup %18809  ;;  %v20547_v1 = vsub.f32 %v20171_v10, %v1315_v20  ;;  %v1739_v48 = vadd.f32 1e-05, %v1675_v19  ;;  %v1581_v18 = vsel %vm1081_vm0, %v1441_v56, 0.0  ;;  %v1584_v54 = vsel %vm1081_vm0, %v1442_v27, 0.0 }
 0x403   : > { %v1207_v14 = vpop.xlane.xlu1 %1206  ;;  %1582 = vadd.xlane.f32.xlu1 %v1581_v18  ;;  %1585 = vadd.xlane.f32.xlu0 %v1584_v54  ;;  %v1520_v53 = vpop.xlane.xlu0 %1519  ;;  %v20552_v36 = vmul.f32 %v18810_v2, %v20098_v9 }
 0x404   : > { %18813 = vrsqrt.f32 %v1739_v48  ;;  %v1316_v32 = vmul.f32 0.0625, %v1207_v14  ;;  %v1676_v3 = vmul.f32 0.0625, %v1520_v53  ;;  %v1443_v61 = vmul.f32 %v20547_v1, %v20547_v1 }
 0x405   : > { %17595 = vmatprep.mubr.msk.f32.mxu0 %vm1081_vm0, %v20552_v36  ;;  %17695 = vmatprep.mubr.msk.f32.mxu1 %vm1081_vm0, %v20552_v36 }
 0x406   : > { %v18812_v10 = vpop.eup %18811  ;;  %v20561_v20 = vsub.f32 %v20189_v15, %v1316_v32  ;;  %v1740_v19 = vadd.f32 1e-05, %v1676_v3  ;;  %v20563_v56 = vpop.f32.mrb[8].mxu0  ;;  %v1587_v27 = vsel %vm1081_vm0, %v1443_v61, 0.0 }
 0x407   : > { %24167 = vst [vmem:[#allocation18_spill] sm:$0xff] %v20563_v56  ;;  %v20565_v9 = vpop.f32.mrb[12].mxu1  ;;  %v1210_v2 = vpop.xlane.xlu1 %1209  ;;  %1588 = vadd.xlane.f32.xlu1 %v1587_v27  ;;  %v20569_v18 = vmul.f32 %v18812_v10, %v20114_v30 }
 0x408   : > { %24168 = vst [vmem:[#allocation38_spill] sm:$0xff] %v20565_v9  ;;  %v1213_v48 = vpop.xlane.xlu0 %1212  ;;  %18815 = vrsqrt.f32 %v1740_v19  ;;  %v1317_v54 = vmul.f32 0.0625, %v1210_v2  ;;  %v20571_v53 = vpop.f32.mrb[9].mxu0  ;;  %v1444_v32 = vmul.f32 %v20561_v20, %v20561_v20 }
 0x409   : > { %24169 = vst [vmem:[#allocation39_spill] sm:$0xff] %v20569_v18  ;;  %v1318_v14 = vmul.f32 0.0625, %v1213_v48  ;;  %24170 = vst [vmem:[#allocation40_spill] sm:$0xff] %v20571_v53  ;;  %v20573_v15 = vpop.f32.mrb[13].mxu1  ;;  %17596 = vmatmul.mubr.msk.f32.gmra.mrb[14].mxu0 %vm1081_vm0, %v20569_v18  ;;  %17696 = vmatmul.mubr.msk.f32.gmra.mrb[18].mxu1 %vm1081_vm0, %v20569_v18 }
 0x40a   : > { %24171 = vst [vmem:[#allocation41_spill] sm:$0xff] %v20573_v15  ;;  %v20582_v3 = vsub.f32 %v20215_v38, %v1317_v54  ;;  %v1590_v61 = vsel %vm1081_vm0, %v1444_v32, 0.0 }
 0x40b   : > { %v20585_v30 = vsub.f32 %v20213_v24, %v1318_v14  ;;  %v1216_v10 = vpop.xlane.xlu1 %1215  ;;  %1591 = vadd.xlane.f32.xlu0 %v1590_v61 }
 0x40c   : > { %v1523_v19 = vpop.xlane.xlu0 %1522  ;;  %v1319_v27 = vmul.f32 0.0625, %v1216_v10  ;;  %v1445_v48 = vmul.f32 %v20582_v3, %v20582_v3  ;;  %v24172_v10 = vld [vmem:[#allocation19_spill] sm:$0xff] }
 0x40d   : > { %v1677_v2 = vmul.f32 0.0625, %v1523_v19  ;;  %v1446_v56 = vmul.f32 %v20585_v30, %v20585_v30 }
 0x40e   : > { %v18814_v9 = vpop.eup %18813  ;;  %v20593_v38 = vsub.f32 %v20233_v16, %v1319_v27  ;;  %v1593_v24 = vsel %vm1081_vm0, %v1445_v48, 0.0 }
 0x40f   : > { %v1741_v54 = vadd.f32 1e-05, %v1677_v2  ;;  %v1596_v14 = vsel %vm1081_vm0, %v1446_v56, 0.0  ;;  %v1219_v32 = vpop.xlane.xlu1 %1218  ;;  %1594 = vadd.xlane.f32.xlu1 %v1593_v24  ;;  %v20598_v19 = vmul.f32 %v18814_v9, %v24172_v10 }
 0x410   : > { %1597 = vadd.xlane.f32.xlu0 %v1596_v14  ;;  %v1526_v61 = vpop.xlane.xlu0 %1525  ;;  %v1320_v53 = vmul.f32 0.0625, %v1219_v32  ;;  %v1447_v18 = vmul.f32 %v20593_v38, %v20593_v38 }
 0x411   : > { %18817 = vrsqrt.f32 %v1741_v54  ;;  %v1678_v15 = vmul.f32 0.0625, %v1526_v61  ;;  %17598 = vmatprep.mubr.msk.f32.mxu0 %vm1081_vm0, %v20598_v19  ;;  %17698 = vmatprep.mubr.msk.f32.mxu1 %vm1081_vm0, %v20598_v19  ;;  %v24173_v54 = vld [vmem:[#allocation20_spill] sm:$0xff] }
 0x412   : > { %v18816_v16 = vpop.eup %18815  ;;  %v20607_v56 = vsub.f32 %v20252_v59, %v1320_v53  ;;  %v1599_v9 = vsel %vm1081_vm0, %v1447_v18, 0.0 }
 0x413   : > { %v1742_v27 = vadd.f32 1e-05, %v1678_v15  ;;  %v1222_v2 = vpop.xlane.xlu1 %1221  ;;  %1600 = vadd.xlane.f32.xlu1 %v1599_v9  ;;  %v20611_v24 = vmul.f32 %v18816_v16, %v24173_v54 }
 0x414   : > { %v1225_v48 = vpop.xlane.xlu0 %1224  ;;  %v1321_v14 = vmul.f32 0.0625, %v1222_v2  ;;  %v1448_v61 = vmul.f32 %v20607_v56, %v20607_v56 }
 0x415   : > { %24174 = vst [vmem:[#allocation19_spill] sm:$0xff] %v20611_v24  ;;  %18819 = vrsqrt.f32 %v1742_v27  ;;  %v1322_v32 = vmul.f32 0.0625, %v1225_v48  ;;  %17599 = vmatmul.mubr.msk.f32.gmra.mrb[16].mxu0 %vm1081_vm0, %v20611_v24  ;;  %17699 = vmatmul.mubr.msk.f32.gmra.mrb[20].mxu1 %vm1081_vm0, %v20611_v24 }
 0x416   : > { %v20620_v59 = vsub.f32 %v20275_v28, %v1321_v14  ;;  %v1602_v53 = vsel %vm1081_vm0, %v1448_v61, 0.0 }
 0x417   : > { %v20623_v18 = vsub.f32 %v20273_v11, %v1322_v32  ;;  %v1228_v15 = vpop.xlane.xlu1 %1227  ;;  %1603 = vadd.xlane.f32.xlu0 %v1602_v53 }
 0x418   : > { %v1529_v10 = vpop.xlane.xlu0 %1528  ;;  %v1323_v16 = vmul.f32 0.0625, %v1228_v15  ;;  %v1449_v9 = vmul.f32 %v20620_v59, %v20620_v59 }
 0x419   : > { %v1679_v27 = vmul.f32 0.0625, %v1529_v10  ;;  %v1450_v2 = vmul.f32 %v20623_v18, %v20623_v18 }
 0x41a   : > { %v20631_v28 = vsub.f32 %v20294_v5, %v1323_v16  ;;  %v1605_v11 = vsel %vm1081_vm0, %v1449_v9, 0.0 }
 0x41b   : > { %v18818_v48 = vpop.eup %18817  ;;  %v1743_v54 = vadd.f32 1e-05, %v1679_v27  ;;  %v1608_v14 = vsel %vm1081_vm0, %v1450_v2, 0.0  ;;  %v1231_v32 = vpop.xlane.xlu1 %1230  ;;  %1606 = vadd.xlane.f32.xlu1 %v1605_v11 }
 0x41c   : > { %1609 = vadd.xlane.f32.xlu0 %v1608_v14  ;;  %v1532_v61 = vpop.xlane.xlu0 %1531  ;;  %v20636_v53 = vmul.f32 %v18818_v48, %v20199_v22  ;;  %v1324_v15 = vmul.f32 0.0625, %v1231_v32  ;;  %v1451_v24 = vmul.f32 %v20631_v28, %v20631_v28 }
 0x41d   : > { %18821 = vrsqrt.f32 %v1743_v54  ;;  %v1680_v10 = vmul.f32 0.0625, %v1532_v61 }
 0x41e   : > { %17601 = vmatprep.mubr.msk.f32.mxu0 %vm1081_vm0, %v20636_v53  ;;  %17701 = vmatprep.mubr.msk.f32.mxu1 %vm1081_vm0, %v20636_v53  ;;  %v20645_v16 = vsub.f32 %v20312_v13, %v1324_v15  ;;  %v1611_v22 = vsel %vm1081_vm0, %v1451_v24, 0.0 }
 0x41f   : > { %v18820_v5 = vpop.eup %18819  ;;  %v1744_v27 = vadd.f32 1e-05, %v1680_v10  ;;  %v1234_v9 = vpop.xlane.xlu1 %1233  ;;  %1612 = vadd.xlane.f32.xlu1 %v1611_v22 }
 0x420   : > { %v1237_v2 = vpop.xlane.xlu0 %1236  ;;  %v20649_v48 = vmul.f32 %v18820_v5, %v20223_v58  ;;  %v1325_v54 = vmul.f32 0.0625, %v1234_v9  ;;  %v1452_v14 = vmul.f32 %v20645_v16, %v20645_v16 }
 0x421   : > { %18823 = vrsqrt.f32 %v1744_v27  ;;  %v1326_v11 = vmul.f32 0.0625, %v1237_v2 }
 0x422   : > { %17602 = vmatmul.mubr.msk.f32.gmra.mrb[18].mxu0 %vm1081_vm0, %v20649_v48  ;;  %17702 = vmatmul.mubr.msk.f32.gmra.mrb[22].mxu1 %vm1081_vm0, %v20649_v48  ;;  %v20658_v13 = vsub.f32 %v20335_v21, %v1325_v54  ;;  %v1614_v58 = vsel %vm1081_vm0, %v1452_v14, 0.0 }
 0x423   : > { %v20661_v24 = vsub.f32 %v20333_v12, %v1326_v11  ;;  %v1240_v32 = vpop.xlane.xlu1 %1239  ;;  %1615 = vadd.xlane.f32.xlu0 %v1614_v58 }
 0x424   : > { %v1535_v61 = vpop.xlane.xlu0 %1534  ;;  %v1327_v15 = vmul.f32 0.0625, %v1240_v32  ;;  %v1453_v5 = vmul.f32 %v20658_v13, %v20658_v13 }
 0x425   : > { %v1681_v10 = vmul.f32 0.0625, %v1535_v61  ;;  %v1454_v27 = vmul.f32 %v20661_v24, %v20661_v24 }
 0x426   : > { %v20669_v21 = vsub.f32 %v20354_v46, %v1327_v15  ;;  %v1617_v12 = vsel %vm1081_vm0, %v1453_v5, 0.0 }
 0x427   : > { %v18822_v22 = vpop.eup %18821  ;;  %v1745_v9 = vadd.f32 1e-05, %v1681_v10  ;;  %v1620_v2 = vsel %vm1081_vm0, %v1454_v27, 0.0  ;;  %v1243_v54 = vpop.xlane.xlu1 %1242  ;;  %1618 = vadd.xlane.f32.xlu1 %v1617_v12 }
 0x428   : > { %1621 = vadd.xlane.f32.xlu0 %v1620_v2  ;;  %v1538_v11 = vpop.xlane.xlu0 %1537  ;;  %v20674_v14 = vmul.f32 %v18822_v22, %v20265_v45  ;;  %v1328_v58 = vmul.f32 0.0625, %v1243_v54  ;;  %v1455_v61 = vmul.f32 %v20669_v21, %v20669_v21 }
 0x429   : > { %18825 = vrsqrt.f32 %v1745_v9  ;;  %v1682_v32 = vmul.f32 0.0625, %v1538_v11 }
 0x42a   : > { %17604 = vmatprep.mubr.msk.f32.mxu0 %vm1081_vm0, %v20674_v14  ;;  %17704 = vmatprep.mubr.msk.f32.mxu1 %vm1081_vm0, %v20674_v14  ;;  %v20683_v15 = vsub.f32 %v20368_v0, %v1328_v58  ;;  %v1623_v45 = vsel %vm1081_vm0, %v1455_v61, 0.0 }
 0x42b   : > { %v18824_v46 = vpop.eup %18823  ;;  %v1746_v10 = vadd.f32 1e-05, %v1682_v32  ;;  %v1246_v5 = vpop.xlane.xlu1 %1245  ;;  %1624 = vadd.xlane.f32.xlu1 %v1623_v45 }
 0x42c   : > { %v1249_v27 = vpop.xlane.xlu0 %1248  ;;  %v20687_v22 = vmul.f32 %v18824_v46, %v20281_v39  ;;  %v1329_v9 = vmul.f32 0.0625, %v1246_v5  ;;  %v1456_v2 = vmul.f32 %v20683_v15, %v20683_v15 }
 0x42d   : > { %18827 = vrsqrt.f32 %v1746_v10  ;;  %v1330_v12 = vmul.f32 0.0625, %v1249_v27 }
 0x42e   : > { %17605 = vmatmul.mubr.msk.f32.gmra.mrb[20].mxu0 %vm1081_vm0, %v20687_v22  ;;  %17705 = vmatmul.mubr.msk.f32.gmra.mrb[24].mxu1 %vm1081_vm0, %v20687_v22  ;;  %v20696_v0 = vsub.f32 %v20387_v57, %v1329_v9  ;;  %v1626_v39 = vsel %vm1081_vm0, %v1456_v2, 0.0 }
 0x42f   : > { %v20699_v54 = vsub.f32 %v20385_v40, %v1330_v12  ;;  %v1252_v11 = vpop.xlane.xlu1 %1251  ;;  %1627 = vadd.xlane.f32.xlu0 %v1626_v39 }
 0x430   : > { %v1541_v58 = vpop.xlane.xlu0 %1540  ;;  %v1331_v32 = vmul.f32 0.0625, %v1252_v11  ;;  %v1457_v46 = vmul.f32 %v20696_v0, %v20696_v0 }
 0x431   : > { %v1683_v61 = vmul.f32 0.0625, %v1541_v58  ;;  %v1458_v10 = vmul.f32 %v20699_v54, %v20699_v54 }
 0x432   : > { %v20707_v57 = vsub.f32 %v20402_v6, %v1331_v32  ;;  %v1629_v40 = vsel %vm1081_vm0, %v1457_v46, 0.0 }
 0x433   : > { %v18826_v45 = vpop.eup %18825  ;;  %v1747_v5 = vadd.f32 1e-05, %v1683_v61  ;;  %v1632_v27 = vsel %vm1081_vm0, %v1458_v10, 0.0  ;;  %v1255_v9 = vpop.xlane.xlu1 %1254  ;;  %1630 = vadd.xlane.f32.xlu1 %v1629_v40 }
 0x434   : > { %1633 = vadd.xlane.f32.xlu0 %v1632_v27  ;;  %v1544_v12 = vpop.xlane.xlu0 %1543  ;;  %v20712_v2 = vmul.f32 %v18826_v45, %v20321_v52  ;;  %v1332_v39 = vmul.f32 0.0625, %v1255_v9  ;;  %v1459_v58 = vmul.f32 %v20707_v57, %v20707_v57 }
 0x435   : > { %18829 = vrsqrt.f32 %v1747_v5  ;;  %v1684_v11 = vmul.f32 0.0625, %v1544_v12 }
 0x436   : > { %17607 = vmatprep.mubr.msk.f32.mxu0 %vm1081_vm0, %v20712_v2  ;;  %17707 = vmatprep.mubr.msk.f32.mxu1 %vm1081_vm0, %v20712_v2  ;;  %v20721_v32 = vsub.f32 %v20417_v42, %v1332_v39  ;;  %v1635_v52 = vsel %vm1081_vm0, %v1459_v58, 0.0 }
 0x437   : > { %v18828_v6 = vpop.eup %18827  ;;  %v1748_v61 = vadd.f32 1e-05, %v1684_v11  ;;  %v1258_v46 = vpop.xlane.xlu1 %1257  ;;  %1636 = vadd.xlane.f32.xlu1 %v1635_v52 }
 0x438   : > { %v1261_v10 = vpop.xlane.xlu0 %1260  ;;  %v20725_v45 = vmul.f32 %v18828_v6, %v20345_v37  ;;  %v1333_v5 = vmul.f32 0.0625, %v1258_v46  ;;  %v1460_v27 = vmul.f32 %v20721_v32, %v20721_v32 }
 0x439   : > { %18831 = vrsqrt.f32 %v1748_v61  ;;  %v1334_v40 = vmul.f32 0.0625, %v1261_v10 }
 0x43a   : > { %17608 = vmatmul.mubr.msk.f32.gmra.mrb[22].mxu0 %vm1081_vm0, %v20725_v45  ;;  %17708 = vmatmul.mubr.msk.f32.gmra.mrb[26].mxu1 %vm1081_vm0, %v20725_v45  ;;  %v20734_v42 = vsub.f32 %v20429_v29, %v1333_v5  ;;  %v1638_v37 = vsel %vm1081_vm0, %v1460_v27, 0.0 }
 0x43b   : > { %v20737_v9 = vsub.f32 %v20436_v41, %v1334_v40  ;;  %v1547_v12 = vpop.xlane.xlu1 %1546  ;;  %1639 = vadd.xlane.f32.xlu0 %v1638_v37 }
 0x43c   : > { %v1550_v39 = vpop.xlane.xlu0 %1549  ;;  %v1685_v11 = vmul.f32 0.0625, %v1547_v12  ;;  %v1461_v6 = vmul.f32 %v20734_v42, %v20734_v42 }
 0x43d   : > { %v1686_v58 = vmul.f32 0.0625, %v1550_v39  ;;  %v1462_v61 = vmul.f32 %v20737_v9, %v20737_v9 }
 0x43e   : > { %v1749_v46 = vadd.f32 1e-05, %v1685_v11  ;;  %v1641_v10 = vsel %vm1081_vm0, %v1461_v6, 0.0 }
 0x43f   : > { %v18830_v52 = vpop.eup %18829  ;;  %v1750_v29 = vadd.f32 1e-05, %v1686_v58  ;;  %v1644_v41 = vsel %vm1081_vm0, %v1462_v61, 0.0  ;;  %1642 = vadd.xlane.f32.xlu1 %v1641_v10 }
 0x440   : > { %1645 = vadd.xlane.f32.xlu0 %v1644_v41  ;;  %v20747_v5 = vmul.f32 %v18830_v52, %v20377_v25  ;;  %18833 = vrsqrt.f32 %v1749_v46  ;;  %v1556_v11 = vpop.xlane.xlu0 %1555 }
 0x441   : > { %18835 = vrsqrt.f32 %v1750_v29  ;;  %v1688_v58 = vmul.f32 0.0625, %v1556_v11 }
 0x442   : > { %17610 = vmatprep.mubr.msk.f32.mxu0 %vm1081_vm0, %v20747_v5  ;;  %17710 = vmatprep.mubr.msk.f32.mxu1 %vm1081_vm0, %v20747_v5 }
 0x443   : > { %v18832_v40 = vpop.eup %18831  ;;  %v1752_v6 = vadd.f32 1e-05, %v1688_v58 }
 0x444   : > { %v20754_v27 = vmul.f32 %v18832_v40, %v20393_v49  ;;  %v2895_v49 = vld [vmem:[%s24051_s7] sm:$0xff] }
 0x445   : > { %18837 = vrsqrt.f32 %v1752_v6 }
 0x446   : > { %17611 = vmatmul.mubr.msk.f32.gmra.mrb[24].mxu0 %vm1081_vm0, %v20754_v27  ;;  %17711 = vmatmul.mubr.msk.f32.gmra.mrb[28].mxu1 %vm1081_vm0, %v20754_v27 }
 0x44a   : > { %v18834_v25 = vpop.eup %18833 }
 0x44b   : > { %v18836_v37 = vpop.eup %18835  ;;  %v20761_v12 = vmul.f32 %v18834_v25, %v20426_v51  ;;  %v2896_v51 = vld [vmem:[%s24051_s7 + $0x8] sm:$0xff] }
 0x44c   : > { %v20764_v39 = vmul.f32 %v18836_v37, %v20432_v31  ;;  %v18738_v31 = vpack.c.bf16 %v2896_v51, %v2895_v49 }
 0x44d   : > { %24175 = vst [vmem:[#allocation20_spill] sm:$0xff] %v20761_v12  ;;  %17613 = vmatprep.mubr.msk.f32.mxu0 %vm1081_vm0, %v20761_v12  ;;  %17713 = vmatprep.mubr.msk.f32.mxu1 %vm1081_vm0, %v20761_v12 }
 0x44e   : > { %24176 = vst [vmem:[#allocation42_spill] sm:$0xff] %v20764_v39  ;;  %17614 = vmatmul.mubr.msk.f32.gmra.mrb[26].mxu0 %vm1081_vm0, %v20764_v39  ;;  %17714 = vmatmul.mubr.msk.f32.gmra.mrb[30].mxu1 %vm1081_vm0, %v20764_v39 }
 0x44f   : > { %18739 = vmatprep.subr.bf16.mxu0 %v18738_v31 }
 0x450   : > { %18741 = vmatpush3.bf16.msra.mxu0 %v18738_v31  ;;  %v18838_v31 = vpop.eup %18837 }
 0x451   : > { %18030 = vmatprep.subr.mxu0 %v24153_v55 }
 0x470   : > { %v1553_v61 = vpop.xlane.xlu1 %1552 }
 0x471   : > { %v1687_v52 = vmul.f32 0.0625, %v1553_v61  ;;  %v20785_v61 = vmul.f32 %v18838_v31, %v20441_v7 }
 0x473   : > { %v1751_v46 = vadd.f32 1e-05, %v1687_v52 }
 0x474   : > { %v1559_v29 = vpop.xlane.xlu1 %1558 }
 0x475   : > { %18839 = vrsqrt.f32 %v1751_v46  ;;  %v1689_v10 = vmul.f32 0.0625, %v1559_v29 }
 0x477   : > { %v1753_v41 = vadd.f32 1e-05, %v1689_v10 }
 0x478   : > { %v1562_v40 = vpop.xlane.xlu0 %1561 }
 0x479   : > { %18841 = vrsqrt.f32 %v1753_v41  ;;  %v1690_v25 = vmul.f32 0.0625, %v1562_v40 }
 0x47b   : > { %v1754_v37 = vadd.f32 1e-05, %v1690_v25 }
 0x47c   : > { %v1565_v49 = vpop.xlane.xlu1 %1564 }
 0x47d   : > { %18843 = vrsqrt.f32 %v1754_v37  ;;  %v1691_v51 = vmul.f32 0.0625, %v1565_v49 }
 0x47f   : > { %v18840_v39 = vpop.eup %18839  ;;  %v1755_v12 = vadd.f32 1e-05, %v1691_v51 }
 0x480   : > { %v1568_v11 = vpop.xlane.xlu0 %1567  ;;  %v20782_v58 = vmul.f32 %v18840_v39, %v20455_v47 }
 0x481   : > { %18845 = vrsqrt.f32 %v1755_v12  ;;  %v1692_v6 = vmul.f32 0.0625, %v1568_v11 }
 0x482   : > { %17616 = vmatprep.mubr.msk.f32.mxu0 %vm1081_vm0, %v20782_v58  ;;  %17716 = vmatprep.mubr.msk.f32.mxu1 %vm1081_vm0, %v20782_v58 }
 0x483   : > { %v18842_v52 = vpop.eup %18841  ;;  %v1756_v46 = vadd.f32 1e-05, %v1692_v6  ;;  %17617 = vmatmul.mubr.msk.f32.gmra.mrb[28].mxu0 %vm1081_vm0, %v20785_v61  ;;  %17717 = vmatmul.mubr.msk.f32.gmra.mrb[32].mxu1 %vm1081_vm0, %v20785_v61 }
 0x484   : > { %v1571_v47 = vpop.xlane.xlu1 %1570  ;;  %v1574_v12 = vpop.xlane.xlu0 %1573  ;;  %v20796_v39 = vmul.f32 %v18842_v52, %v20460_v35 }
 0x485   : > { %18847 = vrsqrt.f32 %v1756_v46  ;;  %v1693_v7 = vmul.f32 0.0625, %v1571_v47  ;;  %v1694_v29 = vmul.f32 0.0625, %v1574_v12 }
 0x486   : > { %17619 = vmatprep.mubr.msk.f32.mxu0 %vm1081_vm0, %v20796_v39  ;;  %17719 = vmatprep.mubr.msk.f32.mxu1 %vm1081_vm0, %v20796_v39 }
 0x487   : > { %v18844_v10 = vpop.eup %18843  ;;  %v1757_v41 = vadd.f32 1e-05, %v1693_v7  ;;  %v1758_v40 = vadd.f32 1e-05, %v1694_v29 }
 0x488   : > { %v1577_v25 = vpop.xlane.xlu1 %1576  ;;  %v20803_v37 = vmul.f32 %v18844_v10, %v20466_v43 }
 0x489   : > { %18849 = vrsqrt.f32 %v1757_v41  ;;  %v1695_v49 = vmul.f32 0.0625, %v1577_v25 }
 0x48a   : > { %18851 = vrsqrt.f32 %v1758_v40  ;;  %17620 = vmatmul.mubr.msk.f32.gmra.mrb[30].mxu0 %vm1081_vm0, %v20803_v37  ;;  %17720 = vmatmul.mubr.msk.f32.gmra.mrb[34].mxu1 %vm1081_vm0, %v20803_v37 }
 0x48b   : > { %v18846_v35 = vpop.eup %18845  ;;  %v1759_v51 = vadd.f32 1e-05, %v1695_v49 }
 0x48c   : > { %v1580_v31 = vpop.xlane.xlu0 %1579  ;;  %v20810_v11 = vmul.f32 %v18846_v35, %v20472_v8 }
 0x48d   : > { %18853 = vrsqrt.f32 %v1759_v51  ;;  %v1696_v6 = vmul.f32 0.0625, %v1580_v31 }
 0x48e   : > { %17622 = vmatprep.mubr.msk.f32.mxu0 %vm1081_vm0, %v20810_v11  ;;  %17722 = vmatprep.mubr.msk.f32.mxu1 %vm1081_vm0, %v20810_v11 }
 0x48f   : > { %v18848_v43 = vpop.eup %18847  ;;  %v1760_v52 = vadd.f32 1e-05, %v1696_v6 }
 0x490   : > { %v1583_v46 = vpop.xlane.xlu1 %1582  ;;  %v1586_v47 = vpop.xlane.xlu0 %1585  ;;  %v20817_v12 = vmul.f32 %v18848_v43, %v20478_v62 }
 0x491   : > { %18855 = vrsqrt.f32 %v1760_v52  ;;  %v1697_v7 = vmul.f32 0.0625, %v1583_v46  ;;  %v1698_v29 = vmul.f32 0.0625, %v1586_v47 }
 0x492   : > { %17623 = vmatmul.mubr.msk.f32.gmra.mrb[32].mxu0 %vm1081_vm0, %v20817_v12  ;;  %17723 = vmatmul.mubr.msk.f32.gmra.mrb[36].mxu1 %vm1081_vm0, %v20817_v12 }
 0x493   : > { %v18850_v8 = vpop.eup %18849  ;;  %v1761_v10 = vadd.f32 1e-05, %v1697_v7  ;;  %v1762_v41 = vadd.f32 1e-05, %v1698_v29 }
 0x494   : > { %v18852_v40 = vpop.eup %18851  ;;  %v1589_v25 = vpop.xlane.xlu1 %1588  ;;  %v20824_v49 = vmul.f32 %v18850_v8, %v20491_v26 }
 0x495   : > { %18857 = vrsqrt.f32 %v1761_v10  ;;  %v1699_v62 = vmul.f32 0.0625, %v1589_v25  ;;  %v20827_v35 = vmul.f32 %v18852_v40, %v20494_v23 }
 0x496   : > { %18859 = vrsqrt.f32 %v1762_v41  ;;  %17625 = vmatprep.mubr.msk.f32.mxu0 %vm1081_vm0, %v20824_v49  ;;  %17725 = vmatprep.mubr.msk.f32.mxu1 %vm1081_vm0, %v20824_v49 }
 0x497   : > { %v18854_v51 = vpop.eup %18853  ;;  %v1763_v31 = vadd.f32 1e-05, %v1699_v62  ;;  %17626 = vmatmul.mubr.msk.f32.gmra.mrb[34].mxu0 %vm1081_vm0, %v20827_v35  ;;  %17726 = vmatmul.mubr.msk.f32.gmra.mrb[38].mxu1 %vm1081_vm0, %v20827_v35 }
 0x498   : > { %v1592_v26 = vpop.xlane.xlu0 %1591  ;;  %v20838_v6 = vmul.f32 %v18854_v51, %v20509_v63 }
 0x499   : > { %18861 = vrsqrt.f32 %v1763_v31  ;;  %v1700_v23 = vmul.f32 0.0625, %v1592_v26 }
 0x49a   : > { %17628 = vmatprep.mubr.msk.f32.mxu0 %vm1081_vm0, %v20838_v6  ;;  %17728 = vmatprep.mubr.msk.f32.mxu1 %vm1081_vm0, %v20838_v6 }
 0x49b   : > { %v18856_v43 = vpop.eup %18855  ;;  %v1764_v52 = vadd.f32 1e-05, %v1700_v23 }
 0x49c   : > { %v1595_v46 = vpop.xlane.xlu1 %1594  ;;  %v20845_v7 = vmul.f32 %v18856_v43, %v20523_v44 }
 0x49d   : > { %v1598_v47 = vpop.xlane.xlu0 %1597  ;;  %18863 = vrsqrt.f32 %v1764_v52  ;;  %v1701_v29 = vmul.f32 0.0625, %v1595_v46 }
 0x49e   : > { %v1702_v8 = vmul.f32 0.0625, %v1598_v47  ;;  %17629 = vmatmul.mubr.msk.f32.gmra.mrb[36].mxu0 %vm1081_vm0, %v20845_v7  ;;  %17729 = vmatmul.mubr.msk.f32.gmra.mrb[40].mxu1 %vm1081_vm0, %v20845_v7 }
 0x49f   : > { %v18858_v63 = vpop.eup %18857  ;;  %v1765_v10 = vadd.f32 1e-05, %v1701_v29 }
 0x4a0   : > { %v1766_v41 = vadd.f32 1e-05, %v1702_v8  ;;  %v18860_v40 = vpop.eup %18859  ;;  %v1601_v25 = vpop.xlane.xlu1 %1600  ;;  %v20852_v62 = vmul.f32 %v18858_v63, %v20536_v4 }
 0x4a1   : > { %18865 = vrsqrt.f32 %v1765_v10  ;;  %v1703_v44 = vmul.f32 0.0625, %v1601_v25  ;;  %v20855_v51 = vmul.f32 %v18860_v40, %v20539_v50 }
 0x4a2   : > { %18867 = vrsqrt.f32 %v1766_v41  ;;  %17631 = vmatprep.mubr.msk.f32.mxu0 %vm1081_vm0, %v20852_v62  ;;  %17731 = vmatprep.mubr.msk.f32.mxu1 %vm1081_vm0, %v20852_v62 }
 0x4a3   : > { %v18862_v31 = vpop.eup %18861  ;;  %v1767_v26 = vadd.f32 1e-05, %v1703_v44  ;;  %17632 = vmatmul.mubr.msk.f32.gmra.mrb[38].mxu0 %vm1081_vm0, %v20855_v51  ;;  %17732 = vmatmul.mubr.msk.f32.gmra.mrb[42].mxu1 %vm1081_vm0, %v20855_v51 }
 0x4a4   : > { %v1604_v4 = vpop.xlane.xlu0 %1603  ;;  %v20866_v23 = vmul.f32 %v18862_v31, %v20547_v1 }
 0x4a5   : > { %18869 = vrsqrt.f32 %v1767_v26  ;;  %v1704_v50 = vmul.f32 0.0625, %v1604_v4 }
 0x4a6   : > { %17634 = vmatprep.mubr.msk.f32.mxu0 %vm1081_vm0, %v20866_v23  ;;  %17734 = vmatprep.mubr.msk.f32.mxu1 %vm1081_vm0, %v20866_v23 }
 0x4a7   : > { %v18864_v43 = vpop.eup %18863  ;;  %v1768_v52 = vadd.f32 1e-05, %v1704_v50 }
 0x4a8   : > { %v1607_v46 = vpop.xlane.xlu1 %1606  ;;  %v20873_v29 = vmul.f32 %v18864_v43, %v20561_v20 }
 0x4a9   : > { %v1610_v47 = vpop.xlane.xlu0 %1609  ;;  %18871 = vrsqrt.f32 %v1768_v52  ;;  %v1705_v8 = vmul.f32 0.0625, %v1607_v46 }
 0x4aa   : > { %v1706_v63 = vmul.f32 0.0625, %v1610_v47  ;;  %17635 = vmatmul.mubr.msk.f32.gmra.mrb[40].mxu0 %vm1081_vm0, %v20873_v29  ;;  %17735 = vmatmul.mubr.msk.f32.gmra.mrb[44].mxu1 %vm1081_vm0, %v20873_v29 }
 0x4ab   : > { %v18866_v1 = vpop.eup %18865  ;;  %v1769_v10 = vadd.f32 1e-05, %v1705_v8 }
 0x4ac   : > { %v1770_v41 = vadd.f32 1e-05, %v1706_v63  ;;  %v18868_v40 = vpop.eup %18867  ;;  %v1613_v25 = vpop.xlane.xlu1 %1612  ;;  %v20880_v44 = vmul.f32 %v18866_v1, %v20582_v3 }
 0x4ad   : > { %18873 = vrsqrt.f32 %v1769_v10  ;;  %v1707_v20 = vmul.f32 0.0625, %v1613_v25  ;;  %v20883_v31 = vmul.f32 %v18868_v40, %v20585_v30 }
 0x4ae   : > { %18875 = vrsqrt.f32 %v1770_v41  ;;  %17637 = vmatprep.mubr.msk.f32.mxu0 %vm1081_vm0, %v20880_v44  ;;  %17737 = vmatprep.mubr.msk.f32.mxu1 %vm1081_vm0, %v20880_v44 }
 0x4af   : > { %v18870_v26 = vpop.eup %18869  ;;  %v1771_v4 = vadd.f32 1e-05, %v1707_v20  ;;  %17638 = vmatmul.mubr.msk.f32.gmra.mrb[42].mxu0 %vm1081_vm0, %v20883_v31  ;;  %17738 = vmatmul.mubr.msk.f32.gmra.mrb[46].mxu1 %vm1081_vm0, %v20883_v31 }
 0x4b0   : > { %v1616_v3 = vpop.xlane.xlu0 %1615  ;;  %v20894_v50 = vmul.f32 %v18870_v26, %v20593_v38 }
 0x4b1   : > { %18877 = vrsqrt.f32 %v1771_v4  ;;  %v1708_v30 = vmul.f32 0.0625, %v1616_v3 }
 0x4b2   : > { %17640 = vmatprep.mubr.msk.f32.mxu0 %vm1081_vm0, %v20894_v50  ;;  %17740 = vmatprep.mubr.msk.f32.mxu1 %vm1081_vm0, %v20894_v50 }
 0x4b3   : > { %v18872_v43 = vpop.eup %18871  ;;  %v1772_v52 = vadd.f32 1e-05, %v1708_v30 }
 0x4b4   : > { %v1619_v46 = vpop.xlane.xlu1 %1618  ;;  %v20901_v8 = vmul.f32 %v18872_v43, %v20607_v56 }
 0x4b5   : > { %v1622_v47 = vpop.xlane.xlu0 %1621  ;;  %18879 = vrsqrt.f32 %v1772_v52  ;;  %v1709_v63 = vmul.f32 0.0625, %v1619_v46 }
 0x4b6   : > { %v1710_v1 = vmul.f32 0.0625, %v1622_v47  ;;  %17641 = vmatmul.mubr.msk.f32.gmra.mrb[44].mxu0 %vm1081_vm0, %v20901_v8  ;;  %17741 = vmatmul.mubr.msk.f32.gmra.mrb[48].mxu1 %vm1081_vm0, %v20901_v8 }
 0x4b7   : > { %v18874_v38 = vpop.eup %18873  ;;  %v1773_v10 = vadd.f32 1e-05, %v1709_v63 }
 0x4b8   : > { %v1774_v41 = vadd.f32 1e-05, %v1710_v1  ;;  %v18876_v40 = vpop.eup %18875  ;;  %v1625_v25 = vpop.xlane.xlu1 %1624  ;;  %v20908_v20 = vmul.f32 %v18874_v38, %v20620_v59 }
 0x4b9   : > { %18881 = vrsqrt.f32 %v1773_v10  ;;  %v1711_v56 = vmul.f32 0.0625, %v1625_v25  ;;  %v20911_v26 = vmul.f32 %v18876_v40, %v20623_v18 }
 0x4ba   : > { %18883 = vrsqrt.f32 %v1774_v41  ;;  %17643 = vmatprep.mubr.msk.f32.mxu0 %vm1081_vm0, %v20908_v20  ;;  %17743 = vmatprep.mubr.msk.f32.mxu1 %vm1081_vm0, %v20908_v20 }
 0x4bb   : > { %v18878_v4 = vpop.eup %18877  ;;  %v1775_v3 = vadd.f32 1e-05, %v1711_v56  ;;  %17644 = vmatmul.mubr.msk.f32.gmra.mrb[46].mxu0 %vm1081_vm0, %v20911_v26  ;;  %17744 = vmatmul.mubr.msk.f32.gmra.mrb[50].mxu1 %vm1081_vm0, %v20911_v26 }
 0x4bc   : > { %v1628_v59 = vpop.xlane.xlu0 %1627  ;;  %v20922_v30 = vmul.f32 %v18878_v4, %v20631_v28 }
 0x4bd   : > { %18885 = vrsqrt.f32 %v1775_v3  ;;  %v1712_v18 = vmul.f32 0.0625, %v1628_v59 }
 0x4be   : > { %17646 = vmatprep.mubr.msk.f32.mxu0 %vm1081_vm0, %v20922_v30  ;;  %17746 = vmatprep.mubr.msk.f32.mxu1 %vm1081_vm0, %v20922_v30 }
 0x4bf   : > { %v18880_v43 = vpop.eup %18879  ;;  %v1776_v52 = vadd.f32 1e-05, %v1712_v18 }
 0x4c0   : > { %v1631_v46 = vpop.xlane.xlu1 %1630  ;;  %v20929_v63 = vmul.f32 %v18880_v43, %v20645_v16 }
 0x4c1   : > { %v1634_v47 = vpop.xlane.xlu0 %1633  ;;  %18887 = vrsqrt.f32 %v1776_v52  ;;  %v1713_v1 = vmul.f32 0.0625, %v1631_v46 }
 0x4c2   : > { %v1714_v38 = vmul.f32 0.0625, %v1634_v47  ;;  %17647 = vmatmul.mubr.msk.f32.gmra.mrb[48].mxu0 %vm1081_vm0, %v20929_v63  ;;  %17747 = vmatmul.mubr.msk.f32.gmra.mrb[52].mxu1 %vm1081_vm0, %v20929_v63 }
 0x4c3   : > { %v18882_v28 = vpop.eup %18881  ;;  %v1777_v10 = vadd.f32 1e-05, %v1713_v1 }
 0x4c4   : > { %v1778_v41 = vadd.f32 1e-05, %v1714_v38  ;;  %v18884_v40 = vpop.eup %18883  ;;  %v1637_v25 = vpop.xlane.xlu1 %1636  ;;  %v20936_v56 = vmul.f32 %v18882_v28, %v20658_v13 }
 0x4c5   : > { %18889 = vrsqrt.f32 %v1777_v10  ;;  %v1715_v16 = vmul.f32 0.0625, %v1637_v25  ;;  %v20939_v4 = vmul.f32 %v18884_v40, %v20661_v24 }
 0x4c6   : > { %24177 = vst [vmem:[#allocation43_spill] sm:$0xff] %v20936_v56  ;;  %18891 = vrsqrt.f32 %v1778_v41  ;;  %17649 = vmatprep.mubr.msk.f32.mxu0 %vm1081_vm0, %v20936_v56  ;;  %17749 = vmatprep.mubr.msk.f32.mxu1 %vm1081_vm0, %v20936_v56  ;;  %v24202_v56 = vld [vmem:[#allocation13_spill] sm:$0xff] }
 0x4c7   : > { %24178 = vst [vmem:[#allocation44_spill] sm:$0xff] %v20939_v4  ;;  %v18886_v3 = vpop.eup %18885  ;;  %v1779_v59 = vadd.f32 1e-05, %v1715_v16  ;;  %17650 = vmatmul.mubr.msk.f32.gmra.mrb[50].mxu0 %vm1081_vm0, %v20939_v4  ;;  %17750 = vmatmul.mubr.msk.f32.gmra.mrb[54].mxu1 %vm1081_vm0, %v20939_v4  ;;  %v24201_v4 = vld [vmem:[#allocation29_spill] sm:$0xff] }
 0x4c8   : > { %v20949_v13 = vpop.f32.mrb[10].mxu0  ;;  %v20951_v18 = vpop.f32.mrb[14].mxu1  ;;  %v20954_v24 = vmul.f32 %v18886_v3, %v20669_v21 }
 0x4c9   : > { %18893 = vrsqrt.f32 %v1779_v59  ;;  %v1640_v43 = vpop.xlane.xlu0 %1639  ;;  %v20956_v52 = vpop.f32.mrb[11].mxu0 }
 0x4ca   : > { %24179 = vst [vmem:[#allocation45_spill] sm:$0xff] %v20954_v24  ;;  %v1716_v46 = vmul.f32 0.0625, %v1640_v43  ;;  %v20958_v47 = vpop.f32.mrb[15].mxu1  ;;  %17652 = vmatprep.mubr.msk.f32.mxu0 %vm1081_vm0, %v20954_v24  ;;  %17752 = vmatprep.mubr.msk.f32.mxu1 %vm1081_vm0, %v20954_v24 }
 0x4cb   : > { %v18888_v1 = vpop.eup %18887 }
 0x4cc   : > { %v1780_v38 = vadd.f32 1e-05, %v1716_v46  ;;  %v1643_v28 = vpop.xlane.xlu1 %1642  ;;  %v20965_v10 = vmul.f32 %v18888_v1, %v20683_v15 }
 0x4cd   : > { %v1717_v21 = vmul.f32 0.0625, %v1643_v28  ;;  %v1646_v41 = vpop.xlane.xlu0 %1645 }
 0x4ce   : > { %24180 = vst [vmem:[#allocation46_spill] sm:$0xff] %v20965_v10  ;;  %18895 = vrsqrt.f32 %v1780_v38  ;;  %v1718_v40 = vmul.f32 0.0625, %v1646_v41  ;;  %17653 = vmatmul.mubr.msk.f32.gmra.mrb[52].mxu0 %vm1081_vm0, %v20965_v10  ;;  %17753 = vmatmul.mubr.msk.f32.gmra.mrb[56].mxu1 %vm1081_vm0, %v20965_v10  ;;  %v24200_v10 = vld [vmem:[#allocation23_spill] sm:$0xff] }
 0x4cf   : > { %v18890_v25 = vpop.eup %18889  ;;  %v1781_v16 = vadd.f32 1e-05, %v1717_v21 }
 0x4d0   : > { %v18892_v3 = vpop.eup %18891  ;;  %v1782_v59 = vadd.f32 1e-05, %v1718_v40  ;;  %v20971_v43 = vpop.f32.mrb[12].mxu0  ;;  %v20976_v15 = vmul.f32 %v18890_v25, %v20696_v0 }
 0x4d1   : > { %v20973_v46 = vpop.f32.mrb[16].mxu1  ;;  %18897 = vrsqrt.f32 %v1781_v16  ;;  %v20978_v1 = vpop.f32.mrb[13].mxu0  ;;  %v20983_v28 = vmul.f32 %v18892_v3, %v20699_v54 }
 0x4d2   : > { %24181 = vst [vmem:[#allocation47_spill] sm:$0xff] %v20976_v15  ;;  %v20980_v38 = vpop.f32.mrb[17].mxu1  ;;  %18899 = vrsqrt.f32 %v1782_v59  ;;  %17655 = vmatprep.mubr.msk.f32.mxu0 %vm1081_vm0, %v20976_v15  ;;  %17755 = vmatprep.mubr.msk.f32.mxu1 %vm1081_vm0, %v20976_v15 }
 0x4d3   : > { %24182 = vst [vmem:[#allocation48_spill] sm:$0xff] %v20983_v28  ;;  %v18894_v21 = vpop.eup %18893  ;;  %17656 = vmatmul.mubr.msk.f32.gmra.mrb[54].mxu0 %vm1081_vm0, %v20983_v28  ;;  %17756 = vmatmul.mubr.msk.f32.gmra.mrb[58].mxu1 %vm1081_vm0, %v20983_v28  ;;  %v24197_v28 = vld [vmem:[#allocation24_spill] sm:$0xff] }
 0x4d4   : > { %v20994_v0 = vmul.f32 %v18894_v21, %v20707_v57 }
 0x4d6   : > { %24183 = vst [vmem:[#allocation49_spill] sm:$0xff] %v20994_v0  ;;  %17658 = vmatprep.mubr.msk.f32.mxu0 %vm1081_vm0, %v20994_v0  ;;  %17758 = vmatprep.mubr.msk.f32.mxu1 %vm1081_vm0, %v20994_v0  ;;  %v21067_v0 = vld [vmem:[%s24050_s6] ss:$0 sm:$0xff] }
 0x4d7   : > { %v2582_v15 = vadd.f32 %v21067_v0, %v24197_v28  ;;  %v2587_v28 = vadd.f32 %v21067_v0, %v24201_v4 }
 0x4d8   : > { %v18896_v54 = vpop.eup %18895 }
 0x4d9   : > { %v21001_v41 = vmul.f32 %v18896_v54, %v20721_v32  ;;  %v24188_v54 = vld [vmem:[#allocation6_spill] sm:$0xff] }
 0x4db   : > { %24184 = vst [vmem:[#allocation50_spill] sm:$0xff] %v21001_v41  ;;  %v18898_v40 = vpop.eup %18897  ;;  %17659 = vmatmul.mubr.msk.f32.gmra.mrb[56].mxu0 %vm1081_vm0, %v21001_v41  ;;  %17759 = vmatmul.mubr.msk.f32.gmra.mrb[60].mxu1 %vm1081_vm0, %v21001_v41  ;;  %v24193_v41 = vld [vmem:[#allocation5_spill] sm:$0xff] }
 0x4dc   : > { %v18900_v25 = vpop.eup %18899  ;;  %v21007_v57 = vpop.f32.mrb[14].mxu0  ;;  %v21012_v3 = vmul.f32 %v18898_v40, %v20734_v42  ;;  %v24187_v42 = vld [vmem:[#allocation2_spill] sm:$0xff]  ;;  %v24190_v40 = vld [vmem:[#allocation7_spill] sm:$0xff] }
 0x4dd   : > { %v21009_v16 = vpop.f32.mrb[18].mxu1  ;;  %v21014_v59 = vpop.f32.mrb[15].mxu0  ;;  %v21019_v32 = vmul.f32 %v18900_v25, %v20737_v9  ;;  %v24189_v9 = vld [vmem:[#allocation3_spill] sm:$0xff]  ;;  %v24191_v25 = vld [vmem:[#allocation4_spill] sm:$0xff] }
 0x4de   : > { %24185 = vst [vmem:[#allocation51_spill] sm:$0xff] %v21012_v3  ;;  %v21016_v21 = vpop.f32.mrb[19].mxu1  ;;  %17661 = vmatprep.mubr.msk.f32.mxu0 %vm1081_vm0, %v21012_v3  ;;  %17761 = vmatprep.mubr.msk.f32.mxu1 %vm1081_vm0, %v21012_v3  ;;  %v24192_v3 = vld [vmem:[#allocation8_spill] sm:$0xff] }
 0x4df   : > { %24186 = vst [vmem:[#allocation52_spill] sm:$0xff] %v21019_v32  ;;  %17662 = vmatmul.mubr.msk.f32.gmra.mrb[58].mxu0 %vm1081_vm0, %v21019_v32  ;;  %17762 = vmatmul.mubr.msk.f32.gmra.mrb[62].mxu1 %vm1081_vm0, %v21019_v32  ;;  %v24194_v32 = vld [vmem:[#allocation9_spill] sm:$0xff] }
 0x4e0   : > { %17764 = vmatprep.mubr.msk.f32.mxu1 %vm1081_vm0, %v24187_v42  ;;  %17774 = vmatprep.mubr.msk.f32.mxu0 %vm1081_vm0, %v24188_v54  ;;  %v21048_v54 = vld [vmem:[%s24048_s4] ss:$0 sm:$0xff] }
 0x4e1   : > { %v24195_v42 = vld [vmem:[#allocation10_spill] sm:$0xff]  ;;  %v2188_v24 = vadd.f32 %v24200_v10, %v21048_v54 }
 0x4e3   : > { %17765 = vmatmul.mubr.msk.f32.gmra.mrb[64].mxu1 %vm1081_vm0, %v24189_v9  ;;  %17775 = vmatmul.mubr.msk.f32.vlgmr.msra.gmra.mrb[60].mxu0 %vm1081_vm0, %v24190_v40 }
 0x4e4   : > { %17767 = vmatprep.mubr.msk.f32.mxu1 %vm1081_vm0, %v24191_v25  ;;  %17777 = vmatprep.mubr.msk.f32.mxu0 %vm1081_vm0, %v24192_v3  ;;  %v24196_v3 = vld [vmem:[#allocation25_spill] sm:$0xff] }
 0x4e7   : > { %17768 = vmatmul.mubr.msk.f32.gmra.mrb[66].mxu1 %vm1081_vm0, %v24193_v41  ;;  %17778 = vmatmul.mubr.msk.f32.gmra.mrb[62].mxu0 %vm1081_vm0, %v24194_v32  ;;  %v2183_v41 = vadd.f32 %v21048_v54, %v24196_v3  ;;  %v24199_v3 = vld [vmem:[#allocation12_spill] sm:$0xff] }
 0x4e8   : > { %v21050_v9 = vpop.f32.mrb[16].mxu0  ;;  %v21052_v40 = vpop.f32.mrb[20].mxu1  ;;  %17780 = vmatprep.mubr.msk.f32.mxu0 %vm1081_vm0, %v24195_v42  ;;  %17872 = vmatprep.mubr.msk.f32.mxu1 %vm19302_vm1, %v24153_v55  ;;  %v24198_v42 = vld [vmem:[#allocation11_spill] sm:$0xff] }
 0x4e9   : > { %v21060_v32 = vpop.f32.mrb[17].mxu0  ;;  %v21062_v25 = vpop.f32.mrb[21].mxu1 }
 0x4eb   : > { %17781 = vmatmul.mubr.msk.f32.gmra.mrb[64].mxu0 %vm1081_vm0, %v24198_v42  ;;  %17873 = vmatmul.mubr.msk.f32.vlgmr.msra.gmra.mrb[68].mxu1 %vm1081_vm0, %v2183_v41  ;;  %v24204_v41 = vld [vmem:[#allocation28_spill] sm:$0xff]  ;;  %v24205_v42 = vld [vmem:[#allocation27_spill] sm:$0xff] }
 0x4ec   : > { %17876 = vmatpush3.xpose.msk.msra.mxu1 %vm1081_vm0, %v2582_v15  ;;  %17783 = vmatprep.mubr.msk.f32.mxu0 %vm1081_vm0, %v24199_v3  ;;  %v24203_v15 = vld [vmem:[#allocation16_spill] sm:$0xff]  ;;  %v2193_v10 = vadd.f32 %v21048_v54, %v24204_v41  ;;  %v2592_v4 = vadd.f32 %v21067_v0, %v24205_v42  ;;  %v24206_v3 = vld [vmem:[#allocation17_spill] sm:$0xff] }
 0x4ed   : > { %17877 = vmatprep.mubr.msk.f32.mxu1 %vm19302_vm1, %v24153_v55  ;;  %17880 = vmatprep.subr.mxu1 %v24153_v55 }
 0x4ef   : > { %17784 = vmatmul.mubr.msk.f32.gmra.mrb[66].mxu0 %vm1081_vm0, %v24202_v56  ;;  %17878 = vmatmul.mubr.msk.f32.vlgmr.msra.gmra.mrb[70].mxu1 %vm1081_vm0, %v2188_v24 }
 0x4f0   : > { %17881 = vmatpush3.xpose.msk.msra.mxu1 %vm1081_vm0, %v2587_v28  ;;  %17786 = vmatprep.mubr.msk.f32.mxu0 %vm1081_vm0, %v24203_v15  ;;  %v24207_v28 = vld [vmem:[#allocation26_spill] sm:$0xff] }
 0x4f1   : > { %17882 = vmatprep.mubr.msk.f32.mxu1 %vm19302_vm1, %v24153_v55  ;;  %17885 = vmatprep.subr.mxu1 %v24153_v55  ;;  %v2198_v15 = vadd.f32 %v24207_v28, %v21048_v54  ;;  %v24210_v28 = vld [vmem:[#allocation31_spill] sm:$0xff] }
 0x4f3   : > { %17787 = vmatmul.mubr.msk.f32.gmra.mrb[68].mxu0 %vm1081_vm0, %v24206_v3  ;;  %17883 = vmatmul.mubr.msk.f32.vlgmr.msra.gmra.mrb[72].mxu1 %vm1081_vm0, %v2193_v10  ;;  %v24208_v10 = vld [vmem:[#allocation33_spill] sm:$0xff] }
 0x4f4   : > { %17886 = vmatpush3.xpose.msk.msra.mxu1 %vm1081_vm0, %v2592_v4  ;;  %17789 = vmatprep.mubr.msk.f32.mxu0 %vm1081_vm0, %v20482_v17  ;;  %v2597_v4 = vadd.f32 %v21067_v0, %v24208_v10  ;;  %v24209_v17 = vld [vmem:[#allocation32_spill] sm:$0xff]  ;;  %v2602_v10 = vadd.f32 %v21067_v0, %v24210_v28 }
 0x4f5   : > { %v21101_v56 = vpop.f32.mrb[18].mxu0  ;;  %v21103_v24 = vpop.f32.mrb[22].mxu1  ;;  %17887 = vmatprep.mubr.msk.f32.mxu1 %vm19302_vm1, %v24153_v55  ;;  %17890 = vmatprep.subr.mxu1 %v24153_v55  ;;  %v2203_v3 = vadd.f32 %v21048_v54, %v24209_v17  ;;  %v24213_v17 = vld [vmem:[#allocation39_spill] sm:$0xff] }
 0x4f6   : > { %v21109_v41 = vpop.f32.mrb[19].mxu0  ;;  %v21111_v42 = vpop.f32.mrb[23].mxu1 }
 0x4f7   : > { %17790 = vmatmul.mubr.msk.f32.gmra.mrb[70].mxu0 %vm1081_vm0, %v20498_v33  ;;  %17888 = vmatmul.mubr.msk.f32.vlgmr.msra.gmra.mrb[74].mxu1 %vm1081_vm0, %v2198_v15  ;;  %v24211_v33 = vld [vmem:[#allocation30_spill] sm:$0xff]  ;;  %v24212_v15 = vld [vmem:[#allocation37_spill] sm:$0xff] }
 0x4f8   : > { %17891 = vmatpush3.xpose.msk.msra.mxu1 %vm1081_vm0, %v2597_v4  ;;  %17792 = vmatprep.mubr.msk.f32.mxu0 %vm1081_vm0, %v20514_v60  ;;  %v2208_v60 = vadd.f32 %v24211_v33, %v21048_v54  ;;  %v2607_v4 = vadd.f32 %v21067_v0, %v24212_v15 }
 0x4f9   : > { %17892 = vmatprep.mubr.msk.f32.mxu1 %vm19302_vm1, %v24153_v55  ;;  %17895 = vmatprep.subr.mxu1 %v24153_v55 }
 0x4fb   : > { %17793 = vmatmul.mubr.msk.f32.gmra.mrb[72].mxu0 %vm1081_vm0, %v20527_v34  ;;  %17893 = vmatmul.mubr.msk.f32.vlgmr.msra.gmra.mrb[76].mxu1 %vm1081_vm0, %v2203_v3  ;;  %v24214_v3 = vld [vmem:[#allocation36_spill] sm:$0xff] }
 0x4fc   : > { %17896 = vmatpush3.xpose.msk.msra.mxu1 %vm1081_vm0, %v2602_v10  ;;  %17795 = vmatprep.mubr.msk.f32.mxu0 %vm1081_vm0, %v20552_v36  ;;  %v2213_v28 = vadd.f32 %v21048_v54, %v24214_v3  ;;  %v24218_v3 = vld [vmem:[#allocation41_spill] sm:$0xff] }
 0x4fd   : > { %17897 = vmatprep.mubr.msk.f32.mxu1 %vm19302_vm1, %v24153_v55  ;;  %17900 = vmatprep.subr.mxu1 %v24153_v55 }
 0x4ff   : > { %17796 = vmatmul.mubr.msk.f32.gmra.mrb[74].mxu0 %vm1081_vm0, %v24213_v17  ;;  %17898 = vmatmul.mubr.msk.f32.vlgmr.msra.gmra.mrb[78].mxu1 %vm1081_vm0, %v2208_v60  ;;  %v24215_v60 = vld [vmem:[#allocation35_spill] sm:$0xff] }
 0x500   : > { %17901 = vmatpush3.xpose.msk.msra.mxu1 %vm1081_vm0, %v2607_v4  ;;  %17798 = vmatprep.mubr.msk.f32.mxu0 %vm1081_vm0, %v20598_v19  ;;  %v2612_v15 = vadd.f32 %v21067_v0, %v24215_v60  ;;  %v24216_v4 = vld [vmem:[#allocation19_spill] sm:$0xff]  ;;  %v24217_v19 = vld [vmem:[#allocation34_spill] sm:$0xff]  ;;  %v2617_v60 = vadd.f32 %v21067_v0, %v24218_v3 }
 0x501   : > { %v21148_v34 = vpop.f32.mrb[20].mxu0  ;;  %v21150_v36 = vpop.f32.mrb[24].mxu1  ;;  %17902 = vmatprep.mubr.msk.f32.mxu1 %vm19302_vm1, %v24153_v55  ;;  %17905 = vmatprep.subr.mxu1 %v24153_v55  ;;  %v2218_v17 = vadd.f32 %v24217_v19, %v21048_v54  ;;  %v24221_v19 = vld [vmem:[#allocation18_spill] sm:$0xff] }
 0x502   : > { %v21156_v10 = vpop.f32.mrb[21].mxu0  ;;  %v21158_v33 = vpop.f32.mrb[25].mxu1 }
 0x503   : > { %17799 = vmatmul.mubr.msk.f32.gmra.mrb[76].mxu0 %vm1081_vm0, %v24216_v4  ;;  %17903 = vmatmul.mubr.msk.f32.vlgmr.msra.gmra.mrb[80].mxu1 %vm1081_vm0, %v2213_v28 }
 0x504   : > { %17906 = vmatpush3.xpose.msk.msra.mxu1 %vm1081_vm0, %v2612_v15  ;;  %17801 = vmatprep.mubr.msk.f32.mxu0 %vm1081_vm0, %v20636_v53  ;;  %v24219_v53 = vld [vmem:[#allocation40_spill] sm:$0xff]  ;;  %v24220_v15 = vld [vmem:[#allocation38_spill] sm:$0xff] }
 0x505   : > { %17907 = vmatprep.mubr.msk.f32.mxu1 %vm19302_vm1, %v24153_v55  ;;  %17910 = vmatprep.subr.mxu1 %v24153_v55  ;;  %v2223_v28 = vadd.f32 %v21048_v54, %v24219_v53  ;;  %v2622_v4 = vadd.f32 %v21067_v0, %v24220_v15  ;;  %v2642_v15 = vadd.f32 %v21067_v0, %v20973_v46 }
 0x506   : > { %v2647_v46 = vadd.f32 %v21067_v0, %v21016_v21 }
 0x507   : > { %17802 = vmatmul.mubr.msk.f32.gmra.mrb[78].mxu0 %vm1081_vm0, %v20649_v48  ;;  %17908 = vmatmul.mubr.msk.f32.vlgmr.msra.gmra.mrb[82].mxu1 %vm1081_vm0, %v2218_v17  ;;  %v2228_v17 = vadd.f32 %v24221_v19, %v21048_v54 }
 0x508   : > { %17911 = vmatpush3.xpose.msk.msra.mxu1 %vm1081_vm0, %v2617_v60  ;;  %17804 = vmatprep.mubr.msk.f32.mxu0 %vm1081_vm0, %v20674_v14 }
 0x509   : > { %17912 = vmatprep.mubr.msk.f32.mxu1 %vm19302_vm1, %v24153_v55  ;;  %17915 = vmatprep.subr.mxu1 %v24153_v55 }
 0x50b   : > { %17805 = vmatmul.mubr.msk.f32.gmra.mrb[80].mxu0 %vm1081_vm0, %v20687_v22  ;;  %17913 = vmatmul.mubr.msk.f32.vlgmr.msra.gmra.mrb[84].mxu1 %vm1081_vm0, %v2223_v28  ;;  %v2627_v22 = vadd.f32 %v21067_v0, %v20958_v47  ;;  %v2632_v47 = vadd.f32 %v21067_v0, %v20951_v18  ;;  %v2637_v18 = vadd.f32 %v21067_v0, %v20980_v38 }
 0x50c   : > { %17916 = vmatpush3.xpose.msk.msra.mxu1 %vm1081_vm0, %v2622_v4  ;;  %17807 = vmatprep.mubr.msk.f32.mxu0 %vm1081_vm0, %v20712_v2  ;;  %v2233_v2 = vadd.f32 %v21048_v54, %v20956_v52  ;;  %v24223_v52 = vld [vmem:[#allocation42_spill] sm:$0xff] }
 0x50d   : > { %v21195_v48 = vpop.f32.mrb[22].mxu0  ;;  %v21197_v14 = vpop.f32.mrb[26].mxu1  ;;  %17917 = vmatprep.mubr.msk.f32.mxu1 %vm19302_vm1, %v24153_v55  ;;  %17920 = vmatprep.subr.mxu1 %v24153_v55 }
 0x50e   : > { %v21203_v3 = vpop.f32.mrb[23].mxu0  ;;  %v21205_v60 = vpop.f32.mrb[27].mxu1 }
 0x50f   : > { %17808 = vmatmul.mubr.msk.f32.gmra.mrb[82].mxu0 %vm1081_vm0, %v20725_v45  ;;  %17918 = vmatmul.mubr.msk.f32.vlgmr.msra.gmra.mrb[86].mxu1 %vm1081_vm0, %v2228_v17  ;;  %v24222_v45 = vld [vmem:[#allocation20_spill] sm:$0xff] }
 0x510   : > { %17921 = vmatpush3.xpose.msk.msra.mxu1 %vm1081_vm0, %v2627_v22  ;;  %17810 = vmatprep.mubr.msk.f32.mxu0 %vm1081_vm0, %v20747_v5  ;;  %v2238_v5 = vadd.f32 %v20949_v13, %v21048_v54  ;;  %v2243_v13 = vadd.f32 %v21048_v54, %v20978_v1  ;;  %v24234_v22 = vld [vmem:[#allocation2_spill] sm:$0xff] }
 0x511   : > { %17922 = vmatprep.mubr.msk.f32.mxu1 %vm19302_vm1, %v24153_v55  ;;  %17925 = vmatprep.subr.mxu1 %v24153_v55 }
 0x513   : > { %17811 = vmatmul.mubr.msk.f32.gmra.mrb[84].mxu0 %vm1081_vm0, %v20754_v27  ;;  %17923 = vmatmul.mubr.msk.f32.vlgmr.msra.gmra.mrb[88].mxu1 %vm1081_vm0, %v2233_v2 }
 0x514   : > { %17926 = vmatpush3.xpose.msk.msra.mxu1 %vm1081_vm0, %v2632_v47  ;;  %17813 = vmatprep.mubr.msk.f32.mxu0 %vm1081_vm0, %v24222_v45  ;;  %v24235_v47 = vld [vmem:[#allocation3_spill] sm:$0xff] }
 0x515   : > { %17927 = vmatprep.mubr.msk.f32.mxu1 %vm19302_vm1, %v24153_v55  ;;  %17930 = vmatprep.subr.mxu1 %v24153_v55 }
 0x517   : > { %17814 = vmatmul.mubr.msk.f32.gmra.mrb[86].mxu0 %vm1081_vm0, %v24223_v52  ;;  %17928 = vmatmul.mubr.msk.f32.vlgmr.msra.gmra.mrb[90].mxu1 %vm1081_vm0, %v2238_v5  ;;  %v24236_v5 = vld [vmem:[#allocation4_spill] sm:$0xff] }
 0x518   : > { %17931 = vmatpush3.xpose.msk.msra.mxu1 %vm1081_vm0, %v2637_v18  ;;  %17816 = vmatprep.mubr.msk.f32.mxu0 %vm1081_vm0, %v20782_v58  ;;  %v2248_v58 = vadd.f32 %v20971_v43, %v21048_v54 }
 0x519   : > { %v21242_v27 = vpop.f32.mrb[24].mxu0  ;;  %v21244_v53 = vpop.f32.mrb[28].mxu1  ;;  %17932 = vmatprep.mubr.msk.f32.mxu1 %vm19302_vm1, %v24153_v55  ;;  %17935 = vmatprep.subr.mxu1 %v24153_v55 }
 0x51a   : > { %v21250_v28 = vpop.f32.mrb[25].mxu0  ;;  %v21252_v38 = vpop.f32.mrb[29].mxu1 }
 0x51b   : > { %17817 = vmatmul.mubr.msk.f32.gmra.mrb[88].mxu0 %vm1081_vm0, %v20785_v61  ;;  %17933 = vmatmul.mubr.msk.f32.vlgmr.msra.gmra.mrb[92].mxu1 %vm1081_vm0, %v2243_v13  ;;  %v2253_v61 = vadd.f32 %v21048_v54, %v21014_v59  ;;  %v24225_v59 = vld [vmem:[#allocation44_spill] sm:$0xff] }
 0x51c   : > { %17936 = vmatpush3.xpose.msk.msra.mxu1 %vm1081_vm0, %v2642_v15  ;;  %17819 = vmatprep.mubr.msk.f32.mxu0 %vm1081_vm0, %v20796_v39 }
 0x51d   : > { %17937 = vmatprep.mubr.msk.f32.mxu1 %vm19302_vm1, %v24153_v55  ;;  %17940 = vmatprep.subr.mxu1 %v24153_v55 }
 0x51f   : > { %17820 = vmatmul.mubr.msk.f32.gmra.mrb[90].mxu0 %vm1081_vm0, %v20803_v37  ;;  %17938 = vmatmul.mubr.msk.f32.vlgmr.msra.gmra.mrb[94].mxu1 %vm1081_vm0, %v2248_v58  ;;  %v2652_v37 = vadd.f32 %v21067_v0, %v21009_v16  ;;  %v2657_v16 = vadd.f32 %v21067_v0, %v21062_v25  ;;  %v2702_v25 = vadd.f32 %v21067_v0, %v21244_v53 }
 0x520   : > { %17941 = vmatpush3.xpose.msk.msra.mxu1 %vm1081_vm0, %v2647_v46  ;;  %17822 = vmatprep.mubr.msk.f32.mxu0 %vm1081_vm0, %v20810_v11  ;;  %v2258_v11 = vadd.f32 %v21007_v57, %v21048_v54  ;;  %v2697_v57 = vadd.f32 %v21067_v0, %v21252_v38  ;;  %v24237_v38 = vld [vmem:[#allocation5_spill] sm:$0xff] }
 0x521   : > { %v21280_v39 = vpop.f32.mrb[26].mxu0  ;;  %v21282_v43 = vpop.f32.mrb[30].mxu1  ;;  %17942 = vmatprep.mubr.msk.f32.mxu1 %vm19302_vm1, %v24153_v55  ;;  %17945 = vmatprep.subr.mxu1 %v24153_v55 }
 0x522   : > { %v21289_v1 = vpop.f32.mrb[27].mxu0  ;;  %v21291_v21 = vpop.f32.mrb[31].mxu1  ;;  %v2318_v4 = vadd.f32 %v21280_v39, %v21048_v54 }
 0x523   : > { %17823 = vmatmul.mubr.msk.f32.gmra.mrb[92].mxu0 %vm1081_vm0, %v20817_v12  ;;  %17943 = vmatmul.mubr.msk.f32.vlgmr.msra.gmra.mrb[96].mxu1 %vm1081_vm0, %v2253_v61  ;;  %v2263_v12 = vadd.f32 %v21048_v54, %v21060_v32  ;;  %v24228_v32 = vld [vmem:[#allocation47_spill] sm:$0xff] }
 0x524   : > { %17946 = vmatpush3.xpose.msk.msra.mxu1 %vm1081_vm0, %v2652_v37  ;;  %17825 = vmatprep.mubr.msk.f32.mxu0 %vm1081_vm0, %v20824_v49  ;;  %v2662_v49 = vadd.f32 %v21067_v0, %v21052_v40  ;;  %v24227_v40 = vld [vmem:[#allocation46_spill] sm:$0xff] }
 0x525   : > { %17947 = vmatprep.mubr.msk.f32.mxu1 %vm19302_vm1, %v24153_v55  ;;  %17950 = vmatprep.subr.mxu1 %v24153_v55 }
 0x527   : > { %17826 = vmatmul.mubr.msk.f32.gmra.mrb[94].mxu0 %vm1081_vm0, %v20827_v35  ;;  %17948 = vmatmul.mubr.msk.f32.vlgmr.msra.gmra.mrb[98].mxu1 %vm1081_vm0, %v2258_v11  ;;  %v2268_v35 = vadd.f32 %v21050_v9, %v21048_v54  ;;  %v2303_v9 = vadd.f32 %v21048_v54, %v21250_v28 }
 0x528   : > { %17951 = vmatpush3.xpose.msk.msra.mxu1 %vm1081_vm0, %v2657_v16  ;;  %17828 = vmatprep.mubr.msk.f32.mxu0 %vm1081_vm0, %v20838_v6  ;;  %v2667_v6 = vadd.f32 %v21067_v0, %v21111_v42  ;;  %v24230_v42 = vld [vmem:[#allocation49_spill] sm:$0xff] }
 0x529   : > { %17952 = vmatprep.mubr.msk.f32.mxu1 %vm19302_vm1, %v24153_v55  ;;  %17955 = vmatprep.subr.mxu1 %v24153_v55 }
 0x52b   : > { %17829 = vmatmul.mubr.msk.f32.gmra.mrb[96].mxu0 %vm1081_vm0, %v20845_v7  ;;  %17953 = vmatmul.mubr.msk.f32.vlgmr.msra.gmra.mrb[100].mxu1 %vm1081_vm0, %v2263_v12  ;;  %v2273_v7 = vadd.f32 %v21048_v54, %v21109_v41  ;;  %v24229_v41 = vld [vmem:[#allocation48_spill] sm:$0xff] }
 0x52c   : > { %17956 = vmatpush3.xpose.msk.msra.mxu1 %vm1081_vm0, %v2662_v49  ;;  %17831 = vmatprep.mubr.msk.f32.mxu0 %vm1081_vm0, %v20852_v62  ;;  %v2672_v62 = vadd.f32 %v21067_v0, %v21103_v24  ;;  %v2707_v24 = vadd.f32 %v21067_v0, %v21291_v21 }
 0x52d   : > { %17957 = vmatprep.mubr.msk.f32.mxu1 %vm19302_vm1, %v24153_v55  ;;  %17960 = vmatprep.subr.mxu1 %v24153_v55 }
 0x52f   : > { %17832 = vmatmul.mubr.msk.f32.gmra.mrb[98].mxu0 %vm1081_vm0, %v20855_v51  ;;  %17958 = vmatmul.mubr.msk.f32.vlgmr.msra.gmra.mrb[102].mxu1 %vm1081_vm0, %v2268_v35  ;;  %v2278_v51 = vadd.f32 %v21101_v56, %v21048_v54  ;;  %v2308_v56 = vadd.f32 %v21242_v27, %v21048_v54 }
 0x530   : > { %17961 = vmatpush3.xpose.msk.msra.mxu1 %vm1081_vm0, %v2667_v6  ;;  %17834 = vmatprep.mubr.msk.f32.mxu0 %vm1081_vm0, %v20866_v23  ;;  %v2677_v23 = vadd.f32 %v21067_v0, %v21158_v33  ;;  %v24232_v33 = vld [vmem:[#allocation51_spill] sm:$0xff] }
 0x531   : > { %17962 = vmatprep.mubr.msk.f32.mxu1 %vm19302_vm1, %v24153_v55  ;;  %17965 = vmatprep.subr.mxu1 %v24153_v55 }
 0x533   : > { %17835 = vmatmul.mubr.msk.f32.gmra.mrb[100].mxu0 %vm1081_vm0, %v20873_v29  ;;  %17963 = vmatmul.mubr.msk.f32.vlgmr.msra.gmra.mrb[104].mxu1 %vm1081_vm0, %v2273_v7  ;;  %v2283_v29 = vadd.f32 %v21048_v54, %v21156_v10  ;;  %v24231_v10 = vld [vmem:[#allocation50_spill] sm:$0xff] }
 0x534   : > { %17966 = vmatpush3.xpose.msk.msra.mxu1 %vm1081_vm0, %v2672_v62  ;;  %17837 = vmatprep.mubr.msk.f32.mxu0 %vm1081_vm0, %v20880_v44  ;;  %v2682_v44 = vadd.f32 %v21067_v0, %v21150_v36  ;;  %v2712_v36 = vadd.f32 %v21067_v0, %v21282_v43 }
 0x535   : > { %17967 = vmatprep.mubr.msk.f32.mxu1 %vm19302_vm1, %v24153_v55  ;;  %17970 = vmatprep.subr.mxu1 %v24153_v55 }
 0x537   : > { %17838 = vmatmul.mubr.msk.f32.gmra.mrb[102].mxu0 %vm1081_vm0, %v20883_v31  ;;  %17968 = vmatmul.mubr.msk.f32.vlgmr.msra.gmra.mrb[106].mxu1 %vm1081_vm0, %v2278_v51  ;;  %v2288_v31 = vadd.f32 %v21148_v34, %v21048_v54  ;;  %v2313_v34 = vadd.f32 %v21048_v54, %v21289_v1 }
 0x538   : > { %17971 = vmatpush3.xpose.msk.msra.mxu1 %vm1081_vm0, %v2677_v23  ;;  %17840 = vmatprep.mubr.msk.f32.mxu0 %vm1081_vm0, %v20894_v50  ;;  %v2687_v50 = vadd.f32 %v21067_v0, %v21205_v60 }
 0x539   : > { %17972 = vmatprep.mubr.msk.f32.mxu1 %vm19302_vm1, %v24153_v55  ;;  %17975 = vmatprep.subr.mxu1 %v24153_v55 }
 0x53b   : > { %17841 = vmatmul.mubr.msk.f32.gmra.mrb[104].mxu0 %vm1081_vm0, %v20901_v8  ;;  %17973 = vmatmul.mubr.msk.f32.vlgmr.msra.gmra.mrb[108].mxu1 %vm1081_vm0, %v2283_v29  ;;  %v2293_v8 = vadd.f32 %v21048_v54, %v21203_v3  ;;  %v24233_v3 = vld [vmem:[#allocation52_spill] sm:$0xff] }
 0x53c   : > { %17976 = vmatpush3.xpose.msk.msra.mxu1 %vm1081_vm0, %v2682_v44  ;;  %17843 = vmatprep.mubr.msk.f32.mxu0 %vm1081_vm0, %v20908_v20  ;;  %v2692_v20 = vadd.f32 %v21067_v0, %v21197_v14 }
 0x53d   : > { %17977 = vmatprep.mubr.msk.f32.mxu1 %vm19302_vm1, %v24153_v55  ;;  %17980 = vmatprep.subr.mxu1 %v24153_v55 }
 0x53f   : > { %17844 = vmatmul.mubr.msk.f32.gmra.mrb[106].mxu0 %vm1081_vm0, %v20911_v26  ;;  %17978 = vmatmul.mubr.msk.f32.vlgmr.msra.gmra.mrb[110].mxu1 %vm1081_vm0, %v2288_v31  ;;  %v24224_v26 = vld [vmem:[#allocation43_spill] sm:$0xff] }
 0x540   : > { %17981 = vmatpush3.xpose.msk.msra.mxu1 %vm1081_vm0, %v2687_v50  ;;  %17846 = vmatprep.mubr.msk.f32.mxu0 %vm1081_vm0, %v20922_v30  ;;  %v2298_v30 = vadd.f32 %v21195_v48, %v21048_v54 }
 0x541   : > { %17982 = vmatprep.mubr.msk.f32.mxu1 %vm19302_vm1, %v24153_v55  ;;  %17985 = vmatprep.subr.mxu1 %v24153_v55 }
 0x543   : > { %17847 = vmatmul.mubr.msk.f32.gmra.mrb[108].mxu0 %vm1081_vm0, %v20929_v63  ;;  %17983 = vmatmul.mubr.msk.f32.vlgmr.msra.gmra.mrb[112].mxu1 %vm1081_vm0, %v2293_v8  ;;  %v24226_v63 = vld [vmem:[#allocation45_spill] sm:$0xff] }
 0x544   : > { %17986 = vmatpush3.xpose.msk.msra.mxu1 %vm1081_vm0, %v2692_v20  ;;  %17849 = vmatprep.mubr.msk.f32.mxu0 %vm1081_vm0, %v24224_v26 }
 0x545   : > { %17987 = vmatprep.mubr.msk.f32.mxu1 %vm19302_vm1, %v24153_v55  ;;  %17990 = vmatprep.subr.mxu1 %v24153_v55 }
 0x547   : > { %17850 = vmatmul.mubr.msk.f32.gmra.mrb[110].mxu0 %vm1081_vm0, %v24225_v59  ;;  %17988 = vmatmul.mubr.msk.f32.vlgmr.msra.gmra.mrb[114].mxu1 %vm1081_vm0, %v2298_v30 }
 0x548   : > { %17991 = vmatpush3.xpose.msk.msra.mxu1 %vm1081_vm0, %v2697_v57  ;;  %17852 = vmatprep.mubr.msk.f32.mxu0 %vm1081_vm0, %v24226_v63 }
 0x549   : > { %17992 = vmatprep.mubr.msk.f32.mxu1 %vm19302_vm1, %v24153_v55  ;;  %17995 = vmatprep.subr.mxu1 %v24153_v55 }
 0x54b   : > { %17853 = vmatmul.mubr.msk.f32.gmra.mrb[112].mxu0 %vm1081_vm0, %v24227_v40  ;;  %17993 = vmatmul.mubr.msk.f32.vlgmr.msra.gmra.mrb[116].mxu1 %vm1081_vm0, %v2303_v9 }
 0x54c   : > { %17996 = vmatpush3.xpose.msk.msra.mxu1 %vm1081_vm0, %v2702_v25  ;;  %17855 = vmatprep.mubr.msk.f32.mxu0 %vm1081_vm0, %v24228_v32 }
 0x54d   : > { %17997 = vmatprep.mubr.msk.f32.mxu1 %vm19302_vm1, %v24153_v55  ;;  %18000 = vmatprep.subr.mxu1 %v24153_v55 }
 0x54f   : > { %17856 = vmatmul.mubr.msk.f32.gmra.mrb[114].mxu0 %vm1081_vm0, %v24229_v41  ;;  %17998 = vmatmul.mubr.msk.f32.vlgmr.msra.gmra.mrb[118].mxu1 %vm1081_vm0, %v2308_v56 }
 0x550   : > { %18001 = vmatpush3.xpose.msk.msra.mxu1 %vm1081_vm0, %v2707_v24  ;;  %17858 = vmatprep.mubr.msk.f32.mxu0 %vm1081_vm0, %v24230_v42 }
 0x551   : > { %18002 = vmatprep.mubr.msk.f32.mxu1 %vm19302_vm1, %v24153_v55  ;;  %18005 = vmatprep.subr.mxu1 %v24153_v55 }
 0x553   : > { %17859 = vmatmul.mubr.msk.f32.gmra.mrb[116].mxu0 %vm1081_vm0, %v24231_v10  ;;  %18003 = vmatmul.mubr.msk.f32.vlgmr.msra.gmra.mrb[120].mxu1 %vm1081_vm0, %v2313_v34 }
 0x554   : > { %18006 = vmatpush3.xpose.msk.msra.mxu1 %vm1081_vm0, %v2712_v36  ;;  %17861 = vmatprep.mubr.msk.f32.mxu0 %vm1081_vm0, %v24232_v33 }
 0x555   : > { %18007 = vmatprep.mubr.msk.f32.mxu1 %vm19302_vm1, %v24153_v55  ;;  %18010 = vmatprep.subr.mxu1 %v24153_v55 }
 0x556   : > { %v17618_v48 = vpop.f32.mrb[28].mxu0  ;;  %v17718_v14 = vpop.f32.mrb[32].mxu1 }
 0x557   : > { %v2322_v19 = vpop.f32.mrb[29].mxu0  ;;  %v2716_v17 = vpop.f32.mrb[33].mxu1  ;;  %17862 = vmatmul.mubr.msk.f32.gmra.mrb[118].mxu0 %vm1081_vm0, %v24233_v3  ;;  %18008 = vmatmul.mubr.msk.f32.vlgmr.msra.gmra.mrb[122].mxu1 %vm1081_vm0, %v2318_v4  ;;  %v2722_v45 = vadd.f32 %v21067_v0, %v17718_v14  ;;  %v2328_v13 = vadd.f32 %v17618_v48, %v21048_v54 }
 0x558   : > { %v2717_v60 = vadd.f32 %v21067_v0, %v2716_v17  ;;  %17864 = vmatprep.mubr.msk.f32.mxu0 %vm1081_vm0, %v24234_v22  ;;  %18012 = vmatprep.mubr.msk.f32.mxu1 %vm19302_vm1, %v24153_v55  ;;  %v2323_v2 = vadd.f32 %v21048_v54, %v2322_v19 }
 0x55a   : > { %18011 = vmatpush3.xpose.msk.msra.mxu1 %vm1081_vm0, %v2717_v60 }
 0x55b   : > { %17865 = vmatmul.mubr.msk.f32.gmra.mrb[120].mxu0 %vm1081_vm0, %v24235_v47  ;;  %18015 = vmatprep.subr.mxu1 %v24153_v55 }
 0x55c   : > { %17867 = vmatprep.mubr.msk.f32.mxu0 %vm1081_vm0, %v24236_v5 }
 0x55d   : > { %v17621_v18 = vpop.f32.mrb[30].mxu0  ;;  %v17721_v52 = vpop.f32.mrb[34].mxu1  ;;  %18013 = vmatmul.mubr.msk.f32.vlgmr.msra.gmra.mrb[124].mxu1 %vm1081_vm0, %v2323_v2 }
 0x55e   : > { %v2332_v27 = vpop.f32.mrb[31].mxu0  ;;  %v2726_v53 = vpop.f32.mrb[35].mxu1  ;;  %18016 = vmatpush3.xpose.msk.msra.mxu1 %vm1081_vm0, %v2722_v45  ;;  %18017 = vmatprep.mubr.msk.f32.mxu1 %vm19302_vm1, %v24153_v55  ;;  %v2732_v58 = vadd.f32 %v21067_v0, %v17721_v52  ;;  %v2338_v37 = vadd.f32 %v17621_v18, %v21048_v54 }
 0x55f   : > { %v2727_v28 = vadd.f32 %v21067_v0, %v2726_v53  ;;  %17868 = vmatmul.mubr.msk.f32.gmra.mrb[122].mxu0 %vm1081_vm0, %v24237_v38  ;;  %18020 = vmatprep.subr.mxu1 %v24153_v55  ;;  %v2333_v15 = vadd.f32 %v21048_v54, %v2332_v27 }
 0x560   : > { %18032 = vmatprep.mubr.msk.f32.mxu0 %vm19302_vm1, %v24153_v55 }
 0x561   : > { %18018 = vmatmul.mubr.msk.f32.vlgmr.msra.gmra.mrb[126].mxu1 %vm1081_vm0, %v2328_v13 }
 0x562   : > { %18021 = vmatpush3.xpose.msk.msra.mxu1 %vm1081_vm0, %v2727_v28  ;;  %18022 = vmatprep.mubr.msk.f32.mxu1 %vm19302_vm1, %v24153_v55 }
 0x563   : > { %18025 = vmatprep.subr.mxu1 %v24153_v55 }
 0x565   : > { %v17624_v46 = vpop.f32.mrb[32].mxu0  ;;  %v17724_v61 = vpop.f32.mrb[36].mxu1  ;;  %18023 = vmatmul.mubr.msk.f32.vlgmr.msra.gmra.mrb[128].mxu1 %vm1081_vm0, %v2333_v15 }
 0x566   : > { %v2342_v39 = vpop.f32.mrb[33].mxu0  ;;  %v2736_v43 = vpop.f32.mrb[37].mxu1  ;;  %18026 = vmatpush3.xpose.msk.msra.mxu1 %vm1081_vm0, %v2732_v58  ;;  %18027 = vmatprep.mubr.msk.f32.mxu1 %vm19302_vm1, %v24153_v55  ;;  %v2742_v21 = vadd.f32 %v21067_v0, %v17724_v61  ;;  %v2348_v49 = vadd.f32 %v17624_v46, %v21048_v54 }
 0x567   : > { %v2737_v1 = vadd.f32 %v21067_v0, %v2736_v43  ;;  %18035 = vmatprep.subr.mxu1 %v24153_v55  ;;  %v2343_v11 = vadd.f32 %v21048_v54, %v2342_v39 }
 0x569   : > { %18028 = vmatmul.mubr.msk.f32.vlgmr.msra.gmra.mrb[130].mxu1 %vm1081_vm0, %v2338_v37  ;;  %18031 = vmatpush3.xpose.msk.msra.mxu0 %vm1081_vm0, %v2737_v1 }
 0x56a   : > { %v17627_v16 = vpop.f32.mrb[34].mxu0  ;;  %v17727_v12 = vpop.f32.mrb[38].mxu1  ;;  %18036 = vmatpush3.xpose.msk.msra.mxu1 %vm1081_vm0, %v2742_v21  ;;  %18037 = vmatprep.mubr.msk.f32.mxu1 %vm19302_vm1, %v24153_v55 }
 0x56b   : > { %v2752_v35 = vadd.f32 %v21067_v0, %v17727_v12  ;;  %v2352_v6 = vpop.f32.mrb[35].mxu0  ;;  %v2746_v7 = vpop.f32.mrb[39].mxu1  ;;  %18040 = vmatprep.subr.mxu0 %v24153_v55  ;;  %18045 = vmatprep.subr.mxu1 %v24153_v55  ;;  %v2358_v51 = vadd.f32 %v17627_v16, %v21048_v54 }
 0x56c   : > { %v2747_v62 = vadd.f32 %v21067_v0, %v2746_v7  ;;  %18033 = vmatmul.mubr.msk.f32.vlgmr.msra.gmra.mrb[124].mxu0 %vm1081_vm0, %v2343_v11  ;;  %v2353_v23 = vadd.f32 %v21048_v54, %v2352_v6 }
 0x56d   : > { %18038 = vmatmul.mubr.msk.f32.vlgmr.msra.gmra.mrb[132].mxu1 %vm1081_vm0, %v2348_v49  ;;  %18042 = vmatprep.mubr.msk.f32.mxu0 %vm19302_vm1, %v24153_v55 }
 0x56e   : > { %18041 = vmatpush3.xpose.msk.msra.mxu0 %vm1081_vm0, %v2747_v62  ;;  %18046 = vmatpush3.xpose.msk.msra.mxu1 %vm1081_vm0, %v2752_v35 }
 0x56f   : > { %18047 = vmatprep.mubr.msk.f32.mxu1 %vm19302_vm1, %v24153_v55  ;;  %18055 = vmatprep.subr.mxu1 %v24153_v55 }
 0x570   : > { %18050 = vmatprep.subr.mxu0 %v24153_v55 }
 0x571   : > { %v17630_v29 = vpop.f32.mrb[36].mxu0  ;;  %v17730_v44 = vpop.f32.mrb[40].mxu1  ;;  %18043 = vmatmul.mubr.msk.f32.vlgmr.msra.gmra.mrb[126].mxu0 %vm1081_vm0, %v2353_v23  ;;  %18048 = vmatmul.mubr.msk.f32.vlgmr.msra.gmra.mrb[134].mxu1 %vm1081_vm0, %v2358_v51 }
 0x572   : > { %v2762_v31 = vadd.f32 %v21067_v0, %v17730_v44  ;;  %v2362_v50 = vpop.f32.mrb[37].mxu0  ;;  %v2756_v8 = vpop.f32.mrb[41].mxu1  ;;  %18057 = vmatprep.mubr.msk.f32.mxu1 %vm19302_vm1, %v24153_v55  ;;  %18052 = vmatprep.mubr.msk.f32.mxu0 %vm19302_vm1, %v24153_v55  ;;  %v2368_v26 = vadd.f32 %v17630_v29, %v21048_v54 }
 0x573   : > { %v2757_v20 = vadd.f32 %v21067_v0, %v2756_v8  ;;  %v2363_v30 = vadd.f32 %v21048_v54, %v2362_v50 }
 0x574   : > { %18056 = vmatpush3.xpose.msk.msra.mxu1 %vm1081_vm0, %v2762_v31 }
 0x575   : > { %18051 = vmatpush3.xpose.msk.msra.mxu0 %vm1081_vm0, %v2757_v20  ;;  %18065 = vmatprep.subr.mxu1 %v24153_v55 }
 0x576   : > { %v17633_v57 = vpop.f32.mrb[38].mxu0  ;;  %v17733_v59 = vpop.f32.mrb[42].mxu1  ;;  %18060 = vmatprep.subr.mxu0 %v24153_v55 }
 0x577   : > { %v2772_v63 = vadd.f32 %v21067_v0, %v17733_v59  ;;  %v2372_v9 = vpop.f32.mrb[39].mxu0  ;;  %v2766_v25 = vpop.f32.mrb[43].mxu1  ;;  %18058 = vmatmul.mubr.msk.f32.vlgmr.msra.gmra.mrb[136].mxu1 %vm1081_vm0, %v2368_v26  ;;  %v2378_v32 = vadd.f32 %v17633_v57, %v21048_v54 }
 0x578   : > { %v2767_v40 = vadd.f32 %v21067_v0, %v2766_v25  ;;  %18053 = vmatmul.mubr.msk.f32.vlgmr.msra.gmra.mrb[128].mxu0 %vm1081_vm0, %v2363_v30  ;;  %18067 = vmatprep.mubr.msk.f32.mxu1 %vm19302_vm1, %v24153_v55  ;;  %v2373_v56 = vadd.f32 %v21048_v54, %v2372_v9 }
 0x579   : > { %18066 = vmatpush3.xpose.msk.msra.mxu1 %vm1081_vm0, %v2772_v63  ;;  %18062 = vmatprep.mubr.msk.f32.mxu0 %vm19302_vm1, %v24153_v55 }
 0x57a   : > { %18061 = vmatpush3.xpose.msk.msra.mxu0 %vm1081_vm0, %v2767_v40  ;;  %18075 = vmatprep.subr.mxu1 %v24153_v55 }
 0x57b   : > { %18070 = vmatprep.subr.mxu0 %v24153_v55 }
 0x57c   : > { %18068 = vmatmul.mubr.msk.f32.vlgmr.msra.gmra.mrb[138].mxu1 %vm1081_vm0, %v2378_v32 }
 0x57d   : > { %v17636_v24 = vpop.f32.mrb[40].mxu0  ;;  %v17736_v41 = vpop.f32.mrb[44].mxu1  ;;  %18063 = vmatmul.mubr.msk.f32.vlgmr.msra.gmra.mrb[130].mxu0 %vm1081_vm0, %v2373_v56  ;;  %18077 = vmatprep.mubr.msk.f32.mxu1 %vm19302_vm1, %v24153_v55 }
 0x57e   : > { %v2782_v42 = vadd.f32 %v21067_v0, %v17736_v41  ;;  %v2382_v34 = vpop.f32.mrb[41].mxu0  ;;  %v2776_v36 = vpop.f32.mrb[45].mxu1  ;;  %18072 = vmatprep.mubr.msk.f32.mxu0 %vm19302_vm1, %v24153_v55  ;;  %v2388_v33 = vadd.f32 %v17636_v24, %v21048_v54 }
 0x57f   : > { %v2777_v10 = vadd.f32 %v21067_v0, %v2776_v36  ;;  %v2383_v4 = vadd.f32 %v21048_v54, %v2382_v34 }
 0x580   : > { %18076 = vmatpush3.xpose.msk.msra.mxu1 %vm1081_vm0, %v2782_v42 }
 0x581   : > { %18071 = vmatpush3.xpose.msk.msra.mxu0 %vm1081_vm0, %v2777_v10  ;;  %18085 = vmatprep.subr.mxu1 %v24153_v55 }
 0x582   : > { %v17639_v48 = vpop.f32.mrb[42].mxu0  ;;  %v17739_v14 = vpop.f32.mrb[46].mxu1  ;;  %18080 = vmatprep.subr.mxu0 %v24153_v55 }
 0x583   : > { %v2792_v19 = vadd.f32 %v21067_v0, %v17739_v14  ;;  %v2392_v17 = vpop.f32.mrb[43].mxu0  ;;  %v2786_v3 = vpop.f32.mrb[47].mxu1  ;;  %18078 = vmatmul.mubr.msk.f32.vlgmr.msra.gmra.mrb[140].mxu1 %vm1081_vm0, %v2388_v33  ;;  %v2398_v22 = vadd.f32 %v17639_v48, %v21048_v54 }
 0x584   : > { %v2787_v60 = vadd.f32 %v21067_v0, %v2786_v3  ;;  %18073 = vmatmul.mubr.msk.f32.vlgmr.msra.gmra.mrb[132].mxu0 %vm1081_vm0, %v2383_v4  ;;  %18087 = vmatprep.mubr.msk.f32.mxu1 %vm19302_vm1, %v24153_v55  ;;  %v2393_v2 = vadd.f32 %v21048_v54, %v2392_v17 }
 0x585   : > { %18086 = vmatpush3.xpose.msk.msra.mxu1 %vm1081_vm0, %v2792_v19  ;;  %18082 = vmatprep.mubr.msk.f32.mxu0 %vm19302_vm1, %v24153_v55 }
 0x586   : > { %18081 = vmatpush3.xpose.msk.msra.mxu0 %vm1081_vm0, %v2787_v60  ;;  %18095 = vmatprep.subr.mxu1 %v24153_v55 }
 0x587   : > { %18090 = vmatprep.subr.mxu0 %v24153_v55 }
 0x588   : > { %18088 = vmatmul.mubr.msk.f32.vlgmr.msra.gmra.mrb[142].mxu1 %vm1081_vm0, %v2398_v22 }
 0x589   : > { %v17642_v47 = vpop.f32.mrb[44].mxu0  ;;  %v17742_v45 = vpop.f32.mrb[48].mxu1  ;;  %18083 = vmatmul.mubr.msk.f32.vlgmr.msra.gmra.mrb[134].mxu0 %vm1081_vm0, %v2393_v2  ;;  %18097 = vmatprep.mubr.msk.f32.mxu1 %vm19302_vm1, %v24153_v55 }
 0x58a   : > { %v2802_v5 = vadd.f32 %v21067_v0, %v17742_v45  ;;  %v2402_v18 = vpop.f32.mrb[45].mxu0  ;;  %v2796_v52 = vpop.f32.mrb[49].mxu1  ;;  %18092 = vmatprep.mubr.msk.f32.mxu0 %vm19302_vm1, %v24153_v55  ;;  %v2408_v53 = vadd.f32 %v17642_v47, %v21048_v54 }
 0x58b   : > { %v2797_v27 = vadd.f32 %v21067_v0, %v2796_v52  ;;  %v2403_v13 = vadd.f32 %v21048_v54, %v2402_v18 }
 0x58c   : > { %18096 = vmatpush3.xpose.msk.msra.mxu1 %vm1081_vm0, %v2802_v5 }
 0x58d   : > { %18091 = vmatpush3.xpose.msk.msra.mxu0 %vm1081_vm0, %v2797_v27  ;;  %18105 = vmatprep.subr.mxu1 %v24153_v55 }
 0x58e   : > { %v17645_v28 = vpop.f32.mrb[46].mxu0  ;;  %v17745_v38 = vpop.f32.mrb[50].mxu1  ;;  %18100 = vmatprep.subr.mxu0 %v24153_v55 }
 0x58f   : > { %v2812_v15 = vadd.f32 %v21067_v0, %v17745_v38  ;;  %v2412_v58 = vpop.f32.mrb[47].mxu0  ;;  %v2806_v46 = vpop.f32.mrb[51].mxu1  ;;  %18098 = vmatmul.mubr.msk.f32.vlgmr.msra.gmra.mrb[144].mxu1 %vm1081_vm0, %v2408_v53  ;;  %v2418_v39 = vadd.f32 %v17645_v28, %v21048_v54  ;;  %v24238_v38 = vld [vmem:[#allocation14_spill] sm:$0xff] }
 0x590   : > { %v2807_v61 = vadd.f32 %v21067_v0, %v2806_v46  ;;  %18093 = vmatmul.mubr.msk.f32.vlgmr.msra.gmra.mrb[136].mxu0 %vm1081_vm0, %v2403_v13  ;;  %18107 = vmatprep.mubr.msk.f32.mxu1 %vm19302_vm1, %v24153_v55  ;;  %v2413_v43 = vadd.f32 %v21048_v54, %v2412_v58 }
 0x591   : > { %18106 = vmatpush3.xpose.msk.msra.mxu1 %vm1081_vm0, %v2812_v15  ;;  %18102 = vmatprep.mubr.msk.f32.mxu0 %vm19302_vm1, %v24153_v55 }
 0x592   : > { %18101 = vmatpush3.xpose.msk.msra.mxu0 %vm1081_vm0, %v2807_v61  ;;  %18115 = vmatprep.subr.mxu1 %v24153_v55  ;;  %v24239_v61 = vld [vmem:[#allocation15_spill] sm:$0xff] }
 0x593   : > { %18110 = vmatprep.subr.mxu0 %v24153_v55 }
 0x594   : > { %18108 = vmatmul.mubr.msk.f32.vlgmr.msra.gmra.mrb[146].mxu1 %vm1081_vm0, %v2418_v39 }
 0x595   : > { %v17648_v37 = vpop.f32.mrb[48].mxu0  ;;  %v17748_v1 = vpop.f32.mrb[52].mxu1  ;;  %18103 = vmatmul.mubr.msk.f32.vlgmr.msra.gmra.mrb[138].mxu0 %vm1081_vm0, %v2413_v43  ;;  %18117 = vmatprep.mubr.msk.f32.mxu1 %vm19302_vm1, %v24153_v55 }
 0x596   : > { %v2822_v21 = vadd.f32 %v21067_v0, %v17748_v1  ;;  %v2422_v11 = vpop.f32.mrb[49].mxu0  ;;  %v2816_v16 = vpop.f32.mrb[53].mxu1  ;;  %18112 = vmatprep.mubr.msk.f32.mxu0 %vm19302_vm1, %v24153_v55  ;;  %v2428_v49 = vadd.f32 %v17648_v37, %v21048_v54 }
 0x597   : > { %v2817_v12 = vadd.f32 %v21067_v0, %v2816_v16  ;;  %v2423_v35 = vadd.f32 %v21048_v54, %v2422_v11  ;;  %v19288_v11 = vld [vmem:[%s24050_s6] ss:$0 sm:$0xff] }
 0x598   : > { %18116 = vmatpush3.xpose.msk.msra.mxu1 %vm1081_vm0, %v2822_v21  ;;  %v16574_v21 = vld [vmem:[%s24052_s8] ss:$0 sm:$0xff] }
 0x599   : > { %18111 = vmatpush3.xpose.msk.msra.mxu0 %vm1081_vm0, %v2817_v12  ;;  %18125 = vmatprep.subr.mxu1 %v24153_v55 }
 0x59a   : > { %v17651_v6 = vpop.f32.mrb[50].mxu0  ;;  %v17751_v7 = vpop.f32.mrb[54].mxu1  ;;  %18120 = vmatprep.subr.mxu0 %v24153_v55 }
 0x59b   : > { %v2832_v62 = vadd.f32 %v21067_v0, %v17751_v7  ;;  %v2432_v51 = vpop.f32.mrb[51].mxu0  ;;  %v2826_v23 = vpop.f32.mrb[55].mxu1  ;;  %18118 = vmatmul.mubr.msk.f32.vlgmr.msra.gmra.mrb[148].mxu1 %vm1081_vm0, %v2428_v49  ;;  %v2438_v44 = vadd.f32 %v17651_v6, %v21048_v54  ;;  %v24242_v6 = vld [vmem:[#allocation22_spill] sm:$0xff] }
 0x59c   : > { %v2827_v29 = vadd.f32 %v21067_v0, %v2826_v23  ;;  %18113 = vmatmul.mubr.msk.f32.vlgmr.msra.gmra.mrb[140].mxu0 %vm1081_vm0, %v2423_v35  ;;  %18127 = vmatprep.mubr.msk.f32.mxu1 %vm19302_vm1, %v24153_v55  ;;  %v2433_v31 = vadd.f32 %v21048_v54, %v2432_v51 }
 0x59d   : > { %18126 = vmatpush3.xpose.msk.msra.mxu1 %vm1081_vm0, %v2832_v62  ;;  %18122 = vmatprep.mubr.msk.f32.mxu0 %vm19302_vm1, %v24153_v55 }
 0x59e   : > { %18121 = vmatpush3.xpose.msk.msra.mxu0 %vm1081_vm0, %v2827_v29  ;;  %18135 = vmatprep.subr.mxu1 %v24153_v55 }
 0x59f   : > { %18130 = vmatprep.subr.mxu0 %v24153_v55 }
 0x5a0   : > { %18128 = vmatmul.mubr.msk.f32.vlgmr.msra.gmra.mrb[150].mxu1 %vm1081_vm0, %v2438_v44 }
 0x5a1   : > { %v17654_v50 = vpop.f32.mrb[52].mxu0  ;;  %v17754_v8 = vpop.f32.mrb[56].mxu1  ;;  %18123 = vmatmul.mubr.msk.f32.vlgmr.msra.gmra.mrb[142].mxu0 %vm1081_vm0, %v2433_v31  ;;  %18137 = vmatprep.mubr.msk.f32.mxu1 %vm19302_vm1, %v24153_v55 }
 0x5a2   : > { %v2842_v20 = vadd.f32 %v21067_v0, %v17754_v8  ;;  %v2442_v26 = vpop.f32.mrb[53].mxu0  ;;  %v2836_v30 = vpop.f32.mrb[57].mxu1  ;;  %18132 = vmatprep.mubr.msk.f32.mxu0 %vm19302_vm1, %v24153_v55  ;;  %v2448_v59 = vadd.f32 %v17654_v50, %v21048_v54 }
 0x5a3   : > { %v2837_v57 = vadd.f32 %v21067_v0, %v2836_v30  ;;  %v2443_v63 = vadd.f32 %v21048_v54, %v2442_v26 }
 0x5a4   : > { %18136 = vmatpush3.xpose.msk.msra.mxu1 %vm1081_vm0, %v2842_v20 }
 0x5a5   : > { %18131 = vmatpush3.xpose.msk.msra.mxu0 %vm1081_vm0, %v2837_v57  ;;  %18145 = vmatprep.subr.mxu1 %v24153_v55 }
 0x5a6   : > { %v17657_v9 = vpop.f32.mrb[54].mxu0  ;;  %v17757_v25 = vpop.f32.mrb[58].mxu1  ;;  %18140 = vmatprep.subr.mxu0 %v24153_v55 }
 0x5a7   : > { %v2852_v40 = vadd.f32 %v21067_v0, %v17757_v25  ;;  %v2452_v32 = vpop.f32.mrb[55].mxu0  ;;  %v2846_v56 = vpop.f32.mrb[59].mxu1  ;;  %18138 = vmatmul.mubr.msk.f32.vlgmr.msra.gmra.mrb[152].mxu1 %vm1081_vm0, %v2448_v59  ;;  %v2458_v41 = vadd.f32 %v17657_v9, %v21048_v54 }
 0x5a8   : > { %v2847_v24 = vadd.f32 %v21067_v0, %v2846_v56  ;;  %18133 = vmatmul.mubr.msk.f32.vlgmr.msra.gmra.mrb[144].mxu0 %vm1081_vm0, %v2443_v63  ;;  %18147 = vmatprep.mubr.msk.f32.mxu1 %vm19302_vm1, %v24153_v55  ;;  %v2453_v42 = vadd.f32 %v21048_v54, %v2452_v32 }
 0x5a9   : > { %18146 = vmatpush3.xpose.msk.msra.mxu1 %vm1081_vm0, %v2852_v40  ;;  %18142 = vmatprep.mubr.msk.f32.mxu0 %vm19302_vm1, %v24153_v55 }
 0x5aa   : > { %18141 = vmatpush3.xpose.msk.msra.mxu0 %vm1081_vm0, %v2847_v24  ;;  %18155 = vmatprep.subr.mxu1 %v24153_v55 }
 0x5ab   : > { %18150 = vmatprep.subr.mxu0 %v24153_v55 }
 0x5ac   : > { %18148 = vmatmul.mubr.msk.f32.vlgmr.msra.gmra.mrb[154].mxu1 %vm1081_vm0, %v2458_v41 }
 0x5ad   : > { %18143 = vmatmul.mubr.msk.f32.vlgmr.msra.gmra.mrb[146].mxu0 %vm1081_vm0, %v2453_v42  ;;  %18157 = vmatprep.mubr.msk.f32.mxu1 %vm19302_vm1, %v24153_v55 }
 0x5ae   : > { %v17660_v34 = vpop.f32.mrb[56].mxu0  ;;  %v17760_v36 = vpop.f32.mrb[60].mxu1  ;;  %18152 = vmatprep.mubr.msk.f32.mxu0 %vm19302_vm1, %v24153_v55 }
 0x5af   : > { %v2862_v10 = vadd.f32 %v21067_v0, %v17760_v36  ;;  %v2462_v33 = vpop.f32.mrb[57].mxu0  ;;  %v2856_v4 = vpop.f32.mrb[61].mxu1  ;;  %v2468_v14 = vadd.f32 %v17660_v34, %v21048_v54 }
 0x5b0   : > { %v2857_v48 = vadd.f32 %v21067_v0, %v2856_v4  ;;  %v2463_v3 = vadd.f32 %v21048_v54, %v2462_v33 }
 0x5b1   : > { %18156 = vmatpush3.xpose.msk.msra.mxu1 %vm1081_vm0, %v2862_v10 }
 0x5b2   : > { %18151 = vmatpush3.xpose.msk.msra.mxu0 %vm1081_vm0, %v2857_v48  ;;  %v17663_v19 = vpop.f32.mrb[58].mxu0  ;;  %v17763_v17 = vpop.f32.mrb[62].mxu1  ;;  %18165 = vmatprep.subr.mxu1 %v24153_v55 }
 0x5b3   : > { %v2872_v60 = vadd.f32 %v21067_v0, %v17763_v17  ;;  %v2472_v22 = vpop.f32.mrb[59].mxu0  ;;  %v2866_v2 = vpop.f32.mrb[63].mxu1  ;;  %18160 = vmatprep.subr.mxu0 %v24153_v55  ;;  %v2478_v45 = vadd.f32 %v17663_v19, %v21048_v54 }
 0x5b4   : > { %v2867_v47 = vadd.f32 %v21067_v0, %v2866_v2  ;;  %18158 = vmatmul.mubr.msk.f32.vlgmr.msra.gmra.mrb[156].mxu1 %vm1081_vm0, %v2468_v14  ;;  %v2473_v52 = vadd.f32 %v21048_v54, %v2472_v22  ;;  %v19287_v54 = vld [vmem:[%s24048_s4] ss:$0 sm:$0xff] }
 0x5b5   : > { %18153 = vmatmul.mubr.msk.f32.vlgmr.msra.gmra.mrb[148].mxu0 %vm1081_vm0, %v2463_v3  ;;  %18166 = vmatpush3.xpose.msk.msra.mxu1 %vm1081_vm0, %v2872_v60  ;;  %v2488_v15 = vadd.f32 %v19287_v54, %v24238_v38  ;;  %v2483_v39 = vadd.f32 %v19287_v54, %v24239_v61  ;;  %v2493_v7 = vadd.f32 %v19287_v54, %v24242_v6 }
 0x5b6   : > { %v17766_v5 = vpop.f32.mrb[64].mxu1  ;;  %v17776_v18 = vpop.f32.mrb[60].mxu0  ;;  %18161 = vmatpush3.xpose.msk.msra.mxu0 %vm1081_vm0, %v2867_v47  ;;  %18167 = vmatprep.mubr.msk.f32.mxu1 %vm19302_vm1, %v24153_v55 }
 0x5b7   : > { %v2882_v27 = vadd.f32 %v21067_v0, %v17766_v5  ;;  %v2876_v53 = vpop.f32.mrb[65].mxu1  ;;  %v2970_v13 = vpop.f32.mrb[61].mxu0  ;;  %18162 = vmatprep.mubr.msk.f32.mxu0 %vm19302_vm1, %v24153_v55  ;;  %18175 = vmatprep.subr.mxu1 %v24153_v55  ;;  %v2976_v62 = vadd.f32 %v17776_v18, %v16574_v21 }
 0x5b8   : > { %v2877_v28 = vadd.f32 %v21067_v0, %v2876_v53  ;;  %18168 = vmatmul.mubr.msk.f32.vlgmr.msra.gmra.mrb[158].mxu1 %vm1081_vm0, %v2478_v45  ;;  %18170 = vmatprep.subr.mxu0 %v24153_v55  ;;  %v2971_v44 = vadd.f32 %v16574_v21, %v2970_v13 }
 0x5b9   : > { %18163 = vmatmul.mubr.msk.f32.vlgmr.msra.gmra.mrb[150].mxu0 %vm1081_vm0, %v2473_v52  ;;  %18176 = vmatpush3.xpose.msk.msra.mxu1 %vm1081_vm0, %v2882_v27 }
 0x5ba   : > { %v17769_v58 = vpop.f32.mrb[66].mxu1  ;;  %v21702_v46 = vpop.f32.mrb[62].mxu0  ;;  %18171 = vmatpush3.xpose.msk.msra.mxu0 %vm1081_vm0, %v2877_v28  ;;  %18177 = vmatprep.mubr.msk.f32.mxu1 %vm19302_vm1, %v24153_v55 }
 0x5bb   : > { %v2892_v43 = vadd.f32 %v21067_v0, %v17769_v58  ;;  %v2886_v37 = vpop.f32.mrb[67].mxu1  ;;  %v21709_v1 = vpop.f32.mrb[63].mxu0  ;;  %18172 = vmatprep.mubr.msk.f32.mxu0 %vm19302_vm1, %v24153_v55  ;;  %18185 = vmatprep.subr.mxu1 %v24153_v55  ;;  %v24240_v0 = vld [vmem:[#allocation21_spill] sm:$0xff] }
 0x5bc   : > { %v2887_v16 = vadd.f32 %v19288_v11, %v2886_v37  ;;  %18178 = vmatmul.mubr.msk.f32.vlgmr.msra.gmra.mrb[160].mxu1 %vm1081_vm0, %v2488_v15  ;;  %18180 = vmatprep.subr.mxu0 %v24153_v55  ;;  %v2498_v12 = vadd.f32 %v19287_v54, %v24240_v0 }
 0x5bd   : > { %18173 = vmatmul.mubr.msk.f32.vlgmr.msra.gmra.mrb[152].mxu0 %vm1081_vm0, %v2483_v39  ;;  %18186 = vmatpush3.xpose.msk.msra.mxu1 %vm1081_vm0, %v2892_v43 }
 0x5be   : > { %v21725_v49 = vpop.f32.mrb[64].mxu0  ;;  %v3361_v35 = vpop.f32.mrb[68].mxu1  ;;  %18181 = vmatpush3.xpose.msk.msra.mxu0 %vm1081_vm0, %v2887_v16  ;;  %18187 = vmatprep.mubr.msk.f32.mxu1 %vm19302_vm1, %v24153_v55 }
 0x5bf   : > { %24241 = vst [vmem:[#allocation6_spill] sm:$0xff] %v21725_v49  ;;  %v21731_v51 = vmul.f32 0.25, %v3361_v35  ;;  %v21733_v23 = vpop.f32.mrb[65].mxu0  ;;  %v17874_v29 = vpop.f32.mrb[69].mxu1  ;;  %18182 = vmatprep.mubr.msk.f32.mxu0 %vm19302_vm1, %v24153_v55  ;;  %18195 = vmatprep.subr.mxu1 %v24153_v55 }
 0x5c0   : > { %18188 = vmatmul.mubr.msk.f32.vlgmr.msra.gmra.mrb[162].mxu1 %vm1081_vm0, %v2498_v12  ;;  %18190 = vmatprep.subr.mxu0 %v24153_v55 }
 0x5c1   : > { %18183 = vmatmul.mubr.msk.f32.vlgmr.msra.gmra.mrb[154].mxu0 %vm1081_vm0, %v2493_v7  ;;  %18196 = vmatpush3.msra.mxu1 %v2976_v62  ;;  %v8218_v31 = vsel %vm8217_vm2, %v21731_v51, -inf }
 0x5c2   : > { %8219 = vmax.xlane.f32.xlu1 %v8218_v31  ;;  %v21743_v50 = vpop.f32.mrb[66].mxu0  ;;  %v3437_v8 = vpop.f32.mrb[70].mxu1  ;;  %18191 = vmatpush3.msra.mxu0 %v2971_v44 }
 0x5c3   : > { %24243 = vst [vmem:[#allocation7_spill] sm:$0xff] %v21743_v50  ;;  %v21745_v20 = vmul.f32 0.25, %v3437_v8  ;;  %v21747_v26 = vpop.f32.mrb[67].mxu0  ;;  %v17879_v30 = vpop.f32.mrb[71].mxu1  ;;  %18192 = vmatprep.mubr.msk.f32.mxu0 %vm19302_vm1, %v24153_v55  ;;  %18200 = vmatprep.subr.mxu0 %v24153_v55 }
 0x5c4   : > { %24244 = vst [vmem:[#allocation8_spill] sm:$0xff] %v21747_v26  ;;  %18197 = vmatprep.mubr.msk.f32.mxu1 %vm19302_vm1, %v24153_v55  ;;  %18205 = vmatprep.subr.mxu1 %v24153_v55 }
 0x5c5   : > { %v8221_v57 = vsel %vm8217_vm2, %v21745_v20, -inf }
 0x5c6   : > { %8222 = vmax.xlane.f32.xlu0 %v8221_v57  ;;  %v21757_v59 = vpop.f32.mrb[68].mxu0  ;;  %v3513_v63 = vpop.f32.mrb[72].mxu1 }
 0x5c7   : > { %24245 = vst [vmem:[#allocation9_spill] sm:$0xff] %v21757_v59  ;;  %v21759_v9 = vmul.f32 0.25, %v3513_v63  ;;  %v21761_v25 = vpop.f32.mrb[69].mxu0  ;;  %v17884_v40 = vpop.f32.mrb[73].mxu1 }
 0x5c8   : > { %24246 = vst [vmem:[#allocation10_spill] sm:$0xff] %v21761_v25 }
 0x5c9   : > { %v8224_v32 = vsel %vm8217_vm2, %v21759_v9, -inf }
 0x5ca   : > { %8225 = vmax.xlane.f32.xlu1 %v8224_v32  ;;  %v21765_v56 = vpop.f32.mrb[70].mxu0  ;;  %v3589_v24 = vpop.f32.mrb[74].mxu1 }
 0x5cb   : > { %24247 = vst [vmem:[#allocation25_spill] sm:$0xff] %v21765_v56  ;;  %v21767_v41 = vmul.f32 0.25, %v3589_v24  ;;  %v21769_v42 = vpop.f32.mrb[71].mxu0  ;;  %v17889_v34 = vpop.f32.mrb[75].mxu1 }
 0x5cc   : > { %24248 = vst [vmem:[#allocation24_spill] sm:$0xff] %v21769_v42 }
 0x5cd   : > { %v8227_v36 = vsel %vm8217_vm2, %v21767_v41, -inf }
 0x5ce   : > { %8228 = vmax.xlane.f32.xlu0 %v8227_v36  ;;  %v21773_v10 = vpop.f32.mrb[72].mxu0  ;;  %v3665_v33 = vpop.f32.mrb[76].mxu1 }
 0x5cf   : > { %24249 = vst [vmem:[#allocation11_spill] sm:$0xff] %v21773_v10  ;;  %v21775_v4 = vmul.f32 0.25, %v3665_v33  ;;  %v21777_v48 = vpop.f32.mrb[73].mxu0  ;;  %v17894_v14 = vpop.f32.mrb[77].mxu1 }
 0x5d0   : > { %24250 = vst [vmem:[#allocation12_spill] sm:$0xff] %v21777_v48 }
 0x5d1   : > { %v8230_v19 = vsel %vm8217_vm2, %v21775_v4, -inf }
 0x5d2   : > { %8231 = vmax.xlane.f32.xlu1 %v8230_v19  ;;  %v21781_v17 = vpop.f32.mrb[74].mxu0  ;;  %v3741_v3 = vpop.f32.mrb[78].mxu1 }
 0x5d3   : > { %24251 = vst [vmem:[#allocation23_spill] sm:$0xff] %v21781_v17  ;;  %v21783_v60 = vmul.f32 0.25, %v3741_v3  ;;  %v21785_v22 = vpop.f32.mrb[75].mxu0  ;;  %v17899_v2 = vpop.f32.mrb[79].mxu1 }
 0x5d4   : > { %24252 = vst [vmem:[#allocation29_spill] sm:$0xff] %v21785_v22 }
 0x5d5   : > { %v8233_v47 = vsel %vm8217_vm2, %v21783_v60, -inf }
 0x5d6   : > { %8234 = vmax.xlane.f32.xlu0 %v8233_v47  ;;  %v21789_v45 = vpop.f32.mrb[76].mxu0  ;;  %v3817_v5 = vpop.f32.mrb[80].mxu1 }
 0x5d7   : > { %24253 = vst [vmem:[#allocation13_spill] sm:$0xff] %v21789_v45  ;;  %v21791_v18 = vmul.f32 0.25, %v3817_v5  ;;  %v21793_v52 = vpop.f32.mrb[77].mxu0  ;;  %v17904_v27 = vpop.f32.mrb[81].mxu1 }
 0x5d8   : > { %24254 = vst [vmem:[#allocation16_spill] sm:$0xff] %v21793_v52 }
 0x5d9   : > { %v8236_v53 = vsel %vm8217_vm2, %v21791_v18, -inf }
 0x5da   : > { %8237 = vmax.xlane.f32.xlu1 %v8236_v53  ;;  %v21797_v13 = vpop.f32.mrb[78].mxu0  ;;  %v3893_v28 = vpop.f32.mrb[82].mxu1 }
 0x5db   : > { %24255 = vst [vmem:[#allocation28_spill] sm:$0xff] %v21797_v13  ;;  %v21799_v54 = vmul.f32 0.25, %v3893_v28  ;;  %v21801_v38 = vpop.f32.mrb[79].mxu0  ;;  %v17909_v15 = vpop.f32.mrb[83].mxu1 }
 0x5dc   : > { %24256 = vst [vmem:[#allocation27_spill] sm:$0xff] %v21801_v38 }
 0x5dd   : > { %v8239_v58 = vsel %vm8217_vm2, %v21799_v54, -inf }
 0x5de   : > { %8240 = vmax.xlane.f32.xlu0 %v8239_v58  ;;  %v21805_v61 = vpop.f32.mrb[80].mxu0  ;;  %v3969_v39 = vpop.f32.mrb[84].mxu1 }
 0x5df   : > { %24257 = vst [vmem:[#allocation17_spill] sm:$0xff] %v21805_v61  ;;  %v21807_v43 = vmul.f32 0.25, %v3969_v39  ;;  %v21809_v37 = vpop.f32.mrb[81].mxu0  ;;  %v17914_v21 = vpop.f32.mrb[85].mxu1 }
 0x5e0   : > { %24258 = vst [vmem:[#allocation26_spill] sm:$0xff] %v21809_v37 }
 0x5e1   : > { %v8242_v11 = vsel %vm8217_vm2, %v21807_v43, -inf }
 0x5e2   : > { %8243 = vmax.xlane.f32.xlu1 %v8242_v11  ;;  %v21813_v16 = vpop.f32.mrb[82].mxu0  ;;  %v4045_v0 = vpop.f32.mrb[86].mxu1 }
 0x5e3   : > { %24259 = vst [vmem:[#allocation33_spill] sm:$0xff] %v21813_v16  ;;  %v21815_v12 = vmul.f32 0.25, %v4045_v0  ;;  %v21817_v35 = vpop.f32.mrb[83].mxu0  ;;  %v17919_v6 = vpop.f32.mrb[87].mxu1 }
 0x5e4   : > { %24260 = vst [vmem:[#allocation32_spill] sm:$0xff] %v21817_v35 }
 0x5e5   : > { %v8245_v7 = vsel %vm8217_vm2, %v21815_v12, -inf }
 0x5e6   : > { %8246 = vmax.xlane.f32.xlu0 %v8245_v7  ;;  %v21821_v62 = vpop.f32.mrb[84].mxu0  ;;  %v4121_v29 = vpop.f32.mrb[88].mxu1 }
 0x5e7   : > { %24261 = vst [vmem:[#allocation31_spill] sm:$0xff] %v21821_v62  ;;  %v21823_v44 = vmul.f32 0.25, %v4121_v29  ;;  %v21825_v31 = vpop.f32.mrb[85].mxu0  ;;  %v17924_v8 = vpop.f32.mrb[89].mxu1 }
 0x5e8   : > { %24262 = vst [vmem:[#allocation30_spill] sm:$0xff] %v21825_v31 }
 0x5e9   : > { %v8248_v30 = vsel %vm8217_vm2, %v21823_v44, -inf }
 0x5ea   : > { %8249 = vmax.xlane.f32.xlu1 %v8248_v30  ;;  %v21829_v57 = vpop.f32.mrb[86].mxu0  ;;  %v4197_v63 = vpop.f32.mrb[90].mxu1 }
 0x5eb   : > { %24263 = vst [vmem:[#allocation37_spill] sm:$0xff] %v21829_v57  ;;  %v21831_v40 = vmul.f32 0.25, %v4197_v63  ;;  %v21833_v32 = vpop.f32.mrb[87].mxu0  ;;  %v17929_v24 = vpop.f32.mrb[91].mxu1 }
 0x5ec   : > { %24264 = vst [vmem:[#allocation39_spill] sm:$0xff] %v21833_v32 }
 0x5ed   : > { %v8251_v34 = vsel %vm8217_vm2, %v21831_v40, -inf }
 0x5ee   : > { %8252 = vmax.xlane.f32.xlu0 %v8251_v34  ;;  %v21837_v36 = vpop.f32.mrb[88].mxu0  ;;  %v4273_v33 = vpop.f32.mrb[92].mxu1 }
 0x5ef   : > { %24265 = vst [vmem:[#allocation36_spill] sm:$0xff] %v21837_v36  ;;  %v21839_v14 = vmul.f32 0.25, %v4273_v33  ;;  %v21841_v19 = vpop.f32.mrb[89].mxu0  ;;  %v17934_v3 = vpop.f32.mrb[93].mxu1 }
 0x5f0   : > { %24266 = vst [vmem:[#allocation35_spill] sm:$0xff] %v21841_v19 }
 0x5f1   : > { %v8254_v2 = vsel %vm8217_vm2, %v21839_v14, -inf }
 0x5f2   : > { %8255 = vmax.xlane.f32.xlu1 %v8254_v2  ;;  %v21845_v47 = vpop.f32.mrb[90].mxu0  ;;  %v4349_v5 = vpop.f32.mrb[94].mxu1 }
 0x5f3   : > { %24267 = vst [vmem:[#allocation19_spill] sm:$0xff] %v21845_v47  ;;  %v21847_v27 = vmul.f32 0.25, %v4349_v5  ;;  %v21849_v53 = vpop.f32.mrb[91].mxu0  ;;  %v17939_v28 = vpop.f32.mrb[95].mxu1 }
 0x5f4   : > { %24268 = vst [vmem:[#allocation34_spill] sm:$0xff] %v21849_v53 }
 0x5f5   : > { %v8257_v15 = vsel %vm8217_vm2, %v21847_v27, -inf }
 0x5f6   : > { %8258 = vmax.xlane.f32.xlu0 %v8257_v15  ;;  %v21853_v58 = vpop.f32.mrb[92].mxu0  ;;  %v4425_v39 = vpop.f32.mrb[96].mxu1 }
 0x5f7   : > { %24269 = vst [vmem:[#allocation41_spill] sm:$0xff] %v21853_v58  ;;  %v21855_v21 = vmul.f32 0.25, %v4425_v39  ;;  %v21857_v11 = vpop.f32.mrb[93].mxu0  ;;  %v17944_v0 = vpop.f32.mrb[97].mxu1 }
 0x5f8   : > { %24270 = vst [vmem:[#allocation40_spill] sm:$0xff] %v21857_v11 }
 0x5f9   : > { %v8260_v6 = vsel %vm8217_vm2, %v21855_v21, -inf }
 0x5fa   : > { %8261 = vmax.xlane.f32.xlu1 %v8260_v6  ;;  %v21861_v7 = vpop.f32.mrb[94].mxu0  ;;  %v4501_v29 = vpop.f32.mrb[98].mxu1 }
 0x5fb   : > { %24271 = vst [vmem:[#allocation38_spill] sm:$0xff] %v21861_v7  ;;  %v21863_v8 = vmul.f32 0.25, %v4501_v29  ;;  %v21865_v30 = vpop.f32.mrb[95].mxu0  ;;  %v17949_v63 = vpop.f32.mrb[99].mxu1 }
 0x5fc   : > { %24272 = vst [vmem:[#allocation18_spill] sm:$0xff] %v21865_v30 }
 0x5fd   : > { %v8263_v24 = vsel %vm8217_vm2, %v21863_v8, -inf }
 0x5fe   : > { %8264 = vmax.xlane.f32.xlu0 %v8263_v24  ;;  %v21869_v34 = vpop.f32.mrb[96].mxu0  ;;  %v4577_v33 = vpop.f32.mrb[100].mxu1 }
 0x5ff   : > { %24273 = vst [vmem:[#allocation20_spill] sm:$0xff] %v21869_v34  ;;  %v21871_v3 = vmul.f32 0.25, %v4577_v33  ;;  %v21873_v2 = vpop.f32.mrb[97].mxu0  ;;  %v17954_v5 = vpop.f32.mrb[101].mxu1 }
 0x600   : > { %24274 = vst [vmem:[#allocation42_spill] sm:$0xff] %v21873_v2 }
 0x601   : > { %v8266_v28 = vsel %vm8217_vm2, %v21871_v3, -inf }
 0x602   : > { %8267 = vmax.xlane.f32.xlu1 %v8266_v28  ;;  %v21877_v15 = vpop.f32.mrb[98].mxu0  ;;  %v4653_v39 = vpop.f32.mrb[102].mxu1 }
 0x603   : > { %24275 = vst [vmem:[#allocation43_spill] sm:$0xff] %v21877_v15  ;;  %v21879_v0 = vmul.f32 0.25, %v4653_v39  ;;  %v21881_v6 = vpop.f32.mrb[99].mxu0  ;;  %v17959_v29 = vpop.f32.mrb[103].mxu1 }
 0x604   : > { %24276 = vst [vmem:[#allocation44_spill] sm:$0xff] %v21881_v6 }
 0x605   : > { %v8269_v63 = vsel %vm8217_vm2, %v21879_v0, -inf }
 0x606   : > { %8270 = vmax.xlane.f32.xlu0 %v8269_v63  ;;  %v21885_v24 = vpop.f32.mrb[100].mxu0  ;;  %v4729_v33 = vpop.f32.mrb[104].mxu1 }
 0x607   : > { %24277 = vst [vmem:[#allocation45_spill] sm:$0xff] %v21885_v24  ;;  %v21887_v5 = vmul.f32 0.25, %v4729_v33  ;;  %v21889_v2 = vpop.f32.mrb[101].mxu0  ;;  %v17964_v28 = vpop.f32.mrb[105].mxu1 }
 0x608   : > { %24278 = vst [vmem:[#allocation46_spill] sm:$0xff] %v21889_v2 }
 0x609   : > { %v8272_v15 = vsel %vm8217_vm2, %v21887_v5, -inf }
 0x60a   : > { %8273 = vmax.xlane.f32.xlu1 %v8272_v15  ;;  %v21893_v39 = vpop.f32.mrb[102].mxu0  ;;  %v4805_v6 = vpop.f32.mrb[106].mxu1 }
 0x60b   : > { %24279 = vst [vmem:[#allocation47_spill] sm:$0xff] %v21893_v39  ;;  %v21895_v29 = vmul.f32 0.25, %v4805_v6  ;;  %v21897_v34 = vpop.f32.mrb[103].mxu0  ;;  %v17969_v63 = vpop.f32.mrb[107].mxu1 }
 0x60c   : > { %24280 = vst [vmem:[#allocation48_spill] sm:$0xff] %v21897_v34 }
 0x60d   : > { %v8275_v24 = vsel %vm8217_vm2, %v21895_v29, -inf }
 0x60e   : > { %8276 = vmax.xlane.f32.xlu0 %v8275_v24  ;;  %v21901_v33 = vpop.f32.mrb[104].mxu0  ;;  %v4881_v2 = vpop.f32.mrb[108].mxu1 }
 0x60f   : > { %24281 = vst [vmem:[#allocation49_spill] sm:$0xff] %v21901_v33  ;;  %v21903_v28 = vmul.f32 0.25, %v4881_v2  ;;  %v21905_v7 = vpop.f32.mrb[105].mxu0  ;;  %v17974_v15 = vpop.f32.mrb[109].mxu1 }
 0x610   : > { %24282 = vst [vmem:[#allocation50_spill] sm:$0xff] %v21905_v7 }
 0x611   : > { %v8278_v39 = vsel %vm8217_vm2, %v21903_v28, -inf }
 0x612   : > { %8279 = vmax.xlane.f32.xlu1 %v8278_v39  ;;  %v21909_v6 = vpop.f32.mrb[106].mxu0  ;;  %v4957_v34 = vpop.f32.mrb[110].mxu1 }
 0x613   : > { %24283 = vst [vmem:[#allocation51_spill] sm:$0xff] %v21909_v6  ;;  %v21911_v63 = vmul.f32 0.25, %v4957_v34  ;;  %v21913_v30 = vpop.f32.mrb[107].mxu0  ;;  %v17979_v24 = vpop.f32.mrb[111].mxu1 }
 0x614   : > { %24284 = vst [vmem:[#allocation52_spill] sm:$0xff] %v21913_v30 }
 0x615   : > { %v8281_v33 = vsel %vm8217_vm2, %v21911_v63, -inf }
 0x616   : > { %8282 = vmax.xlane.f32.xlu0 %v8281_v33  ;;  %v21917_v2 = vpop.f32.mrb[108].mxu0  ;;  %v5033_v7 = vpop.f32.mrb[112].mxu1 }
 0x617   : > { %24285 = vst [vmem:[#allocation2_spill] sm:$0xff] %v21917_v2  ;;  %v21919_v15 = vmul.f32 0.25, %v5033_v7  ;;  %v21921_v58 = vpop.f32.mrb[109].mxu0  ;;  %v17984_v39 = vpop.f32.mrb[113].mxu1 }
 0x618   : > { %24286 = vst [vmem:[#allocation3_spill] sm:$0xff] %v21921_v58 }
 0x619   : > { %v8284_v6 = vsel %vm8217_vm2, %v21919_v15, -inf }
 0x61a   : > { %8285 = vmax.xlane.f32.xlu1 %v8284_v6  ;;  %v21925_v34 = vpop.f32.mrb[110].mxu0  ;;  %v5109_v30 = vpop.f32.mrb[114].mxu1 }
 0x61b   : > { %24287 = vst [vmem:[#allocation4_spill] sm:$0xff] %v21925_v34  ;;  %v21927_v24 = vmul.f32 0.25, %v5109_v30  ;;  %v21929_v11 = vpop.f32.mrb[111].mxu0  ;;  %v17989_v33 = vpop.f32.mrb[115].mxu1 }
 0x61c   : > { %24288 = vst [vmem:[#allocation5_spill] sm:$0xff] %v21929_v11 }
 0x61d   : > { %v8287_v2 = vsel %vm8217_vm2, %v21927_v24, -inf }
 0x61e   : > { %8288 = vmax.xlane.f32.xlu0 %v8287_v2  ;;  %v21933_v7 = vpop.f32.mrb[112].mxu0  ;;  %v5185_v58 = vpop.f32.mrb[116].mxu1 }
 0x61f   : > { %24289 = vst [vmem:[#allocation14_spill] sm:$0xff] %v21933_v7  ;;  %v21935_v39 = vmul.f32 0.25, %v5185_v58  ;;  %v21937_v47 = vpop.f32.mrb[113].mxu0  ;;  %v17994_v6 = vpop.f32.mrb[117].mxu1 }
 0x620   : > { %24290 = vst [vmem:[#allocation15_spill] sm:$0xff] %v21937_v47 }
 0x621   : > { %v8290_v34 = vsel %vm8217_vm2, %v21935_v39, -inf }
 0x622   : > { %8291 = vmax.xlane.f32.xlu1 %v8290_v34  ;;  %v21941_v30 = vpop.f32.mrb[114].mxu0  ;;  %v5261_v11 = vpop.f32.mrb[118].mxu1 }
 0x623   : > { %24291 = vst [vmem:[#allocation21_spill] sm:$0xff] %v21941_v30  ;;  %v21943_v33 = vmul.f32 0.25, %v5261_v11  ;;  %v21945_v53 = vpop.f32.mrb[115].mxu0  ;;  %v17999_v2 = vpop.f32.mrb[119].mxu1 }
 0x624   : > { %24292 = vst [vmem:[#allocation22_spill] sm:$0xff] %v21945_v53 }
 0x625   : > { %v8293_v7 = vsel %vm8217_vm2, %v21943_v33, -inf }
 0x626   : > { %8294 = vmax.xlane.f32.xlu0 %v8293_v7  ;;  %v21949_v58 = vpop.f32.mrb[116].mxu0  ;;  %v5337_v47 = vpop.f32.mrb[120].mxu1 }
 0x627   : > { %24293 = vst [vmem:[#allocation53_spill] sm:$0xff] %v21949_v58  ;;  %v21951_v6 = vmul.f32 0.25, %v5337_v47  ;;  %v21953_v36 = vpop.f32.mrb[117].mxu0  ;;  %v18004_v34 = vpop.f32.mrb[121].mxu1 }
 0x628   : > { %24294 = vst [vmem:[#allocation54_spill] sm:$0xff] %v21953_v36 }
 0x629   : > { %v8296_v30 = vsel %vm8217_vm2, %v21951_v6, -inf }
 0x62a   : > { %8297 = vmax.xlane.f32.xlu1 %v8296_v30  ;;  %v21957_v11 = vpop.f32.mrb[118].mxu0  ;;  %v5413_v53 = vpop.f32.mrb[122].mxu1 }
 0x62b   : > { %24295 = vst [vmem:[#allocation55_spill] sm:$0xff] %v21957_v11  ;;  %v21959_v2 = vmul.f32 0.25, %v5413_v53  ;;  %v21961_v19 = vpop.f32.mrb[119].mxu0  ;;  %v18009_v7 = vpop.f32.mrb[123].mxu1 }
 0x62c   : > { %24296 = vst [vmem:[#allocation56_spill] sm:$0xff] %v21961_v19 }
 0x62d   : > { %v8299_v58 = vsel %vm8217_vm2, %v21959_v2, -inf }
 0x62e   : > { %8300 = vmax.xlane.f32.xlu0 %v8299_v58  ;;  %v21965_v47 = vpop.f32.mrb[120].mxu0 }
 0x62f   : > { %24297 = vst [vmem:[#allocation57_spill] sm:$0xff] %v21965_v47  ;;  %v21967_v36 = vpop.f32.mrb[121].mxu0 }
 0x630   : > { %24298 = vst [vmem:[#allocation58_spill] sm:$0xff] %v21967_v36  ;;  %v5489_v34 = vpop.f32.mrb[124].mxu1 }
 0x631   : > { %v21969_v57 = vmul.f32 0.25, %v5489_v34  ;;  %v18014_v30 = vpop.f32.mrb[125].mxu1 }
 0x632   : > { %v21971_v32 = vpop.f32.mrb[122].mxu0 }
 0x633   : > { %24299 = vst [vmem:[#allocation59_spill] sm:$0xff] %v21971_v32  ;;  %v21973_v11 = vpop.f32.mrb[123].mxu0  ;;  %v8302_v53 = vsel %vm8217_vm2, %v21969_v57, -inf }
 0x634   : > { %24300 = vst [vmem:[#allocation60_spill] sm:$0xff] %v21973_v11  ;;  %8303 = vmax.xlane.f32.xlu1 %v8302_v53  ;;  %v5565_v7 = vpop.f32.mrb[126].mxu1 }
 0x635   : > { %v21977_v19 = vmul.f32 0.25, %v5565_v7  ;;  %v18019_v58 = vpop.f32.mrb[127].mxu1 }
 0x637   : > { %v8305_v47 = vsel %vm8217_vm2, %v21977_v19, -inf }
 0x638   : > { %8306 = vmax.xlane.f32.xlu0 %v8305_v47  ;;  %v5641_v36 = vpop.f32.mrb[128].mxu1 }
 0x639   : > { %v21981_v34 = vmul.f32 0.25, %v5641_v36  ;;  %v18024_v30 = vpop.f32.mrb[129].mxu1 }
 0x63b   : > { %v8308_v32 = vsel %vm8217_vm2, %v21981_v34, -inf }
 0x63c   : > { %8309 = vmax.xlane.f32.xlu1 %v8308_v32  ;;  %v5717_v11 = vpop.f32.mrb[130].mxu1 }
 0x63d   : > { %v21985_v31 = vmul.f32 0.25, %v5717_v11  ;;  %v18029_v53 = vpop.f32.mrb[131].mxu1 }
 0x63f   : > { %v5793_v62 = vpop.f32.mrb[124].mxu0  ;;  %v8311_v7 = vsel %vm8217_vm2, %v21985_v31, -inf }
 0x640   : > { %v21989_v58 = vmul.f32 0.25, %v5793_v62  ;;  %8312 = vmax.xlane.f32.xlu0 %v8311_v7  ;;  %v18034_v47 = vpop.f32.mrb[125].mxu0  ;;  %v5869_v35 = vpop.f32.mrb[132].mxu1 }
 0x641   : > { %v21991_v36 = vmul.f32 0.25, %v5869_v35  ;;  %v18039_v30 = vpop.f32.mrb[133].mxu1 }
 0x642   : > { %v8314_v16 = vsel %vm8217_vm2, %v21989_v58, -inf }
 0x643   : > { %8315 = vmax.xlane.f32.xlu1 %v8314_v16  ;;  %v8317_v32 = vsel %vm8217_vm2, %v21991_v36, -inf }
 0x644   : > { %8318 = vmax.xlane.f32.xlu0 %v8317_v32  ;;  %v5945_v11 = vpop.f32.mrb[126].mxu0  ;;  %v6021_v53 = vpop.f32.mrb[134].mxu1 }
 0x645   : > { %v21997_v61 = vmul.f32 0.25, %v5945_v11  ;;  %v21999_v62 = vmul.f32 0.25, %v6021_v53  ;;  %v18044_v7 = vpop.f32.mrb[127].mxu0  ;;  %v18049_v47 = vpop.f32.mrb[135].mxu1 }
 0x647   : > { %v8323_v35 = vsel %vm8217_vm2, %v21999_v62, -inf  ;;  %v8320_v30 = vsel %vm8217_vm2, %v21997_v61, -inf }
 0x648   : > { %8324 = vmax.xlane.f32.xlu0 %v8323_v35  ;;  %8321 = vmax.xlane.f32.xlu1 %v8320_v30 }
 0x64a   : > { %v6173_v16 = vpop.f32.mrb[136].mxu1 }
 0x64b   : > { %v22005_v37 = vmul.f32 0.25, %v6173_v16  ;;  %v6097_v32 = vpop.f32.mrb[128].mxu0  ;;  %v18059_v13 = vpop.f32.mrb[137].mxu1 }
 0x64c   : > { %v22007_v38 = vmul.f32 0.25, %v6097_v32  ;;  %v18054_v11 = vpop.f32.mrb[129].mxu0 }
 0x64d   : > { %v8329_v53 = vsel %vm8217_vm2, %v22005_v37, -inf }
 0x64e   : > { %8330 = vmax.xlane.f32.xlu0 %v8329_v53  ;;  %v8326_v7 = vsel %vm8217_vm2, %v22007_v38, -inf }
 0x64f   : > { %v8220_v47 = vpop.xlane.xlu1 %8219  ;;  %v6325_v45 = vpop.f32.mrb[138].mxu1  ;;  %8327 = vmax.xlane.f32.xlu1 %v8326_v7 }
 0x650   : > { %v8410_v35 = vsub.f32 %v21731_v51, %v8220_v47  ;;  %v22014_v30 = vmul.f32 0.25, %v6325_v45  ;;  %v6249_v16 = vpop.f32.mrb[130].mxu0  ;;  %v18069_v52 = vpop.f32.mrb[139].mxu1 }
 0x651   : > { %v22016_v13 = vmul.f32 0.25, %v6249_v16  ;;  %v18064_v32 = vpop.f32.mrb[131].mxu0 }
 0x652   : > { %v8474_v11 = vmul.f32 1.442695, %v8410_v35  ;;  %v8335_v17 = vsel %vm8217_vm2, %v22014_v30, -inf }
 0x653   : > { %v8223_v53 = vpop.xlane.xlu0 %8222  ;;  %8336 = vmax.xlane.f32.xlu0 %v8335_v17  ;;  %v8332_v22 = vsel %vm8217_vm2, %v22016_v13, -inf }
 0x654   : > { %v8411_v7 = vsub.f32 %v21745_v20, %v8223_v53  ;;  %8333 = vmax.xlane.f32.xlu1 %v8332_v22  ;;  %18901 = vpow2.f32 %v8474_v11 }
 0x656   : > { %v8476_v51 = vmul.f32 1.442695, %v8411_v7  ;;  %v6477_v45 = vpop.f32.mrb[140].mxu1 }
 0x657   : > { %v22023_v47 = vmul.f32 0.25, %v6477_v45  ;;  %v8226_v52 = vpop.xlane.xlu1 %8225  ;;  %v6401_v16 = vpop.f32.mrb[132].mxu0 }
 0x658   : > { %v8412_v35 = vsub.f32 %v21759_v9, %v8226_v52  ;;  %v22026_v32 = vmul.f32 0.25, %v6401_v16  ;;  %v18079_v10 = vpop.f32.mrb[141].mxu1  ;;  %v18074_v48 = vpop.f32.mrb[133].mxu0  ;;  %18903 = vpow2.f32 %v8476_v51 }
 0x659   : > { %v8341_v17 = vsel %vm8217_vm2, %v22023_v47, -inf }
 0x65a   : > { %v8478_v56 = vmul.f32 1.442695, %v8412_v35  ;;  %8342 = vmax.xlane.f32.xlu0 %v8341_v17  ;;  %v8338_v20 = vsel %vm8217_vm2, %v22026_v32, -inf }
 0x65b   : > { %v8229_v22 = vpop.xlane.xlu0 %8228  ;;  %v6629_v11 = vpop.f32.mrb[142].mxu1  ;;  %8339 = vmax.xlane.f32.xlu1 %v8338_v20 }
 0x65c   : > { %v8413_v53 = vsub.f32 %v21767_v41, %v8229_v22  ;;  %v22033_v7 = vmul.f32 0.25, %v6629_v11  ;;  %v6553_v9 = vpop.f32.mrb[134].mxu0  ;;  %v18089_v45 = vpop.f32.mrb[143].mxu1  ;;  %18905 = vpow2.f32 %v8478_v56 }
 0x65d   : > { %v22035_v10 = vmul.f32 0.25, %v6553_v9  ;;  %v18084_v48 = vpop.f32.mrb[135].mxu0 }
 0x65e   : > { %v8480_v51 = vmul.f32 1.442695, %v8413_v53  ;;  %v8347_v52 = vsel %vm8217_vm2, %v22033_v7, -inf  ;;  %v22039_v16 = vpop.eup %18901 }
 0x65f   : > { %v8232_v35 = vpop.xlane.xlu1 %8231  ;;  %8348 = vmax.xlane.f32.xlu0 %v8347_v52  ;;  %v8344_v17 = vsel %vm8217_vm2, %v22035_v10, -inf  ;;  %v8602_v22 = vsel %vm8217_vm2, %v22039_v16, 0.0 }
 0x660   : > { %v8414_v41 = vsub.f32 %v21775_v4, %v8232_v35  ;;  %8345 = vmax.xlane.f32.xlu1 %v8344_v17  ;;  %18907 = vpow2.f32 %v8480_v51 }
 0x662   : > { %v8482_v20 = vmul.f32 1.442695, %v8414_v41  ;;  %v6781_v56 = vpop.f32.mrb[144].mxu1  ;;  %v22046_v11 = vpop.eup %18903 }
 0x663   : > { %v8235_v53 = vpop.xlane.xlu0 %8234  ;;  %8603 = vadd.xlane.f32.xlu0 %v8602_v22  ;;  %v6705_v9 = vpop.f32.mrb[136].mxu0  ;;  %v22051_v4 = vmul.f32 0.25, %v6781_v56  ;;  %v8605_v35 = vsel %vm8217_vm2, %v22046_v11, 0.0 }
 0x664   : > { %v8415_v45 = vsub.f32 %v21783_v60, %v8235_v53  ;;  %v22049_v48 = vmul.f32 0.25, %v6705_v9  ;;  %v18099_v52 = vpop.f32.mrb[145].mxu1  ;;  %v18094_v42 = vpop.f32.mrb[137].mxu0  ;;  %18909 = vpow2.f32 %v8482_v20 }
 0x665   : > { %v8353_v52 = vsel %vm8217_vm2, %v22051_v4, -inf }
 0x666   : > { %v8484_v51 = vmul.f32 1.442695, %v8415_v45  ;;  %v8350_v17 = vsel %vm8217_vm2, %v22049_v48, -inf  ;;  %v22057_v41 = vpop.eup %18905 }
 0x667   : > { %v8238_v22 = vpop.xlane.xlu1 %8237  ;;  %8606 = vadd.xlane.f32.xlu0 %v8605_v35  ;;  %v6933_v59 = vpop.f32.mrb[146].mxu1  ;;  %8351 = vmax.xlane.f32.xlu1 %v8350_v17  ;;  %v8608_v45 = vsel %vm8217_vm2, %v22057_v41, 0.0 }
 0x668   : > { %v8416_v60 = vsub.f32 %v21791_v18, %v8238_v22  ;;  %v6857_v53 = vpop.f32.mrb[138].mxu0  ;;  %v18109_v42 = vpop.f32.mrb[147].mxu1  ;;  %18911 = vpow2.f32 %v8484_v51  ;;  %v22069_v17 = vmul.f32 0.25, %v6933_v59 }
 0x669   : > { %v18104_v20 = vpop.f32.mrb[139].mxu0  ;;  %v22060_v9 = vmul.f32 0.25, %v6857_v53 }
 0x66a   : > { %v8486_v56 = vmul.f32 1.442695, %v8416_v60  ;;  %v22066_v25 = vpop.eup %18907 }
 0x66b   : > { %24301 = vst [vmem:[#allocation61_spill] sm:$0xff] %v22066_v25  ;;  %v8241_v35 = vpop.xlane.xlu0 %8240  ;;  %8609 = vadd.xlane.f32.xlu0 %v8608_v45  ;;  %8354 = vmax.xlane.f32.xlu1 %v8353_v52  ;;  %v8611_v60 = vsel %vm8217_vm2, %v22066_v25, 0.0  ;;  %v8356_v53 = vsel %vm8217_vm2, %v22060_v9, -inf }
 0x66c   : > { %v8417_v18 = vsub.f32 %v21799_v54, %v8241_v35  ;;  %18913 = vpow2.f32 %v8486_v56 }
 0x66e   : > { %v8488_v51 = vmul.f32 1.442695, %v8417_v18  ;;  %v7085_v22 = vpop.f32.mrb[148].mxu1  ;;  %v22075_v42 = vpop.eup %18909  ;;  %v8359_v18 = vsel %vm8217_vm2, %v22069_v17, -inf }
 0x66f   : > { %24302 = vst [vmem:[#allocation62_spill] sm:$0xff] %v22075_v42  ;;  %v8244_v20 = vpop.xlane.xlu1 %8243  ;;  %8612 = vadd.xlane.f32.xlu0 %v8611_v60  ;;  %v18119_v50 = vpop.f32.mrb[149].mxu1  ;;  %8357 = vmax.xlane.f32.xlu1 %v8356_v53  ;;  %v8614_v35 = vsel %vm8217_vm2, %v22075_v42, 0.0 }
 0x670   : > { %v8418_v45 = vsub.f32 %v21807_v43, %v8244_v20  ;;  %v7009_v54 = vpop.f32.mrb[140].mxu0  ;;  %18915 = vpow2.f32 %v8488_v51  ;;  %v22087_v20 = vmul.f32 0.25, %v7085_v22 }
 0x671   : > { %v18114_v59 = vpop.f32.mrb[141].mxu0  ;;  %v22078_v52 = vmul.f32 0.25, %v7009_v54 }
 0x672   : > { %v8490_v56 = vmul.f32 1.442695, %v8418_v45  ;;  %v22084_v26 = vpop.eup %18911 }
 0x673   : > { %24303 = vst [vmem:[#allocation63_spill] sm:$0xff] %v22084_v26  ;;  %v8247_v49 = vpop.xlane.xlu0 %8246  ;;  %8615 = vadd.xlane.f32.xlu0 %v8614_v35  ;;  %v7237_v50 = vpop.f32.mrb[150].mxu1  ;;  %8360 = vmax.xlane.f32.xlu1 %v8359_v18  ;;  %v8617_v54 = vsel %vm8217_vm2, %v22084_v26, 0.0  ;;  %v8362_v59 = vsel %vm8217_vm2, %v22078_v52, -inf }
 0x674   : > { %v8419_v43 = vsub.f32 %v21815_v12, %v8247_v49  ;;  %v7161_v60 = vpop.f32.mrb[142].mxu0  ;;  %v18129_v51 = vpop.f32.mrb[151].mxu1  ;;  %18917 = vpow2.f32 %v8490_v56 }
 0x675   : > { %v18124_v53 = vpop.f32.mrb[143].mxu0  ;;  %v22096_v12 = vmul.f32 0.25, %v7161_v60 }
 0x676   : > { %v8492_v45 = vmul.f32 1.442695, %v8419_v43  ;;  %v22093_v42 = vpop.eup %18913  ;;  %v8365_v43 = vsel %vm8217_vm2, %v22087_v20, -inf }
 0x677   : > { %24304 = vst [vmem:[#allocation64_spill] sm:$0xff] %v22093_v42  ;;  %v8250_v35 = vpop.xlane.xlu1 %8249  ;;  %8618 = vadd.xlane.f32.xlu0 %v8617_v54  ;;  %8363 = vmax.xlane.f32.xlu1 %v8362_v59  ;;  %v8620_v18 = vsel %vm8217_vm2, %v22093_v42, 0.0 }
 0x678   : > { %v8420_v49 = vsub.f32 %v21823_v44, %v8250_v35  ;;  %18919 = vpow2.f32 %v8492_v45  ;;  %v22105_v45 = vmul.f32 0.25, %v7237_v50 }
 0x67a   : > { %v8494_v56 = vmul.f32 1.442695, %v8420_v49  ;;  %v7389_v22 = vpop.f32.mrb[152].mxu1  ;;  %v22102_v51 = vpop.eup %18915  ;;  %v8368_v49 = vsel %vm8217_vm2, %v22096_v12, -inf }
 0x67b   : > { %24305 = vst [vmem:[#allocation65_spill] sm:$0xff] %v22102_v51  ;;  %v8253_v53 = vpop.xlane.xlu0 %8252  ;;  %8621 = vadd.xlane.f32.xlu0 %v8620_v18  ;;  %v18139_v26 = vpop.f32.mrb[153].mxu1  ;;  %8366 = vmax.xlane.f32.xlu1 %v8365_v43  ;;  %v8623_v35 = vsel %vm8217_vm2, %v22102_v51, 0.0 }
 0x67c   : > { %v8421_v54 = vsub.f32 %v21831_v40, %v8253_v53  ;;  %v7313_v44 = vpop.f32.mrb[144].mxu0  ;;  %18921 = vpow2.f32 %v8494_v56 }
 0x67d   : > { %v18134_v60 = vpop.f32.mrb[145].mxu0  ;;  %v22114_v43 = vmul.f32 0.25, %v7313_v44 }
 0x67e   : > { %v8496_v59 = vmul.f32 1.442695, %v8421_v54  ;;  %v22111_v42 = vpop.eup %18917  ;;  %v8371_v60 = vsel %vm8217_vm2, %v22105_v45, -inf }
 0x67f   : > { %24306 = vst [vmem:[#allocation66_spill] sm:$0xff] %v22111_v42  ;;  %v8256_v25 = vpop.xlane.xlu1 %8255  ;;  %8624 = vadd.xlane.f32.xlu0 %v8623_v35  ;;  %v7541_v26 = vpop.f32.mrb[154].mxu1  ;;  %8369 = vmax.xlane.f32.xlu1 %v8368_v49  ;;  %24307 = vst [vmem:[#allocation67_spill] sm:$0xff] %v22114_v43  ;;  %v8626_v54 = vsel %vm8217_vm2, %v22111_v42, 0.0  ;;  %v8374_v49 = vsel %vm8217_vm2, %v22114_v43, -inf }
 0x680   : > { %v8422_v40 = vsub.f32 %v21839_v14, %v8256_v25  ;;  %v7465_v18 = vpop.f32.mrb[146].mxu0  ;;  %v18149_v56 = vpop.f32.mrb[155].mxu1  ;;  %18923 = vpow2.f32 %v8496_v59  ;;  %v22123_v14 = vmul.f32 0.25, %v7389_v22 }
 0x681   : > { %v18144_v50 = vpop.f32.mrb[147].mxu0 }
 0x682   : > { %v8498_v53 = vmul.f32 1.442695, %v8422_v40  ;;  %v22120_v51 = vpop.eup %18919 }
 0x683   : > { %24308 = vst [vmem:[#allocation68_spill] sm:$0xff] %v22120_v51  ;;  %v8259_v35 = vpop.xlane.xlu0 %8258  ;;  %8627 = vadd.xlane.f32.xlu0 %v8626_v54  ;;  %8372 = vmax.xlane.f32.xlu1 %v8371_v60  ;;  %v8629_v44 = vsel %vm8217_vm2, %v22120_v51, 0.0  ;;  %v8377_v51 = vsel %vm8217_vm2, %v22123_v14, -inf }
 0x684   : > { %v8423_v25 = vsub.f32 %v21847_v27, %v8259_v35  ;;  %18925 = vpow2.f32 %v8498_v53  ;;  %v22132_v53 = vmul.f32 0.25, %v7465_v18 }
 0x686   : > { %v8500_v59 = vmul.f32 1.442695, %v8423_v25  ;;  %v22129_v40 = vpop.eup %18921  ;;  %24310 = vst [vmem:[#allocation70_spill] sm:$0xff] %v22132_v53 }
 0x687   : > { %24309 = vst [vmem:[#allocation69_spill] sm:$0xff] %v22129_v40  ;;  %v7693_v56 = vpop.f32.mrb[156].mxu1  ;;  %v8262_v50 = vpop.xlane.xlu1 %8261  ;;  %8630 = vadd.xlane.f32.xlu0 %v8629_v44  ;;  %8375 = vmax.xlane.f32.xlu1 %v8374_v49  ;;  %v8632_v25 = vsel %vm8217_vm2, %v22129_v40, 0.0 }
 0x688   : > { %v8424_v54 = vsub.f32 %v21855_v21, %v8262_v50  ;;  %v18159_v60 = vpop.f32.mrb[157].mxu1  ;;  %v7617_v27 = vpop.f32.mrb[148].mxu0  ;;  %18927 = vpow2.f32 %v8500_v59  ;;  %v22141_v50 = vmul.f32 0.25, %v7541_v26 }
 0x689   : > { %v18154_v22 = vpop.f32.mrb[149].mxu0 }
 0x68a   : > { %v8502_v35 = vmul.f32 1.442695, %v8424_v54  ;;  %v22138_v42 = vpop.eup %18923  ;;  %24312 = vst [vmem:[#allocation72_spill] sm:$0xff] %v22141_v50  ;;  %v8380_v22 = vsel %vm8217_vm2, %v22132_v53, -inf }
 0x68b   : > { %24311 = vst [vmem:[#allocation71_spill] sm:$0xff] %v22138_v42  ;;  %v8265_v43 = vpop.xlane.xlu0 %8264  ;;  %8633 = vadd.xlane.f32.xlu0 %v8632_v25  ;;  %v7845_v44 = vpop.f32.mrb[158].mxu1  ;;  %8378 = vmax.xlane.f32.xlu1 %v8377_v51  ;;  %v8635_v60 = vsel %vm8217_vm2, %v22138_v42, 0.0  ;;  %v8383_v42 = vsel %vm8217_vm2, %v22141_v50, -inf }
 0x68c   : > { %v8425_v21 = vsub.f32 %v21863_v8, %v8265_v43  ;;  %v7769_v49 = vpop.f32.mrb[150].mxu0  ;;  %v18169_v59 = vpop.f32.mrb[159].mxu1  ;;  %18929 = vpow2.f32 %v8502_v35 }
 0x68d   : > { %v18164_v18 = vpop.f32.mrb[151].mxu0  ;;  %v22150_v59 = vmul.f32 0.25, %v7617_v27 }
 0x68e   : > { %v8504_v54 = vmul.f32 1.442695, %v8425_v21  ;;  %v22147_v40 = vpop.eup %18925 }
 0x68f   : > { %24313 = vst [vmem:[#allocation73_spill] sm:$0xff] %v22147_v40  ;;  %v8268_v25 = vpop.xlane.xlu1 %8267  ;;  %8636 = vadd.xlane.f32.xlu0 %v8635_v60  ;;  %v7997_v51 = vpop.f32.mrb[160].mxu1  ;;  %8381 = vmax.xlane.f32.xlu1 %v8380_v22  ;;  %v8638_v18 = vsel %vm8217_vm2, %v22147_v40, 0.0  ;;  %v8386_v40 = vsel %vm8217_vm2, %v22150_v59, -inf }
 0x690   : > { %v8426_v8 = vsub.f32 %v21871_v3, %v8268_v25  ;;  %v7921_v43 = vpop.f32.mrb[152].mxu0  ;;  %v18179_v35 = vpop.f32.mrb[161].mxu1  ;;  %18931 = vpow2.f32 %v8504_v54 }
 0x691   : > { %v18174_v26 = vpop.f32.mrb[153].mxu0 }
 0x692   : > { %v8506_v21 = vmul.f32 1.442695, %v8426_v8  ;;  %v22156_v53 = vpop.eup %18927  ;;  %v22161_v8 = vmul.f32 0.25, %v7693_v56 }
 0x693   : > { %v8271_v60 = vpop.xlane.xlu0 %8270  ;;  %8639 = vadd.xlane.f32.xlu0 %v8638_v18  ;;  %v22158_v22 = vpop.f32.mrb[162].mxu1  ;;  %8384 = vmax.xlane.f32.xlu1 %v8383_v42  ;;  %v8641_v26 = vsel %vm8217_vm2, %v22156_v53, 0.0  ;;  %v22170_v42 = vmul.f32 0.25, %v7769_v49 }
 0x694   : > { %v8427_v3 = vsub.f32 %v21879_v0, %v8271_v60  ;;  %v8073_v54 = vpop.f32.mrb[154].mxu0  ;;  %v18189_v25 = vpop.f32.mrb[163].mxu1  ;;  %18933 = vpow2.f32 %v8506_v21  ;;  %v8389_v60 = vsel %vm8217_vm2, %v22161_v8, -inf }
 0x695   : > { %v18184_v27 = vpop.f32.mrb[155].mxu0 }
 0x696   : > { %v8508_v35 = vmul.f32 1.442695, %v8427_v3  ;;  %v22167_v50 = vpop.eup %18929 }
 0x697   : > { %v8274_v18 = vpop.xlane.xlu1 %8273  ;;  %8642 = vadd.xlane.f32.xlu0 %v8641_v26  ;;  %8387 = vmax.xlane.f32.xlu1 %v8386_v40  ;;  %v8644_v56 = vsel %vm8217_vm2, %v22167_v50, 0.0  ;;  %v22179_v40 = vmul.f32 0.25, %v7845_v44 }
 0x698   : > { %v8428_v0 = vsub.f32 %v21887_v5, %v8274_v18  ;;  %18935 = vpow2.f32 %v8508_v35  ;;  %v8392_v35 = vsel %vm8217_vm2, %v22170_v42, -inf }
 0x699   : > { %v8395_v44 = vsel %vm8217_vm2, %v22179_v40, -inf }
 0x69a   : > { %v8510_v21 = vmul.f32 1.442695, %v8428_v0  ;;  %v22176_v3 = vpop.eup %18931 }
 0x69b   : > { %v8277_v25 = vpop.xlane.xlu0 %8276  ;;  %8645 = vadd.xlane.f32.xlu0 %v8644_v56  ;;  %8390 = vmax.xlane.f32.xlu1 %v8389_v60  ;;  %v8647_v49 = vsel %vm8217_vm2, %v22176_v3, 0.0  ;;  %v22188_v56 = vmul.f32 0.25, %v7921_v43 }
 0x69c   : > { %v8429_v27 = vsub.f32 %v21895_v29, %v8277_v25  ;;  %18937 = vpow2.f32 %v8510_v21 }
 0x69d   : > { %v8398_v43 = vsel %vm8217_vm2, %v22188_v56, -inf }
 0x69e   : > { %v8512_v5 = vmul.f32 1.442695, %v8429_v27  ;;  %v22185_v26 = vpop.eup %18933 }
 0x69f   : > { %v8280_v18 = vpop.xlane.xlu1 %8279  ;;  %8648 = vadd.xlane.f32.xlu0 %v8647_v49  ;;  %8393 = vmax.xlane.f32.xlu1 %v8392_v35  ;;  %v8650_v29 = vsel %vm8217_vm2, %v22185_v26, 0.0  ;;  %v22197_v49 = vmul.f32 0.25, %v7997_v51 }
 0x6a0   : > { %18939 = vpow2.f32 %v8512_v5  ;;  %v8430_v0 = vsub.f32 %v21903_v28, %v8280_v18 }
 0x6a2   : > { %v22194_v21 = vpop.eup %18935  ;;  %v8514_v27 = vmul.f32 1.442695, %v8430_v0 }
 0x6a3   : > { %v8283_v60 = vpop.xlane.xlu0 %8282  ;;  %8651 = vadd.xlane.f32.xlu0 %v8650_v29  ;;  %8396 = vmax.xlane.f32.xlu1 %v8395_v44  ;;  %v8653_v28 = vsel %vm8217_vm2, %v22194_v21, 0.0  ;;  %v8401_v44 = vsel %vm8217_vm2, %v22197_v49, -inf }
 0x6a4   : > { %v8431_v25 = vsub.f32 %v21911_v63, %v8283_v60  ;;  %v22206_v63 = vmul.f32 0.25, %v8073_v54 }
 0x6a6   : > { %v8516_v5 = vmul.f32 1.442695, %v8431_v25  ;;  %v22203_v35 = vpop.eup %18937 }
 0x6a7   : > { %v8286_v18 = vpop.xlane.xlu1 %8285  ;;  %8654 = vadd.xlane.f32.xlu0 %v8653_v28  ;;  %8399 = vmax.xlane.f32.xlu1 %v8398_v43  ;;  %v8656_v0 = vsel %vm8217_vm2, %v22203_v35, 0.0 }
 0x6a8   : > { %18941 = vpow2.f32 %v8516_v5  ;;  %v8432_v29 = vsub.f32 %v21919_v15, %v8286_v18  ;;  %v22216_v15 = vmul.f32 0.25, %v22158_v22  ;;  %v8404_v5 = vsel %vm8217_vm2, %v22206_v63, -inf }
 0x6a9   : > { %18943 = vpow2.f32 %v8514_v27 }
 0x6aa   : > { %v8518_v51 = vmul.f32 1.442695, %v8432_v29  ;;  %v22212_v60 = vpop.eup %18939  ;;  %v8407_v22 = vsel %vm8217_vm2, %v22216_v15, -inf }
 0x6ab   : > { %v8289_v25 = vpop.xlane.xlu0 %8288  ;;  %8657 = vadd.xlane.f32.xlu0 %v8656_v0  ;;  %8402 = vmax.xlane.f32.xlu1 %v8401_v44  ;;  %v8659_v27 = vsel %vm8217_vm2, %v22212_v60, 0.0 }
 0x6ac   : > { %v8433_v28 = vsub.f32 %v21927_v24, %v8289_v25  ;;  %18945 = vpow2.f32 %v8518_v51 }
 0x6ae   : > { %v8520_v54 = vmul.f32 1.442695, %v8433_v28 }
 0x6af   : > { %v8292_v43 = vpop.xlane.xlu1 %8291  ;;  %8660 = vadd.xlane.f32.xlu0 %v8659_v27  ;;  %8405 = vmax.xlane.f32.xlu1 %v8404_v5 }
 0x6b0   : > { %18947 = vpow2.f32 %v8520_v54  ;;  %v8434_v18 = vsub.f32 %v21935_v39, %v8292_v43 }
 0x6b2   : > { %v22223_v29 = vpop.eup %18941  ;;  %v8522_v24 = vmul.f32 1.442695, %v8434_v18 }
 0x6b3   : > { %v22227_v51 = vpop.eup %18943  ;;  %v8295_v0 = vpop.xlane.xlu0 %8294  ;;  %8408 = vmax.xlane.f32.xlu1 %v8407_v22  ;;  %v8665_v44 = vsel %vm8217_vm2, %v22223_v29, 0.0 }
 0x6b4   : > { %18949 = vpow2.f32 %v8522_v24  ;;  %v8435_v25 = vsub.f32 %v21943_v33, %v8295_v0  ;;  %8666 = vadd.xlane.f32.xlu0 %v8665_v44  ;;  %v8662_v39 = vsel %vm8217_vm2, %v22227_v51, 0.0 }
 0x6b6   : > { %v8524_v28 = vmul.f32 1.442695, %v8435_v25  ;;  %v22234_v54 = vpop.eup %18945 }
 0x6b7   : > { %v8298_v27 = vpop.xlane.xlu1 %8297  ;;  %8663 = vadd.xlane.f32.xlu1 %v8662_v39  ;;  %v8668_v24 = vsel %vm8217_vm2, %v22234_v54, 0.0 }
 0x6b8   : > { %18951 = vpow2.f32 %v8524_v28  ;;  %v8436_v5 = vsub.f32 %v21951_v6, %v8298_v27 }
 0x6ba   : > { %v22237_v43 = vpop.eup %18947  ;;  %v8526_v18 = vmul.f32 1.442695, %v8436_v5 }
 0x6bb   : > { %v8301_v22 = vpop.xlane.xlu0 %8300  ;;  %8669 = vadd.xlane.f32.xlu1 %v8668_v24  ;;  %v8671_v33 = vsel %vm8217_vm2, %v22237_v43, 0.0 }
 0x6bc   : > { %18953 = vpow2.f32 %v8526_v18  ;;  %v8437_v0 = vsub.f32 %v21959_v2, %v8301_v22  ;;  %8672 = vadd.xlane.f32.xlu0 %v8671_v33 }
 0x6be   : > { %v22244_v44 = vpop.eup %18949  ;;  %v8528_v25 = vmul.f32 1.442695, %v8437_v0 }
 0x6bf   : > { %v8674_v6 = vsel %vm8217_vm2, %v22244_v44, 0.0 }
 0x6c0   : > { %18955 = vpow2.f32 %v8528_v25  ;;  %8675 = vadd.xlane.f32.xlu1 %v8674_v6 }
 0x6c1   : > { %v8304_v28 = vpop.xlane.xlu1 %8303 }
 0x6c2   : > { %v22248_v39 = vpop.eup %18951  ;;  %v8438_v27 = vsub.f32 %v21969_v57, %v8304_v28 }
 0x6c3   : > { %v8677_v5 = vsel %vm8217_vm2, %v22248_v39, 0.0 }
 0x6c4   : > { %v8530_v18 = vmul.f32 1.442695, %v8438_v27  ;;  %8678 = vadd.xlane.f32.xlu0 %v8677_v5 }
 0x6c5   : > { %v8307_v2 = vpop.xlane.xlu0 %8306 }
 0x6c6   : > { %v22253_v24 = vpop.eup %18953  ;;  %18957 = vpow2.f32 %v8530_v18  ;;  %v8439_v22 = vsub.f32 %v21977_v19, %v8307_v2 }
 0x6c7   : > { %24314 = vst [vmem:[#allocation74_spill] sm:$0xff] %v22253_v24  ;;  %v8680_v33 = vsel %vm8217_vm2, %v22253_v24, 0.0 }
 0x6c8   : > { %v8532_v0 = vmul.f32 1.442695, %v8439_v22  ;;  %8681 = vadd.xlane.f32.xlu1 %v8680_v33 }
 0x6c9   : > { %v8310_v25 = vpop.xlane.xlu1 %8309 }
 0x6ca   : > { %v22258_v6 = vpop.eup %18955  ;;  %18959 = vpow2.f32 %v8532_v0  ;;  %v8440_v57 = vsub.f32 %v21981_v34, %v8310_v25 }
 0x6cb   : > { %v8683_v28 = vsel %vm8217_vm2, %v22258_v6, 0.0 }
 0x6cc   : > { %v8534_v27 = vmul.f32 1.442695, %v8440_v57  ;;  %8684 = vadd.xlane.f32.xlu0 %v8683_v28 }
 0x6cd   : > { %v8313_v5 = vpop.xlane.xlu0 %8312 }
 0x6ce   : > { %18961 = vpow2.f32 %v8534_v27  ;;  %v8441_v19 = vsub.f32 %v21985_v31, %v8313_v5 }
 0x6d0   : > { %v22264_v18 = vpop.eup %18957  ;;  %v8536_v2 = vmul.f32 1.442695, %v8441_v19  ;;  %v8316_v22 = vpop.xlane.xlu1 %8315 }
 0x6d1   : > { %v8442_v33 = vsub.f32 %v21989_v58, %v8316_v22  ;;  %v8319_v24 = vpop.xlane.xlu0 %8318  ;;  %v8686_v0 = vsel %vm8217_vm2, %v22264_v18, 0.0 }
 0x6d2   : > { %18963 = vpow2.f32 %v8536_v2  ;;  %v8443_v34 = vsub.f32 %v21991_v36, %v8319_v24  ;;  %8687 = vadd.xlane.f32.xlu1 %v8686_v0 }
 0x6d3   : > { %v8538_v25 = vmul.f32 1.442695, %v8442_v33 }
 0x6d4   : > { %v22270_v57 = vpop.eup %18959  ;;  %v8540_v28 = vmul.f32 1.442695, %v8443_v34 }
 0x6d5   : > { %18965 = vpow2.f32 %v8538_v25  ;;  %v8325_v31 = vpop.xlane.xlu0 %8324  ;;  %v8322_v27 = vpop.xlane.xlu1 %8321  ;;  %v8689_v5 = vsel %vm8217_vm2, %v22270_v57, 0.0 }
 0x6d6   : > { %18967 = vpow2.f32 %v8540_v28  ;;  %v8445_v58 = vsub.f32 %v21999_v62, %v8325_v31  ;;  %v8444_v19 = vsub.f32 %v21997_v61, %v8322_v27  ;;  %8690 = vadd.xlane.f32.xlu0 %v8689_v5 }
 0x6d8   : > { %v22276_v2 = vpop.eup %18961  ;;  %v8544_v36 = vmul.f32 1.442695, %v8445_v58  ;;  %v8542_v24 = vmul.f32 1.442695, %v8444_v19 }
 0x6d9   : > { %v8692_v22 = vsel %vm8217_vm2, %v22276_v2, 0.0 }
 0x6da   : > { %18969 = vpow2.f32 %v8544_v36  ;;  %8693 = vadd.xlane.f32.xlu1 %v8692_v22 }
 0x6db   : > { %18971 = vpow2.f32 %v8542_v24  ;;  %v8331_v33 = vpop.xlane.xlu0 %8330 }
 0x6dc   : > { %v22280_v0 = vpop.eup %18963  ;;  %v8447_v34 = vsub.f32 %v22005_v37, %v8331_v33  ;;  %v8328_v25 = vpop.xlane.xlu1 %8327 }
 0x6dd   : > { %v8446_v62 = vsub.f32 %v22007_v38, %v8328_v25  ;;  %v8695_v61 = vsel %vm8217_vm2, %v22280_v0, 0.0 }
 0x6de   : > { %v8548_v28 = vmul.f32 1.442695, %v8447_v34  ;;  %8696 = vadd.xlane.f32.xlu0 %v8695_v61 }
 0x6df   : > { %v22286_v31 = vpop.eup %18965  ;;  %v8546_v27 = vmul.f32 1.442695, %v8446_v62 }
 0x6e0   : > { %v22288_v5 = vpop.eup %18967  ;;  %18973 = vpow2.f32 %v8548_v28  ;;  %v8337_v58 = vpop.xlane.xlu0 %8336  ;;  %v8698_v19 = vsel %vm8217_vm2, %v22286_v31, 0.0 }
 0x6e1   : > { %18975 = vpow2.f32 %v8546_v27  ;;  %v8449_v37 = vsub.f32 %v22014_v30, %v8337_v58  ;;  %v8334_v36 = vpop.xlane.xlu1 %8333  ;;  %8699 = vadd.xlane.f32.xlu1 %v8698_v19  ;;  %v8701_v38 = vsel %vm8217_vm2, %v22288_v5, 0.0 }
 0x6e2   : > { %v8448_v24 = vsub.f32 %v22016_v13, %v8334_v36  ;;  %8702 = vadd.xlane.f32.xlu0 %v8701_v38 }
 0x6e3   : > { %v8552_v22 = vmul.f32 1.442695, %v8449_v37 }
 0x6e4   : > { %v22296_v33 = vpop.eup %18969  ;;  %v8550_v34 = vmul.f32 1.442695, %v8448_v24 }
 0x6e5   : > { %v22298_v25 = vpop.eup %18971  ;;  %18977 = vpow2.f32 %v8552_v22  ;;  %v8707_v62 = vsel %vm8217_vm2, %v22296_v33, 0.0 }
 0x6e6   : > { %18979 = vpow2.f32 %v8550_v34  ;;  %8708 = vadd.xlane.f32.xlu0 %v8707_v62  ;;  %v8704_v30 = vsel %vm8217_vm2, %v22298_v25, 0.0 }
 0x6e7   : > { %8705 = vadd.xlane.f32.xlu1 %v8704_v30  ;;  %v8343_v61 = vpop.xlane.xlu0 %8342 }
 0x6e8   : > { %v8451_v13 = vsub.f32 %v22023_v47, %v8343_v61  ;;  %v8340_v28 = vpop.xlane.xlu1 %8339 }
 0x6e9   : > { %v8450_v27 = vsub.f32 %v22026_v32, %v8340_v28 }
 0x6ea   : > { %v22306_v58 = vpop.eup %18973  ;;  %v8556_v19 = vmul.f32 1.442695, %v8451_v13 }
 0x6eb   : > { %v22308_v37 = vpop.eup %18975  ;;  %v8554_v36 = vmul.f32 1.442695, %v8450_v27  ;;  %v8713_v38 = vsel %vm8217_vm2, %v22306_v58, 0.0 }
 0x6ec   : > { %18981 = vpow2.f32 %v8556_v19  ;;  %8714 = vadd.xlane.f32.xlu0 %v8713_v38  ;;  %v8349_v24 = vpop.xlane.xlu0 %8348  ;;  %v8710_v22 = vsel %vm8217_vm2, %v22308_v37, 0.0 }
 0x6ed   : > { %18983 = vpow2.f32 %v8554_v36  ;;  %v8453_v47 = vsub.f32 %v22033_v7, %v8349_v24  ;;  %v8346_v34 = vpop.xlane.xlu1 %8345  ;;  %8711 = vadd.xlane.f32.xlu1 %v8710_v22 }
 0x6ee   : > { %v8452_v32 = vsub.f32 %v22035_v10, %v8346_v34 }
 0x6ef   : > { %v22316_v62 = vpop.eup %18977  ;;  %v8560_v30 = vmul.f32 1.442695, %v8453_v47 }
 0x6f0   : > { %v22318_v61 = vpop.eup %18979  ;;  %v8558_v13 = vmul.f32 1.442695, %v8452_v32  ;;  %v8604_v28 = vpop.xlane.xlu0 %8603  ;;  %v8719_v27 = vsel %vm8217_vm2, %v22316_v62, 0.0 }
 0x6f1   : > { %18985 = vpow2.f32 %v8560_v30  ;;  %8720 = vadd.xlane.f32.xlu0 %v8719_v27  ;;  %v8716_v19 = vsel %vm8217_vm2, %v22318_v61, 0.0 }
 0x6f2   : > { %18987 = vpow2.f32 %v8558_v13  ;;  %8717 = vadd.xlane.f32.xlu1 %v8716_v19 }
 0x6f3   : > { %18989 = vrcp.f32 %v8604_v28 }
 0x6f4   : > { %v8607_v7 = vpop.xlane.xlu0 %8606  ;;  %v8352_v10 = vpop.xlane.xlu1 %8351 }
 0x6f5   : > { %18991 = vrcp.f32 %v8607_v7  ;;  %v8454_v36 = vsub.f32 %v22049_v48, %v8352_v10 }
 0x6f6   : > { %v22325_v38 = vpop.eup %18981 }
 0x6f7   : > { %v22327_v24 = vpop.eup %18983  ;;  %v8562_v22 = vmul.f32 1.442695, %v8454_v36  ;;  %v8725_v47 = vsel %vm8217_vm2, %v22325_v38, 0.0 }
 0x6f8   : > { %8726 = vadd.xlane.f32.xlu0 %v8725_v47  ;;  %v8610_v34 = vpop.xlane.xlu0 %8609  ;;  %v8355_v32 = vpop.xlane.xlu1 %8354  ;;  %v8722_v30 = vsel %vm8217_vm2, %v22327_v24, 0.0 }
 0x6f9   : > { %18993 = vpow2.f32 %v8562_v22  ;;  %v8455_v13 = vsub.f32 %v22051_v4, %v8355_v32  ;;  %8723 = vadd.xlane.f32.xlu1 %v8722_v30  ;;  %v22347_v32 = vld [vmem:[%s24052_s8] ss:$0 sm:$0xff] }
 0x6fa   : > { %18995 = vrcp.f32 %v8610_v34  ;;  %v2981_v30 = vadd.f32 %v22347_v32, %v21709_v1 }
 0x6fb   : > { %v22334_v48 = vpop.eup %18985  ;;  %v8564_v28 = vmul.f32 1.442695, %v8455_v13 }
 0x6fc   : > { %v22336_v27 = vpop.eup %18987  ;;  %v8613_v19 = vpop.xlane.xlu0 %8612  ;;  %v8731_v10 = vsel %vm8217_vm2, %v22334_v48, 0.0 }
 0x6fd   : > { %v8358_v7 = vpop.xlane.xlu1 %8357  ;;  %v18990_v36 = vpop.eup %18989  ;;  %18997 = vpow2.f32 %v8564_v28  ;;  %8732 = vadd.xlane.f32.xlu0 %v8731_v10  ;;  %v8728_v4 = vsel %vm8217_vm2, %v22336_v27, 0.0 }
 0x6fe   : > { %v8456_v47 = vsub.f32 %v22060_v9, %v8358_v7  ;;  %18999 = vrcp.f32 %v8613_v19  ;;  %v8795_v22 = vmul.f32 %v18990_v36, %v22039_v16  ;;  %8729 = vadd.xlane.f32.xlu1 %v8728_v4  ;;  %v2986_v16 = vadd.f32 %v22347_v32, %v21702_v46 }
 0x6ff   : > { %v18992_v34 = vpop.eup %18991 }
 0x700   : > { %v8566_v13 = vmul.f32 1.442695, %v8456_v47  ;;  %18193 = vmatmul.mubr.msk.f32.vlgmr.msra.gmra.mrb[156].mxu0 %vm8217_vm2, %v8795_v22  ;;  %v8616_v9 = vpop.xlane.xlu0 %8615  ;;  %v8797_v7 = vmul.f32 %v18992_v34, %v22046_v11  ;;  %v2991_v22 = vadd.f32 %v22347_v32, %v21733_v23  ;;  %v24315_v23 = vld [vmem:[#allocation61_spill] sm:$0xff] }
 0x701   : > { %v8361_v28 = vpop.xlane.xlu1 %8360  ;;  %18201 = vmatpush3.msra.mxu0 %v2981_v30  ;;  %18202 = vmatprep.mubr.msk.f32.mxu0 %vm19302_vm1, %v24153_v55 }
 0x702   : > { %19001 = vpow2.f32 %v8566_v13  ;;  %v8457_v19 = vsub.f32 %v22069_v17, %v8361_v28  ;;  %18198 = vmatmul.mubr.msk.f32.vlgmr.msra.gmra.mrb[164].mxu1 %vm8217_vm2, %v8797_v7  ;;  %18210 = vmatprep.subr.mxu0 %v24153_v55 }
 0x703   : > { %19003 = vrcp.f32 %v8616_v9  ;;  %v22360_v1 = vpop.eup %18993  ;;  %18206 = vmatpush3.msra.mxu1 %v2986_v16  ;;  %18207 = vmatprep.mubr.msk.f32.mxu1 %vm19302_vm1, %v24153_v55  ;;  %v24316_v16 = vld [vmem:[#allocation6_spill] sm:$0xff] }
 0x704   : > { %v8568_v10 = vmul.f32 1.442695, %v8457_v19  ;;  %v18996_v46 = vpop.eup %18995  ;;  %v8619_v11 = vpop.xlane.xlu0 %8618  ;;  %v8734_v17 = vsel %vm8217_vm2, %v22360_v1, 0.0  ;;  %18215 = vmatprep.subr.mxu1 %v24153_v55  ;;  %v2996_v19 = vadd.f32 %v22347_v32, %v24316_v16  ;;  %v24319_v16 = vld [vmem:[#allocation63_spill] sm:$0xff] }
 0x705   : > { %v8364_v36 = vpop.xlane.xlu1 %8363  ;;  %8735 = vadd.xlane.f32.xlu1 %v8734_v17  ;;  %v8799_v4 = vmul.f32 %v18996_v46, %v22057_v41 }
 0x706   : > { %19005 = vpow2.f32 %v8568_v10  ;;  %v8458_v47 = vsub.f32 %v22078_v52, %v8364_v36 }
 0x707   : > { %19007 = vrcp.f32 %v8619_v11  ;;  %v22371_v34 = vpop.eup %18997  ;;  %18203 = vmatmul.mubr.msk.f32.vlgmr.msra.gmra.mrb[158].mxu0 %vm8217_vm2, %v8799_v4  ;;  %v24317_v4 = vld [vmem:[#allocation62_spill] sm:$0xff] }
 0x708   : > { %v8570_v30 = vmul.f32 1.442695, %v8458_v47  ;;  %v19000_v13 = vpop.eup %18999  ;;  %18211 = vmatpush3.msra.mxu0 %v2991_v22  ;;  %v8622_v9 = vpop.xlane.xlu0 %8621  ;;  %v8737_v7 = vsel %vm8217_vm2, %v22371_v34, 0.0  ;;  %18212 = vmatprep.mubr.msk.f32.mxu0 %vm19302_vm1, %v24153_v55 }
 0x709   : > { %v8367_v28 = vpop.xlane.xlu1 %8366  ;;  %8738 = vadd.xlane.f32.xlu0 %v8737_v7  ;;  %v8801_v52 = vmul.f32 %v19000_v13, %v24315_v23  ;;  %18220 = vmatprep.subr.mxu0 %v24153_v55 }
 0x70a   : > { %19009 = vpow2.f32 %v8570_v30  ;;  %v8459_v41 = vsub.f32 %v22087_v20, %v8367_v28  ;;  %v24318_v30 = vld [vmem:[#allocation8_spill] sm:$0xff] }
 0x70b   : > { %19011 = vrcp.f32 %v8622_v9  ;;  %18208 = vmatmul.mubr.msk.f32.vlgmr.msra.gmra.mrb[166].mxu1 %vm8217_vm2, %v8801_v52  ;;  %v3001_v13 = vadd.f32 %v22347_v32, %v24318_v30 }
 0x70c   : > { %v22383_v10 = vpop.eup %19001  ;;  %v8572_v46 = vmul.f32 1.442695, %v8459_v41  ;;  %18216 = vmatpush3.msra.mxu1 %v2996_v19  ;;  %v8625_v36 = vpop.xlane.xlu0 %8624  ;;  %18217 = vmatprep.mubr.msk.f32.mxu1 %vm19302_vm1, %v24153_v55 }
 0x70d   : > { %v19004_v11 = vpop.eup %19003  ;;  %v8370_v17 = vpop.xlane.xlu1 %8369  ;;  %v8740_v20 = vsel %vm8217_vm2, %v22383_v10, 0.0  ;;  %18225 = vmatprep.subr.mxu1 %v24153_v55 }
 0x70e   : > { %19013 = vpow2.f32 %v8572_v46  ;;  %v8460_v47 = vsub.f32 %v22096_v12, %v8370_v17  ;;  %8741 = vadd.xlane.f32.xlu1 %v8740_v20  ;;  %v8803_v22 = vmul.f32 %v19004_v11, %v24317_v4  ;;  %v24320_v46 = vld [vmem:[#allocation7_spill] sm:$0xff] }
 0x70f   : > { %19015 = vrcp.f32 %v8625_v36  ;;  %v3006_v11 = vadd.f32 %v22347_v32, %v24320_v46 }
 0x710   : > { %v22395_v9 = vpop.eup %19005  ;;  %v8574_v28 = vmul.f32 1.442695, %v8460_v47  ;;  %18213 = vmatmul.mubr.msk.f32.vlgmr.msra.gmra.mrb[160].mxu0 %vm8217_vm2, %v8803_v22  ;;  %v8628_v41 = vpop.xlane.xlu0 %8627  ;;  %v24321_v22 = vld [vmem:[#allocation67_spill] sm:$0xff] }
 0x711   : > { %v19008_v7 = vpop.eup %19007  ;;  %18221 = vmatpush3.msra.mxu0 %v3001_v13  ;;  %v8373_v23 = vpop.xlane.xlu1 %8372  ;;  %v8743_v12 = vsel %vm8217_vm2, %v22395_v9, 0.0  ;;  %18222 = vmatprep.mubr.msk.f32.mxu0 %vm19302_vm1, %v24153_v55  ;;  %v24322_v13 = vld [vmem:[#allocation64_spill] sm:$0xff] }
 0x712   : > { %19017 = vpow2.f32 %v8574_v28  ;;  %v8461_v52 = vsub.f32 %v22105_v45, %v8373_v23  ;;  %8744 = vadd.xlane.f32.xlu0 %v8743_v12  ;;  %v8805_v19 = vmul.f32 %v19008_v7, %v24319_v16  ;;  %18230 = vmatprep.subr.mxu0 %v24153_v55  ;;  %v24323_v7 = vld [vmem:[#allocation10_spill] sm:$0xff] }
 0x713   : > { %19019 = vrcp.f32 %v8628_v41  ;;  %v3011_v41 = vadd.f32 %v22347_v32, %v24323_v7  ;;  %v24326_v7 = vld [vmem:[#allocation70_spill] sm:$0xff] }
 0x714   : > { %v22407_v36 = vpop.eup %19009  ;;  %v8576_v17 = vmul.f32 1.442695, %v8461_v52  ;;  %18218 = vmatmul.mubr.msk.f32.vlgmr.msra.gmra.mrb[168].mxu1 %vm8217_vm2, %v8805_v19  ;;  %v8631_v47 = vpop.xlane.xlu0 %8630 }
 0x715   : > { %v19012_v20 = vpop.eup %19011  ;;  %18226 = vmatpush3.msra.mxu1 %v3006_v11  ;;  %v8376_v4 = vpop.xlane.xlu1 %8375  ;;  %v8746_v45 = vsel %vm8217_vm2, %v22407_v36, 0.0  ;;  %18227 = vmatprep.mubr.msk.f32.mxu1 %vm19302_vm1, %v24153_v55 }
 0x716   : > { %19021 = vpow2.f32 %v8576_v17  ;;  %v8462_v30 = vsub.f32 %v24321_v22, %v8376_v4  ;;  %8747 = vadd.xlane.f32.xlu1 %v8746_v45  ;;  %v8807_v28 = vmul.f32 %v19012_v20, %v24322_v13  ;;  %18235 = vmatprep.subr.mxu1 %v24153_v55  ;;  %v24324_v17 = vld [vmem:[#allocation65_spill] sm:$0xff] }
 0x717   : > { %19023 = vrcp.f32 %v8631_v47  ;;  %v24325_v47 = vld [vmem:[#allocation9_spill] sm:$0xff] }
 0x718   : > { %v22419_v23 = vpop.eup %19013  ;;  %v8578_v12 = vmul.f32 1.442695, %v8462_v30  ;;  %18223 = vmatmul.mubr.msk.f32.vlgmr.msra.gmra.mrb[162].mxu0 %vm8217_vm2, %v8807_v28  ;;  %v8634_v16 = vpop.xlane.xlu0 %8633  ;;  %v3016_v4 = vadd.f32 %v22347_v32, %v24325_v47 }
 0x719   : > { %v19016_v52 = vpop.eup %19015  ;;  %18231 = vmatpush3.msra.mxu0 %v3011_v41  ;;  %v8379_v19 = vpop.xlane.xlu1 %8378  ;;  %v8749_v46 = vsel %vm8217_vm2, %v22419_v23, 0.0  ;;  %18232 = vmatprep.mubr.msk.f32.mxu0 %vm19302_vm1, %v24153_v55 }
 0x71a   : > { %19025 = vpow2.f32 %v8578_v12  ;;  %v8463_v11 = vsub.f32 %v22123_v14, %v8379_v19  ;;  %8750 = vadd.xlane.f32.xlu0 %v8749_v46  ;;  %v8809_v20 = vmul.f32 %v19016_v52, %v24324_v17  ;;  %18240 = vmatprep.subr.mxu0 %v24153_v55  ;;  %v24327_v12 = vld [vmem:[#allocation66_spill] sm:$0xff] }
 0x71b   : > { %19027 = vrcp.f32 %v8634_v16  ;;  %v24328_v16 = vld [vmem:[#allocation24_spill] sm:$0xff] }
 0x71c   : > { %v22431_v45 = vpop.eup %19017  ;;  %v8580_v22 = vmul.f32 1.442695, %v8463_v11  ;;  %18228 = vmatmul.mubr.msk.f32.vlgmr.msra.gmra.mrb[170].mxu1 %vm8217_vm2, %v8809_v20  ;;  %v8637_v13 = vpop.xlane.xlu0 %8636  ;;  %v3021_v19 = vadd.f32 %v22347_v32, %v24328_v16 }
 0x71d   : > { %v19020_v30 = vpop.eup %19019  ;;  %18236 = vmatpush3.msra.mxu1 %v3016_v4  ;;  %v8382_v28 = vpop.xlane.xlu1 %8381  ;;  %v8752_v14 = vsel %vm8217_vm2, %v22431_v45, 0.0  ;;  %18237 = vmatprep.mubr.msk.f32.mxu1 %vm19302_vm1, %v24153_v55 }
 0x71e   : > { %19029 = vpow2.f32 %v8580_v22  ;;  %v8464_v41 = vsub.f32 %v24326_v7, %v8382_v28  ;;  %8753 = vadd.xlane.f32.xlu1 %v8752_v14  ;;  %v8811_v52 = vmul.f32 %v19020_v30, %v24327_v12  ;;  %18245 = vmatprep.subr.mxu1 %v24153_v55  ;;  %v24329_v22 = vld [vmem:[#allocation72_spill] sm:$0xff]  ;;  %v24331_v14 = vld [vmem:[#allocation25_spill] sm:$0xff] }
 0x71f   : > { %19031 = vrcp.f32 %v8637_v13  ;;  %v24330_v13 = vld [vmem:[#allocation68_spill] sm:$0xff]  ;;  %v3026_v7 = vadd.f32 %v22347_v32, %v24331_v14 }
 0x720   : > { %v22443_v46 = vpop.eup %19021  ;;  %v8582_v11 = vmul.f32 1.442695, %v8464_v41  ;;  %18233 = vmatmul.mubr.msk.f32.vlgmr.msra.gmra.mrb[164].mxu0 %vm8217_vm2, %v8811_v52  ;;  %v8640_v20 = vpop.xlane.xlu0 %8639 }
 0x721   : > { %v19024_v17 = vpop.eup %19023  ;;  %18241 = vmatpush3.msra.mxu0 %v3021_v19  ;;  %v8385_v47 = vpop.xlane.xlu1 %8384  ;;  %v8755_v4 = vsel %vm8217_vm2, %v22443_v46, 0.0  ;;  %18242 = vmatprep.mubr.msk.f32.mxu0 %vm19302_vm1, %v24153_v55 }
 0x722   : > { %19033 = vpow2.f32 %v8582_v11  ;;  %v8465_v30 = vsub.f32 %v24329_v22, %v8385_v47  ;;  %8756 = vadd.xlane.f32.xlu0 %v8755_v4  ;;  %v8813_v28 = vmul.f32 %v19024_v17, %v24330_v13  ;;  %18250 = vmatprep.subr.mxu0 %v24153_v55  ;;  %v24333_v4 = vld [vmem:[#allocation12_spill] sm:$0xff] }
 0x723   : > { %19035 = vrcp.f32 %v8640_v20  ;;  %v24332_v20 = vld [vmem:[#allocation69_spill] sm:$0xff]  ;;  %v3031_v22 = vadd.f32 %v22347_v32, %v24333_v4 }
 0x724   : > { %v22455_v41 = vpop.eup %19025  ;;  %v8584_v12 = vmul.f32 1.442695, %v8465_v30  ;;  %18238 = vmatmul.mubr.msk.f32.vlgmr.msra.gmra.mrb[172].mxu1 %vm8217_vm2, %v8813_v28  ;;  %v8643_v16 = vpop.xlane.xlu0 %8642 }
 0x725   : > { %v19028_v52 = vpop.eup %19027  ;;  %18246 = vmatpush3.msra.mxu1 %v3026_v7  ;;  %v8388_v19 = vpop.xlane.xlu1 %8387  ;;  %v8758_v11 = vsel %vm8217_vm2, %v22455_v41, 0.0  ;;  %18247 = vmatprep.mubr.msk.f32.mxu1 %vm19302_vm1, %v24153_v55 }
 0x726   : > { %19037 = vpow2.f32 %v8584_v12  ;;  %v8466_v17 = vsub.f32 %v22150_v59, %v8388_v19  ;;  %8759 = vadd.xlane.f32.xlu1 %v8758_v11  ;;  %v8815_v47 = vmul.f32 %v19028_v52, %v24332_v20  ;;  %18255 = vmatprep.subr.mxu1 %v24153_v55  ;;  %v24334_v52 = vld [vmem:[#allocation71_spill] sm:$0xff] }
 0x727   : > { %19039 = vrcp.f32 %v8643_v16  ;;  %v24335_v19 = vld [vmem:[#allocation11_spill] sm:$0xff] }
 0x728   : > { %v22467_v30 = vpop.eup %19029  ;;  %v8586_v13 = vmul.f32 1.442695, %v8466_v17  ;;  %18243 = vmatmul.mubr.msk.f32.vlgmr.msra.gmra.mrb[166].mxu0 %vm8217_vm2, %v8815_v47  ;;  %v8646_v14 = vpop.xlane.xlu0 %8645  ;;  %v3036_v11 = vadd.f32 %v22347_v32, %v24335_v19 }
 0x729   : > { %v19032_v28 = vpop.eup %19031  ;;  %18251 = vmatpush3.msra.mxu0 %v3031_v22  ;;  %v8391_v7 = vpop.xlane.xlu1 %8390  ;;  %v8761_v59 = vsel %vm8217_vm2, %v22467_v30, 0.0  ;;  %18252 = vmatprep.mubr.msk.f32.mxu0 %vm19302_vm1, %v24153_v55 }
 0x72a   : > { %19041 = vpow2.f32 %v8586_v13  ;;  %v8467_v12 = vsub.f32 %v22161_v8, %v8391_v7  ;;  %8762 = vadd.xlane.f32.xlu0 %v8761_v59  ;;  %v8817_v16 = vmul.f32 %v19032_v28, %v24334_v52  ;;  %18260 = vmatprep.subr.mxu0 %v24153_v55  ;;  %v24336_v28 = vld [vmem:[#allocation73_spill] sm:$0xff] }
 0x72b   : > { %19043 = vrcp.f32 %v8646_v14  ;;  %v24337_v7 = vld [vmem:[#allocation29_spill] sm:$0xff] }
 0x72c   : > { %v22479_v17 = vpop.eup %19033  ;;  %v8588_v20 = vmul.f32 1.442695, %v8467_v12  ;;  %18248 = vmatmul.mubr.msk.f32.vlgmr.msra.gmra.mrb[174].mxu1 %vm8217_vm2, %v8817_v16  ;;  %v8649_v4 = vpop.xlane.xlu0 %8648  ;;  %v3041_v59 = vadd.f32 %v22347_v32, %v24337_v7 }
 0x72d   : > { %v19036_v47 = vpop.eup %19035  ;;  %18256 = vmatpush3.msra.mxu1 %v3036_v11  ;;  %v8394_v22 = vpop.xlane.xlu1 %8393  ;;  %v8764_v8 = vsel %vm8217_vm2, %v22479_v17, 0.0  ;;  %18257 = vmatprep.mubr.msk.f32.mxu1 %vm19302_vm1, %v24153_v55 }
 0x72e   : > { %19045 = vpow2.f32 %v8588_v20  ;;  %v8468_v13 = vsub.f32 %v22170_v42, %v8394_v22  ;;  %8765 = vadd.xlane.f32.xlu1 %v8764_v8  ;;  %v8819_v14 = vmul.f32 %v19036_v47, %v24336_v28  ;;  %18265 = vmatprep.subr.mxu1 %v24153_v55 }
 0x72f   : > { %19047 = vrcp.f32 %v8649_v4  ;;  %v24338_v4 = vld [vmem:[#allocation23_spill] sm:$0xff] }
 0x730   : > { %v22491_v12 = vpop.eup %19037  ;;  %v8590_v52 = vmul.f32 1.442695, %v8468_v13  ;;  %18253 = vmatmul.mubr.msk.f32.vlgmr.msra.gmra.mrb[168].mxu0 %vm8217_vm2, %v8819_v14  ;;  %v8652_v19 = vpop.xlane.xlu0 %8651  ;;  %v3046_v22 = vadd.f32 %v22347_v32, %v24338_v4 }
 0x731   : > { %v19040_v16 = vpop.eup %19039  ;;  %18261 = vmatpush3.msra.mxu0 %v3041_v59  ;;  %v8397_v11 = vpop.xlane.xlu1 %8396  ;;  %v8767_v42 = vsel %vm8217_vm2, %v22491_v12, 0.0  ;;  %18262 = vmatprep.mubr.msk.f32.mxu0 %vm19302_vm1, %v24153_v55 }
 0x732   : > { %19049 = vpow2.f32 %v8590_v52  ;;  %v8469_v20 = vsub.f32 %v22179_v40, %v8397_v11  ;;  %8768 = vadd.xlane.f32.xlu0 %v8767_v42  ;;  %v8821_v47 = vmul.f32 %v19040_v16, %v22156_v53  ;;  %18270 = vmatprep.subr.mxu0 %v24153_v55  ;;  %v24339_v52 = vld [vmem:[#allocation16_spill] sm:$0xff] }
 0x733   : > { %19051 = vrcp.f32 %v8652_v19  ;;  %v3051_v16 = vadd.f32 %v22347_v32, %v24339_v52  ;;  %v24341_v52 = vld [vmem:[#allocation27_spill] sm:$0xff] }
 0x734   : > { %v22503_v8 = vpop.eup %19041  ;;  %v8592_v13 = vmul.f32 1.442695, %v8469_v20  ;;  %18258 = vmatmul.mubr.msk.f32.vlgmr.msra.gmra.mrb[176].mxu1 %vm8217_vm2, %v8821_v47  ;;  %v8655_v14 = vpop.xlane.xlu0 %8654 }
 0x735   : > { %v19044_v28 = vpop.eup %19043  ;;  %18266 = vmatpush3.msra.mxu1 %v3046_v22  ;;  %v8400_v7 = vpop.xlane.xlu1 %8399  ;;  %v8770_v40 = vsel %vm8217_vm2, %v22503_v8, 0.0  ;;  %18267 = vmatprep.mubr.msk.f32.mxu1 %vm19302_vm1, %v24153_v55  ;;  %v24340_v22 = vld [vmem:[#allocation13_spill] sm:$0xff] }
 0x736   : > { %19053 = vpow2.f32 %v8592_v13  ;;  %v8470_v53 = vsub.f32 %v22188_v56, %v8400_v7  ;;  %8771 = vadd.xlane.f32.xlu1 %v8770_v40  ;;  %v8823_v59 = vmul.f32 %v19044_v28, %v22167_v50  ;;  %18275 = vmatprep.subr.mxu1 %v24153_v55  ;;  %v3056_v13 = vadd.f32 %v22347_v32, %v24340_v22 }
 0x737   : > { %19055 = vrcp.f32 %v8655_v14 }
 0x738   : > { %v22515_v19 = vpop.eup %19045  ;;  %v8594_v11 = vmul.f32 1.442695, %v8470_v53  ;;  %18263 = vmatmul.mubr.msk.f32.vlgmr.msra.gmra.mrb[170].mxu0 %vm8217_vm2, %v8823_v59  ;;  %v8658_v20 = vpop.xlane.xlu0 %8657 }
 0x739   : > { %v19048_v42 = vpop.eup %19047  ;;  %18271 = vmatpush3.msra.mxu0 %v3051_v16  ;;  %v8403_v47 = vpop.xlane.xlu1 %8402  ;;  %v8773_v56 = vsel %vm8217_vm2, %v22515_v19, 0.0  ;;  %18272 = vmatprep.mubr.msk.f32.mxu0 %vm19302_vm1, %v24153_v55  ;;  %v3061_v16 = vadd.f32 %v22347_v32, %v24341_v52 }
 0x73a   : > { %19057 = vpow2.f32 %v8594_v11  ;;  %v8471_v50 = vsub.f32 %v22197_v49, %v8403_v47  ;;  %8774 = vadd.xlane.f32.xlu0 %v8773_v56  ;;  %v8825_v4 = vmul.f32 %v19048_v42, %v22176_v3  ;;  %18280 = vmatprep.subr.mxu0 %v24153_v55 }
 0x73b   : > { %19059 = vrcp.f32 %v8658_v20 }
 0x73c   : > { %v22527_v28 = vpop.eup %19049  ;;  %v8596_v14 = vmul.f32 1.442695, %v8471_v50  ;;  %18268 = vmatmul.mubr.msk.f32.vlgmr.msra.gmra.mrb[178].mxu1 %vm8217_vm2, %v8825_v4  ;;  %v8661_v40 = vpop.xlane.xlu0 %8660  ;;  %v24342_v4 = vld [vmem:[#allocation28_spill] sm:$0xff] }
 0x73d   : > { %v19052_v7 = vpop.eup %19051  ;;  %18276 = vmatpush3.msra.mxu1 %v3056_v13  ;;  %v8406_v53 = vpop.xlane.xlu1 %8405  ;;  %v8776_v49 = vsel %vm8217_vm2, %v22527_v28, 0.0  ;;  %18277 = vmatprep.mubr.msk.f32.mxu1 %vm19302_vm1, %v24153_v55  ;;  %v3066_v22 = vadd.f32 %v22347_v32, %v24342_v4  ;;  %v24345_v4 = vld [vmem:[#allocation33_spill] sm:$0xff] }
 0x73e   : > { %19061 = vpow2.f32 %v8596_v14  ;;  %v8472_v3 = vsub.f32 %v22206_v63, %v8406_v53  ;;  %8777 = vadd.xlane.f32.xlu1 %v8776_v49  ;;  %v8827_v59 = vmul.f32 %v19052_v7, %v22185_v26  ;;  %18285 = vmatprep.subr.mxu1 %v24153_v55  ;;  %v24343_v53 = vld [vmem:[#allocation26_spill] sm:$0xff] }
 0x73f   : > { %19063 = vrcp.f32 %v8661_v40  ;;  %v3071_v49 = vadd.f32 %v22347_v32, %v24343_v53 }
 0x740   : > { %v22539_v11 = vpop.eup %19053  ;;  %v8598_v42 = vmul.f32 1.442695, %v8472_v3  ;;  %18273 = vmatmul.mubr.msk.f32.vlgmr.msra.gmra.mrb[172].mxu0 %vm8217_vm2, %v8827_v59 }
 0x741   : > { %v19056_v20 = vpop.eup %19055  ;;  %18281 = vmatpush3.msra.mxu0 %v3061_v16  ;;  %v8409_v47 = vpop.xlane.xlu1 %8408  ;;  %v8779_v63 = vsel %vm8217_vm2, %v22539_v11, 0.0  ;;  %18282 = vmatprep.mubr.msk.f32.mxu0 %vm19302_vm1, %v24153_v55 }
 0x742   : > { %19065 = vpow2.f32 %v8598_v42  ;;  %v8473_v26 = vsub.f32 %v22216_v15, %v8409_v47  ;;  %v8667_v56 = vpop.xlane.xlu0 %8666  ;;  %8780 = vadd.xlane.f32.xlu0 %v8779_v63  ;;  %v8829_v50 = vmul.f32 %v19056_v20, %v22194_v21  ;;  %18290 = vmatprep.subr.mxu0 %v24153_v55  ;;  %v24344_v20 = vld [vmem:[#allocation17_spill] sm:$0xff] }
 0x743   : > { %19067 = vrcp.f32 %v8667_v56  ;;  %v3076_v47 = vadd.f32 %v22347_v32, %v24344_v20  ;;  %v24348_v20 = vld [vmem:[#allocation30_spill] sm:$0xff] }
 0x744   : > { %v22551_v13 = vpop.eup %19057  ;;  %v8600_v14 = vmul.f32 1.442695, %v8473_v26  ;;  %18278 = vmatmul.mubr.msk.f32.vlgmr.msra.gmra.mrb[180].mxu1 %vm8217_vm2, %v8829_v50 }
 0x745   : > { %v19060_v7 = vpop.eup %19059  ;;  %18286 = vmatpush3.msra.mxu1 %v3066_v22  ;;  %v8664_v40 = vpop.xlane.xlu1 %8663  ;;  %v8782_v15 = vsel %vm8217_vm2, %v22551_v13, 0.0  ;;  %18287 = vmatprep.mubr.msk.f32.mxu1 %vm19302_vm1, %v24153_v55  ;;  %v3086_v22 = vadd.f32 %v22347_v32, %v24345_v4 }
 0x746   : > { %19069 = vpow2.f32 %v8600_v14  ;;  %8783 = vadd.xlane.f32.xlu1 %v8782_v15  ;;  %v8831_v21 = vmul.f32 %v19060_v7, %v22203_v35  ;;  %18295 = vmatprep.subr.mxu1 %v24153_v55 }
 0x747   : > { %19071 = vrcp.f32 %v8664_v40 }
 0x748   : > { %v22562_v3 = vpop.eup %19061  ;;  %18283 = vmatmul.mubr.msk.f32.vlgmr.msra.gmra.mrb[174].mxu0 %vm8217_vm2, %v8831_v21  ;;  %v24346_v21 = vld [vmem:[#allocation32_spill] sm:$0xff] }
 0x749   : > { %v19064_v59 = vpop.eup %19063  ;;  %18291 = vmatpush3.msra.mxu0 %v3071_v49  ;;  %v8670_v52 = vpop.xlane.xlu1 %8669  ;;  %v8785_v16 = vsel %vm8217_vm2, %v22562_v3, 0.0  ;;  %18292 = vmatprep.mubr.msk.f32.mxu0 %vm19302_vm1, %v24153_v55  ;;  %v3081_v53 = vadd.f32 %v22347_v32, %v24346_v21  ;;  %v24352_v21 = vld [vmem:[#allocation35_spill] sm:$0xff] }
 0x74a   : > { %19073 = vrcp.f32 %v8670_v52  ;;  %v8673_v35 = vpop.xlane.xlu0 %8672  ;;  %8786 = vadd.xlane.f32.xlu0 %v8785_v16  ;;  %v8833_v42 = vmul.f32 %v19064_v59, %v22212_v60  ;;  %18300 = vmatprep.subr.mxu0 %v24153_v55 }
 0x74b   : > { %19075 = vrcp.f32 %v8673_v35  ;;  %v24347_v35 = vld [vmem:[#allocation31_spill] sm:$0xff] }
 0x74c   : > { %v22573_v63 = vpop.eup %19065  ;;  %18288 = vmatmul.mubr.msk.f32.vlgmr.msra.gmra.mrb[182].mxu1 %vm8217_vm2, %v8833_v42  ;;  %v3096_v42 = vadd.f32 %v22347_v32, %v24347_v35 }
 0x74d   : > { %v19068_v26 = vpop.eup %19067  ;;  %18296 = vmatpush3.msra.mxu1 %v3076_v47  ;;  %v8788_v56 = vsel %vm8217_vm2, %v22573_v63, 0.0  ;;  %18297 = vmatprep.mubr.msk.f32.mxu1 %vm19302_vm1, %v24153_v55  ;;  %v8676_v60 = vpop.xlane.xlu1 %8675  ;;  %v3091_v47 = vadd.f32 %v22347_v32, %v24348_v20 }
 0x74e   : > { %8789 = vadd.xlane.f32.xlu1 %v8788_v56  ;;  %18305 = vmatprep.subr.mxu1 %v24153_v55  ;;  %v8837_v50 = vmul.f32 %v19068_v26, %v22223_v29  ;;  %19077 = vrcp.f32 %v8676_v60  ;;  %v24349_v56 = vld [vmem:[#allocation39_spill] sm:$0xff] }
 0x74f   : > { %v3101_v60 = vadd.f32 %v22347_v32, %v24349_v56 }
 0x750   : > { %v22584_v14 = vpop.eup %19069  ;;  %18298 = vmatmul.mubr.msk.f32.vlgmr.msra.gmra.mrb[184].mxu1 %vm8217_vm2, %v8837_v50 }
 0x751   : > { %v19072_v7 = vpop.eup %19071  ;;  %18306 = vmatpush3.msra.mxu1 %v3086_v22  ;;  %v8791_v40 = vsel %vm8217_vm2, %v22584_v14, 0.0  ;;  %18307 = vmatprep.mubr.msk.f32.mxu1 %vm19302_vm1, %v24153_v55  ;;  %v8679_v15 = vpop.xlane.xlu0 %8678 }
 0x752   : > { %8792 = vadd.xlane.f32.xlu0 %v8791_v40  ;;  %v8835_v29 = vmul.f32 %v19072_v7, %v22227_v51  ;;  %18315 = vmatprep.subr.mxu1 %v24153_v55  ;;  %19079 = vrcp.f32 %v8679_v15  ;;  %v24351_v15 = vld [vmem:[#allocation74_spill] sm:$0xff] }
 0x754   : > { %v19074_v49 = vpop.eup %19073  ;;  %18293 = vmatmul.mubr.msk.f32.vlgmr.msra.gmra.mrb[176].mxu0 %vm8217_vm2, %v8835_v29 }
 0x755   : > { %v19076_v59 = vpop.eup %19075  ;;  %18301 = vmatpush3.msra.mxu0 %v3081_v53  ;;  %18302 = vmatprep.mubr.msk.f32.mxu0 %vm19302_vm1, %v24153_v55  ;;  %v8839_v52 = vmul.f32 %v19074_v49, %v22234_v54  ;;  %v8682_v16 = vpop.xlane.xlu1 %8681 }
 0x756   : > { %18310 = vmatprep.subr.mxu0 %v24153_v55  ;;  %v8841_v51 = vmul.f32 %v19076_v59, %v22237_v43  ;;  %19081 = vrcp.f32 %v8682_v16 }
 0x758   : > { %18303 = vmatmul.mubr.msk.f32.vlgmr.msra.gmra.mrb[178].mxu0 %vm8217_vm2, %v8839_v52  ;;  %18308 = vmatmul.mubr.msk.f32.vlgmr.msra.gmra.mrb[186].mxu1 %vm8217_vm2, %v8841_v51  ;;  %v19078_v26 = vpop.eup %19077  ;;  %v24353_v52 = vld [vmem:[#allocation36_spill] sm:$0xff] }
 0x759   : > { %18311 = vmatpush3.msra.mxu0 %v3091_v47  ;;  %18316 = vmatpush3.msra.mxu1 %v3096_v42  ;;  %v8685_v54 = vpop.xlane.xlu0 %8684  ;;  %v8843_v43 = vmul.f32 %v19078_v26, %v22244_v44  ;;  %v24350_v44 = vld [vmem:[#allocation37_spill] sm:$0xff]  ;;  %v3116_v16 = vadd.f32 %v22347_v32, %v24353_v52  ;;  %v24358_v52 = vld [vmem:[#allocation18_spill] sm:$0xff] }
 0x75a   : > { %18312 = vmatprep.mubr.msk.f32.mxu0 %vm19302_vm1, %v24153_v55  ;;  %18320 = vmatprep.subr.mxu0 %v24153_v55  ;;  %19083 = vrcp.f32 %v8685_v54  ;;  %v3106_v22 = vadd.f32 %v22347_v32, %v24350_v44 }
 0x75b   : > { %18317 = vmatprep.mubr.msk.f32.mxu1 %vm19302_vm1, %v24153_v55  ;;  %18325 = vmatprep.subr.mxu1 %v24153_v55 }
 0x75c   : > { %18313 = vmatmul.mubr.msk.f32.vlgmr.msra.gmra.mrb[180].mxu0 %vm8217_vm2, %v8843_v43  ;;  %v19080_v50 = vpop.eup %19079 }
 0x75d   : > { %18321 = vmatpush3.msra.mxu0 %v3101_v60  ;;  %18322 = vmatprep.mubr.msk.f32.mxu0 %vm19302_vm1, %v24153_v55  ;;  %v8845_v4 = vmul.f32 %v19080_v50, %v22248_v39  ;;  %v3111_v39 = vadd.f32 %v22347_v32, %v24352_v21  ;;  %v24355_v60 = vld [vmem:[#allocation19_spill] sm:$0xff] }
 0x75e   : > { %18330 = vmatprep.subr.mxu0 %v24153_v55 }
 0x75f   : > { %18318 = vmatmul.mubr.msk.f32.vlgmr.msra.gmra.mrb[188].mxu1 %vm8217_vm2, %v8845_v4  ;;  %v8688_v7 = vpop.xlane.xlu1 %8687 }
 0x760   : > { %v19082_v40 = vpop.eup %19081  ;;  %18326 = vmatpush3.msra.mxu1 %v3106_v22  ;;  %19085 = vrcp.f32 %v8688_v7  ;;  %18327 = vmatprep.mubr.msk.f32.mxu1 %vm19302_vm1, %v24153_v55  ;;  %v24356_v22 = vld [vmem:[#allocation40_spill] sm:$0xff] }
 0x761   : > { %v8847_v29 = vmul.f32 %v19082_v40, %v24351_v15  ;;  %18335 = vmatprep.subr.mxu1 %v24153_v55 }
 0x763   : > { %v8691_v53 = vpop.xlane.xlu0 %8690  ;;  %18323 = vmatmul.mubr.msk.f32.vlgmr.msra.gmra.mrb[182].mxu0 %vm8217_vm2, %v8847_v29 }
 0x764   : > { %v19084_v49 = vpop.eup %19083  ;;  %19087 = vrcp.f32 %v8691_v53  ;;  %18331 = vmatpush3.msra.mxu0 %v3111_v39  ;;  %18332 = vmatprep.mubr.msk.f32.mxu0 %vm19302_vm1, %v24153_v55 }
 0x765   : > { %v8849_v59 = vmul.f32 %v19084_v49, %v22258_v6  ;;  %18340 = vmatprep.subr.mxu0 %v24153_v55  ;;  %v24354_v6 = vld [vmem:[#allocation34_spill] sm:$0xff] }
 0x766   : > { %v3121_v47 = vadd.f32 %v22347_v32, %v24354_v6 }
 0x767   : > { %18328 = vmatmul.mubr.msk.f32.vlgmr.msra.gmra.mrb[190].mxu1 %vm8217_vm2, %v8849_v59  ;;  %v8694_v51 = vpop.xlane.xlu1 %8693 }
 0x768   : > { %18336 = vmatpush3.msra.mxu1 %v3116_v16  ;;  %19089 = vrcp.f32 %v8694_v51  ;;  %18337 = vmatprep.mubr.msk.f32.mxu1 %vm19302_vm1, %v24153_v55  ;;  %v24359_v51 = vld [vmem:[#allocation38_spill] sm:$0xff] }
 0x769   : > { %18345 = vmatprep.subr.mxu1 %v24153_v55 }
 0x76a   : > { %v19086_v35 = vpop.eup %19085 }
 0x76b   : > { %v8697_v42 = vpop.xlane.xlu0 %8696  ;;  %v8851_v20 = vmul.f32 %v19086_v35, %v22264_v18  ;;  %v3126_v18 = vadd.f32 %v22347_v32, %v24355_v60  ;;  %v3146_v35 = vadd.f32 %v22347_v32, %v24359_v51 }
 0x76c   : > { %19091 = vrcp.f32 %v8697_v42 }
 0x76d   : > { %18333 = vmatmul.mubr.msk.f32.vlgmr.msra.gmra.mrb[184].mxu0 %vm8217_vm2, %v8851_v20 }
 0x76e   : > { %v19088_v26 = vpop.eup %19087  ;;  %18341 = vmatpush3.msra.mxu0 %v3121_v47  ;;  %v8700_v54 = vpop.xlane.xlu1 %8699  ;;  %18342 = vmatprep.mubr.msk.f32.mxu0 %vm19302_vm1, %v24153_v55  ;;  %v24360_v47 = vld [vmem:[#allocation20_spill] sm:$0xff] }
 0x76f   : > { %19093 = vrcp.f32 %v8700_v54  ;;  %v8703_v43 = vpop.xlane.xlu0 %8702  ;;  %v8853_v56 = vmul.f32 %v19088_v26, %v22270_v57  ;;  %18350 = vmatprep.subr.mxu0 %v24153_v55  ;;  %v3131_v57 = vadd.f32 %v22347_v32, %v24356_v22  ;;  %v3156_v26 = vadd.f32 %v22347_v32, %v24360_v47 }
 0x770   : > { %19095 = vrcp.f32 %v8703_v43  ;;  %v24361_v43 = vld [vmem:[#allocation42_spill] sm:$0xff] }
 0x771   : > { %18338 = vmatmul.mubr.msk.f32.vlgmr.msra.gmra.mrb[192].mxu1 %vm8217_vm2, %v8853_v56  ;;  %v3151_v56 = vadd.f32 %v22347_v32, %v24361_v43 }
 0x772   : > { %v19090_v50 = vpop.eup %19089  ;;  %18346 = vmatpush3.msra.mxu1 %v3126_v18  ;;  %18347 = vmatprep.mubr.msk.f32.mxu1 %vm19302_vm1, %v24153_v55 }
 0x773   : > { %v8709_v4 = vpop.xlane.xlu0 %8708  ;;  %v8855_v44 = vmul.f32 %v19090_v50, %v22276_v2  ;;  %18355 = vmatprep.subr.mxu1 %v24153_v55  ;;  %v24357_v2 = vld [vmem:[#allocation41_spill] sm:$0xff]  ;;  %v24362_v50 = vld [vmem:[#allocation43_spill] sm:$0xff] }
 0x774   : > { %19097 = vrcp.f32 %v8709_v4  ;;  %v8706_v7 = vpop.xlane.xlu1 %8705  ;;  %v3136_v29 = vadd.f32 %v22347_v32, %v24357_v2  ;;  %v3166_v4 = vadd.f32 %v22347_v32, %v24362_v50  ;;  %v24364_v2 = vld [vmem:[#allocation45_spill] sm:$0xff] }
 0x775   : > { %19099 = vrcp.f32 %v8706_v7  ;;  %18343 = vmatmul.mubr.msk.f32.vlgmr.msra.gmra.mrb[186].mxu0 %vm8217_vm2, %v8855_v44 }
 0x776   : > { %v19092_v40 = vpop.eup %19091  ;;  %18351 = vmatpush3.msra.mxu0 %v3131_v57  ;;  %18352 = vmatprep.mubr.msk.f32.mxu0 %vm19302_vm1, %v24153_v55  ;;  %v24363_v57 = vld [vmem:[#allocation44_spill] sm:$0xff] }
 0x777   : > { %v8857_v15 = vmul.f32 %v19092_v40, %v22280_v0  ;;  %18360 = vmatprep.subr.mxu0 %v24153_v55  ;;  %v3141_v0 = vadd.f32 %v22347_v32, %v24358_v52  ;;  %v3161_v7 = vadd.f32 %v22347_v32, %v24363_v57  ;;  %v24366_v52 = vld [vmem:[#allocation47_spill] sm:$0xff] }
 0x779   : > { %v19094_v21 = vpop.eup %19093  ;;  %v8715_v39 = vpop.xlane.xlu0 %8714  ;;  %18348 = vmatmul.mubr.msk.f32.vlgmr.msra.gmra.mrb[194].mxu1 %vm8217_vm2, %v8857_v15 }
 0x77a   : > { %v19096_v53 = vpop.eup %19095  ;;  %19101 = vrcp.f32 %v8715_v39  ;;  %18356 = vmatpush3.msra.mxu1 %v3136_v29  ;;  %v8712_v49 = vpop.xlane.xlu1 %8711  ;;  %v8859_v59 = vmul.f32 %v19094_v21, %v22286_v31  ;;  %18357 = vmatprep.mubr.msk.f32.mxu1 %vm19302_vm1, %v24153_v55  ;;  %v3176_v29 = vadd.f32 %v22347_v32, %v24364_v2 }
 0x77b   : > { %19103 = vrcp.f32 %v8712_v49  ;;  %18365 = vmatprep.subr.mxu1 %v24153_v55  ;;  %v8861_v16 = vmul.f32 %v19096_v53, %v22288_v5  ;;  %v24365_v53 = vld [vmem:[#allocation46_spill] sm:$0xff] }
 0x77c   : > { %18353 = vmatmul.mubr.msk.f32.vlgmr.msra.gmra.mrb[188].mxu0 %vm8217_vm2, %v8859_v59  ;;  %v3171_v49 = vadd.f32 %v22347_v32, %v24365_v53 }
 0x77d   : > { %18361 = vmatpush3.msra.mxu0 %v3141_v0  ;;  %18358 = vmatmul.mubr.msk.f32.vlgmr.msra.gmra.mrb[196].mxu1 %vm8217_vm2, %v8861_v16  ;;  %v3186_v0 = vadd.f32 %v22347_v32, %v24366_v52 }
 0x77e   : > { %v19098_v31 = vpop.eup %19097  ;;  %18366 = vmatpush3.msra.mxu1 %v3146_v35  ;;  %v8721_v42 = vpop.xlane.xlu0 %8720  ;;  %18362 = vmatprep.mubr.msk.f32.mxu0 %vm19302_vm1, %v24153_v55  ;;  %v24367_v35 = vld [vmem:[#allocation48_spill] sm:$0xff] }
 0x77f   : > { %v19100_v20 = vpop.eup %19099  ;;  %19105 = vrcp.f32 %v8721_v42  ;;  %v8718_v6 = vpop.xlane.xlu1 %8717  ;;  %18367 = vmatprep.mubr.msk.f32.mxu1 %vm19302_vm1, %v24153_v55  ;;  %18370 = vmatprep.subr.mxu0 %v24153_v55  ;;  %v8865_v5 = vmul.f32 %v19098_v31, %v22296_v33  ;;  %v3181_v31 = vadd.f32 %v22347_v32, %v24367_v35 }
 0x780   : > { %19107 = vrcp.f32 %v8718_v6  ;;  %18375 = vmatprep.subr.mxu1 %v24153_v55  ;;  %v8863_v54 = vmul.f32 %v19100_v20, %v22298_v25  ;;  %v24368_v6 = vld [vmem:[#allocation49_spill] sm:$0xff] }
 0x781   : > { %18368 = vmatmul.mubr.msk.f32.vlgmr.msra.gmra.mrb[198].mxu1 %vm8217_vm2, %v8865_v5  ;;  %v3196_v5 = vadd.f32 %v22347_v32, %v24368_v6  ;;  %v24378_v6 = vld [vmem:[#allocation22_spill] sm:$0xff] }
 0x782   : > { %18363 = vmatmul.mubr.msk.f32.vlgmr.msra.gmra.mrb[190].mxu0 %vm8217_vm2, %v8863_v54  ;;  %18376 = vmatpush3.msra.mxu1 %v3156_v26  ;;  %v24369_v26 = vld [vmem:[#allocation50_spill] sm:$0xff] }
 0x783   : > { %18371 = vmatpush3.msra.mxu0 %v3151_v56  ;;  %18377 = vmatprep.mubr.msk.f32.mxu1 %vm19302_vm1, %v24153_v55  ;;  %v3191_v54 = vadd.f32 %v22347_v32, %v24369_v26  ;;  %v22757_v56 = vld [vmem:[%s24052_s8] ss:$0 sm:$0xff] }
 0x784   : > { %v19102_v33 = vpop.eup %19101  ;;  %18385 = vmatprep.subr.mxu1 %v24153_v55  ;;  %18372 = vmatprep.mubr.msk.f32.mxu0 %vm19302_vm1, %v24153_v55 }
 0x785   : > { %v19104_v60 = vpop.eup %19103  ;;  %v8727_v25 = vpop.xlane.xlu0 %8726  ;;  %v8869_v18 = vmul.f32 %v19102_v33, %v22306_v58  ;;  %18380 = vmatprep.subr.mxu0 %v24153_v55  ;;  %v24370_v33 = vld [vmem:[#allocation52_spill] sm:$0xff] }
 0x786   : > { %19109 = vrcp.f32 %v8727_v25  ;;  %v8724_v44 = vpop.xlane.xlu1 %8723  ;;  %v8867_v22 = vmul.f32 %v19104_v60, %v22308_v37  ;;  %v3201_v60 = vadd.f32 %v22757_v56, %v24370_v33 }
 0x787   : > { %19111 = vrcp.f32 %v8724_v44  ;;  %18378 = vmatmul.mubr.msk.f32.vlgmr.msra.gmra.mrb[200].mxu1 %vm8217_vm2, %v8869_v18 }
 0x788   : > { %18386 = vmatpush3.msra.mxu1 %v3166_v4  ;;  %18373 = vmatmul.mubr.msk.f32.vlgmr.msra.gmra.mrb[192].mxu0 %vm8217_vm2, %v8867_v22 }
 0x789   : > { %v19106_v40 = vpop.eup %19105  ;;  %18381 = vmatpush3.msra.mxu0 %v3161_v7  ;;  %18387 = vmatprep.mubr.msk.f32.mxu1 %vm19302_vm1, %v24153_v55  ;;  %v24372_v7 = vld [vmem:[#allocation3_spill] sm:$0xff] }
 0x78a   : > { %v19108_v58 = vpop.eup %19107  ;;  %v8733_v15 = vpop.xlane.xlu0 %8732  ;;  %18395 = vmatprep.subr.mxu1 %v24153_v55  ;;  %18382 = vmatprep.mubr.msk.f32.mxu0 %vm19302_vm1, %v24153_v55  ;;  %v8873_v37 = vmul.f32 %v19106_v40, %v22316_v62 }
 0x78b   : > { %19113 = vrcp.f32 %v8733_v15  ;;  %v8730_v21 = vpop.xlane.xlu1 %8729  ;;  %18390 = vmatprep.subr.mxu0 %v24153_v55  ;;  %v8871_v39 = vmul.f32 %v19108_v58, %v22318_v61 }
 0x78c   : > { %19115 = vrcp.f32 %v8730_v21  ;;  %18388 = vmatmul.mubr.msk.f32.vlgmr.msra.gmra.mrb[202].mxu1 %vm8217_vm2, %v8873_v37  ;;  %v24373_v37 = vld [vmem:[#allocation2_spill] sm:$0xff] }
 0x78d   : > { %18396 = vmatpush3.msra.mxu1 %v3176_v29  ;;  %18383 = vmatmul.mubr.msk.f32.vlgmr.msra.gmra.mrb[194].mxu0 %vm8217_vm2, %v8871_v39  ;;  %v24374_v39 = vld [vmem:[#allocation5_spill] sm:$0xff] }
 0x78e   : > { %18391 = vmatpush3.msra.mxu0 %v3171_v49  ;;  %18397 = vmatprep.mubr.msk.f32.mxu1 %vm19302_vm1, %v24153_v55 }
 0x78f   : > { %18405 = vmatprep.subr.mxu1 %v24153_v55  ;;  %18392 = vmatprep.mubr.msk.f32.mxu0 %vm19302_vm1, %v24153_v55 }
 0x790   : > { %v19110_v62 = vpop.eup %19109  ;;  %18400 = vmatprep.subr.mxu0 %v24153_v55 }
 0x791   : > { %v19112_v61 = vpop.eup %19111  ;;  %v8877_v59 = vmul.f32 %v19110_v62, %v22325_v38 }
 0x792   : > { %v8736_v16 = vpop.xlane.xlu1 %8735  ;;  %v8875_v51 = vmul.f32 %v19112_v61, %v22327_v24  ;;  %v24375_v61 = vld [vmem:[#allocation4_spill] sm:$0xff] }
 0x793   : > { %19117 = vrcp.f32 %v8736_v16  ;;  %18398 = vmatmul.mubr.msk.f32.vlgmr.msra.gmra.mrb[204].mxu1 %vm8217_vm2, %v8877_v59  ;;  %v24376_v16 = vld [vmem:[#allocation15_spill] sm:$0xff] }
 0x794   : > { %18406 = vmatpush3.msra.mxu1 %v3186_v0  ;;  %18393 = vmatmul.mubr.msk.f32.vlgmr.msra.gmra.mrb[196].mxu0 %vm8217_vm2, %v8875_v51 }
 0x795   : > { %v19114_v42 = vpop.eup %19113  ;;  %18401 = vmatpush3.msra.mxu0 %v3181_v31  ;;  %18407 = vmatprep.mubr.msk.f32.mxu1 %vm19302_vm1, %v24153_v55 }
 0x796   : > { %v19116_v38 = vpop.eup %19115  ;;  %v8739_v20 = vpop.xlane.xlu0 %8738  ;;  %18415 = vmatprep.subr.mxu1 %v24153_v55  ;;  %18402 = vmatprep.mubr.msk.f32.mxu0 %vm19302_vm1, %v24153_v55  ;;  %v8881_v24 = vmul.f32 %v19114_v42, %v22334_v48  ;;  %v24377_v42 = vld [vmem:[#allocation14_spill] sm:$0xff] }
 0x797   : > { %19119 = vrcp.f32 %v8739_v20  ;;  %18410 = vmatprep.subr.mxu0 %v24153_v55  ;;  %v8879_v47 = vmul.f32 %v19116_v38, %v22336_v27 }
 0x798   : > { %18408 = vmatmul.mubr.msk.f32.vlgmr.msra.gmra.mrb[206].mxu1 %vm8217_vm2, %v8881_v24 }
 0x799   : > { %18416 = vmatpush3.msra.mxu1 %v3196_v5  ;;  %18403 = vmatmul.mubr.msk.f32.vlgmr.msra.gmra.mrb[198].mxu0 %vm8217_vm2, %v8879_v47 }
 0x79a   : > { %18411 = vmatpush3.msra.mxu0 %v3191_v54  ;;  %18412 = vmatprep.mubr.msk.f32.mxu0 %vm19302_vm1, %v24153_v55  ;;  %v24379_v54 = vld [vmem:[#allocation21_spill] sm:$0xff] }
 0x79b   : > { %v8742_v43 = vpop.xlane.xlu1 %8741  ;;  %18420 = vmatprep.subr.mxu0 %v24153_v55  ;;  %18417 = vmatprep.mubr.msk.f32.mxu1 %vm19302_vm1, %v24153_v55 }
 0x79c   : > { %19121 = vrcp.f32 %v8742_v43  ;;  %18425 = vmatprep.subr.mxu1 %v24153_v55 }
 0x79d   : > { %v19118_v48 = vpop.eup %19117 }
 0x79e   : > { %v8883_v32 = vmul.f32 %v19118_v48, %v22360_v1  ;;  %v24371_v1 = vld [vmem:[#allocation51_spill] sm:$0xff] }
 0x79f   : > { %v8745_v27 = vpop.xlane.xlu0 %8744  ;;  %v3206_v4 = vadd.f32 %v22757_v56, %v24371_v1 }
 0x7a0   : > { %19123 = vrcp.f32 %v8745_v27  ;;  %18413 = vmatmul.mubr.msk.f32.vlgmr.msra.gmra.mrb[200].mxu0 %vm8217_vm2, %v8883_v32  ;;  %v24380_v32 = vld [vmem:[#allocation54_spill] sm:$0xff] }
 0x7a1   : > { %v19120_v25 = vpop.eup %19119  ;;  %18421 = vmatpush3.msra.mxu0 %v3201_v60  ;;  %18422 = vmatprep.mubr.msk.f32.mxu0 %vm19302_vm1, %v24153_v55 }
 0x7a2   : > { %v8885_v50 = vmul.f32 %v19120_v25, %v22371_v34  ;;  %18430 = vmatprep.subr.mxu0 %v24153_v55  ;;  %v3211_v34 = vadd.f32 %v22757_v56, %v24372_v7 }
 0x7a3   : > { %v8748_v18 = vpop.xlane.xlu1 %8747 }
 0x7a4   : > { %19125 = vrcp.f32 %v8748_v18  ;;  %18418 = vmatmul.mubr.msk.f32.vlgmr.msra.gmra.mrb[208].mxu1 %vm8217_vm2, %v8885_v50  ;;  %v24381_v18 = vld [vmem:[#allocation53_spill] sm:$0xff] }
 0x7a5   : > { %18426 = vmatpush3.msra.mxu1 %v3206_v4  ;;  %18427 = vmatprep.mubr.msk.f32.mxu1 %vm19302_vm1, %v24153_v55 }
 0x7a6   : > { %v19122_v44 = vpop.eup %19121  ;;  %18435 = vmatprep.subr.mxu1 %v24153_v55 }
 0x7a7   : > { %v8751_v22 = vpop.xlane.xlu0 %8750  ;;  %v8887_v57 = vmul.f32 %v19122_v44, %v22383_v10  ;;  %v3216_v10 = vadd.f32 %v22757_v56, %v24373_v37  ;;  %v24382_v44 = vld [vmem:[#allocation56_spill] sm:$0xff] }
 0x7a8   : > { %19127 = vrcp.f32 %v8751_v22 }
 0x7a9   : > { %18423 = vmatmul.mubr.msk.f32.vlgmr.msra.gmra.mrb[202].mxu0 %vm8217_vm2, %v8887_v57 }
 0x7aa   : > { %v19124_v40 = vpop.eup %19123  ;;  %18431 = vmatpush3.msra.mxu0 %v3211_v34  ;;  %18432 = vmatprep.mubr.msk.f32.mxu0 %vm19302_vm1, %v24153_v55  ;;  %v24383_v34 = vld [vmem:[#allocation55_spill] sm:$0xff] }
 0x7ab   : > { %v8754_v58 = vpop.xlane.xlu1 %8753  ;;  %v8889_v15 = vmul.f32 %v19124_v40, %v22395_v9  ;;  %18440 = vmatprep.subr.mxu0 %v24153_v55  ;;  %v3221_v9 = vadd.f32 %v22757_v56, %v24374_v39 }
 0x7ac   : > { %19129 = vrcp.f32 %v8754_v58 }
 0x7ad   : > { %18428 = vmatmul.mubr.msk.f32.vlgmr.msra.gmra.mrb[210].mxu1 %vm8217_vm2, %v8889_v15 }
 0x7ae   : > { %v19126_v2 = vpop.eup %19125  ;;  %18436 = vmatpush3.msra.mxu1 %v3216_v10  ;;  %18437 = vmatprep.mubr.msk.f32.mxu1 %vm19302_vm1, %v24153_v55 }
 0x7af   : > { %v8757_v29 = vpop.xlane.xlu0 %8756  ;;  %v8891_v21 = vmul.f32 %v19126_v2, %v22407_v36  ;;  %18445 = vmatprep.subr.mxu1 %v24153_v55  ;;  %v3226_v36 = vadd.f32 %v22757_v56, %v24375_v61 }
 0x7b0   : > { %19131 = vrcp.f32 %v8757_v29  ;;  %v24384_v29 = vld [vmem:[#allocation58_spill] sm:$0xff] }
 0x7b1   : > { %18433 = vmatmul.mubr.msk.f32.vlgmr.msra.gmra.mrb[204].mxu0 %vm8217_vm2, %v8891_v21  ;;  %v3271_v21 = vadd.f32 %v22757_v56, %v24384_v29 }
 0x7b2   : > { %v19128_v53 = vpop.eup %19127  ;;  %18441 = vmatpush3.msra.mxu0 %v3221_v9  ;;  %18442 = vmatprep.mubr.msk.f32.mxu0 %vm19302_vm1, %v24153_v55 }
 0x7b3   : > { %v8760_v49 = vpop.xlane.xlu1 %8759  ;;  %v8893_v62 = vmul.f32 %v19128_v53, %v22419_v23  ;;  %18450 = vmatprep.subr.mxu0 %v24153_v55  ;;  %v3231_v23 = vadd.f32 %v22757_v56, %v24376_v16 }
 0x7b4   : > { %19133 = vrcp.f32 %v8760_v49 }
 0x7b5   : > { %18438 = vmatmul.mubr.msk.f32.vlgmr.msra.gmra.mrb[212].mxu1 %vm8217_vm2, %v8893_v62 }
 0x7b6   : > { %v19130_v59 = vpop.eup %19129  ;;  %18446 = vmatpush3.msra.mxu1 %v3226_v36  ;;  %18447 = vmatprep.mubr.msk.f32.mxu1 %vm19302_vm1, %v24153_v55  ;;  %v13594_v36 = vld [vmem:[%s24053_s9] sm:$0xff] }
 0x7b7   : > { %v8763_v52 = vpop.xlane.xlu0 %8762  ;;  %v8895_v0 = vmul.f32 %v19130_v59, %v22431_v45  ;;  %18455 = vmatprep.subr.mxu1 %v24153_v55  ;;  %v3236_v45 = vadd.f32 %v22757_v56, %v24377_v42  ;;  %v13595_v59 = vld [vmem:[%s24053_s9 + $0x8] sm:$0xff] }
 0x7b8   : > { %19135 = vrcp.f32 %v8763_v52 }
 0x7b9   : > { %18443 = vmatmul.mubr.msk.f32.vlgmr.msra.gmra.mrb[206].mxu0 %vm8217_vm2, %v8895_v0 }
 0x7ba   : > { %v19132_v51 = vpop.eup %19131  ;;  %18451 = vmatpush3.msra.mxu0 %v3231_v23  ;;  %18452 = vmatprep.mubr.msk.f32.mxu0 %vm19302_vm1, %v24153_v55  ;;  %v18742_v23 = vpack.c.bf16 %v13595_v59, %v13594_v36 }
 0x7bb   : > { %v8766_v35 = vpop.xlane.xlu1 %8765  ;;  %v8897_v31 = vmul.f32 %v19132_v51, %v22443_v46  ;;  %18460 = vmatprep.subr.mxu0 %v24153_v55  ;;  %v3241_v46 = vadd.f32 %v22757_v56, %v24378_v6  ;;  %v24386_v51 = vld [vmem:[#allocation60_spill] sm:$0xff] }
 0x7bc   : > { %19137 = vrcp.f32 %v8766_v35  ;;  %v3281_v35 = vadd.f32 %v22757_v56, %v24386_v51 }
 0x7bd   : > { %18448 = vmatmul.mubr.msk.f32.vlgmr.msra.gmra.mrb[214].mxu1 %vm8217_vm2, %v8897_v31 }
 0x7be   : > { %v19134_v38 = vpop.eup %19133  ;;  %18456 = vmatpush3.msra.mxu1 %v3236_v45  ;;  %18457 = vmatprep.mubr.msk.f32.mxu1 %vm19302_vm1, %v24153_v55 }
 0x7bf   : > { %v8769_v20 = vpop.xlane.xlu0 %8768  ;;  %v8899_v24 = vmul.f32 %v19134_v38, %v22455_v41  ;;  %18465 = vmatprep.subr.mxu1 %v24153_v55  ;;  %v3246_v41 = vadd.f32 %v22757_v56, %v24379_v54 }
 0x7c0   : > { %19139 = vrcp.f32 %v8769_v20 }
 0x7c1   : > { %18453 = vmatmul.mubr.msk.f32.vlgmr.msra.gmra.mrb[208].mxu0 %vm8217_vm2, %v8899_v24 }
 0x7c2   : > { %v19136_v5 = vpop.eup %19135  ;;  %18461 = vmatpush3.msra.mxu0 %v3241_v46  ;;  %18462 = vmatprep.mubr.msk.f32.mxu0 %vm19302_vm1, %v24153_v55 }
 0x7c3   : > { %v8772_v47 = vpop.xlane.xlu1 %8771  ;;  %v8901_v26 = vmul.f32 %v19136_v5, %v22467_v30  ;;  %18470 = vmatprep.subr.mxu0 %v24153_v55  ;;  %v3251_v30 = vadd.f32 %v22757_v56, %v24380_v32 }
 0x7c4   : > { %19141 = vrcp.f32 %v8772_v47 }
 0x7c5   : > { %18458 = vmatmul.mubr.msk.f32.vlgmr.msra.gmra.mrb[216].mxu1 %vm8217_vm2, %v8901_v26 }
 0x7c6   : > { %v19138_v43 = vpop.eup %19137  ;;  %18466 = vmatpush3.msra.mxu1 %v3246_v41  ;;  %18467 = vmatprep.mubr.msk.f32.mxu1 %vm19302_vm1, %v24153_v55 }
 0x7c7   : > { %v8775_v48 = vpop.xlane.xlu0 %8774  ;;  %v8903_v27 = vmul.f32 %v19138_v43, %v22479_v17  ;;  %18475 = vmatprep.subr.mxu1 %v24153_v55  ;;  %v3256_v17 = vadd.f32 %v22757_v56, %v24381_v18 }
 0x7c8   : > { %19143 = vrcp.f32 %v8775_v48 }
 0x7c9   : > { %18463 = vmatmul.mubr.msk.f32.vlgmr.msra.gmra.mrb[210].mxu0 %vm8217_vm2, %v8903_v27 }
 0x7ca   : > { %v19140_v33 = vpop.eup %19139  ;;  %18471 = vmatpush3.msra.mxu0 %v3251_v30  ;;  %18472 = vmatprep.mubr.msk.f32.mxu0 %vm19302_vm1, %v24153_v55 }
 0x7cb   : > { %v8778_v60 = vpop.xlane.xlu1 %8777  ;;  %v8905_v25 = vmul.f32 %v19140_v33, %v22491_v12  ;;  %18480 = vmatprep.subr.mxu0 %v24153_v55  ;;  %v3261_v12 = vadd.f32 %v22757_v56, %v24382_v44 }
 0x7cc   : > { %19145 = vrcp.f32 %v8778_v60 }
 0x7cd   : > { %18468 = vmatmul.mubr.msk.f32.vlgmr.msra.gmra.mrb[218].mxu1 %vm8217_vm2, %v8905_v25 }
 0x7ce   : > { %v19142_v50 = vpop.eup %19141  ;;  %18476 = vmatpush3.msra.mxu1 %v3256_v17  ;;  %18477 = vmatprep.mubr.msk.f32.mxu1 %vm19302_vm1, %v24153_v55 }
 0x7cf   : > { %v8781_v1 = vpop.xlane.xlu0 %8780  ;;  %v8907_v4 = vmul.f32 %v19142_v50, %v22503_v8  ;;  %18485 = vmatprep.subr.mxu1 %v24153_v55  ;;  %v3266_v8 = vadd.f32 %v22757_v56, %v24383_v34 }
 0x7d0   : > { %19147 = vrcp.f32 %v8781_v1 }
 0x7d1   : > { %18473 = vmatmul.mubr.msk.f32.vlgmr.msra.gmra.mrb[212].mxu0 %vm8217_vm2, %v8907_v4 }
 0x7d2   : > { %v19144_v22 = vpop.eup %19143  ;;  %18481 = vmatpush3.msra.mxu0 %v3261_v12  ;;  %18482 = vmatprep.mubr.msk.f32.mxu0 %vm19302_vm1, %v24153_v55 }
 0x7d3   : > { %v8784_v57 = vpop.xlane.xlu1 %8783  ;;  %v8909_v7 = vmul.f32 %v19144_v22, %v22515_v19  ;;  %18490 = vmatprep.subr.mxu0 %v24153_v55  ;;  %v8991_v40 = vpop.f32.mrb[156].mxu0 }
 0x7d4   : > { %19149 = vrcp.f32 %v8784_v57  ;;  %v18194_v58 = vpop.f32.mrb[157].mxu0 }
 0x7d5   : > { %18478 = vmatmul.mubr.msk.f32.vlgmr.msra.gmra.mrb[220].mxu1 %vm8217_vm2, %v8909_v7  ;;  %v9064_v37 = vpop.f32.mrb[164].mxu1 }
 0x7d6   : > { %v19146_v15 = vpop.eup %19145  ;;  %18486 = vmatpush3.msra.mxu1 %v3266_v8  ;;  %18487 = vmatprep.mubr.msk.f32.mxu1 %vm19302_vm1, %v24153_v55  ;;  %v18199_v10 = vpop.f32.mrb[165].mxu1 }
 0x7d7   : > { %v8787_v2 = vpop.xlane.xlu0 %8786  ;;  %v8911_v19 = vmul.f32 %v19146_v15, %v22527_v28  ;;  %18495 = vmatprep.subr.mxu1 %v24153_v55  ;;  %v24385_v28 = vld [vmem:[#allocation57_spill] sm:$0xff] }
 0x7d8   : > { %19151 = vrcp.f32 %v8787_v2  ;;  %v3276_v62 = vadd.f32 %v22757_v56, %v24385_v28 }
 0x7d9   : > { %18483 = vmatmul.mubr.msk.f32.vlgmr.msra.gmra.mrb[214].mxu0 %vm8217_vm2, %v8911_v19 }
 0x7da   : > { %v19148_v39 = vpop.eup %19147  ;;  %18491 = vmatpush3.msra.mxu0 %v3271_v21  ;;  %18492 = vmatprep.mubr.msk.f32.mxu0 %vm19302_vm1, %v24153_v55  ;;  %v9137_v9 = vpop.f32.mrb[158].mxu0 }
 0x7db   : > { %v8790_v53 = vpop.xlane.xlu1 %8789  ;;  %v8913_v49 = vmul.f32 %v19148_v39, %v22539_v11  ;;  %18500 = vmatprep.subr.mxu0 %v24153_v55  ;;  %v18204_v61 = vpop.f32.mrb[159].mxu0 }
 0x7dc   : > { %19153 = vrcp.f32 %v8790_v53 }
 0x7dd   : > { %18488 = vmatmul.mubr.msk.f32.vlgmr.msra.gmra.mrb[222].mxu1 %vm8217_vm2, %v8913_v49 }
 0x7de   : > { %v19150_v52 = vpop.eup %19149  ;;  %18496 = vmatpush3.msra.mxu1 %v3276_v62  ;;  %18497 = vmatprep.mubr.msk.f32.mxu1 %vm19302_vm1, %v24153_v55  ;;  %v9210_v11 = vpop.f32.mrb[166].mxu1 }
 0x7df   : > { %v8793_v0 = vpop.xlane.xlu0 %8792  ;;  %v8915_v16 = vmul.f32 %v19150_v52, %v22551_v13  ;;  %18505 = vmatprep.subr.mxu1 %v24153_v55  ;;  %v18209_v31 = vpop.f32.mrb[167].mxu1  ;;  %v24387_v13 = vld [vmem:[#allocation59_spill] sm:$0xff] }
 0x7e0   : > { %19155 = vrcp.f32 %v8793_v0  ;;  %v3286_v20 = vadd.f32 %v22757_v56, %v24387_v13 }
 0x7e1   : > { %18493 = vmatmul.mubr.msk.f32.vlgmr.msra.gmra.mrb[216].mxu0 %vm8217_vm2, %v8915_v16 }
 0x7e2   : > { %v19152_v42 = vpop.eup %19151  ;;  %18501 = vmatpush3.msra.mxu0 %v3281_v35  ;;  %18502 = vmatprep.mubr.msk.f32.mxu0 %vm19302_vm1, %v24153_v55 }
 0x7e3   : > { %v9283_v45 = vpop.f32.mrb[160].mxu0  ;;  %v8917_v38 = vmul.f32 %v19152_v42, %v22562_v3  ;;  %18743 = vmatprep.subr.bf16.mxu0 %v18742_v23 }
 0x7e4   : > { %v18214_v24 = vpop.f32.mrb[161].mxu0 }
 0x7e5   : > { %18498 = vmatmul.mubr.msk.f32.vlgmr.msra.gmra.mrb[224].mxu1 %vm8217_vm2, %v8917_v38 }
 0x7e6   : > { %v19154_v6 = vpop.eup %19153  ;;  %18506 = vmatpush3.msra.mxu1 %v3286_v20  ;;  %18507 = vmatprep.mubr.msk.f32.mxu1 %vm19302_vm1, %v24153_v55 }
 0x7e7   : > { %v9356_v46 = vpop.f32.mrb[168].mxu1  ;;  %v8919_v5 = vmul.f32 %v19154_v6, %v22573_v63 }
 0x7e8   : > { %v18219_v47 = vpop.f32.mrb[169].mxu1 }
 0x7e9   : > { %18503 = vmatmul.mubr.msk.f32.vlgmr.msra.gmra.mrb[218].mxu0 %vm8217_vm2, %v8919_v5 }
 0x7ea   : > { %v19156_v26 = vpop.eup %19155  ;;  %18745 = vmatpush3.bf16.msra.mxu0 %v18742_v23  ;;  %18514 = vmatprep.mubr.msk.f32.mxu0 %vm1081_vm0, %v8991_v40 }
 0x7eb   : > { %v9429_v3 = vpop.f32.mrb[162].mxu0  ;;  %v8921_v56 = vmul.f32 %v19156_v26, %v22584_v14 }
 0x7ec   : > { %v18224_v54 = vpop.f32.mrb[163].mxu0 }
 0x7ed   : > { %18508 = vmatmul.mubr.msk.f32.vlgmr.msra.gmra.mrb[226].mxu1 %vm8217_vm2, %v8921_v56  ;;  %18515 = vmatmul.mubr.msk.f32.vlgmr.msra.gmra.mrb[220].mxu0 %vm1081_vm0, %v9064_v37 }
 0x7ee   : > { %18517 = vmatprep.mubr.msk.f32.mxu0 %vm1081_vm0, %v9137_v9 }
 0x7ef   : > { %v9502_v55 = vpop.f32.mrb[170].mxu1 }
 0x7f0   : > { %v18229_v41 = vpop.f32.mrb[171].mxu1 }
 0x7f1   : > { %18518 = vmatmul.mubr.msk.f32.gmra.mrb[222].mxu0 %vm1081_vm0, %v9210_v11 }
 0x7f2   : > { %18520 = vmatprep.mubr.msk.f32.mxu0 %vm1081_vm0, %v9283_v45 }
 0x7f3   : > { %v9575_v63 = vpop.f32.mrb[164].mxu0 }
 0x7f4   : > { %v18234_v43 = vpop.f32.mrb[165].mxu0 }
 0x7f5   : > { %18521 = vmatmul.mubr.msk.f32.gmra.mrb[224].mxu0 %vm1081_vm0, %v9356_v46 }
 0x7f6   : > { %18523 = vmatprep.mubr.msk.f32.mxu0 %vm1081_vm0, %v9429_v3 }
 0x7f7   : > { %v9648_v14 = vpop.f32.mrb[172].mxu1 }
 0x7f8   : > { %v18239_v48 = vpop.f32.mrb[173].mxu1 }
 0x7f9   : > { %18524 = vmatmul.mubr.msk.f32.gmra.mrb[226].mxu0 %vm1081_vm0, %v9502_v55 }
 0x7fa   : > { %18526 = vmatprep.mubr.msk.f32.mxu0 %vm1081_vm0, %v9575_v63 }
 0x7fb   : > { %v9721_v27 = vpop.f32.mrb[166].mxu0 }
 0x7fc   : > { %v18244_v32 = vpop.f32.mrb[167].mxu0 }
 0x7fd   : > { %18527 = vmatmul.mubr.msk.f32.gmra.mrb[228].mxu0 %vm1081_vm0, %v9648_v14 }
 0x7fe   : > { %18529 = vmatprep.mubr.msk.f32.mxu0 %vm1081_vm0, %v9721_v27 }
 0x7ff   : > { %v9794_v30 = vpop.f32.mrb[174].mxu1 }
 0x800   : > { %v18249_v33 = vpop.f32.mrb[175].mxu1 }
 0x801   : > { %18530 = vmatmul.mubr.msk.f32.gmra.mrb[230].mxu0 %vm1081_vm0, %v9794_v30 }
 0x803   : > { %v9867_v60 = vpop.f32.mrb[168].mxu0 }
 0x804   : > { %v18254_v25 = vpop.f32.mrb[169].mxu0  ;;  %18532 = vmatprep.mubr.msk.f32.mxu0 %vm1081_vm0, %v9867_v60 }
 0x807   : > { %v9940_v18 = vpop.f32.mrb[176].mxu1 }
 0x808   : > { %v18259_v17 = vpop.f32.mrb[177].mxu1  ;;  %18533 = vmatmul.mubr.msk.f32.gmra.mrb[232].mxu0 %vm1081_vm0, %v9940_v18 }
 0x80b   : > { %v10013_v50 = vpop.f32.mrb[170].mxu0 }
 0x80c   : > { %v18264_v1 = vpop.f32.mrb[171].mxu0  ;;  %18535 = vmatprep.mubr.msk.f32.mxu0 %vm1081_vm0, %v10013_v50 }
 0x80f   : > { %v10086_v4 = vpop.f32.mrb[178].mxu1 }
 0x810   : > { %v18269_v44 = vpop.f32.mrb[179].mxu1  ;;  %18536 = vmatmul.mubr.msk.f32.gmra.mrb[234].mxu0 %vm1081_vm0, %v10086_v4 }
 0x813   : > { %v10159_v12 = vpop.f32.mrb[172].mxu0 }
 0x814   : > { %v18274_v22 = vpop.f32.mrb[173].mxu0  ;;  %18538 = vmatprep.mubr.msk.f32.mxu0 %vm1081_vm0, %v10159_v12 }
 0x817   : > { %v10232_v57 = vpop.f32.mrb[180].mxu1 }
 0x818   : > { %v18279_v7 = vpop.f32.mrb[181].mxu1  ;;  %18539 = vmatmul.mubr.msk.f32.gmra.mrb[236].mxu0 %vm1081_vm0, %v10232_v57 }
 0x81b   : > { %v10305_v34 = vpop.f32.mrb[174].mxu0 }
 0x81c   : > { %v18284_v8 = vpop.f32.mrb[175].mxu0  ;;  %18541 = vmatprep.mubr.msk.f32.mxu0 %vm1081_vm0, %v10305_v34 }
 0x81f   : > { %v10378_v40 = vpop.f32.mrb[182].mxu1 }
 0x820   : > { %v18289_v58 = vpop.f32.mrb[183].mxu1  ;;  %18542 = vmatmul.mubr.msk.f32.gmra.mrb[238].mxu0 %vm1081_vm0, %v10378_v40 }
 0x823   : > { %v10524_v15 = vpop.f32.mrb[184].mxu1 }
 0x824   : > { %v18299_v37 = vpop.f32.mrb[185].mxu1 }
 0x827   : > { %v10451_v10 = vpop.f32.mrb[176].mxu0 }
 0x828   : > { %v18294_v2 = vpop.f32.mrb[177].mxu0  ;;  %18544 = vmatprep.mubr.msk.f32.mxu0 %vm1081_vm0, %v10451_v10 }
 0x829   : > { %18545 = vmatmul.mubr.msk.f32.gmra.mrb[240].mxu0 %vm1081_vm0, %v10524_v15 }
 0x82b   : > { %v10597_v19 = vpop.f32.mrb[178].mxu0  ;;  %v10670_v29 = vpop.f32.mrb[186].mxu1 }
 0x82c   : > { %v18304_v21 = vpop.f32.mrb[179].mxu0  ;;  %18547 = vmatprep.mubr.msk.f32.mxu0 %vm1081_vm0, %v10597_v19  ;;  %v18309_v39 = vpop.f32.mrb[187].mxu1 }
 0x82d   : > { %18548 = vmatmul.mubr.msk.f32.gmra.mrb[242].mxu0 %vm1081_vm0, %v10670_v29 }
 0x82f   : > { %v10743_v9 = vpop.f32.mrb[180].mxu0 }
 0x830   : > { %v18314_v53 = vpop.f32.mrb[181].mxu0  ;;  %18550 = vmatprep.mubr.msk.f32.mxu0 %vm1081_vm0, %v10743_v9 }
 0x832   : > { %v10816_v49 = vpop.f32.mrb[188].mxu1 }
 0x833   : > { %v18319_v28 = vpop.f32.mrb[189].mxu1  ;;  %18551 = vmatmul.mubr.msk.f32.gmra.mrb[244].mxu0 %vm1081_vm0, %v10816_v49 }
 0x836   : > { %v10889_v62 = vpop.f32.mrb[182].mxu0 }
 0x837   : > { %v18324_v61 = vpop.f32.mrb[183].mxu0  ;;  %18553 = vmatprep.mubr.msk.f32.mxu0 %vm1081_vm0, %v10889_v62 }
 0x83a   : > { %v10962_v36 = vpop.f32.mrb[190].mxu1 }
 0x83b   : > { %v18329_v59 = vpop.f32.mrb[191].mxu1  ;;  %18554 = vmatmul.mubr.msk.f32.gmra.mrb[246].mxu0 %vm1081_vm0, %v10962_v36 }
 0x840   : > { %v11035_v52 = vpop.f32.mrb[184].mxu0 }
 0x841   : > { %v18334_v11 = vpop.f32.mrb[185].mxu0  ;;  %18556 = vmatprep.mubr.msk.f32.mxu0 %vm1081_vm0, %v11035_v52 }
 0x844   : > { %v11108_v0 = vpop.f32.mrb[192].mxu1 }
 0x845   : > { %v18339_v16 = vpop.f32.mrb[193].mxu1  ;;  %18557 = vmatmul.mubr.msk.f32.gmra.mrb[248].mxu0 %vm1081_vm0, %v11108_v0 }
 0x848   : > { %v11181_v23 = vpop.f32.mrb[186].mxu0 }
 0x849   : > { %v18344_v51 = vpop.f32.mrb[187].mxu0  ;;  %18559 = vmatprep.mubr.msk.f32.mxu0 %vm1081_vm0, %v11181_v23 }
 0x84c   : > { %v11254_v35 = vpop.f32.mrb[194].mxu1 }
 0x84d   : > { %v18349_v31 = vpop.f32.mrb[195].mxu1  ;;  %18560 = vmatmul.mubr.msk.f32.gmra.mrb[250].mxu0 %vm1081_vm0, %v11254_v35  ;;  %v22958_v35 = vld [vmem:[%s24054_s10] ss:$0 sm:$0xff] }
 0x84f   : > { %v11327_v42 = vpop.f32.mrb[188].mxu0 }
 0x850   : > { %v18354_v45 = vpop.f32.mrb[189].mxu0  ;;  %v11400_v38 = vpop.f32.mrb[196].mxu1  ;;  %18562 = vmatprep.mubr.msk.f32.mxu0 %vm1081_vm0, %v11327_v42 }
 0x851   : > { %v18359_v13 = vpop.f32.mrb[197].mxu1  ;;  %18563 = vmatmul.mubr.msk.f32.gmra.mrb[252].mxu0 %vm1081_vm0, %v11400_v38 }
 0x854   : > { %v11546_v20 = vpop.f32.mrb[198].mxu1 }
 0x855   : > { %v11473_v24 = vpop.f32.mrb[190].mxu0  ;;  %v18369_v6 = vpop.f32.mrb[199].mxu1 }
 0x856   : > { %v18364_v46 = vpop.f32.mrb[191].mxu0  ;;  %18565 = vmatprep.mubr.msk.f32.mxu0 %vm1081_vm0, %v11473_v24 }
 0x857   : > { %18566 = vmatmul.mubr.msk.f32.gmra.mrb[254].mxu0 %vm1081_vm0, %v11546_v20 }
 0x85a   : > { %v11692_v5 = vpop.f32.mrb[200].mxu1 }
 0x85b   : > { %v11619_v47 = vpop.f32.mrb[192].mxu0  ;;  %v18379_v26 = vpop.f32.mrb[201].mxu1 }
 0x85c   : > { %v18374_v3 = vpop.f32.mrb[193].mxu0  ;;  %18568 = vmatprep.mubr.msk.f32.mxu0 %vm1081_vm0, %v11619_v47 }
 0x85d   : > { %18569 = vmatmul.mubr.msk.f32.gmra.mrb[0].mxu0 %vm1081_vm0, %v11692_v5 }
 0x85f   : > { %v11838_v56 = vpop.f32.mrb[202].mxu1 }
 0x860   : > { %v11765_v54 = vpop.f32.mrb[194].mxu0  ;;  %v18389_v55 = vpop.f32.mrb[203].mxu1 }
 0x861   : > { %v18384_v41 = vpop.f32.mrb[195].mxu0  ;;  %18571 = vmatprep.mubr.msk.f32.mxu0 %vm1081_vm0, %v11765_v54 }
 0x862   : > { %18572 = vmatmul.mubr.msk.f32.gmra.mrb[2].mxu0 %vm1081_vm0, %v11838_v56 }
 0x866   : > { %v11984_v63 = vpop.f32.mrb[204].mxu1 }
 0x867   : > { %v11911_v43 = vpop.f32.mrb[196].mxu0  ;;  %v18399_v14 = vpop.f32.mrb[205].mxu1 }
 0x868   : > { %v18394_v48 = vpop.f32.mrb[197].mxu0  ;;  %18574 = vmatprep.mubr.msk.f32.mxu0 %vm1081_vm0, %v11911_v43 }
 0x869   : > { %18575 = vmatmul.mubr.msk.f32.gmra.mrb[4].mxu0 %vm1081_vm0, %v11984_v63 }
 0x86b   : > { %v12130_v27 = vpop.f32.mrb[206].mxu1 }
 0x86c   : > { %v12057_v32 = vpop.f32.mrb[198].mxu0  ;;  %v18409_v30 = vpop.f32.mrb[207].mxu1 }
 0x86d   : > { %v18404_v33 = vpop.f32.mrb[199].mxu0  ;;  %18577 = vmatprep.mubr.msk.f32.mxu0 %vm1081_vm0, %v12057_v32 }
 0x86e   : > { %18578 = vmatmul.mubr.msk.f32.gmra.mrb[6].mxu0 %vm1081_vm0, %v12130_v27 }
 0x873   : > { %v12203_v60 = vpop.f32.mrb[200].mxu0 }
 0x874   : > { %v18414_v25 = vpop.f32.mrb[201].mxu0  ;;  %18580 = vmatprep.mubr.msk.f32.mxu0 %vm1081_vm0, %v12203_v60 }
 0x877   : > { %v12276_v18 = vpop.f32.mrb[208].mxu1 }
 0x878   : > { %v18419_v17 = vpop.f32.mrb[209].mxu1  ;;  %18581 = vmatmul.mubr.msk.f32.gmra.mrb[8].mxu0 %vm1081_vm0, %v12276_v18 }
 0x87c   : > { %v12349_v50 = vpop.f32.mrb[202].mxu0 }
 0x87d   : > { %v18424_v1 = vpop.f32.mrb[203].mxu0  ;;  %18583 = vmatprep.mubr.msk.f32.mxu0 %vm1081_vm0, %v12349_v50 }
 0x880   : > { %v12422_v4 = vpop.f32.mrb[210].mxu1 }
 0x881   : > { %v18429_v44 = vpop.f32.mrb[211].mxu1  ;;  %18584 = vmatmul.mubr.msk.f32.gmra.mrb[10].mxu0 %vm1081_vm0, %v12422_v4 }
 0x884   : > { %v12495_v12 = vpop.f32.mrb[204].mxu0 }
 0x885   : > { %v18434_v22 = vpop.f32.mrb[205].mxu0  ;;  %18586 = vmatprep.mubr.msk.f32.mxu0 %vm1081_vm0, %v12495_v12 }
 0x888   : > { %v12568_v57 = vpop.f32.mrb[212].mxu1 }
 0x889   : > { %v18439_v7 = vpop.f32.mrb[213].mxu1  ;;  %18587 = vmatmul.mubr.msk.f32.gmra.mrb[12].mxu0 %vm1081_vm0, %v12568_v57 }
 0x88c   : > { %v12641_v34 = vpop.f32.mrb[206].mxu0 }
 0x88d   : > { %v18444_v8 = vpop.f32.mrb[207].mxu0  ;;  %18589 = vmatprep.mubr.msk.f32.mxu0 %vm1081_vm0, %v12641_v34 }
 0x890   : > { %v12714_v40 = vpop.f32.mrb[214].mxu1 }
 0x891   : > { %v18449_v58 = vpop.f32.mrb[215].mxu1  ;;  %18590 = vmatmul.mubr.msk.f32.gmra.mrb[14].mxu0 %vm1081_vm0, %v12714_v40 }
 0x894   : > { %v12787_v15 = vpop.f32.mrb[208].mxu0 }
 0x895   : > { %v18454_v37 = vpop.f32.mrb[209].mxu0  ;;  %18592 = vmatprep.mubr.msk.f32.mxu0 %vm1081_vm0, %v12787_v15 }
 0x898   : > { %v12860_v10 = vpop.f32.mrb[216].mxu1 }
 0x899   : > { %v18459_v2 = vpop.f32.mrb[217].mxu1  ;;  %18593 = vmatmul.mubr.msk.f32.gmra.mrb[16].mxu0 %vm1081_vm0, %v12860_v10 }
 0x89c   : > { %v12933_v19 = vpop.f32.mrb[210].mxu0 }
 0x89d   : > { %v18464_v29 = vpop.f32.mrb[211].mxu0  ;;  %18595 = vmatprep.mubr.msk.f32.mxu0 %vm1081_vm0, %v12933_v19 }
 0x8a0   : > { %v13006_v21 = vpop.f32.mrb[218].mxu1 }
 0x8a1   : > { %v18469_v39 = vpop.f32.mrb[219].mxu1  ;;  %18596 = vmatmul.mubr.msk.f32.gmra.mrb[18].mxu0 %vm1081_vm0, %v13006_v21 }
 0x8a4   : > { %v13079_v9 = vpop.f32.mrb[212].mxu0 }
 0x8a5   : > { %v18474_v53 = vpop.f32.mrb[213].mxu0  ;;  %18598 = vmatprep.mubr.msk.f32.mxu0 %vm1081_vm0, %v13079_v9 }
 0x8a8   : > { %v13152_v49 = vpop.f32.mrb[220].mxu1 }
 0x8a9   : > { %v18479_v28 = vpop.f32.mrb[221].mxu1  ;;  %18599 = vmatmul.mubr.msk.f32.gmra.mrb[20].mxu0 %vm1081_vm0, %v13152_v49 }
 0x8ac   : > { %v13225_v62 = vpop.f32.mrb[214].mxu0 }
 0x8ad   : > { %v18484_v61 = vpop.f32.mrb[215].mxu0  ;;  %18601 = vmatprep.mubr.msk.f32.mxu0 %vm1081_vm0, %v13225_v62 }
 0x8b0   : > { %v13298_v36 = vpop.f32.mrb[222].mxu1 }
 0x8b1   : > { %v18489_v59 = vpop.f32.mrb[223].mxu1  ;;  %18602 = vmatmul.mubr.msk.f32.gmra.mrb[22].mxu0 %vm1081_vm0, %v13298_v36 }
 0x8b4   : > { %v13371_v52 = vpop.f32.mrb[216].mxu0 }
 0x8b5   : > { %v18494_v11 = vpop.f32.mrb[217].mxu0  ;;  %18604 = vmatprep.mubr.msk.f32.mxu0 %vm1081_vm0, %v13371_v52 }
 0x8b8   : > { %v13444_v0 = vpop.f32.mrb[224].mxu1 }
 0x8b9   : > { %v18499_v16 = vpop.f32.mrb[225].mxu1  ;;  %18605 = vmatmul.mubr.msk.f32.gmra.mrb[24].mxu0 %vm1081_vm0, %v13444_v0 }
 0x8bc   : > { %v13517_v23 = vpop.f32.mrb[218].mxu0 }
 0x8bd   : > { %v18504_v51 = vpop.f32.mrb[219].mxu0  ;;  %18607 = vmatprep.mubr.msk.f32.mxu0 %vm1081_vm0, %v13517_v23 }
 0x8c0   : > { %v13590_v31 = vpop.f32.mrb[226].mxu1  ;;  %v18516_v42 = vpop.f32.mrb[220].mxu0 }
 0x8c1   : > { %v22961_v45 = vadd.f32 %v18516_v42, %v22958_v35  ;;  %v18509_v38 = vpop.f32.mrb[227].mxu1  ;;  %v13861_v13 = vpop.f32.mrb[221].mxu0  ;;  %18608 = vmatmul.mubr.msk.f32.gmra.mrb[26].mxu0 %vm1081_vm0, %v13590_v31 }
 0x8c2   : > { %v22965_v20 = vadd.f32 %v22958_v35, %v13861_v13 }
 0x8c3   : > { %v14183_v24 = vsel %vm1081_vm0, %v22961_v45, 0.0 }
 0x8c4   : > { %14184 = vadd.xlane.f32.xlu0 %v14183_v24  ;;  %v18519_v6 = vpop.f32.mrb[222].mxu0  ;;  %v14180_v46 = vsel %vm1081_vm0, %v22965_v20, 0.0 }
 0x8c5   : > { %v22972_v5 = vadd.f32 %v18519_v6, %v22958_v35  ;;  %v13871_v47 = vpop.f32.mrb[223].mxu0  ;;  %14181 = vadd.xlane.f32.xlu1 %v14180_v46 }
 0x8c6   : > { %v22975_v26 = vadd.f32 %v22958_v35, %v13871_v47 }
 0x8c7   : > { %v14189_v3 = vsel %vm1081_vm0, %v22972_v5, 0.0 }
 0x8c8   : > { %14190 = vadd.xlane.f32.xlu0 %v14189_v3  ;;  %v18522_v56 = vpop.f32.mrb[224].mxu0  ;;  %v14186_v54 = vsel %vm1081_vm0, %v22975_v26, 0.0 }
 0x8c9   : > { %v22982_v55 = vadd.f32 %v18522_v56, %v22958_v35  ;;  %v13881_v41 = vpop.f32.mrb[225].mxu0  ;;  %14187 = vadd.xlane.f32.xlu1 %v14186_v54 }
 0x8ca   : > { %v22985_v63 = vadd.f32 %v22958_v35, %v13881_v41 }
 0x8cb   : > { %v14195_v43 = vsel %vm1081_vm0, %v22982_v55, 0.0 }
 0x8cc   : > { %14196 = vadd.xlane.f32.xlu0 %v14195_v43  ;;  %v18525_v14 = vpop.f32.mrb[226].mxu0  ;;  %v14192_v48 = vsel %vm1081_vm0, %v22985_v63, 0.0 }
 0x8cd   : > { %v22992_v27 = vadd.f32 %v18525_v14, %v22958_v35  ;;  %v13891_v32 = vpop.f32.mrb[227].mxu0  ;;  %14193 = vadd.xlane.f32.xlu1 %v14192_v48 }
 0x8ce   : > { %v22995_v30 = vadd.f32 %v22958_v35, %v13891_v32 }
 0x8cf   : > { %v14201_v33 = vsel %vm1081_vm0, %v22992_v27, 0.0 }
 0x8d0   : > { %14202 = vadd.xlane.f32.xlu0 %v14201_v33  ;;  %v18528_v60 = vpop.f32.mrb[228].mxu0  ;;  %v14198_v25 = vsel %vm1081_vm0, %v22995_v30, 0.0 }
 0x8d1   : > { %v23002_v18 = vadd.f32 %v18528_v60, %v22958_v35  ;;  %v13901_v17 = vpop.f32.mrb[229].mxu0  ;;  %14199 = vadd.xlane.f32.xlu1 %v14198_v25 }
 0x8d2   : > { %v23005_v50 = vadd.f32 %v22958_v35, %v13901_v17 }
 0x8d3   : > { %v14207_v1 = vsel %vm1081_vm0, %v23002_v18, 0.0 }
 0x8d4   : > { %14208 = vadd.xlane.f32.xlu0 %v14207_v1  ;;  %v18531_v4 = vpop.f32.mrb[230].mxu0  ;;  %v14204_v44 = vsel %vm1081_vm0, %v23005_v50, 0.0 }
 0x8d5   : > { %v23012_v12 = vadd.f32 %v18531_v4, %v22958_v35  ;;  %v13911_v22 = vpop.f32.mrb[231].mxu0  ;;  %14205 = vadd.xlane.f32.xlu1 %v14204_v44 }
 0x8d6   : > { %v23015_v57 = vadd.f32 %v22958_v35, %v13911_v22 }
 0x8d7   : > { %v14213_v7 = vsel %vm1081_vm0, %v23012_v12, 0.0 }
 0x8d8   : > { %14214 = vadd.xlane.f32.xlu0 %v14213_v7  ;;  %v14210_v34 = vsel %vm1081_vm0, %v23015_v57, 0.0 }
 0x8d9   : > { %14211 = vadd.xlane.f32.xlu1 %v14210_v34 }
 0x8db   : > { %v18534_v8 = vpop.f32.mrb[232].mxu0 }
 0x8dc   : > { %v23022_v40 = vadd.f32 %v18534_v8, %v22958_v35  ;;  %v13921_v58 = vpop.f32.mrb[233].mxu0 }
 0x8dd   : > { %v23025_v15 = vadd.f32 %v22958_v35, %v13921_v58 }
 0x8de   : > { %v14219_v37 = vsel %vm1081_vm0, %v23022_v40, 0.0 }
 0x8df   : > { %14220 = vadd.xlane.f32.xlu0 %v14219_v37  ;;  %v14216_v10 = vsel %vm1081_vm0, %v23025_v15, 0.0 }
 0x8e0   : > { %14217 = vadd.xlane.f32.xlu1 %v14216_v10 }
 0x8e3   : > { %v18537_v2 = vpop.f32.mrb[234].mxu0 }
 0x8e4   : > { %v23032_v19 = vadd.f32 %v18537_v2, %v22958_v35  ;;  %v13931_v29 = vpop.f32.mrb[235].mxu0 }
 0x8e5   : > { %v23035_v21 = vadd.f32 %v22958_v35, %v13931_v29 }
 0x8e6   : > { %v14225_v39 = vsel %vm1081_vm0, %v23032_v19, 0.0 }
 0x8e7   : > { %14226 = vadd.xlane.f32.xlu0 %v14225_v39  ;;  %v14222_v9 = vsel %vm1081_vm0, %v23035_v21, 0.0 }
 0x8e8   : > { %14223 = vadd.xlane.f32.xlu1 %v14222_v9 }
 0x8eb   : > { %v18540_v53 = vpop.f32.mrb[236].mxu0 }
 0x8ec   : > { %v23042_v49 = vadd.f32 %v18540_v53, %v22958_v35  ;;  %v13941_v28 = vpop.f32.mrb[237].mxu0 }
 0x8ed   : > { %v23045_v62 = vadd.f32 %v22958_v35, %v13941_v28 }
 0x8ee   : > { %v14231_v61 = vsel %vm1081_vm0, %v23042_v49, 0.0 }
 0x8ef   : > { %14232 = vadd.xlane.f32.xlu0 %v14231_v61  ;;  %v14228_v36 = vsel %vm1081_vm0, %v23045_v62, 0.0 }
 0x8f0   : > { %14229 = vadd.xlane.f32.xlu1 %v14228_v36 }
 0x8f3   : > { %v18543_v59 = vpop.f32.mrb[238].mxu0 }
 0x8f4   : > { %v23052_v52 = vadd.f32 %v18543_v59, %v22958_v35  ;;  %v13951_v11 = vpop.f32.mrb[239].mxu0 }
 0x8f5   : > { %v23055_v0 = vadd.f32 %v22958_v35, %v13951_v11 }
 0x8f6   : > { %v14237_v16 = vsel %vm1081_vm0, %v23052_v52, 0.0 }
 0x8f7   : > { %14238 = vadd.xlane.f32.xlu0 %v14237_v16  ;;  %v14234_v23 = vsel %vm1081_vm0, %v23055_v0, 0.0 }
 0x8f8   : > { %14235 = vadd.xlane.f32.xlu1 %v14234_v23 }
 0x8fc   : > { %v18546_v51 = vpop.f32.mrb[240].mxu0 }
 0x8fd   : > { %v23062_v31 = vadd.f32 %v18546_v51, %v22958_v35  ;;  %v13961_v42 = vpop.f32.mrb[241].mxu0 }
 0x8fe   : > { %v23065_v38 = vadd.f32 %v22958_v35, %v13961_v42 }
 0x8ff   : > { %v14243_v13 = vsel %vm1081_vm0, %v23062_v31, 0.0 }
 0x900   : > { %14244 = vadd.xlane.f32.xlu0 %v14243_v13  ;;  %v18549_v24 = vpop.f32.mrb[242].mxu0  ;;  %v14240_v6 = vsel %vm1081_vm0, %v23065_v38, 0.0 }
 0x901   : > { %v23072_v46 = vadd.f32 %v18549_v24, %v22958_v35  ;;  %v13971_v47 = vpop.f32.mrb[243].mxu0  ;;  %14241 = vadd.xlane.f32.xlu1 %v14240_v6 }
 0x902   : > { %v23075_v3 = vadd.f32 %v22958_v35, %v13971_v47 }
 0x903   : > { %v14249_v56 = vsel %vm1081_vm0, %v23072_v46, 0.0 }
 0x904   : > { %14250 = vadd.xlane.f32.xlu0 %v14249_v56  ;;  %v14246_v54 = vsel %vm1081_vm0, %v23075_v3, 0.0 }
 0x905   : > { %14247 = vadd.xlane.f32.xlu1 %v14246_v54 }
 0x906   : > { %v18552_v41 = vpop.f32.mrb[244].mxu0 }
 0x907   : > { %v23082_v43 = vadd.f32 %v18552_v41, %v22958_v35  ;;  %v13981_v14 = vpop.f32.mrb[245].mxu0 }
 0x908   : > { %v23085_v48 = vadd.f32 %v22958_v35, %v13981_v14 }
 0x909   : > { %v14255_v32 = vsel %vm1081_vm0, %v23082_v43, 0.0 }
 0x90a   : > { %14256 = vadd.xlane.f32.xlu0 %v14255_v32  ;;  %v14252_v33 = vsel %vm1081_vm0, %v23085_v48, 0.0 }
 0x90b   : > { %14253 = vadd.xlane.f32.xlu1 %v14252_v33 }
 0x90e   : > { %v18555_v60 = vpop.f32.mrb[246].mxu0 }
 0x90f   : > { %v23092_v25 = vadd.f32 %v18555_v60, %v22958_v35  ;;  %v13991_v17 = vpop.f32.mrb[247].mxu0 }
 0x910   : > { %v23095_v1 = vadd.f32 %v22958_v35, %v13991_v17 }
 0x911   : > { %v14261_v4 = vsel %vm1081_vm0, %v23092_v25, 0.0 }
 0x912   : > { %14262 = vadd.xlane.f32.xlu0 %v14261_v4  ;;  %v14258_v44 = vsel %vm1081_vm0, %v23095_v1, 0.0 }
 0x913   : > { %14259 = vadd.xlane.f32.xlu1 %v14258_v44 }
 0x918   : > { %v18558_v22 = vpop.f32.mrb[248].mxu0 }
 0x919   : > { %v23102_v7 = vadd.f32 %v18558_v22, %v22958_v35  ;;  %v14001_v34 = vpop.f32.mrb[249].mxu0 }
 0x91a   : > { %v23105_v8 = vadd.f32 %v22958_v35, %v14001_v34 }
 0x91b   : > { %v14267_v58 = vsel %vm1081_vm0, %v23102_v7, 0.0 }
 0x91c   : > { %14268 = vadd.xlane.f32.xlu0 %v14267_v58  ;;  %v14264_v37 = vsel %vm1081_vm0, %v23105_v8, 0.0 }
 0x91d   : > { %14265 = vadd.xlane.f32.xlu1 %v14264_v37 }
 0x920   : > { %v18561_v10 = vpop.f32.mrb[250].mxu0 }
 0x921   : > { %v23112_v2 = vadd.f32 %v18561_v10, %v22958_v35  ;;  %v14011_v29 = vpop.f32.mrb[251].mxu0 }
 0x922   : > { %v23115_v39 = vadd.f32 %v22958_v35, %v14011_v29 }
 0x923   : > { %v14273_v9 = vsel %vm1081_vm0, %v23112_v2, 0.0 }
 0x924   : > { %14274 = vadd.xlane.f32.xlu0 %v14273_v9  ;;  %v18564_v53 = vpop.f32.mrb[252].mxu0  ;;  %v14270_v28 = vsel %vm1081_vm0, %v23115_v39, 0.0 }
 0x925   : > { %v23122_v61 = vadd.f32 %v18564_v53, %v22958_v35  ;;  %v14021_v36 = vpop.f32.mrb[253].mxu0  ;;  %14271 = vadd.xlane.f32.xlu1 %v14270_v28 }
 0x926   : > { %v23125_v59 = vadd.f32 %v22958_v35, %v14021_v36 }
 0x927   : > { %v14279_v11 = vsel %vm1081_vm0, %v23122_v61, 0.0 }
 0x928   : > { %14280 = vadd.xlane.f32.xlu0 %v14279_v11  ;;  %v14276_v16 = vsel %vm1081_vm0, %v23125_v59, 0.0 }
 0x929   : > { %14277 = vadd.xlane.f32.xlu1 %v14276_v16 }
 0x92a   : > { %v18567_v23 = vpop.f32.mrb[254].mxu0 }
 0x92b   : > { %v23132_v51 = vadd.f32 %v18567_v23, %v22958_v35  ;;  %v14031_v42 = vpop.f32.mrb[255].mxu0 }
 0x92c   : > { %v23135_v13 = vadd.f32 %v22958_v35, %v14031_v42 }
 0x92d   : > { %v14285_v24 = vsel %vm1081_vm0, %v23132_v51, 0.0 }
 0x92e   : > { %14286 = vadd.xlane.f32.xlu0 %v14285_v24  ;;  %v14282_v6 = vsel %vm1081_vm0, %v23135_v13, 0.0 }
 0x92f   : > { %14283 = vadd.xlane.f32.xlu1 %v14282_v6 }
 0x930   : > { %v18570_v47 = vpop.f32.mrb[0].mxu0 }
 0x931   : > { %v23142_v56 = vadd.f32 %v18570_v47, %v22958_v35  ;;  %v14041_v54 = vpop.f32.mrb[1].mxu0 }
 0x932   : > { %v23145_v41 = vadd.f32 %v22958_v35, %v14041_v54 }
 0x933   : > { %v14291_v14 = vsel %vm1081_vm0, %v23142_v56, 0.0 }
 0x934   : > { %14292 = vadd.xlane.f32.xlu0 %v14291_v14  ;;  %v14288_v32 = vsel %vm1081_vm0, %v23145_v41, 0.0 }
 0x935   : > { %v18573_v33 = vpop.f32.mrb[2].mxu0  ;;  %14289 = vadd.xlane.f32.xlu1 %v14288_v32 }
 0x936   : > { %v23152_v60 = vadd.f32 %v18573_v33, %v22958_v35  ;;  %v14051_v17 = vpop.f32.mrb[3].mxu0 }
 0x937   : > { %v23155_v4 = vadd.f32 %v22958_v35, %v14051_v17 }
 0x938   : > { %v14297_v44 = vsel %vm1081_vm0, %v23152_v60, 0.0 }
 0x939   : > { %14298 = vadd.xlane.f32.xlu0 %v14297_v44  ;;  %v14294_v22 = vsel %vm1081_vm0, %v23155_v4, 0.0 }
 0x93a   : > { %14295 = vadd.xlane.f32.xlu1 %v14294_v22 }
 0x93c   : > { %v18576_v34 = vpop.f32.mrb[4].mxu0 }
 0x93d   : > { %v23162_v58 = vadd.f32 %v18576_v34, %v22958_v35  ;;  %v14061_v37 = vpop.f32.mrb[5].mxu0 }
 0x93e   : > { %v23165_v10 = vadd.f32 %v22958_v35, %v14061_v37 }
 0x93f   : > { %v14303_v29 = vsel %vm1081_vm0, %v23162_v58, 0.0 }
 0x940   : > { %14304 = vadd.xlane.f32.xlu0 %v14303_v29  ;;  %v14300_v36 = vsel %vm1081_vm0, %v23165_v10, 0.0 }
 0x941   : > { %v18579_v9 = vpop.f32.mrb[6].mxu0 }
 0x942   : > { %v14071_v53 = vpop.f32.mrb[7].mxu0  ;;  %v23170_v28 = vadd.f32 %v18579_v9, %v22958_v35 }
 0x943   : > { %v23175_v11 = vadd.f32 %v22958_v35, %v14071_v53 }
 0x944   : > { %14301 = vadd.xlane.f32.xlu0 %v14300_v36  ;;  %v14309_v16 = vsel %vm1081_vm0, %v23170_v28, 0.0 }
 0x945   : > { %v14306_v42 = vsel %vm1081_vm0, %v23175_v11, 0.0 }
 0x948   : > { %14310 = vadd.xlane.f32.xlu0 %v14309_v16 }
 0x94b   : > { %v18582_v23 = vpop.f32.mrb[8].mxu0 }
 0x94c   : > { %v23182_v24 = vadd.f32 %v18582_v23, %v22958_v35  ;;  %v14081_v6 = vpop.f32.mrb[9].mxu0  ;;  %14307 = vadd.xlane.f32.xlu0 %v14306_v42 }
 0x94d   : > { %v23187_v54 = vadd.f32 %v22958_v35, %v14081_v6 }
 0x94e   : > { %v14315_v47 = vsel %vm1081_vm0, %v23182_v24, 0.0 }
 0x94f   : > { %v14312_v34 = vsel %vm1081_vm0, %v23187_v54, 0.0 }
 0x950   : > { %14316 = vadd.xlane.f32.xlu0 %v14315_v47 }
 0x951   : > { %v14185_v14 = vpop.xlane.xlu0 %14184 }
 0x952   : > { %v14373_v32 = vmul.f32 0.0625, %v14185_v14  ;;  %v14182_v33 = vpop.xlane.xlu1 %14181 }
 0x953   : > { %v14372_v17 = vmul.f32 0.0625, %v14182_v33 }
 0x954   : > { %v23190_v44 = vsub.f32 %v22961_v45, %v14373_v32  ;;  %v18585_v22 = vpop.f32.mrb[10].mxu0  ;;  %14313 = vadd.xlane.f32.xlu0 %v14312_v34 }
 0x955   : > { %v23195_v37 = vsub.f32 %v22965_v20, %v14372_v17  ;;  %v23198_v29 = vadd.f32 %v18585_v22, %v22958_v35  ;;  %v14191_v9 = vpop.xlane.xlu0 %14190  ;;  %v14091_v53 = vpop.f32.mrb[11].mxu0 }
 0x956   : > { %v14375_v36 = vmul.f32 0.0625, %v14191_v9  ;;  %v14188_v16 = vpop.xlane.xlu1 %14187  ;;  %v14501_v23 = vmul.f32 %v23190_v44, %v23190_v44  ;;  %v23203_v45 = vadd.f32 %v22958_v35, %v14091_v53 }
 0x957   : > { %v14321_v42 = vsel %vm1081_vm0, %v23198_v29, 0.0  ;;  %v14374_v6 = vmul.f32 0.0625, %v14188_v16  ;;  %v14500_v14 = vmul.f32 %v23195_v37, %v23195_v37 }
 0x958   : > { %v23208_v20 = vsub.f32 %v22972_v5, %v14375_v36  ;;  %v14567_v47 = vsel %vm1081_vm0, %v14501_v23, 0.0  ;;  %14322 = vadd.xlane.f32.xlu0 %v14321_v42  ;;  %v14318_v33 = vsel %vm1081_vm0, %v23203_v45, 0.0 }
 0x959   : > { %v14197_v32 = vpop.xlane.xlu0 %14196  ;;  %14568 = vadd.xlane.f32.xlu1 %v14567_v47  ;;  %v23216_v17 = vsub.f32 %v22975_v26, %v14374_v6  ;;  %v14564_v5 = vsel %vm1081_vm0, %v14500_v14, 0.0 }
 0x95a   : > { %24388 = vst [vmem:[#allocation61_spill] sm:$0xff] %v23208_v20  ;;  %v14377_v22 = vmul.f32 0.0625, %v14197_v32  ;;  %v14194_v34 = vpop.xlane.xlu1 %14193  ;;  %v14503_v53 = vmul.f32 %v23208_v20, %v23208_v20 }
 0x95b   : > { %v14376_v23 = vmul.f32 0.0625, %v14194_v34  ;;  %v14502_v14 = vmul.f32 %v23216_v17, %v23216_v17 }
 0x95c   : > { %v18588_v9 = vpop.f32.mrb[12].mxu0  ;;  %14319 = vadd.xlane.f32.xlu0 %v14318_v33  ;;  %v23227_v26 = vsub.f32 %v22982_v55, %v14377_v22  ;;  %v14573_v47 = vsel %vm1081_vm0, %v14503_v53, 0.0 }
 0x95d   : > { %v23222_v36 = vadd.f32 %v18588_v9, %v22958_v35  ;;  %v14101_v16 = vpop.f32.mrb[13].mxu0  ;;  %14565 = vadd.xlane.f32.xlu1 %v14564_v5  ;;  %v14203_v32 = vpop.xlane.xlu0 %14202  ;;  %v23236_v33 = vsub.f32 %v22985_v63, %v14376_v23  ;;  %v14570_v22 = vsel %vm1081_vm0, %v14502_v14, 0.0 }
 0x95e   : > { %24389 = vst [vmem:[#allocation6_spill] sm:$0xff] %v23227_v26  ;;  %v23230_v6 = vadd.f32 %v22958_v35, %v14101_v16  ;;  %v14379_v34 = vmul.f32 0.0625, %v14203_v32  ;;  %v14200_v9 = vpop.xlane.xlu1 %14199  ;;  %v14505_v53 = vmul.f32 %v23227_v26, %v23227_v26 }
 0x95f   : > { %v14327_v42 = vsel %vm1081_vm0, %v23222_v36, 0.0  ;;  %24390 = vst [vmem:[#allocation62_spill] sm:$0xff] %v23236_v33  ;;  %v14504_v32 = vmul.f32 %v23236_v33, %v23236_v33 }
 0x960   : > { %14328 = vadd.xlane.f32.xlu0 %v14327_v42  ;;  %v14324_v55 = vsel %vm1081_vm0, %v23230_v6, 0.0  ;;  %v14378_v42 = vmul.f32 0.0625, %v14200_v9  ;;  %v23249_v23 = vsub.f32 %v22992_v27, %v14379_v34  ;;  %v14579_v14 = vsel %vm1081_vm0, %v14505_v53, 0.0 }
 0x961   : > { %14574 = vadd.xlane.f32.xlu1 %v14573_v47 }
 0x962   : > { %24391 = vst [vmem:[#allocation8_spill] sm:$0xff] %v23249_v23  ;;  %v14507_v34 = vmul.f32 %v23249_v23, %v23249_v23 }
 0x964   : > { %v18591_v5 = vpop.f32.mrb[14].mxu0  ;;  %14325 = vadd.xlane.f32.xlu0 %v14324_v55  ;;  %v23258_v55 = vsub.f32 %v22995_v30, %v14378_v42 }
 0x965   : > { %v23244_v16 = vadd.f32 %v18591_v5, %v22958_v35  ;;  %v14111_v20 = vpop.f32.mrb[15].mxu0  ;;  %14571 = vadd.xlane.f32.xlu1 %v14570_v22  ;;  %v14209_v5 = vpop.xlane.xlu0 %14208 }
 0x966   : > { %v23252_v47 = vadd.f32 %v22958_v35, %v14111_v20  ;;  %24392 = vst [vmem:[#allocation63_spill] sm:$0xff] %v23258_v55  ;;  %v14381_v9 = vmul.f32 0.0625, %v14209_v5  ;;  %v14206_v22 = vpop.xlane.xlu1 %14205  ;;  %v14576_v20 = vsel %vm1081_vm0, %v14504_v32, 0.0  ;;  %v14585_v32 = vsel %vm1081_vm0, %v14507_v34, 0.0 }
 0x967   : > { %v14333_v63 = vsel %vm1081_vm0, %v23244_v16, 0.0  ;;  %v14506_v5 = vmul.f32 %v23258_v55, %v23258_v55 }
 0x968   : > { %14334 = vadd.xlane.f32.xlu0 %v14333_v63  ;;  %v14330_v27 = vsel %vm1081_vm0, %v23252_v47, 0.0  ;;  %v14380_v63 = vmul.f32 0.0625, %v14206_v22  ;;  %v23271_v42 = vsub.f32 %v23002_v18, %v14381_v9 }
 0x969   : > { %14580 = vadd.xlane.f32.xlu1 %v14579_v14 }
 0x96a   : > { %24393 = vst [vmem:[#allocation7_spill] sm:$0xff] %v23271_v42  ;;  %v14509_v9 = vmul.f32 %v23271_v42, %v23271_v42 }
 0x96c   : > { %v18594_v26 = vpop.f32.mrb[16].mxu0  ;;  %14331 = vadd.xlane.f32.xlu0 %v14330_v27  ;;  %v23280_v27 = vsub.f32 %v23005_v50, %v14380_v63 }
 0x96d   : > { %v23266_v53 = vadd.f32 %v18594_v26, %v22958_v35  ;;  %v14121_v33 = vpop.f32.mrb[17].mxu0  ;;  %14577 = vadd.xlane.f32.xlu1 %v14576_v20  ;;  %v14215_v26 = vpop.xlane.xlu0 %14214 }
 0x96e   : > { %v23274_v14 = vadd.f32 %v22958_v35, %v14121_v33  ;;  %24394 = vst [vmem:[#allocation67_spill] sm:$0xff] %v23280_v27  ;;  %v14383_v22 = vmul.f32 0.0625, %v14215_v26  ;;  %v14212_v20 = vpop.xlane.xlu1 %14211  ;;  %v14582_v33 = vsel %vm1081_vm0, %v14506_v5, 0.0  ;;  %v14591_v5 = vsel %vm1081_vm0, %v14509_v9, 0.0 }
 0x96f   : > { %v14339_v30 = vsel %vm1081_vm0, %v23266_v53, 0.0  ;;  %v14508_v26 = vmul.f32 %v23280_v27, %v23280_v27 }
 0x970   : > { %14340 = vadd.xlane.f32.xlu0 %v14339_v30  ;;  %v14336_v18 = vsel %vm1081_vm0, %v23274_v14, 0.0  ;;  %v14382_v30 = vmul.f32 0.0625, %v14212_v20  ;;  %v23293_v63 = vsub.f32 %v23012_v12, %v14383_v22  ;;  %v15012_v20 = vld [vmem:[%s24055_s11] sm:$0xff]  ;;  %v15013_v12 = vld [vmem:[%s24055_s11 + $0x8] sm:$0xff] }
 0x971   : > { %14586 = vadd.xlane.f32.xlu1 %v14585_v32  ;;  %v18746_v22 = vpack.c.bf16 %v15013_v12, %v15012_v20 }
 0x972   : > { %24396 = vst [vmem:[#allocation10_spill] sm:$0xff] %v23293_v63 }
 0x973   : > { %18747 = vmatprep.subr.bf16.mxu1 %v18746_v22 }
 0x974   : > { %v18597_v23 = vpop.f32.mrb[18].mxu0  ;;  %14337 = vadd.xlane.f32.xlu0 %v14336_v18  ;;  %18749 = vmatpush3.bf16.msra.mxu1 %v18746_v22 }
 0x975   : > { %v23288_v34 = vadd.f32 %v18597_v23, %v22958_v35  ;;  %v14131_v55 = vpop.f32.mrb[19].mxu0  ;;  %14583 = vadd.xlane.f32.xlu1 %v14582_v33  ;;  %v14221_v23 = vpop.xlane.xlu0 %14220 }
 0x976   : > { %v23296_v32 = vadd.f32 %v22958_v35, %v14131_v55  ;;  %v23308_v55 = vsub.f32 %v23015_v57, %v14382_v30  ;;  %v14385_v18 = vmul.f32 0.0625, %v14221_v23  ;;  %v14218_v33 = vpop.xlane.xlu1 %14217 }
 0x977   : > { %24395 = vst [vmem:[#allocation64_spill] sm:$0xff] %v23288_v34  ;;  %v14345_v50 = vsel %vm1081_vm0, %v23288_v34, 0.0  ;;  %v14384_v57 = vmul.f32 0.0625, %v14218_v33 }
 0x978   : > { %14346 = vadd.xlane.f32.xlu0 %v14345_v50  ;;  %24397 = vst [vmem:[#allocation65_spill] sm:$0xff] %v23308_v55  ;;  %v14342_v42 = vsel %vm1081_vm0, %v23296_v32, 0.0  ;;  %v14588_v50 = vsel %vm1081_vm0, %v14508_v26, 0.0  ;;  %v23321_v23 = vsub.f32 %v23022_v40, %v14385_v18  ;;  %v14510_v12 = vmul.f32 %v23308_v55, %v23308_v55 }
 0x979   : > { %14592 = vadd.xlane.f32.xlu1 %v14591_v5  ;;  %v14511_v5 = vmul.f32 %v23293_v63, %v23293_v63 }
 0x97a   : > { %24398 = vst [vmem:[#allocation9_spill] sm:$0xff] %v23321_v23  ;;  %v14594_v18 = vsel %vm1081_vm0, %v14510_v12, 0.0 }
 0x97b   : > { %v14597_v20 = vsel %vm1081_vm0, %v14511_v5, 0.0 }
 0x97c   : > { %v18600_v9 = vpop.f32.mrb[20].mxu0  ;;  %14343 = vadd.xlane.f32.xlu0 %v14342_v42  ;;  %v23330_v42 = vsub.f32 %v23025_v15, %v14384_v57 }
 0x97d   : > { %v23316_v27 = vadd.f32 %v18600_v9, %v22958_v35  ;;  %v14141_v34 = vpop.f32.mrb[21].mxu0  ;;  %14589 = vadd.xlane.f32.xlu1 %v14588_v50  ;;  %v14227_v9 = vpop.xlane.xlu0 %14226 }
 0x97e   : > { %v23324_v26 = vadd.f32 %v22958_v35, %v14141_v34  ;;  %24399 = vst [vmem:[#allocation70_spill] sm:$0xff] %v23330_v42  ;;  %v14387_v22 = vmul.f32 0.0625, %v14227_v9  ;;  %v14513_v34 = vmul.f32 %v23321_v23, %v23321_v23  ;;  %v14224_v50 = vpop.xlane.xlu1 %14223  ;;  %v14512_v57 = vmul.f32 %v23330_v42, %v23330_v42 }
 0x97f   : > { %v14351_v30 = vsel %vm1081_vm0, %v23316_v27, 0.0  ;;  %v14386_v12 = vmul.f32 0.0625, %v14224_v50 }
 0x980   : > { %14352 = vadd.xlane.f32.xlu0 %v14351_v30  ;;  %v14348_v40 = vsel %vm1081_vm0, %v23324_v26, 0.0 }
 0x981   : > { %14598 = vadd.xlane.f32.xlu1 %v14597_v20  ;;  %v14233_v30 = vpop.xlane.xlu0 %14232  ;;  %v23345_v20 = vsub.f32 %v23032_v19, %v14387_v22  ;;  %v23353_v23 = vsub.f32 %v23035_v21, %v14386_v12 }
 0x982   : > { %v14389_v55 = vmul.f32 0.0625, %v14233_v30 }
 0x983   : > { %24401 = vst [vmem:[#allocation24_spill] sm:$0xff] %v23345_v20  ;;  %24402 = vst [vmem:[#allocation72_spill] sm:$0xff] %v23353_v23 }
 0x984   : > { %v18603_v33 = vpop.f32.mrb[22].mxu0  ;;  %14349 = vadd.xlane.f32.xlu0 %v14348_v40  ;;  %v23365_v30 = vsub.f32 %v23042_v49, %v14389_v55 }
 0x985   : > { %v23338_v5 = vadd.f32 %v18603_v33, %v22958_v35  ;;  %v14151_v63 = vpop.f32.mrb[23].mxu0  ;;  %14595 = vadd.xlane.f32.xlu1 %v14594_v18  ;;  %v14603_v33 = vsel %vm1081_vm0, %v14513_v34, 0.0  ;;  %v14239_v40 = vpop.xlane.xlu0 %14238  ;;  %v14600_v18 = vsel %vm1081_vm0, %v14512_v57, 0.0 }
 0x986   : > { %v23348_v9 = vadd.f32 %v22958_v35, %v14151_v63  ;;  %v14515_v63 = vmul.f32 %v23345_v20, %v23345_v20  ;;  %24403 = vst [vmem:[#allocation68_spill] sm:$0xff] %v23365_v30 }
 0x987   : > { %24400 = vst [vmem:[#allocation66_spill] sm:$0xff] %v23338_v5  ;;  %v14357_v15 = vsel %vm1081_vm0, %v23338_v5, 0.0  ;;  %v14230_v5 = vpop.xlane.xlu1 %14229 }
 0x988   : > { %14358 = vadd.xlane.f32.xlu0 %v14357_v15  ;;  %v14354_v19 = vsel %vm1081_vm0, %v23348_v9, 0.0  ;;  %v14388_v15 = vmul.f32 0.0625, %v14230_v5  ;;  %v14609_v12 = vsel %vm1081_vm0, %v14515_v63, 0.0  ;;  %v14391_v5 = vmul.f32 0.0625, %v14239_v40 }
 0x989   : > { %14604 = vadd.xlane.f32.xlu1 %v14603_v33 }
 0x98a   : > { %v23374_v33 = vsub.f32 %v23045_v62, %v14388_v15  ;;  %v23389_v15 = vsub.f32 %v23052_v52, %v14391_v5 }
 0x98b   : > { %v14236_v63 = vpop.xlane.xlu1 %14235 }
 0x98c   : > { %v18606_v42 = vpop.f32.mrb[24].mxu0  ;;  %14355 = vadd.xlane.f32.xlu0 %v14354_v19  ;;  %24404 = vst [vmem:[#allocation25_spill] sm:$0xff] %v23374_v33  ;;  %v14516_v40 = vmul.f32 %v23374_v33, %v23374_v33 }
 0x98d   : > { %v23360_v22 = vadd.f32 %v18606_v42, %v22958_v35  ;;  %v14161_v34 = vpop.f32.mrb[25].mxu0  ;;  %14601 = vadd.xlane.f32.xlu1 %v14600_v18  ;;  %v14245_v50 = vpop.xlane.xlu0 %14244  ;;  %v14514_v42 = vmul.f32 %v23353_v23, %v23353_v23 }
 0x98e   : > { %v23368_v57 = vadd.f32 %v22958_v35, %v14161_v34  ;;  %v14517_v34 = vmul.f32 %v23365_v30, %v23365_v30  ;;  %v14393_v52 = vmul.f32 0.0625, %v14245_v50 }
 0x98f   : > { %v14363_v21 = vsel %vm1081_vm0, %v23360_v22, 0.0  ;;  %v14606_v55 = vsel %vm1081_vm0, %v14514_v42, 0.0 }
 0x990   : > { %14364 = vadd.xlane.f32.xlu0 %v14363_v21  ;;  %v14360_v49 = vsel %vm1081_vm0, %v23368_v57, 0.0 }
 0x991   : > { %14610 = vadd.xlane.f32.xlu1 %v14609_v12  ;;  %v14251_v18 = vpop.xlane.xlu0 %14250  ;;  %v14390_v12 = vmul.f32 0.0625, %v14236_v63  ;;  %v14242_v63 = vpop.xlane.xlu1 %14241 }
 0x993   : > { %v23400_v33 = vsub.f32 %v23055_v0, %v14390_v12  ;;  %v14392_v0 = vmul.f32 0.0625, %v14242_v63 }
 0x994   : > { %v18609_v19 = vpop.f32.mrb[26].mxu0  ;;  %14361 = vadd.xlane.f32.xlu0 %v14360_v49 }
 0x995   : > { %v23382_v20 = vadd.f32 %v18609_v19, %v22958_v35  ;;  %v14171_v21 = vpop.f32.mrb[27].mxu0  ;;  %14607 = vadd.xlane.f32.xlu1 %v14606_v55  ;;  %v14615_v19 = vsel %vm1081_vm0, %v14517_v34, 0.0  ;;  %v14612_v55 = vsel %vm1081_vm0, %v14516_v40, 0.0  ;;  %v14248_v40 = vpop.xlane.xlu1 %14247 }
 0x996   : > { %v23392_v42 = vadd.f32 %v22958_v35, %v14171_v21  ;;  %v14519_v35 = vmul.f32 %v23389_v15, %v23389_v15  ;;  %v14518_v21 = vmul.f32 %v23400_v33, %v23400_v33 }
 0x997   : > { %v14369_v62 = vsel %vm1081_vm0, %v23382_v20, 0.0  ;;  %v14257_v30 = vpop.xlane.xlu0 %14256 }
 0x998   : > { %v14397_v23 = vmul.f32 0.0625, %v14257_v30  ;;  %14370 = vadd.xlane.f32.xlu0 %v14369_v62  ;;  %v14366_v5 = vsel %vm1081_vm0, %v23392_v42, 0.0  ;;  %v14621_v50 = vsel %vm1081_vm0, %v14519_v35, 0.0 }
 0x999   : > { %14616 = vadd.xlane.f32.xlu1 %v14615_v19  ;;  %v23419_v19 = vsub.f32 %v23065_v38, %v14392_v0  ;;  %v14254_v35 = vpop.xlane.xlu1 %14253 }
 0x99a   : > { %v23396_v49 = vsub.f32 %v23082_v43, %v14397_v23  ;;  %v23410_v23 = vsub.f32 %v23062_v31, %v14393_v52  ;;  %v14618_v31 = vsel %vm1081_vm0, %v14518_v21, 0.0  ;;  %v14396_v21 = vmul.f32 0.0625, %v14254_v35 }
 0x99c   : > { %14367 = vadd.xlane.f32.xlu0 %v14366_v5  ;;  %v14525_v30 = vmul.f32 %v23396_v49, %v23396_v49  ;;  %v14521_v52 = vmul.f32 %v23410_v23, %v23410_v23 }
 0x99d   : > { %14613 = vadd.xlane.f32.xlu1 %v14612_v55  ;;  %v14395_v55 = vmul.f32 0.0625, %v14251_v18  ;;  %v14520_v18 = vmul.f32 %v23419_v19, %v23419_v19 }
 0x99e   : > { %v14639_v43 = vsel %vm1081_vm0, %v14525_v30, 0.0  ;;  %v14627_v38 = vsel %vm1081_vm0, %v14521_v52, 0.0  ;;  %v23445_v52 = vsub.f32 %v23085_v48, %v14396_v21 }
 0x99f   : > { %v14263_v34 = vpop.xlane.xlu0 %14262  ;;  %v23428_v30 = vsub.f32 %v23072_v46, %v14395_v55 }
 0x9a0   : > { %v14399_v62 = vmul.f32 0.0625, %v14263_v34  ;;  %14640 = vadd.xlane.f32.xlu0 %v14639_v43  ;;  %v14260_v0 = vpop.xlane.xlu1 %14259 }
 0x9a1   : > { %14622 = vadd.xlane.f32.xlu1 %v14621_v50  ;;  %v14523_v46 = vmul.f32 %v23428_v30, %v23428_v30 }
 0x9a2   : > { %v23416_v12 = vsub.f32 %v23092_v25, %v14399_v62  ;;  %v14394_v25 = vmul.f32 0.0625, %v14248_v40  ;;  %v14624_v62 = vsel %vm1081_vm0, %v14520_v18, 0.0 }
 0x9a4   : > { %v14527_v5 = vmul.f32 %v23416_v12, %v23416_v12  ;;  %v23434_v50 = vsub.f32 %v23075_v3, %v14394_v25  ;;  %v14633_v3 = vsel %vm1081_vm0, %v14523_v46, 0.0 }
 0x9a5   : > { %14619 = vadd.xlane.f32.xlu1 %v14618_v31 }
 0x9a6   : > { %v14645_v63 = vsel %vm1081_vm0, %v14527_v5, 0.0  ;;  %v14398_v5 = vmul.f32 0.0625, %v14260_v0  ;;  %v14522_v35 = vmul.f32 %v23434_v50, %v23434_v50  ;;  %v14524_v0 = vmul.f32 %v23445_v52, %v23445_v52 }
 0x9a7   : > { %14646 = vadd.xlane.f32.xlu0 %v14645_v63 }
 0x9a8   : > { %v23452_v18 = vsub.f32 %v23095_v1, %v14398_v5  ;;  %v14630_v48 = vsel %vm1081_vm0, %v14522_v35, 0.0 }
 0x9a9   : > { %14628 = vadd.xlane.f32.xlu1 %v14627_v38  ;;  %v14269_v43 = vpop.xlane.xlu0 %14268 }
 0x9aa   : > { %v14401_v34 = vmul.f32 0.0625, %v14269_v43  ;;  %v14266_v55 = vpop.xlane.xlu1 %14265  ;;  %v14526_v5 = vmul.f32 %v23452_v18, %v23452_v18 }
 0x9ab   : > { %v14400_v43 = vmul.f32 0.0625, %v14266_v55  ;;  %v14636_v55 = vsel %vm1081_vm0, %v14524_v0, 0.0 }
 0x9ac   : > { %v23440_v40 = vsub.f32 %v23102_v7, %v14401_v34 }
 0x9ad   : > { %14625 = vadd.xlane.f32.xlu1 %v14624_v62 }
 0x9ae   : > { %v14529_v31 = vmul.f32 %v23440_v40, %v23440_v40 }
 0x9b0   : > { %v14651_v63 = vsel %vm1081_vm0, %v14529_v31, 0.0 }
 0x9b1   : > { %14634 = vadd.xlane.f32.xlu1 %v14633_v3  ;;  %v14275_v25 = vpop.xlane.xlu0 %14274  ;;  %14652 = vadd.xlane.f32.xlu0 %v14651_v63  ;;  %v23463_v3 = vsub.f32 %v23105_v8, %v14400_v43 }
 0x9b2   : > { %v14403_v7 = vmul.f32 0.0625, %v14275_v25  ;;  %v14272_v38 = vpop.xlane.xlu1 %14271 }
 0x9b3   : > { %v14402_v1 = vmul.f32 0.0625, %v14272_v38  ;;  %v14642_v38 = vsel %vm1081_vm0, %v14526_v5, 0.0  ;;  %v14528_v43 = vmul.f32 %v23463_v3, %v23463_v3 }
 0x9b4   : > { %v23458_v34 = vsub.f32 %v23112_v2, %v14403_v7 }
 0x9b5   : > { %14631 = vadd.xlane.f32.xlu1 %v14630_v48  ;;  %v14281_v21 = vpop.xlane.xlu0 %14280  ;;  %v23475_v25 = vsub.f32 %v23115_v39, %v14402_v1 }
 0x9b6   : > { %v14405_v62 = vmul.f32 0.0625, %v14281_v21  ;;  %v14278_v46 = vpop.xlane.xlu1 %14277  ;;  %v14531_v31 = vmul.f32 %v23458_v34, %v23458_v34 }
 0x9b7   : > { %v14404_v8 = vmul.f32 0.0625, %v14278_v46  ;;  %v14648_v46 = vsel %vm1081_vm0, %v14528_v43, 0.0 }
 0x9b8   : > { %v23469_v35 = vsub.f32 %v23122_v61, %v14405_v62  ;;  %v14657_v2 = vsel %vm1081_vm0, %v14531_v31, 0.0  ;;  %v14530_v31 = vmul.f32 %v23475_v25, %v23475_v25 }
 0x9b9   : > { %14637 = vadd.xlane.f32.xlu1 %v14636_v55  ;;  %14658 = vadd.xlane.f32.xlu0 %v14657_v2  ;;  %v23485_v62 = vsub.f32 %v23125_v59, %v14404_v8 }
 0x9ba   : > { %v14533_v63 = vmul.f32 %v23469_v35, %v23469_v35  ;;  %v14654_v8 = vsel %vm1081_vm0, %v14530_v31, 0.0 }
 0x9bb   : > { %v14287_v7 = vpop.xlane.xlu0 %14286 }
 0x9bc   : > { %v14407_v48 = vmul.f32 0.0625, %v14287_v7  ;;  %v14284_v61 = vpop.xlane.xlu1 %14283  ;;  %v14663_v0 = vsel %vm1081_vm0, %v14533_v63, 0.0  ;;  %v14532_v7 = vmul.f32 %v23485_v62, %v23485_v62 }
 0x9bd   : > { %14643 = vadd.xlane.f32.xlu1 %v14642_v38  ;;  %14664 = vadd.xlane.f32.xlu0 %v14663_v0  ;;  %v14406_v39 = vmul.f32 0.0625, %v14284_v61 }
 0x9be   : > { %v23482_v21 = vsub.f32 %v23132_v51, %v14407_v48 }
 0x9bf   : > { %v23494_v51 = vsub.f32 %v23135_v13, %v14406_v39  ;;  %v14660_v39 = vsel %vm1081_vm0, %v14532_v7, 0.0 }
 0x9c0   : > { %v14535_v1 = vmul.f32 %v23482_v21, %v23482_v21 }
 0x9c1   : > { %14649 = vadd.xlane.f32.xlu1 %v14648_v46  ;;  %v14293_v55 = vpop.xlane.xlu0 %14292  ;;  %v14534_v46 = vmul.f32 %v23494_v51, %v23494_v51 }
 0x9c2   : > { %v14409_v5 = vmul.f32 0.0625, %v14293_v55  ;;  %v14669_v2 = vsel %vm1081_vm0, %v14535_v1, 0.0  ;;  %v14290_v63 = vpop.xlane.xlu1 %14289 }
 0x9c3   : > { %14670 = vadd.xlane.f32.xlu0 %v14669_v2  ;;  %v14408_v59 = vmul.f32 0.0625, %v14290_v63 }
 0x9c4   : > { %v23500_v38 = vsub.f32 %v23142_v56, %v14409_v5 }
 0x9c5   : > { %14655 = vadd.xlane.f32.xlu1 %v14654_v8  ;;  %v23505_v61 = vsub.f32 %v23145_v41, %v14408_v59  ;;  %v14666_v41 = vsel %vm1081_vm0, %v14534_v46, 0.0 }
 0x9c6   : > { %v14299_v43 = vpop.xlane.xlu0 %14298  ;;  %v14537_v48 = vmul.f32 %v23500_v38, %v23500_v38 }
 0x9c7   : > { %v14411_v13 = vmul.f32 0.0625, %v14299_v43  ;;  %v14296_v0 = vpop.xlane.xlu1 %14295  ;;  %v14536_v2 = vmul.f32 %v23505_v61, %v23505_v61 }
 0x9c8   : > { %v14410_v31 = vmul.f32 0.0625, %v14296_v0  ;;  %v14675_v56 = vsel %vm1081_vm0, %v14537_v48, 0.0 }
 0x9c9   : > { %14661 = vadd.xlane.f32.xlu1 %v14660_v39  ;;  %v23512_v1 = vsub.f32 %v23152_v60, %v14411_v13  ;;  %14676 = vadd.xlane.f32.xlu0 %v14675_v56  ;;  %v14672_v60 = vsel %vm1081_vm0, %v14536_v2, 0.0 }
 0x9ca   : > { %v23515_v55 = vsub.f32 %v23155_v4, %v14410_v31 }
 0x9cb   : > { %v14539_v5 = vmul.f32 %v23512_v1, %v23512_v1 }
 0x9cc   : > { %v14538_v4 = vmul.f32 %v23515_v55, %v23515_v55 }
 0x9cd   : > { %14667 = vadd.xlane.f32.xlu1 %v14666_v41  ;;  %v14305_v63 = vpop.xlane.xlu0 %14304  ;;  %v14681_v59 = vsel %vm1081_vm0, %v14539_v5, 0.0 }
 0x9ce   : > { %v14413_v8 = vmul.f32 0.0625, %v14305_v63  ;;  %14682 = vadd.xlane.f32.xlu0 %v14681_v59  ;;  %v14678_v0 = vsel %vm1081_vm0, %v14538_v4, 0.0 }
 0x9d0   : > { %v23527_v7 = vsub.f32 %v23162_v58, %v14413_v8 }
 0x9d1   : > { %14673 = vadd.xlane.f32.xlu1 %v14672_v60  ;;  %v14302_v43 = vpop.xlane.xlu0 %14301 }
 0x9d2   : > { %v14412_v48 = vmul.f32 0.0625, %v14302_v43  ;;  %v14541_v13 = vmul.f32 %v23527_v7, %v23527_v7 }
 0x9d4   : > { %v23533_v39 = vsub.f32 %v23165_v10, %v14412_v48  ;;  %v14687_v46 = vsel %vm1081_vm0, %v14541_v13, 0.0 }
 0x9d5   : > { %14679 = vadd.xlane.f32.xlu1 %v14678_v0  ;;  %14688 = vadd.xlane.f32.xlu0 %v14687_v46  ;;  %v14311_v31 = vpop.xlane.xlu0 %14310 }
 0x9d6   : > { %v14415_v56 = vmul.f32 0.0625, %v14311_v31  ;;  %v14540_v58 = vmul.f32 %v23533_v39, %v23533_v39 }
 0x9d8   : > { %v23539_v41 = vsub.f32 %v23170_v28, %v14415_v56  ;;  %v14684_v5 = vsel %vm1081_vm0, %v14540_v58, 0.0 }
 0x9d9   : > { %v14308_v2 = vpop.xlane.xlu0 %14307  ;;  %14685 = vadd.xlane.f32.xlu1 %v14684_v5 }
 0x9da   : > { %v14414_v63 = vmul.f32 0.0625, %v14308_v2  ;;  %v14543_v10 = vmul.f32 %v23539_v41, %v23539_v41 }
 0x9dc   : > { %v23545_v59 = vsub.f32 %v23175_v11, %v14414_v63  ;;  %v14693_v8 = vsel %vm1081_vm0, %v14543_v10, 0.0 }
 0x9dd   : > { %14694 = vadd.xlane.f32.xlu0 %v14693_v8  ;;  %v14317_v60 = vpop.xlane.xlu0 %14316 }
 0x9de   : > { %v14417_v4 = vmul.f32 0.0625, %v14317_v60  ;;  %v14542_v28 = vmul.f32 %v23545_v59, %v23545_v59 }
 0x9e0   : > { %v23551_v43 = vsub.f32 %v23182_v24, %v14417_v4  ;;  %v14690_v48 = vsel %vm1081_vm0, %v14542_v28, 0.0 }
 0x9e1   : > { %v14314_v13 = vpop.xlane.xlu0 %14313  ;;  %14691 = vadd.xlane.f32.xlu1 %v14690_v48 }
 0x9e2   : > { %v14416_v0 = vmul.f32 0.0625, %v14314_v13  ;;  %v14545_v11 = vmul.f32 %v23551_v43, %v23551_v43 }
 0x9e4   : > { %v23557_v46 = vsub.f32 %v23187_v54, %v14416_v0  ;;  %v14699_v31 = vsel %vm1081_vm0, %v14545_v11, 0.0 }
 0x9e5   : > { %14700 = vadd.xlane.f32.xlu0 %v14699_v31  ;;  %v14323_v56 = vpop.xlane.xlu0 %14322 }
 0x9e6   : > { %v14569_v58 = vpop.xlane.xlu1 %14568  ;;  %v14419_v5 = vmul.f32 0.0625, %v14323_v56  ;;  %v14544_v24 = vmul.f32 %v23557_v46, %v23557_v46 }
 0x9e7   : > { %v14757_v2 = vmul.f32 0.0625, %v14569_v58 }
 0x9e8   : > { %v23563_v63 = vsub.f32 %v23198_v29, %v14419_v5  ;;  %v14696_v10 = vsel %vm1081_vm0, %v14544_v24, 0.0 }
 0x9e9   : > { %v14821_v8 = vadd.f32 1e-05, %v14757_v2  ;;  %v14320_v60 = vpop.xlane.xlu0 %14319  ;;  %14697 = vadd.xlane.f32.xlu1 %v14696_v10 }
 0x9ea   : > { %v14566_v54 = vpop.xlane.xlu1 %14565  ;;  %v14418_v4 = vmul.f32 0.0625, %v14320_v60  ;;  %v14547_v48 = vmul.f32 %v23563_v63, %v23563_v63 }
 0x9eb   : > { %v14756_v28 = vmul.f32 0.0625, %v14566_v54  ;;  %19157 = vrsqrt.f32 %v14821_v8 }
 0x9ec   : > { %v23569_v13 = vsub.f32 %v23203_v45, %v14418_v4  ;;  %v14705_v11 = vsel %vm1081_vm0, %v14547_v48, 0.0 }
 0x9ed   : > { %v14820_v0 = vadd.f32 1e-05, %v14756_v28  ;;  %14706 = vadd.xlane.f32.xlu0 %v14705_v11  ;;  %v14329_v29 = vpop.xlane.xlu0 %14328 }
 0x9ee   : > { %v14575_v31 = vpop.xlane.xlu1 %14574  ;;  %v14421_v56 = vmul.f32 0.0625, %v14329_v29  ;;  %v14546_v5 = vmul.f32 %v23569_v13, %v23569_v13 }
 0x9ef   : > { %19159 = vrsqrt.f32 %v14820_v0  ;;  %v14759_v58 = vmul.f32 0.0625, %v14575_v31 }
 0x9f0   : > { %v23575_v2 = vsub.f32 %v23222_v36, %v14421_v56  ;;  %v14702_v24 = vsel %vm1081_vm0, %v14546_v5, 0.0 }
 0x9f1   : > { %v14823_v45 = vadd.f32 1e-05, %v14759_v58  ;;  %v14326_v10 = vpop.xlane.xlu0 %14325  ;;  %14703 = vadd.xlane.f32.xlu1 %v14702_v24 }
 0x9f2   : > { %v14572_v60 = vpop.xlane.xlu1 %14571  ;;  %v14420_v54 = vmul.f32 0.0625, %v14326_v10  ;;  %v14549_v4 = vmul.f32 %v23575_v2, %v23575_v2 }
 0x9f3   : > { %v14758_v8 = vmul.f32 0.0625, %v14572_v60  ;;  %19161 = vrsqrt.f32 %v14823_v45 }
 0x9f4   : > { %v23581_v28 = vsub.f32 %v23230_v6, %v14420_v54  ;;  %v14711_v0 = vsel %vm1081_vm0, %v14549_v4, 0.0 }
 0x9f5   : > { %v14822_v48 = vadd.f32 1e-05, %v14758_v8  ;;  %14712 = vadd.xlane.f32.xlu0 %v14711_v0  ;;  %v14335_v36 = vpop.xlane.xlu0 %14334  ;;  %v19158_v58 = vpop.eup %19157 }
 0x9f6   : > { %v14581_v11 = vpop.xlane.xlu1 %14580  ;;  %v14423_v29 = vmul.f32 0.0625, %v14335_v36  ;;  %v14548_v56 = vmul.f32 %v23581_v28, %v23581_v28 }
 0x9f7   : > { %19163 = vrsqrt.f32 %v14822_v48  ;;  %v14761_v31 = vmul.f32 0.0625, %v14581_v11  ;;  %v14949_v48 = vmul.f32 %v19158_v58, %v23190_v44 }
 0x9f8   : > { %v23587_v24 = vsub.f32 %v23244_v16, %v14423_v29  ;;  %v14708_v6 = vsel %vm1081_vm0, %v14548_v56, 0.0 }
 0x9f9   : > { %v19160_v5 = vpop.eup %19159  ;;  %v14825_v10 = vadd.f32 1e-05, %v14761_v31  ;;  %v14332_v60 = vpop.xlane.xlu0 %14331  ;;  %14709 = vadd.xlane.f32.xlu1 %v14708_v6 }
 0x9fa   : > { %v14578_v45 = vpop.xlane.xlu1 %14577  ;;  %v14948_v54 = vmul.f32 %v19160_v5, %v23195_v37  ;;  %v14422_v8 = vmul.f32 0.0625, %v14332_v60  ;;  %v14551_v0 = vmul.f32 %v23587_v24, %v23587_v24 }
 0x9fb   : > { %v14760_v4 = vmul.f32 0.0625, %v14578_v45  ;;  %19165 = vrsqrt.f32 %v14825_v10 }
 0x9fc   : > { %18614 = vmatprep.mubr.msk.f32.mxu1 %vm1081_vm0, %v14948_v54  ;;  %v23596_v16 = vsub.f32 %v23252_v47, %v14422_v8  ;;  %v14717_v11 = vsel %vm1081_vm0, %v14551_v0, 0.0 }
 0x9fd   : > { %v14824_v36 = vadd.f32 1e-05, %v14760_v4  ;;  %18615 = vmatmul.mubr.msk.f32.vlgmr.msra.gmra.mrb[228].mxu1 %vm1081_vm0, %v14949_v48  ;;  %14718 = vadd.xlane.f32.xlu0 %v14717_v11  ;;  %v14341_v37 = vpop.xlane.xlu0 %14340  ;;  %v19162_v58 = vpop.eup %19161  ;;  %v24405_v48 = vld [vmem:[#allocation61_spill] sm:$0xff] }
 0x9fe   : > { %v14587_v29 = vpop.xlane.xlu1 %14586  ;;  %v14425_v31 = vmul.f32 0.0625, %v14341_v37  ;;  %v14550_v56 = vmul.f32 %v23596_v16, %v23596_v16  ;;  %v14951_v0 = vmul.f32 %v19162_v58, %v24405_v48 }
 0x9ff   : > { %19167 = vrsqrt.f32 %v14824_v36  ;;  %v14763_v44 = vmul.f32 0.0625, %v14587_v29 }
 0xa00   : > { %v23603_v47 = vsub.f32 %v23266_v53, %v14425_v31  ;;  %v14714_v6 = vsel %vm1081_vm0, %v14550_v56, 0.0 }
 0xa01   : > { %v19164_v5 = vpop.eup %19163  ;;  %v14827_v60 = vadd.f32 1e-05, %v14763_v44  ;;  %v14338_v45 = vpop.xlane.xlu0 %14337  ;;  %14715 = vadd.xlane.f32.xlu1 %v14714_v6  ;;  %v24406_v6 = vld [vmem:[#allocation64_spill] sm:$0xff] }
 0xa02   : > { %v14584_v10 = vpop.xlane.xlu1 %14583  ;;  %v14950_v54 = vmul.f32 %v19164_v5, %v23216_v17  ;;  %v14424_v8 = vmul.f32 0.0625, %v14338_v45  ;;  %v14553_v36 = vmul.f32 %v23603_v47, %v23603_v47 }
 0xa03   : > { %v14762_v4 = vmul.f32 0.0625, %v14584_v10  ;;  %19169 = vrsqrt.f32 %v14827_v60 }
 0xa04   : > { %18617 = vmatprep.mubr.msk.f32.mxu1 %vm1081_vm0, %v14950_v54  ;;  %v23612_v53 = vsub.f32 %v23274_v14, %v14424_v8  ;;  %v14723_v37 = vsel %vm1081_vm0, %v14553_v36, 0.0  ;;  %v24407_v8 = vld [vmem:[#allocation62_spill] sm:$0xff] }
 0xa05   : > { %v14826_v11 = vadd.f32 1e-05, %v14762_v4  ;;  %18618 = vmatmul.mubr.msk.f32.gmra.mrb[230].mxu1 %vm1081_vm0, %v14951_v0  ;;  %14724 = vadd.xlane.f32.xlu0 %v14723_v37  ;;  %v14347_v17 = vpop.xlane.xlu0 %14346  ;;  %v19166_v58 = vpop.eup %19165  ;;  %v24408_v36 = vld [vmem:[#allocation6_spill] sm:$0xff] }
 0xa06   : > { %v14593_v29 = vpop.xlane.xlu1 %14592  ;;  %v14427_v31 = vmul.f32 0.0625, %v14347_v17  ;;  %v14552_v56 = vmul.f32 %v23612_v53, %v23612_v53 }
 0xa07   : > { %19171 = vrsqrt.f32 %v14826_v11  ;;  %v14765_v44 = vmul.f32 0.0625, %v14593_v29  ;;  %v14953_v11 = vmul.f32 %v19166_v58, %v24408_v36 }
 0xa08   : > { %v23619_v14 = vsub.f32 %v24406_v6, %v14427_v31  ;;  %v14720_v45 = vsel %vm1081_vm0, %v14552_v56, 0.0 }
 0xa09   : > { %v19168_v5 = vpop.eup %19167  ;;  %v14829_v10 = vadd.f32 1e-05, %v14765_v44  ;;  %v14344_v54 = vpop.xlane.xlu0 %14343  ;;  %14721 = vadd.xlane.f32.xlu1 %v14720_v45 }
 0xa0a   : > { %v14590_v60 = vpop.xlane.xlu1 %14589  ;;  %v14952_v4 = vmul.f32 %v19168_v5, %v24407_v8  ;;  %v14426_v48 = vmul.f32 0.0625, %v14344_v54  ;;  %v14555_v37 = vmul.f32 %v23619_v14, %v23619_v14 }
 0xa0b   : > { %v14764_v0 = vmul.f32 0.0625, %v14590_v60  ;;  %19173 = vrsqrt.f32 %v14829_v10 }
 0xa0c   : > { %18620 = vmatprep.mubr.msk.f32.mxu1 %vm1081_vm0, %v14952_v4  ;;  %v23628_v17 = vsub.f32 %v23296_v32, %v14426_v48  ;;  %v14729_v31 = vsel %vm1081_vm0, %v14555_v37, 0.0  ;;  %v24409_v48 = vld [vmem:[#allocation63_spill] sm:$0xff]  ;;  %v24410_v37 = vld [vmem:[#allocation8_spill] sm:$0xff] }
 0xa0d   : > { %v14828_v29 = vadd.f32 1e-05, %v14764_v0  ;;  %18621 = vmatmul.mubr.msk.f32.gmra.mrb[232].mxu1 %vm1081_vm0, %v14953_v11  ;;  %14730 = vadd.xlane.f32.xlu0 %v14729_v31  ;;  %v14353_v44 = vpop.xlane.xlu0 %14352  ;;  %v19170_v45 = vpop.eup %19169 }
 0xa0e   : > { %v14599_v56 = vpop.xlane.xlu1 %14598  ;;  %v14429_v5 = vmul.f32 0.0625, %v14353_v44  ;;  %v14554_v6 = vmul.f32 %v23628_v17, %v23628_v17 }
 0xa0f   : > { %19175 = vrsqrt.f32 %v14828_v29  ;;  %v14767_v58 = vmul.f32 0.0625, %v14599_v56  ;;  %v14955_v29 = vmul.f32 %v19170_v45, %v24410_v37 }
 0xa10   : > { %v23635_v32 = vsub.f32 %v23316_v27, %v14429_v5  ;;  %v14726_v60 = vsel %vm1081_vm0, %v14554_v6, 0.0 }
 0xa11   : > { %v19172_v54 = vpop.eup %19171  ;;  %v14831_v8 = vadd.f32 1e-05, %v14767_v58  ;;  %v14350_v4 = vpop.xlane.xlu0 %14349  ;;  %14727 = vadd.xlane.f32.xlu1 %v14726_v60 }
 0xa12   : > { %v14596_v10 = vpop.xlane.xlu1 %14595  ;;  %v14954_v0 = vmul.f32 %v19172_v54, %v24409_v48  ;;  %v14428_v36 = vmul.f32 0.0625, %v14350_v4  ;;  %v14557_v31 = vmul.f32 %v23635_v32, %v23635_v32 }
 0xa13   : > { %v14766_v11 = vmul.f32 0.0625, %v14596_v10  ;;  %19177 = vrsqrt.f32 %v14831_v8  ;;  %v24411_v10 = vld [vmem:[#allocation66_spill] sm:$0xff] }
 0xa14   : > { %18623 = vmatprep.mubr.msk.f32.mxu1 %vm1081_vm0, %v14954_v0  ;;  %v23644_v27 = vsub.f32 %v23324_v26, %v14428_v36  ;;  %v14735_v56 = vsel %vm1081_vm0, %v14557_v31, 0.0 }
 0xa15   : > { %v14830_v44 = vadd.f32 1e-05, %v14766_v11  ;;  %18624 = vmatmul.mubr.msk.f32.gmra.mrb[234].mxu1 %vm1081_vm0, %v14955_v29  ;;  %14736 = vadd.xlane.f32.xlu0 %v14735_v56  ;;  %v14359_v5 = vpop.xlane.xlu0 %14358  ;;  %v19174_v60 = vpop.eup %19173  ;;  %v24412_v11 = vld [vmem:[#allocation67_spill] sm:$0xff] }
 0xa16   : > { %v14605_v58 = vpop.xlane.xlu1 %14604  ;;  %v14431_v6 = vmul.f32 0.0625, %v14359_v5  ;;  %v14556_v54 = vmul.f32 %v23644_v27, %v23644_v27 }
 0xa17   : > { %19179 = vrsqrt.f32 %v14830_v44  ;;  %v14769_v45 = vmul.f32 0.0625, %v14605_v58  ;;  %v24413_v44 = vld [vmem:[#allocation7_spill] sm:$0xff] }
 0xa18   : > { %v23651_v26 = vsub.f32 %v24411_v10, %v14431_v6  ;;  %v14732_v48 = vsel %vm1081_vm0, %v14556_v54, 0.0  ;;  %v14957_v56 = vmul.f32 %v19174_v60, %v24413_v44 }
 0xa19   : > { %v19176_v4 = vpop.eup %19175  ;;  %v14833_v0 = vadd.f32 1e-05, %v14769_v45  ;;  %v14356_v36 = vpop.xlane.xlu0 %14355  ;;  %14733 = vadd.xlane.f32.xlu1 %v14732_v48 }
 0xa1a   : > { %v14602_v8 = vpop.xlane.xlu1 %14601  ;;  %v14956_v37 = vmul.f32 %v19176_v4, %v24412_v11  ;;  %v14430_v29 = vmul.f32 0.0625, %v14356_v36  ;;  %v14559_v5 = vmul.f32 %v23651_v26, %v23651_v26 }
 0xa1b   : > { %v14768_v31 = vmul.f32 0.0625, %v14602_v8  ;;  %19181 = vrsqrt.f32 %v14833_v0 }
 0xa1c   : > { %18626 = vmatprep.mubr.msk.f32.mxu1 %vm1081_vm0, %v14956_v37  ;;  %v23660_v58 = vsub.f32 %v23348_v9, %v14430_v29  ;;  %v14741_v45 = vsel %vm1081_vm0, %v14559_v5, 0.0 }
 0xa1d   : > { %v14832_v6 = vadd.f32 1e-05, %v14768_v31  ;;  %18627 = vmatmul.mubr.msk.f32.gmra.mrb[236].mxu1 %vm1081_vm0, %v14957_v56  ;;  %14742 = vadd.xlane.f32.xlu0 %v14741_v45  ;;  %v14365_v54 = vpop.xlane.xlu0 %14364  ;;  %v19178_v36 = vpop.eup %19177  ;;  %v24414_v31 = vld [vmem:[#allocation65_spill] sm:$0xff] }
 0xa1e   : > { %v14611_v4 = vpop.xlane.xlu1 %14610  ;;  %v14433_v10 = vmul.f32 0.0625, %v14365_v54  ;;  %v14558_v48 = vmul.f32 %v23660_v58, %v23660_v58 }
 0xa1f   : > { %19183 = vrsqrt.f32 %v14832_v6  ;;  %v14771_v60 = vmul.f32 0.0625, %v14611_v4  ;;  %v24415_v6 = vld [vmem:[#allocation10_spill] sm:$0xff] }
 0xa20   : > { %v23667_v9 = vsub.f32 %v23360_v22, %v14433_v10  ;;  %v14738_v11 = vsel %vm1081_vm0, %v14558_v48, 0.0  ;;  %v14959_v45 = vmul.f32 %v19178_v36, %v24415_v6 }
 0xa21   : > { %v19180_v8 = vpop.eup %19179  ;;  %v14835_v37 = vadd.f32 1e-05, %v14771_v60  ;;  %v14362_v29 = vpop.xlane.xlu0 %14361  ;;  %14739 = vadd.xlane.f32.xlu1 %v14738_v11 }
 0xa22   : > { %v14608_v0 = vpop.xlane.xlu1 %14607  ;;  %v14958_v44 = vmul.f32 %v19180_v8, %v24414_v31  ;;  %v14432_v56 = vmul.f32 0.0625, %v14362_v29  ;;  %v14561_v54 = vmul.f32 %v23667_v9, %v23667_v9 }
 0xa23   : > { %v14770_v5 = vmul.f32 0.0625, %v14608_v0  ;;  %19185 = vrsqrt.f32 %v14835_v37 }
 0xa24   : > { %18629 = vmatprep.mubr.msk.f32.mxu1 %vm1081_vm0, %v14958_v44  ;;  %v23676_v22 = vsub.f32 %v23368_v57, %v14432_v56  ;;  %v14747_v10 = vsel %vm1081_vm0, %v14561_v54, 0.0 }
 0xa25   : > { %v14834_v4 = vadd.f32 1e-05, %v14770_v5  ;;  %18630 = vmatmul.mubr.msk.f32.gmra.mrb[238].mxu1 %vm1081_vm0, %v14959_v45  ;;  %14748 = vadd.xlane.f32.xlu0 %v14747_v10  ;;  %v14371_v60 = vpop.xlane.xlu0 %14370  ;;  %v19182_v29 = vpop.eup %19181  ;;  %v24417_v5 = vld [vmem:[#allocation70_spill] sm:$0xff] }
 0xa26   : > { %v14617_v48 = vpop.xlane.xlu1 %14616  ;;  %v14435_v8 = vmul.f32 0.0625, %v14371_v60  ;;  %v14560_v11 = vmul.f32 %v23676_v22, %v23676_v22 }
 0xa27   : > { %19187 = vrsqrt.f32 %v14834_v4  ;;  %v14773_v36 = vmul.f32 0.0625, %v14617_v48  ;;  %v24418_v4 = vld [vmem:[#allocation9_spill] sm:$0xff] }
 0xa28   : > { %v23683_v57 = vsub.f32 %v23382_v20, %v14435_v8  ;;  %v14744_v31 = vsel %vm1081_vm0, %v14560_v11, 0.0  ;;  %v14961_v10 = vmul.f32 %v19182_v29, %v24418_v4 }
 0xa29   : > { %v19184_v0 = vpop.eup %19183  ;;  %v14837_v44 = vadd.f32 1e-05, %v14773_v36  ;;  %v14368_v56 = vpop.xlane.xlu0 %14367  ;;  %14745 = vadd.xlane.f32.xlu1 %v14744_v31 }
 0xa2a   : > { %24416 = vst [vmem:[#allocation69_spill] sm:$0xff] %v23683_v57  ;;  %v14614_v37 = vpop.xlane.xlu1 %14613  ;;  %v14960_v6 = vmul.f32 %v19184_v0, %v24417_v5  ;;  %v14434_v45 = vmul.f32 0.0625, %v14368_v56  ;;  %v14563_v60 = vmul.f32 %v23683_v57, %v23683_v57  ;;  %v24419_v5 = vld [vmem:[#allocation72_spill] sm:$0xff] }
 0xa2b   : > { %v14772_v54 = vmul.f32 0.0625, %v14614_v37  ;;  %19189 = vrsqrt.f32 %v14837_v44 }
 0xa2c   : > { %18632 = vmatprep.mubr.msk.f32.mxu1 %vm1081_vm0, %v14960_v6  ;;  %v23692_v20 = vsub.f32 %v23392_v42, %v14434_v45  ;;  %v14753_v8 = vsel %vm1081_vm0, %v14563_v60, 0.0 }
 0xa2d   : > { %v14836_v48 = vadd.f32 1e-05, %v14772_v54  ;;  %18633 = vmatmul.mubr.msk.f32.gmra.mrb[240].mxu1 %vm1081_vm0, %v14961_v10  ;;  %14754 = vadd.xlane.f32.xlu0 %v14753_v8  ;;  %v19186_v0 = vpop.eup %19185  ;;  %v24420_v54 = vld [vmem:[#allocation24_spill] sm:$0xff]  ;;  %v14641_v57 = vpop.xlane.xlu0 %14640 }
 0xa2e   : > { %v14623_v36 = vpop.xlane.xlu1 %14622  ;;  %v14562_v29 = vmul.f32 %v23692_v20, %v23692_v20  ;;  %v14963_v4 = vmul.f32 %v19186_v0, %v24420_v54 }
 0xa2f   : > { %19191 = vrsqrt.f32 %v14836_v48  ;;  %v14775_v11 = vmul.f32 0.0625, %v14623_v36 }
 0xa30   : > { %v14750_v56 = vsel %vm1081_vm0, %v14562_v29, 0.0  ;;  %v24421_v29 = vld [vmem:[#allocation25_spill] sm:$0xff] }
 0xa31   : > { %v19188_v31 = vpop.eup %19187  ;;  %v14839_v37 = vadd.f32 1e-05, %v14775_v11  ;;  %14751 = vadd.xlane.f32.xlu1 %v14750_v56 }
 0xa32   : > { %v14620_v42 = vpop.xlane.xlu1 %14619  ;;  %v14962_v6 = vmul.f32 %v19188_v31, %v24419_v5 }
 0xa33   : > { %v14774_v45 = vmul.f32 0.0625, %v14620_v42  ;;  %19193 = vrsqrt.f32 %v14839_v37  ;;  %v24422_v42 = vld [vmem:[#allocation68_spill] sm:$0xff] }
 0xa34   : > { %18635 = vmatprep.mubr.msk.f32.mxu1 %vm1081_vm0, %v14962_v6  ;;  %v14647_v6 = vpop.xlane.xlu0 %14646 }
 0xa35   : > { %v14838_v44 = vadd.f32 1e-05, %v14774_v45  ;;  %18636 = vmatmul.mubr.msk.f32.gmra.mrb[242].mxu1 %vm1081_vm0, %v14963_v4  ;;  %v19190_v48 = vpop.eup %19189 }
 0xa36   : > { %v14629_v10 = vpop.xlane.xlu1 %14628  ;;  %v14965_v5 = vmul.f32 %v19190_v48, %v24422_v42 }
 0xa37   : > { %19195 = vrsqrt.f32 %v14838_v44  ;;  %v14777_v60 = vmul.f32 0.0625, %v14629_v10  ;;  %v14781_v44 = vmul.f32 0.0625, %v14641_v57 }
 0xa39   : > { %v19192_v8 = vpop.eup %19191  ;;  %v14841_v36 = vadd.f32 1e-05, %v14777_v60 }
 0xa3a   : > { %v14626_v11 = vpop.xlane.xlu1 %14625  ;;  %v14964_v56 = vmul.f32 %v19192_v8, %v24421_v29 }
 0xa3b   : > { %v14776_v31 = vmul.f32 0.0625, %v14626_v11  ;;  %19197 = vrsqrt.f32 %v14841_v36  ;;  %v14845_v36 = vadd.f32 1e-05, %v14781_v44 }
 0xa3c   : > { %18638 = vmatprep.mubr.msk.f32.mxu1 %vm1081_vm0, %v14964_v56 }
 0xa3d   : > { %v14840_v0 = vadd.f32 1e-05, %v14776_v31  ;;  %18639 = vmatmul.mubr.msk.f32.gmra.mrb[244].mxu1 %vm1081_vm0, %v14965_v5  ;;  %v19194_v54 = vpop.eup %19193  ;;  %v14783_v31 = vmul.f32 0.0625, %v14647_v6 }
 0xa3e   : > { %v14635_v37 = vpop.xlane.xlu1 %14634  ;;  %v14653_v11 = vpop.xlane.xlu0 %14652  ;;  %v14967_v48 = vmul.f32 %v19194_v54, %v23389_v15 }
 0xa3f   : > { %19199 = vrsqrt.f32 %v14840_v0  ;;  %v14779_v45 = vmul.f32 0.0625, %v14635_v37 }
 0xa41   : > { %v19196_v4 = vpop.eup %19195  ;;  %v14843_v10 = vadd.f32 1e-05, %v14779_v45 }
 0xa42   : > { %v14632_v60 = vpop.xlane.xlu1 %14631  ;;  %v14966_v8 = vmul.f32 %v19196_v4, %v23400_v33  ;;  %v14847_v33 = vadd.f32 1e-05, %v14783_v31  ;;  %v14785_v4 = vmul.f32 0.0625, %v14653_v11 }
 0xa43   : > { %v14778_v29 = vmul.f32 0.0625, %v14632_v60  ;;  %19201 = vrsqrt.f32 %v14843_v10 }
 0xa44   : > { %18641 = vmatprep.mubr.msk.f32.mxu1 %vm1081_vm0, %v14966_v8  ;;  %v14849_v10 = vadd.f32 1e-05, %v14785_v4 }
 0xa45   : > { %v14842_v56 = vadd.f32 1e-05, %v14778_v29  ;;  %18642 = vmatmul.mubr.msk.f32.gmra.mrb[246].mxu1 %vm1081_vm0, %v14967_v48  ;;  %v19198_v0 = vpop.eup %19197 }
 0xa46   : > { %v14638_v42 = vpop.xlane.xlu1 %14637  ;;  %v14659_v57 = vpop.xlane.xlu0 %14658  ;;  %v14969_v8 = vmul.f32 %v19198_v0, %v23410_v23 }
 0xa47   : > { %19203 = vrsqrt.f32 %v14842_v56  ;;  %v14780_v5 = vmul.f32 0.0625, %v14638_v42  ;;  %v14787_v29 = vmul.f32 0.0625, %v14659_v57 }
 0xa48   : > { %19205 = vrsqrt.f32 %v14845_v36 }
 0xa49   : > { %v19200_v37 = vpop.eup %19199  ;;  %v14844_v45 = vadd.f32 1e-05, %v14780_v5 }
 0xa4a   : > { %v14644_v60 = vpop.xlane.xlu1 %14643  ;;  %v14968_v15 = vmul.f32 %v19200_v37, %v23419_v19  ;;  %v14665_v44 = vpop.xlane.xlu0 %14664  ;;  %v14851_v19 = vadd.f32 1e-05, %v14787_v29 }
 0xa4b   : > { %19207 = vrsqrt.f32 %v14844_v45  ;;  %v14782_v54 = vmul.f32 0.0625, %v14644_v60  ;;  %v14789_v42 = vmul.f32 0.0625, %v14665_v44 }
 0xa4c   : > { %18644 = vmatprep.mubr.msk.f32.mxu1 %vm1081_vm0, %v14968_v15  ;;  %19209 = vrsqrt.f32 %v14847_v33 }
 0xa4d   : > { %v14846_v6 = vadd.f32 1e-05, %v14782_v54  ;;  %18645 = vmatmul.mubr.msk.f32.gmra.mrb[248].mxu1 %vm1081_vm0, %v14969_v8  ;;  %v19202_v11 = vpop.eup %19201  ;;  %v14853_v60 = vadd.f32 1e-05, %v14789_v42 }
 0xa4e   : > { %v14650_v48 = vpop.xlane.xlu1 %14649  ;;  %v14971_v45 = vmul.f32 %v19202_v11, %v23428_v30 }
 0xa4f   : > { %19211 = vrsqrt.f32 %v14846_v6  ;;  %v14784_v56 = vmul.f32 0.0625, %v14650_v48 }
 0xa50   : > { %19213 = vrsqrt.f32 %v14849_v10  ;;  %v14671_v0 = vpop.xlane.xlu0 %14670 }
 0xa51   : > { %v19204_v36 = vpop.eup %19203  ;;  %v14848_v31 = vadd.f32 1e-05, %v14784_v56  ;;  %v14791_v15 = vmul.f32 0.0625, %v14671_v0 }
 0xa52   : > { %v14656_v5 = vpop.xlane.xlu1 %14655  ;;  %v14970_v23 = vmul.f32 %v19204_v36, %v23434_v50  ;;  %v19206_v33 = vpop.eup %19205 }
 0xa53   : > { %19215 = vrsqrt.f32 %v14848_v31  ;;  %v14786_v37 = vmul.f32 0.0625, %v14656_v5  ;;  %v14973_v44 = vmul.f32 %v19206_v33, %v23396_v49  ;;  %v14855_v48 = vadd.f32 1e-05, %v14791_v15 }
 0xa54   : > { %18647 = vmatprep.mubr.msk.f32.mxu1 %vm1081_vm0, %v14970_v23  ;;  %19217 = vrsqrt.f32 %v14851_v19 }
 0xa55   : > { %v19208_v57 = vpop.eup %19207  ;;  %v14850_v4 = vadd.f32 1e-05, %v14786_v37  ;;  %18648 = vmatmul.mubr.msk.f32.gmra.mrb[250].mxu1 %vm1081_vm0, %v14971_v45 }
 0xa56   : > { %v14662_v54 = vpop.xlane.xlu1 %14661  ;;  %v14972_v8 = vmul.f32 %v19208_v57, %v23445_v52  ;;  %v14677_v6 = vpop.xlane.xlu0 %14676 }
 0xa57   : > { %19219 = vrsqrt.f32 %v14850_v4  ;;  %v14788_v50 = vmul.f32 0.0625, %v14662_v54  ;;  %v19210_v10 = vpop.eup %19209  ;;  %v14793_v56 = vmul.f32 0.0625, %v14677_v6 }
 0xa58   : > { %18650 = vmatprep.mubr.msk.f32.mxu1 %vm1081_vm0, %v14972_v8  ;;  %19221 = vrsqrt.f32 %v14853_v60  ;;  %v14975_v31 = vmul.f32 %v19210_v10, %v23416_v12 }
 0xa59   : > { %v19212_v30 = vpop.eup %19211  ;;  %v14852_v29 = vadd.f32 1e-05, %v14788_v50  ;;  %18651 = vmatmul.mubr.msk.f32.gmra.mrb[252].mxu1 %vm1081_vm0, %v14973_v44  ;;  %v14857_v23 = vadd.f32 1e-05, %v14793_v56 }
 0xa5a   : > { %v14668_v11 = vpop.xlane.xlu1 %14667  ;;  %v14974_v36 = vmul.f32 %v19212_v30, %v23452_v18  ;;  %v19214_v19 = vpop.eup %19213 }
 0xa5b   : > { %19223 = vrsqrt.f32 %v14852_v29  ;;  %v14790_v52 = vmul.f32 0.0625, %v14668_v11  ;;  %v14683_v42 = vpop.xlane.xlu0 %14682  ;;  %v14977_v18 = vmul.f32 %v19214_v19, %v23440_v40 }
 0xa5c   : > { %18653 = vmatprep.mubr.msk.f32.mxu1 %vm1081_vm0, %v14974_v36  ;;  %19225 = vrsqrt.f32 %v14855_v48  ;;  %v14795_v0 = vmul.f32 0.0625, %v14683_v42 }
 0xa5d   : > { %v19216_v49 = vpop.eup %19215  ;;  %v14854_v5 = vadd.f32 1e-05, %v14790_v52  ;;  %18654 = vmatmul.mubr.msk.f32.gmra.mrb[254].mxu1 %vm1081_vm0, %v14975_v31 }
 0xa5e   : > { %v14674_v37 = vpop.xlane.xlu1 %14673  ;;  %v14976_v45 = vmul.f32 %v19216_v49, %v23463_v3  ;;  %v19218_v57 = vpop.eup %19217  ;;  %v14859_v60 = vadd.f32 1e-05, %v14795_v0 }
 0xa5f   : > { %19227 = vrsqrt.f32 %v14854_v5  ;;  %v14792_v33 = vmul.f32 0.0625, %v14674_v37  ;;  %v14979_v8 = vmul.f32 %v19218_v57, %v23458_v34 }
 0xa60   : > { %18656 = vmatprep.mubr.msk.f32.mxu1 %vm1081_vm0, %v14976_v45  ;;  %19229 = vrsqrt.f32 %v14857_v23 }
 0xa61   : > { %v19220_v12 = vpop.eup %19219  ;;  %v14856_v4 = vadd.f32 1e-05, %v14792_v33  ;;  %18657 = vmatmul.mubr.msk.f32.gmra.mrb[0].mxu1 %vm1081_vm0, %v14977_v18 }
 0xa62   : > { %v14680_v15 = vpop.xlane.xlu1 %14679  ;;  %v14978_v54 = vmul.f32 %v19220_v12, %v23475_v25  ;;  %v14689_v50 = vpop.xlane.xlu0 %14688 }
 0xa63   : > { %19231 = vrsqrt.f32 %v14856_v4  ;;  %v14794_v3 = vmul.f32 0.0625, %v14680_v15  ;;  %v19222_v40 = vpop.eup %19221  ;;  %v14797_v6 = vmul.f32 0.0625, %v14689_v50 }
 0xa64   : > { %18659 = vmatprep.mubr.msk.f32.mxu1 %vm1081_vm0, %v14978_v54  ;;  %19233 = vrsqrt.f32 %v14859_v60  ;;  %v14981_v29 = vmul.f32 %v19222_v40, %v23469_v35 }
 0xa65   : > { %v19224_v44 = vpop.eup %19223  ;;  %v14858_v10 = vadd.f32 1e-05, %v14794_v3  ;;  %18660 = vmatmul.mubr.msk.f32.gmra.mrb[2].mxu1 %vm1081_vm0, %v14979_v8  ;;  %v14861_v25 = vadd.f32 1e-05, %v14797_v6 }
 0xa66   : > { %v14980_v30 = vmul.f32 %v19224_v44, %v23485_v62  ;;  %v14686_v48 = vpop.xlane.xlu1 %14685  ;;  %v19226_v34 = vpop.eup %19225 }
 0xa67   : > { %19235 = vrsqrt.f32 %v14858_v10  ;;  %v14796_v56 = vmul.f32 0.0625, %v14686_v48  ;;  %v14983_v31 = vmul.f32 %v19226_v34, %v23482_v21 }
 0xa68   : > { %18662 = vmatprep.mubr.msk.f32.mxu1 %vm1081_vm0, %v14980_v30  ;;  %19237 = vrsqrt.f32 %v14861_v25 }
 0xa69   : > { %v19228_v11 = vpop.eup %19227  ;;  %18663 = vmatmul.mubr.msk.f32.gmra.mrb[4].mxu1 %vm1081_vm0, %v14981_v29  ;;  %v14860_v36 = vadd.f32 1e-05, %v14796_v56 }
 0xa6a   : > { %v14982_v52 = vmul.f32 %v19228_v11, %v23494_v51  ;;  %v14695_v19 = vpop.xlane.xlu0 %14694  ;;  %v19230_v62 = vpop.eup %19229 }
 0xa6b   : > { %19239 = vrsqrt.f32 %v14860_v36  ;;  %v14799_v35 = vmul.f32 0.0625, %v14695_v19  ;;  %v14985_v5 = vmul.f32 %v19230_v62, %v23500_v38 }
 0xa6c   : > { %18665 = vmatprep.mubr.msk.f32.mxu1 %vm1081_vm0, %v14982_v52 }
 0xa6d   : > { %v19232_v42 = vpop.eup %19231  ;;  %18666 = vmatmul.mubr.msk.f32.gmra.mrb[6].mxu1 %vm1081_vm0, %v14983_v31  ;;  %v14863_v23 = vadd.f32 1e-05, %v14799_v35 }
 0xa6e   : > { %v14984_v49 = vmul.f32 %v19232_v42, %v23505_v61  ;;  %v14692_v0 = vpop.xlane.xlu1 %14691  ;;  %v19234_v37 = vpop.eup %19233 }
 0xa6f   : > { %v14798_v51 = vmul.f32 0.0625, %v14692_v0  ;;  %v14987_v33 = vmul.f32 %v19234_v37, %v23512_v1  ;;  %19241 = vrsqrt.f32 %v14863_v23 }
 0xa70   : > { %18668 = vmatprep.mubr.msk.f32.mxu1 %vm1081_vm0, %v14984_v49 }
 0xa71   : > { %v19236_v21 = vpop.eup %19235  ;;  %18669 = vmatmul.mubr.msk.f32.gmra.mrb[8].mxu1 %vm1081_vm0, %v14985_v5  ;;  %v14862_v45 = vadd.f32 1e-05, %v14798_v51 }
 0xa72   : > { %v14986_v18 = vmul.f32 %v19236_v21, %v23515_v55  ;;  %v14701_v57 = vpop.xlane.xlu0 %14700  ;;  %v19238_v38 = vpop.eup %19237  ;;  %v16111_v21 = vld [vmem:[%s24057_s13] sm:$0xff] }
 0xa73   : > { %19243 = vrsqrt.f32 %v14862_v45  ;;  %v14801_v61 = vmul.f32 0.0625, %v14701_v57  ;;  %v14989_v54 = vmul.f32 %v19238_v38, %v23527_v7 }
 0xa74   : > { %18671 = vmatprep.mubr.msk.f32.mxu1 %vm1081_vm0, %v14986_v18 }
 0xa75   : > { %18672 = vmatmul.mubr.msk.f32.gmra.mrb[10].mxu1 %vm1081_vm0, %v14987_v33  ;;  %v19240_v12 = vpop.eup %19239  ;;  %v14865_v4 = vadd.f32 1e-05, %v14801_v61 }
 0xa76   : > { %v14698_v60 = vpop.xlane.xlu1 %14697  ;;  %v14988_v15 = vmul.f32 %v19240_v12, %v23533_v39  ;;  %v16113_v12 = vld [vmem:[%s24057_s13 + $0x10] sm:$0xff] }
 0xa77   : > { %v14800_v8 = vmul.f32 0.0625, %v14698_v60  ;;  %19245 = vrsqrt.f32 %v14865_v4  ;;  %v16114_v4 = vld [vmem:[%s24057_s13 + $0x18] sm:$0xff] }
 0xa78   : > { %18674 = vmatprep.mubr.msk.f32.mxu1 %vm1081_vm0, %v14988_v15  ;;  %v18754_v15 = vpack.c.bf16 %v16114_v4, %v16113_v12  ;;  %v24423_v4 = vld [vmem:[#allocation69_spill] sm:$0xff] }
 0xa79   : > { %v14864_v1 = vadd.f32 1e-05, %v14800_v8  ;;  %18675 = vmatmul.mubr.msk.f32.gmra.mrb[12].mxu1 %vm1081_vm0, %v14989_v54  ;;  %v19242_v50 = vpop.eup %19241 }
 0xa7a   : > { %v14707_v55 = vpop.xlane.xlu0 %14706  ;;  %v14991_v39 = vmul.f32 %v19242_v50, %v23539_v41 }
 0xa7b   : > { %19247 = vrsqrt.f32 %v14864_v1  ;;  %v14803_v3 = vmul.f32 0.0625, %v14707_v55 }
 0xa7d   : > { %v19244_v40 = vpop.eup %19243  ;;  %v14867_v6 = vadd.f32 1e-05, %v14803_v3 }
 0xa7e   : > { %v14704_v44 = vpop.xlane.xlu1 %14703  ;;  %v14990_v10 = vmul.f32 %v19244_v40, %v23545_v59 }
 0xa7f   : > { %v14802_v30 = vmul.f32 0.0625, %v14704_v44  ;;  %19249 = vrsqrt.f32 %v14867_v6 }
 0xa80   : > { %18677 = vmatprep.mubr.msk.f32.mxu1 %vm1081_vm0, %v14990_v10 }
 0xa81   : > { %v14866_v7 = vadd.f32 1e-05, %v14802_v30  ;;  %18678 = vmatmul.mubr.msk.f32.gmra.mrb[14].mxu1 %vm1081_vm0, %v14991_v39  ;;  %v19246_v48 = vpop.eup %19245 }
 0xa82   : > { %v14713_v29 = vpop.xlane.xlu0 %14712  ;;  %v14993_v59 = vmul.f32 %v19246_v48, %v23551_v43 }
 0xa83   : > { %19251 = vrsqrt.f32 %v14866_v7  ;;  %v14805_v25 = vmul.f32 0.0625, %v14713_v29 }
 0xa85   : > { %v19248_v34 = vpop.eup %19247  ;;  %v14869_v56 = vadd.f32 1e-05, %v14805_v25 }
 0xa86   : > { %v14710_v11 = vpop.xlane.xlu1 %14709  ;;  %v14992_v36 = vmul.f32 %v19248_v34, %v23557_v46 }
 0xa87   : > { %v14804_v52 = vmul.f32 0.0625, %v14710_v11  ;;  %19253 = vrsqrt.f32 %v14869_v56 }
 0xa88   : > { %18680 = vmatprep.mubr.msk.f32.mxu1 %vm1081_vm0, %v14992_v36 }
 0xa89   : > { %v14868_v41 = vadd.f32 1e-05, %v14804_v52  ;;  %18681 = vmatmul.mubr.msk.f32.gmra.mrb[16].mxu1 %vm1081_vm0, %v14993_v59  ;;  %v19250_v62 = vpop.eup %19249 }
 0xa8a   : > { %v14719_v31 = vpop.xlane.xlu0 %14718  ;;  %v14995_v46 = vmul.f32 %v19250_v62, %v23563_v63 }
 0xa8b   : > { %19255 = vrsqrt.f32 %v14868_v41  ;;  %v14807_v19 = vmul.f32 0.0625, %v14719_v31 }
 0xa8d   : > { %v19252_v35 = vpop.eup %19251  ;;  %v14871_v42 = vadd.f32 1e-05, %v14807_v19 }
 0xa8e   : > { %v14716_v49 = vpop.xlane.xlu1 %14715  ;;  %v14994_v5 = vmul.f32 %v19252_v35, %v23569_v13  ;;  %v16112_v13 = vld [vmem:[%s24057_s13 + $0x8] sm:$0xff] }
 0xa8f   : > { %v14806_v23 = vmul.f32 0.0625, %v14716_v49  ;;  %19257 = vrsqrt.f32 %v14871_v42  ;;  %v18750_v45 = vpack.c.bf16 %v16112_v13, %v16111_v21 }
 0xa90   : > { %18683 = vmatprep.mubr.msk.f32.mxu1 %vm1081_vm0, %v14994_v5 }
 0xa91   : > { %v14870_v43 = vadd.f32 1e-05, %v14806_v23  ;;  %18684 = vmatmul.mubr.msk.f32.gmra.mrb[18].mxu1 %vm1081_vm0, %v14995_v46  ;;  %v19254_v51 = vpop.eup %19253  ;;  %18751 = vmatprep.subr.bf16.mxu0 %v18750_v45 }
 0xa92   : > { %v14725_v0 = vpop.xlane.xlu0 %14724  ;;  %v14997_v61 = vmul.f32 %v19254_v51, %v23575_v2  ;;  %18753 = vmatpush3.bf16.msra.mxu0 %v18750_v45 }
 0xa93   : > { %19259 = vrsqrt.f32 %v14870_v43  ;;  %v14809_v37 = vmul.f32 0.0625, %v14725_v0  ;;  %18755 = vmatprep.subr.bf16.mxu0 %v18754_v15 }
 0xa95   : > { %v19256_v63 = vpop.eup %19255  ;;  %v14873_v18 = vadd.f32 1e-05, %v14809_v37 }
 0xa96   : > { %v14722_v33 = vpop.xlane.xlu1 %14721  ;;  %v14996_v57 = vmul.f32 %v19256_v63, %v23581_v28  ;;  %18757 = vmatpush3.bf16.msra.mxu0 %v18754_v15 }
 0xa97   : > { %v14808_v38 = vmul.f32 0.0625, %v14722_v33  ;;  %19261 = vrsqrt.f32 %v14873_v18 }
 0xa98   : > { %18686 = vmatprep.mubr.msk.f32.mxu1 %vm1081_vm0, %v14996_v57 }
 0xa99   : > { %v14872_v60 = vadd.f32 1e-05, %v14808_v38  ;;  %18687 = vmatmul.mubr.msk.f32.gmra.mrb[20].mxu1 %vm1081_vm0, %v14997_v61  ;;  %v19258_v54 = vpop.eup %19257  ;;  %v23810_v38 = vld [vmem:[%s24056_s12] ss:$0 sm:$0xff] }
 0xa9a   : > { %v14731_v28 = vpop.xlane.xlu0 %14730  ;;  %v14999_v50 = vmul.f32 %v19258_v54, %v23587_v24 }
 0xa9b   : > { %19263 = vrsqrt.f32 %v14872_v60  ;;  %v14811_v2 = vmul.f32 0.0625, %v14731_v28 }
 0xa9d   : > { %v19260_v8 = vpop.eup %19259  ;;  %v14875_v1 = vadd.f32 1e-05, %v14811_v2 }
 0xa9e   : > { %v14728_v55 = vpop.xlane.xlu1 %14727  ;;  %v14998_v3 = vmul.f32 %v19260_v8, %v23596_v16 }
 0xa9f   : > { %v14810_v40 = vmul.f32 0.0625, %v14728_v55  ;;  %19265 = vrsqrt.f32 %v14875_v1 }
 0xaa0   : > { %18689 = vmatprep.mubr.msk.f32.mxu1 %vm1081_vm0, %v14998_v3 }
 0xaa1   : > { %v14874_v6 = vadd.f32 1e-05, %v14810_v40  ;;  %18690 = vmatmul.mubr.msk.f32.gmra.mrb[22].mxu1 %vm1081_vm0, %v14999_v50  ;;  %v19262_v39 = vpop.eup %19261 }
 0xaa2   : > { %v14737_v44 = vpop.xlane.xlu0 %14736  ;;  %v15001_v16 = vmul.f32 %v19262_v39, %v23603_v47 }
 0xaa3   : > { %19267 = vrsqrt.f32 %v14874_v6  ;;  %v14813_v10 = vmul.f32 0.0625, %v14737_v44 }
 0xaa5   : > { %v19264_v30 = vpop.eup %19263  ;;  %v14877_v7 = vadd.f32 1e-05, %v14813_v10 }
 0xaa6   : > { %v14734_v29 = vpop.xlane.xlu1 %14733  ;;  %v15000_v25 = vmul.f32 %v19264_v30, %v23612_v53 }
 0xaa7   : > { %v14812_v48 = vmul.f32 0.0625, %v14734_v29  ;;  %19269 = vrsqrt.f32 %v14877_v7 }
 0xaa8   : > { %18692 = vmatprep.mubr.msk.f32.mxu1 %vm1081_vm0, %v15000_v25 }
 0xaa9   : > { %v14876_v24 = vadd.f32 1e-05, %v14812_v48  ;;  %18693 = vmatmul.mubr.msk.f32.gmra.mrb[24].mxu1 %vm1081_vm0, %v15001_v16  ;;  %v19266_v11 = vpop.eup %19265 }
 0xaaa   : > { %v14743_v34 = vpop.xlane.xlu0 %14742  ;;  %v15003_v53 = vmul.f32 %v19266_v11, %v23619_v14 }
 0xaab   : > { %19271 = vrsqrt.f32 %v14876_v24  ;;  %v14815_v56 = vmul.f32 0.0625, %v14743_v34 }
 0xaad   : > { %v19268_v36 = vpop.eup %19267  ;;  %v14879_v59 = vadd.f32 1e-05, %v14815_v56 }
 0xaae   : > { %v14740_v52 = vpop.xlane.xlu1 %14739  ;;  %v15002_v41 = vmul.f32 %v19268_v36, %v23628_v17 }
 0xaaf   : > { %v14814_v31 = vmul.f32 0.0625, %v14740_v52  ;;  %19273 = vrsqrt.f32 %v14879_v59 }
 0xab0   : > { %18695 = vmatprep.mubr.msk.f32.mxu1 %vm1081_vm0, %v15002_v41 }
 0xab1   : > { %v14878_v47 = vadd.f32 1e-05, %v14814_v31  ;;  %18696 = vmatmul.mubr.msk.f32.gmra.mrb[26].mxu1 %vm1081_vm0, %v15003_v53  ;;  %v19270_v35 = vpop.eup %19269 }
 0xab2   : > { %v14749_v19 = vpop.xlane.xlu0 %14748  ;;  %v15005_v17 = vmul.f32 %v19270_v35, %v23635_v32 }
 0xab3   : > { %19275 = vrsqrt.f32 %v14878_v47  ;;  %v14817_v62 = vmul.f32 0.0625, %v14749_v19 }
 0xab5   : > { %v19272_v42 = vpop.eup %19271  ;;  %v14881_v49 = vadd.f32 1e-05, %v14817_v62 }
 0xab6   : > { %v14746_v5 = vpop.xlane.xlu1 %14745  ;;  %v15004_v46 = vmul.f32 %v19272_v42, %v23644_v27 }
 0xab7   : > { %v14816_v23 = vmul.f32 0.0625, %v14746_v5  ;;  %19277 = vrsqrt.f32 %v14881_v49 }
 0xab8   : > { %18698 = vmatprep.mubr.msk.f32.mxu1 %vm1081_vm0, %v15004_v46 }
 0xab9   : > { %v14880_v14 = vadd.f32 1e-05, %v14816_v23  ;;  %18699 = vmatmul.mubr.msk.f32.gmra.mrb[28].mxu1 %vm1081_vm0, %v15005_v17  ;;  %v19274_v37 = vpop.eup %19273 }
 0xaba   : > { %v14755_v43 = vpop.xlane.xlu0 %14754  ;;  %v15007_v27 = vmul.f32 %v19274_v37, %v23651_v26 }
 0xabb   : > { %19279 = vrsqrt.f32 %v14880_v14  ;;  %v14819_v0 = vmul.f32 0.0625, %v14755_v43 }
 0xabd   : > { %v19276_v51 = vpop.eup %19275  ;;  %v14883_v21 = vadd.f32 1e-05, %v14819_v0 }
 0xabe   : > { %v14752_v13 = vpop.xlane.xlu1 %14751  ;;  %v15006_v63 = vmul.f32 %v19276_v51, %v23660_v58 }
 0xabf   : > { %v14818_v45 = vmul.f32 0.0625, %v14752_v13  ;;  %19281 = vrsqrt.f32 %v14883_v21 }
 0xac0   : > { %18701 = vmatprep.mubr.msk.f32.mxu1 %vm1081_vm0, %v15006_v63 }
 0xac1   : > { %v14882_v32 = vadd.f32 1e-05, %v14818_v45  ;;  %18702 = vmatmul.mubr.msk.f32.gmra.mrb[30].mxu1 %vm1081_vm0, %v15007_v27  ;;  %v19278_v18 = vpop.eup %19277 }
 0xac2   : > { %v15009_v61 = vmul.f32 %v19278_v18, %v23667_v9 }
 0xac3   : > { %19283 = vrsqrt.f32 %v14882_v32 }
 0xac5   : > { %v19280_v33 = vpop.eup %19279 }
 0xac6   : > { %v15008_v57 = vmul.f32 %v19280_v33, %v23676_v22 }
 0xac8   : > { %18704 = vmatprep.mubr.msk.f32.mxu1 %vm1081_vm0, %v15008_v57 }
 0xac9   : > { %18705 = vmatmul.mubr.msk.f32.gmra.mrb[32].mxu1 %vm1081_vm0, %v15009_v61  ;;  %v19282_v58 = vpop.eup %19281 }
 0xaca   : > { %v15011_v60 = vmul.f32 %v19282_v58, %v24423_v4 }
 0xacd   : > { %v19284_v26 = vpop.eup %19283 }
 0xace   : > { %v15010_v12 = vmul.f32 %v19284_v26, %v23692_v20 }
 0xad0   : > { %v18616_v15 = vpop.f32.mrb[228].mxu1  ;;  %18707 = vmatprep.mubr.msk.f32.mxu1 %vm1081_vm0, %v15010_v12 }
 0xad1   : > { %v15285_v22 = vadd.f32 %v18616_v15, %v23810_v38  ;;  %v15279_v28 = vpop.f32.mrb[229].mxu1  ;;  %18708 = vmatmul.mubr.msk.f32.gmra.mrb[34].mxu1 %vm1081_vm0, %v15011_v60 }
 0xad2   : > { %v15280_v9 = vadd.f32 %v23810_v38, %v15279_v28 }
 0xad3   : > { %v15599_v2 = vmax.f32 %v15285_v22, 0.0 }
 0xad4   : > { %v15598_v54 = vmax.f32 %v15280_v9, 0.0 }
 0xad5   : > { %v15670_v8 = vsel %vm15662_vm3, %v15599_v2, 0.0 }
 0xad6   : > { %v15671_v1 = vrot.slane %v15670_v8, 4  ;;  %v15663_v20 = vsel %vm15662_vm3, %v15598_v54, 0.0 }
 0xad7   : > { %v15664_v55 = vrot.slane %v15663_v20, 4 }
 0xad8   : > { %v15672_v3 = vadd.f32 %v15671_v1, %v15670_v8  ;;  %v18619_v50 = vpop.f32.mrb[230].mxu1 }
 0xad9   : > { %v15665_v40 = vadd.f32 %v15664_v55, %v15663_v20  ;;  %v15295_v6 = vadd.f32 %v18619_v50, %v23810_v38  ;;  %v15289_v44 = vpop.f32.mrb[231].mxu1 }
 0xada   : > { %v15673_v10 = vrot.slane %v15672_v3, 2  ;;  %v15290_v39 = vadd.f32 %v23810_v38, %v15289_v44 }
 0xadb   : > { %v15666_v30 = vrot.slane %v15665_v40, 2  ;;  %v15601_v7 = vmax.f32 %v15295_v6, 0.0 }
 0xadc   : > { %v15674_v29 = vadd.f32 %v15673_v10, %v15672_v3  ;;  %v15600_v25 = vmax.f32 %v15290_v39, 0.0 }
 0xadd   : > { %v15667_v16 = vadd.f32 %v15666_v30, %v15665_v40  ;;  %v15684_v48 = vsel %vm15662_vm3, %v15601_v7, 0.0 }
 0xade   : > { %v15675_v24 = vrot.slane %v15674_v29, 1  ;;  %v15685_v34 = vrot.slane %v15684_v48, 4  ;;  %v15677_v56 = vsel %vm15662_vm3, %v15600_v25, 0.0 }
 0xadf   : > { %v15668_v11 = vrot.slane %v15667_v16, 1  ;;  %v15678_v36 = vrot.slane %v15677_v56, 4 }
 0xae0   : > { %v15676_v59 = vadd.f32 %v15675_v24, %v15674_v29  ;;  %v15686_v52 = vadd.f32 %v15685_v34, %v15684_v48  ;;  %v18622_v41 = vpop.f32.mrb[232].mxu1 }
 0xae1   : > { %v15669_v53 = vadd.f32 %v15668_v11, %v15667_v16  ;;  %v15679_v31 = vadd.f32 %v15678_v36, %v15677_v56  ;;  %v15305_v47 = vadd.f32 %v18622_v41, %v23810_v38  ;;  %v15299_v19 = vpop.f32.mrb[233].mxu1 }
 0xae2   : > { %v15687_v62 = vrot.slane %v15686_v52, 2  ;;  %v15300_v35 = vadd.f32 %v23810_v38, %v15299_v19 }
 0xae3   : > { %v16187_v42 = vsel %vm16186_vm4, %v15676_v59, %v15669_v53  ;;  %v15680_v49 = vrot.slane %v15679_v31, 2  ;;  %v15603_v5 = vmax.f32 %v15305_v47, 0.0 }
 0xae4   : > { %v15688_v46 = vadd.f32 %v15687_v62, %v15686_v52  ;;  %v15602_v17 = vmax.f32 %v15300_v35, 0.0 }
 0xae5   : > { %v15681_v23 = vadd.f32 %v15680_v49, %v15679_v31  ;;  %v15698_v14 = vsel %vm15662_vm3, %v15603_v5, 0.0 }
 0xae6   : > { %v15689_v43 = vrot.slane %v15688_v46, 1  ;;  %v15699_v0 = vrot.slane %v15698_v14, 4  ;;  %v15691_v37 = vsel %vm15662_vm3, %v15602_v17, 0.0 }
 0xae7   : > { %v15682_v51 = vrot.slane %v15681_v23, 1  ;;  %v15692_v21 = vrot.slane %v15691_v37, 4 }
 0xae8   : > { %v15700_v13 = vadd.f32 %v15699_v0, %v15698_v14  ;;  %v18625_v63 = vpop.f32.mrb[234].mxu1  ;;  %v15690_v33 = vadd.f32 %v15689_v43, %v15688_v46 }
 0xae9   : > { %v15683_v27 = vadd.f32 %v15682_v51, %v15681_v23  ;;  %v15693_v45 = vadd.f32 %v15692_v21, %v15691_v37  ;;  %v15315_v32 = vadd.f32 %v18625_v63, %v23810_v38  ;;  %v15309_v18 = vpop.f32.mrb[235].mxu1 }
 0xaea   : > { %v15701_v57 = vrot.slane %v15700_v13, 2  ;;  %v15310_v61 = vadd.f32 %v23810_v38, %v15309_v18 }
 0xaeb   : > { %v16189_v58 = vsel %vm16188_vm5, %v15683_v27, %v16187_v42  ;;  %v15694_v26 = vrot.slane %v15693_v45, 2  ;;  %v15605_v12 = vmax.f32 %v15315_v32, 0.0 }
 0xaec   : > { %v15702_v4 = vadd.f32 %v15701_v57, %v15700_v13  ;;  %v15604_v60 = vmax.f32 %v15310_v61, 0.0  ;;  %v16191_v15 = vsel %vm16190_vm6, %v15690_v33, %v16189_v58 }
 0xaed   : > { %v15695_v22 = vadd.f32 %v15694_v26, %v15693_v45  ;;  %v15712_v28 = vsel %vm15662_vm3, %v15605_v12, 0.0 }
 0xaee   : > { %v15703_v9 = vrot.slane %v15702_v4, 1  ;;  %v15713_v2 = vrot.slane %v15712_v28, 4  ;;  %v15705_v54 = vsel %vm15662_vm3, %v15604_v60, 0.0 }
 0xaef   : > { %v15696_v8 = vrot.slane %v15695_v22, 1  ;;  %v15706_v1 = vrot.slane %v15705_v54, 4 }
 0xaf0   : > { %v15714_v20 = vadd.f32 %v15713_v2, %v15712_v28  ;;  %v18628_v55 = vpop.f32.mrb[236].mxu1  ;;  %v15704_v44 = vadd.f32 %v15703_v9, %v15702_v4 }
 0xaf1   : > { %v15697_v3 = vadd.f32 %v15696_v8, %v15695_v22  ;;  %v15707_v50 = vadd.f32 %v15706_v1, %v15705_v54  ;;  %v15325_v40 = vadd.f32 %v18628_v55, %v23810_v38  ;;  %v15319_v6 = vpop.f32.mrb[237].mxu1 }
 0xaf2   : > { %v15715_v10 = vrot.slane %v15714_v20, 2  ;;  %v15320_v39 = vadd.f32 %v23810_v38, %v15319_v6 }
 0xaf3   : > { %v15708_v30 = vrot.slane %v15707_v50, 2  ;;  %v15607_v7 = vmax.f32 %v15325_v40, 0.0  ;;  %v16193_v29 = vsel %vm16192_vm7, %v15697_v3, %v16191_v15 }
 0xaf4   : > { %v15716_v25 = vadd.f32 %v15715_v10, %v15714_v20  ;;  %v15606_v16 = vmax.f32 %v15320_v39, 0.0  ;;  %v16195_v48 = vsel %vm16194_vm8, %v15704_v44, %v16193_v29 }
 0xaf5   : > { %v15709_v24 = vadd.f32 %v15708_v30, %v15707_v50  ;;  %v15726_v34 = vsel %vm15662_vm3, %v15607_v7, 0.0 }
 0xaf6   : > { %v15717_v56 = vrot.slane %v15716_v25, 1  ;;  %v15727_v11 = vrot.slane %v15726_v34, 4  ;;  %v15719_v36 = vsel %vm15662_vm3, %v15606_v16, 0.0 }
 0xaf7   : > { %v15710_v59 = vrot.slane %v15709_v24, 1  ;;  %v15720_v52 = vrot.slane %v15719_v36, 4 }
 0xaf8   : > { %v15728_v41 = vadd.f32 %v15727_v11, %v15726_v34  ;;  %v18631_v53 = vpop.f32.mrb[238].mxu1  ;;  %v15718_v49 = vadd.f32 %v15717_v56, %v15716_v25 }
 0xaf9   : > { %v15711_v31 = vadd.f32 %v15710_v59, %v15709_v24  ;;  %v15721_v47 = vadd.f32 %v15720_v52, %v15719_v36  ;;  %v15335_v19 = vadd.f32 %v18631_v53, %v23810_v38  ;;  %v15329_v62 = vpop.f32.mrb[239].mxu1 }
 0xafa   : > { %v15729_v35 = vrot.slane %v15728_v41, 2  ;;  %v15330_v42 = vadd.f32 %v23810_v38, %v15329_v62 }
 0xafb   : > { %v15722_v5 = vrot.slane %v15721_v47, 2  ;;  %v15609_v46 = vmax.f32 %v15335_v19, 0.0  ;;  %v16197_v17 = vsel %vm16196_vm9, %v15711_v31, %v16195_v48 }
 0xafc   : > { %v15730_v23 = vadd.f32 %v15729_v35, %v15728_v41  ;;  %v15608_v14 = vmax.f32 %v15330_v42, 0.0  ;;  %v16199_v43 = vsel %vm16198_vm10, %v15718_v49, %v16197_v17 }
 0xafd   : > { %v15723_v0 = vadd.f32 %v15722_v5, %v15721_v47  ;;  %v15740_v37 = vsel %vm15662_vm3, %v15609_v46, 0.0  ;;  %18718 = vmatprep.mubr.msk.f32.mxu0 %vm15662_vm3, %v16199_v43 }
 0xafe   : > { %v15731_v51 = vrot.slane %v15730_v23, 1  ;;  %v15741_v21 = vrot.slane %v15740_v37, 4  ;;  %v15733_v13 = vsel %vm15662_vm3, %v15608_v14, 0.0 }
 0xaff   : > { %v15724_v63 = vrot.slane %v15723_v0, 1  ;;  %v15734_v27 = vrot.slane %v15733_v13, 4 }
 0xb00   : > { %v15732_v45 = vadd.f32 %v15731_v51, %v15730_v23  ;;  %v15742_v32 = vadd.f32 %v15741_v21, %v15740_v37  ;;  %v18634_v18 = vpop.f32.mrb[240].mxu1 }
 0xb01   : > { %v15725_v33 = vadd.f32 %v15724_v63, %v15723_v0  ;;  %v15735_v57 = vadd.f32 %v15734_v27, %v15733_v13  ;;  %v15345_v61 = vadd.f32 %v18634_v18, %v23810_v38  ;;  %v15339_v58 = vpop.f32.mrb[241].mxu1 }
 0xb02   : > { %v15743_v26 = vrot.slane %v15742_v32, 2  ;;  %v15340_v12 = vadd.f32 %v23810_v38, %v15339_v58 }
 0xb03   : > { %v16200_v4 = vsel %vm16186_vm4, %v15732_v45, %v15725_v33  ;;  %v15736_v60 = vrot.slane %v15735_v57, 2  ;;  %v15611_v15 = vmax.f32 %v15345_v61, 0.0 }
 0xb04   : > { %v15744_v22 = vadd.f32 %v15743_v26, %v15742_v32  ;;  %v15610_v28 = vmax.f32 %v15340_v12, 0.0 }
 0xb05   : > { %v15737_v9 = vadd.f32 %v15736_v60, %v15735_v57  ;;  %v15754_v2 = vsel %vm15662_vm3, %v15611_v15, 0.0 }
 0xb06   : > { %v15745_v54 = vrot.slane %v15744_v22, 1  ;;  %v15755_v8 = vrot.slane %v15754_v2, 4  ;;  %v15747_v1 = vsel %vm15662_vm3, %v15610_v28, 0.0 }
 0xb07   : > { %v15738_v20 = vrot.slane %v15737_v9, 1  ;;  %v15748_v55 = vrot.slane %v15747_v1, 4 }
 0xb08   : > { %v15756_v3 = vadd.f32 %v15755_v8, %v15754_v2  ;;  %v18637_v50 = vpop.f32.mrb[242].mxu1  ;;  %v15746_v39 = vadd.f32 %v15745_v54, %v15744_v22 }
 0xb09   : > { %v15739_v40 = vadd.f32 %v15738_v20, %v15737_v9  ;;  %v15749_v6 = vadd.f32 %v15748_v55, %v15747_v1  ;;  %v15355_v44 = vadd.f32 %v18637_v50, %v23810_v38  ;;  %v15349_v10 = vpop.f32.mrb[243].mxu1 }
 0xb0a   : > { %v15757_v30 = vrot.slane %v15756_v3, 2  ;;  %v15350_v7 = vadd.f32 %v23810_v38, %v15349_v10 }
 0xb0b   : > { %v16201_v29 = vsel %vm16188_vm5, %v15739_v40, %v16200_v4  ;;  %v15750_v25 = vrot.slane %v15749_v6, 2  ;;  %v15613_v16 = vmax.f32 %v15355_v44, 0.0 }
 0xb0c   : > { %v15758_v48 = vadd.f32 %v15757_v30, %v15756_v3  ;;  %v16202_v24 = vsel %vm16190_vm6, %v15746_v39, %v16201_v29  ;;  %v15612_v34 = vmax.f32 %v15350_v7, 0.0 }
 0xb0d   : > { %v15751_v56 = vadd.f32 %v15750_v25, %v15749_v6  ;;  %v15768_v11 = vsel %vm15662_vm3, %v15613_v16, 0.0 }
 0xb0e   : > { %v15759_v36 = vrot.slane %v15758_v48, 1  ;;  %v15769_v59 = vrot.slane %v15768_v11, 4  ;;  %v15761_v52 = vsel %vm15662_vm3, %v15612_v34, 0.0 }
 0xb0f   : > { %v15752_v41 = vrot.slane %v15751_v56, 1  ;;  %v15762_v53 = vrot.slane %v15761_v52, 4 }
 0xb10   : > { %v15770_v31 = vadd.f32 %v15769_v59, %v15768_v11  ;;  %v18640_v47 = vpop.f32.mrb[244].mxu1  ;;  %v15760_v49 = vadd.f32 %v15759_v36, %v15758_v48 }
 0xb11   : > { %v15753_v19 = vadd.f32 %v15752_v41, %v15751_v56  ;;  %v15763_v62 = vadd.f32 %v15762_v53, %v15761_v52  ;;  %v15365_v35 = vadd.f32 %v18640_v47, %v23810_v38  ;;  %v15359_v42 = vpop.f32.mrb[245].mxu1 }
 0xb12   : > { %v15771_v5 = vrot.slane %v15770_v31, 2  ;;  %v15360_v46 = vadd.f32 %v23810_v38, %v15359_v42 }
 0xb13   : > { %v16203_v17 = vsel %vm16192_vm7, %v15753_v19, %v16202_v24  ;;  %v15764_v23 = vrot.slane %v15763_v62, 2  ;;  %v15615_v14 = vmax.f32 %v15365_v35, 0.0 }
 0xb14   : > { %v15772_v43 = vadd.f32 %v15771_v5, %v15770_v31  ;;  %v16204_v0 = vsel %vm16194_vm8, %v15760_v49, %v16203_v17  ;;  %v15614_v37 = vmax.f32 %v15360_v46, 0.0 }
 0xb15   : > { %v15765_v51 = vadd.f32 %v15764_v23, %v15763_v62  ;;  %v15782_v21 = vsel %vm15662_vm3, %v15615_v14, 0.0 }
 0xb16   : > { %v15773_v13 = vrot.slane %v15772_v43, 1  ;;  %v15783_v63 = vrot.slane %v15782_v21, 4  ;;  %v15775_v27 = vsel %vm15662_vm3, %v15614_v37, 0.0 }
 0xb17   : > { %v15766_v45 = vrot.slane %v15765_v51, 1  ;;  %v15776_v32 = vrot.slane %v15775_v27, 4 }
 0xb18   : > { %v15784_v18 = vadd.f32 %v15783_v63, %v15782_v21  ;;  %v18643_v33 = vpop.f32.mrb[246].mxu1  ;;  %v15774_v12 = vadd.f32 %v15773_v13, %v15772_v43 }
 0xb19   : > { %v15767_v57 = vadd.f32 %v15766_v45, %v15765_v51  ;;  %v15777_v61 = vadd.f32 %v15776_v32, %v15775_v27  ;;  %v15375_v58 = vadd.f32 %v18643_v33, %v23810_v38  ;;  %v15369_v26 = vpop.f32.mrb[247].mxu1 }
 0xb1a   : > { %v15785_v4 = vrot.slane %v15784_v18, 2  ;;  %v15370_v60 = vadd.f32 %v23810_v38, %v15369_v26 }
 0xb1b   : > { %v16205_v15 = vsel %vm16196_vm9, %v15767_v57, %v16204_v0  ;;  %v15778_v22 = vrot.slane %v15777_v61, 2  ;;  %v15617_v28 = vmax.f32 %v15375_v58, 0.0 }
 0xb1c   : > { %v16206_v9 = vsel %vm16198_vm10, %v15774_v12, %v16205_v15  ;;  %v15786_v2 = vadd.f32 %v15785_v4, %v15784_v18  ;;  %v15616_v54 = vmax.f32 %v15370_v60, 0.0 }
 0xb1d   : > { %v15779_v8 = vadd.f32 %v15778_v22, %v15777_v61  ;;  %v15796_v1 = vsel %vm15662_vm3, %v15617_v28, 0.0  ;;  %18719 = vmatmul.mubr.msk.f32.vlgmr.msra.gmra.mrb[28].mxu0 %vm15662_vm3, %v16206_v9 }
 0xb1e   : > { %v15787_v20 = vrot.slane %v15786_v2, 1  ;;  %v15797_v55 = vrot.slane %v15796_v1, 4  ;;  %v15789_v3 = vsel %vm15662_vm3, %v15616_v54, 0.0 }
 0xb1f   : > { %v15780_v50 = vrot.slane %v15779_v8, 1  ;;  %v15790_v40 = vrot.slane %v15789_v3, 4 }
 0xb20   : > { %v15788_v6 = vadd.f32 %v15787_v20, %v15786_v2  ;;  %v15798_v44 = vadd.f32 %v15797_v55, %v15796_v1  ;;  %v18646_v10 = vpop.f32.mrb[248].mxu1 }
 0xb21   : > { %v15781_v39 = vadd.f32 %v15780_v50, %v15779_v8  ;;  %v15791_v30 = vadd.f32 %v15790_v40, %v15789_v3  ;;  %v15385_v7 = vadd.f32 %v18646_v10, %v23810_v38  ;;  %v15379_v29 = vpop.f32.mrb[249].mxu1 }
 0xb22   : > { %v15799_v25 = vrot.slane %v15798_v44, 2  ;;  %v15380_v16 = vadd.f32 %v23810_v38, %v15379_v29 }
 0xb23   : > { %v16207_v48 = vsel %vm16186_vm4, %v15788_v6, %v15781_v39  ;;  %v15792_v24 = vrot.slane %v15791_v30, 2  ;;  %v15619_v34 = vmax.f32 %v15385_v7, 0.0 }
 0xb24   : > { %v15800_v56 = vadd.f32 %v15799_v25, %v15798_v44  ;;  %v15618_v11 = vmax.f32 %v15380_v16, 0.0 }
 0xb25   : > { %v15793_v36 = vadd.f32 %v15792_v24, %v15791_v30  ;;  %v15810_v59 = vsel %vm15662_vm3, %v15619_v34, 0.0 }
 0xb26   : > { %v15801_v52 = vrot.slane %v15800_v56, 1  ;;  %v15811_v41 = vrot.slane %v15810_v59, 4  ;;  %v15803_v53 = vsel %vm15662_vm3, %v15618_v11, 0.0 }
 0xb27   : > { %v15794_v31 = vrot.slane %v15793_v36, 1  ;;  %v15804_v47 = vrot.slane %v15803_v53, 4 }
 0xb28   : > { %v15812_v19 = vadd.f32 %v15811_v41, %v15810_v59  ;;  %v18649_v62 = vpop.f32.mrb[250].mxu1  ;;  %v15802_v46 = vadd.f32 %v15801_v52, %v15800_v56 }
 0xb29   : > { %v15795_v35 = vadd.f32 %v15794_v31, %v15793_v36  ;;  %v15805_v42 = vadd.f32 %v15804_v47, %v15803_v53  ;;  %v15395_v49 = vadd.f32 %v18649_v62, %v23810_v38  ;;  %v15389_v5 = vpop.f32.mrb[251].mxu1 }
 0xb2a   : > { %v15813_v17 = vrot.slane %v15812_v19, 2  ;;  %v15390_v23 = vadd.f32 %v23810_v38, %v15389_v5 }
 0xb2b   : > { %v16208_v14 = vsel %vm16188_vm5, %v15795_v35, %v16207_v48  ;;  %v15806_v43 = vrot.slane %v15805_v42, 2  ;;  %v15621_v0 = vmax.f32 %v15395_v49, 0.0 }
 0xb2c   : > { %v15814_v37 = vadd.f32 %v15813_v17, %v15812_v19  ;;  %v15620_v51 = vmax.f32 %v15390_v23, 0.0  ;;  %v18652_v21 = vpop.f32.mrb[252].mxu1  ;;  %v16209_v13 = vsel %vm16190_vm6, %v15802_v46, %v16208_v14 }
 0xb2d   : > { %v15807_v63 = vadd.f32 %v15806_v43, %v15805_v42  ;;  %v15824_v27 = vsel %vm15662_vm3, %v15621_v0, 0.0  ;;  %v15405_v45 = vadd.f32 %v18652_v21, %v23810_v38  ;;  %v15399_v32 = vpop.f32.mrb[253].mxu1 }
 0xb2e   : > { %v15815_v18 = vrot.slane %v15814_v37, 1  ;;  %v15825_v33 = vrot.slane %v15824_v27, 4  ;;  %v15817_v57 = vsel %vm15662_vm3, %v15620_v51, 0.0  ;;  %v15400_v61 = vadd.f32 %v23810_v38, %v15399_v32 }
 0xb2f   : > { %v15808_v58 = vrot.slane %v15807_v63, 1  ;;  %v15818_v26 = vrot.slane %v15817_v57, 4  ;;  %v15623_v12 = vmax.f32 %v15405_v45, 0.0 }
 0xb30   : > { %v15816_v4 = vadd.f32 %v15815_v18, %v15814_v37  ;;  %v15826_v60 = vadd.f32 %v15825_v33, %v15824_v27  ;;  %v15622_v15 = vmax.f32 %v15400_v61, 0.0  ;;  %v18655_v22 = vpop.f32.mrb[254].mxu1 }
 0xb31   : > { %v15809_v28 = vadd.f32 %v15808_v58, %v15807_v63  ;;  %v15819_v9 = vadd.f32 %v15818_v26, %v15817_v57  ;;  %v15838_v2 = vsel %vm15662_vm3, %v15623_v12, 0.0  ;;  %v15415_v54 = vadd.f32 %v18655_v22, %v23810_v38  ;;  %v15409_v8 = vpop.f32.mrb[255].mxu1 }
 0xb32   : > { %v15827_v1 = vrot.slane %v15826_v60, 2  ;;  %v15839_v20 = vrot.slane %v15838_v2, 4  ;;  %v15831_v55 = vsel %vm15662_vm3, %v15622_v15, 0.0  ;;  %v15410_v3 = vadd.f32 %v23810_v38, %v15409_v8 }
 0xb33   : > { %v15820_v50 = vrot.slane %v15819_v9, 2  ;;  %v15832_v40 = vrot.slane %v15831_v55, 4  ;;  %v15625_v6 = vmax.f32 %v15415_v54, 0.0  ;;  %v16210_v44 = vsel %vm16192_vm7, %v15809_v28, %v16209_v13 }
 0xb34   : > { %v15828_v10 = vadd.f32 %v15827_v1, %v15826_v60  ;;  %v15840_v39 = vadd.f32 %v15839_v20, %v15838_v2  ;;  %v15624_v30 = vmax.f32 %v15410_v3, 0.0  ;;  %v18658_v7 = vpop.f32.mrb[0].mxu1  ;;  %v23891_v29 = vsel %vm16194_vm8, %v15816_v4, %v16210_v44 }
 0xb35   : > { %v15821_v25 = vadd.f32 %v15820_v50, %v15819_v9  ;;  %v15833_v16 = vadd.f32 %v15832_v40, %v15831_v55  ;;  %v15852_v48 = vsel %vm15662_vm3, %v15625_v6, 0.0  ;;  %v15425_v24 = vadd.f32 %v18658_v7, %v23810_v38  ;;  %v15419_v34 = vpop.f32.mrb[1].mxu1 }
 0xb36   : > { %v15841_v56 = vrot.slane %v15840_v39, 2  ;;  %v15853_v11 = vrot.slane %v15852_v48, 4  ;;  %v15845_v36 = vsel %vm15662_vm3, %v15624_v30, 0.0  ;;  %v15829_v31 = vrot.slane %v15828_v10, 1 }
 0xb37   : > { %v15822_v59 = vrot.slane %v15821_v25, 1  ;;  %v15834_v52 = vrot.slane %v15833_v16, 2  ;;  %v15846_v41 = vrot.slane %v15845_v36, 4  ;;  %v15627_v53 = vmax.f32 %v15425_v24, 0.0 }
 0xb38   : > { %v15842_v47 = vadd.f32 %v15841_v56, %v15840_v39  ;;  %v15854_v19 = vadd.f32 %v15853_v11, %v15852_v48  ;;  %v15420_v62 = vadd.f32 %v23810_v38, %v15419_v34  ;;  %v18661_v35 = vpop.f32.mrb[2].mxu1  ;;  %v15830_v20 = vadd.f32 %v15829_v31, %v15828_v10 }
 0xb39   : > { %v15823_v42 = vadd.f32 %v15822_v59, %v15821_v25  ;;  %v15835_v49 = vadd.f32 %v15834_v52, %v15833_v16  ;;  %v15847_v5 = vadd.f32 %v15846_v41, %v15845_v36  ;;  %v15866_v46 = vsel %vm15662_vm3, %v15627_v53, 0.0  ;;  %v15429_v17 = vpop.f32.mrb[3].mxu1 }
 0xb3a   : > { %v15843_v23 = vrot.slane %v15842_v47, 1  ;;  %v15855_v14 = vrot.slane %v15854_v19, 2  ;;  %v15867_v43 = vrot.slane %v15866_v46, 4  ;;  %v15626_v0 = vmax.f32 %v15420_v62, 0.0 }
 0xb3b   : > { %v15836_v37 = vrot.slane %v15835_v49, 1  ;;  %v15848_v51 = vrot.slane %v15847_v5, 2  ;;  %v15435_v21 = vadd.f32 %v18661_v35, %v23810_v38  ;;  %v15430_v13 = vadd.f32 %v23810_v38, %v15429_v17 }
 0xb3c   : > { %v15844_v63 = vadd.f32 %v15843_v23, %v15842_v47  ;;  %v15856_v27 = vadd.f32 %v15855_v14, %v15854_v19  ;;  %v15868_v45 = vadd.f32 %v15867_v43, %v15866_v46  ;;  %v15859_v32 = vsel %vm15662_vm3, %v15626_v0, 0.0  ;;  %v18664_v18 = vpop.f32.mrb[4].mxu1 }
 0xb3d   : > { %v15837_v33 = vadd.f32 %v15836_v37, %v15835_v49  ;;  %v15849_v57 = vadd.f32 %v15848_v51, %v15847_v5  ;;  %v15860_v61 = vrot.slane %v15859_v32, 4  ;;  %v15629_v58 = vmax.f32 %v15435_v21, 0.0  ;;  %v15439_v26 = vpop.f32.mrb[5].mxu1 }
 0xb3e   : > { %v15857_v12 = vrot.slane %v15856_v27, 1  ;;  %v15869_v4 = vrot.slane %v15868_v45, 2  ;;  %v15628_v60 = vmax.f32 %v15430_v13, 0.0  ;;  %v15445_v15 = vadd.f32 %v18664_v18, %v23810_v38 }
 0xb3f   : > { %v16214_v22 = vsel %vm16186_vm4, %v15844_v63, %v15837_v33  ;;  %v15850_v28 = vrot.slane %v15849_v57, 1  ;;  %v15861_v9 = vadd.f32 %v15860_v61, %v15859_v32  ;;  %v15880_v2 = vsel %vm15662_vm3, %v15629_v58, 0.0 }
 0xb40   : > { %v15870_v54 = vadd.f32 %v15869_v4, %v15868_v45  ;;  %v15881_v8 = vrot.slane %v15880_v2, 4  ;;  %v15873_v1 = vsel %vm15662_vm3, %v15628_v60, 0.0  ;;  %v18667_v55 = vpop.f32.mrb[6].mxu1  ;;  %v15631_v6 = vmax.f32 %v15445_v15, 0.0 }
 0xb41   : > { %v15851_v3 = vadd.f32 %v15850_v28, %v15849_v57  ;;  %v15862_v50 = vrot.slane %v15861_v9, 2  ;;  %v15874_v40 = vrot.slane %v15873_v1, 4  ;;  %v15449_v44 = vpop.f32.mrb[7].mxu1  ;;  %v15858_v39 = vadd.f32 %v15857_v12, %v15856_v27 }
 0xb42   : > { %v15882_v30 = vadd.f32 %v15881_v8, %v15880_v2  ;;  %v15440_v7 = vadd.f32 %v23810_v38, %v15439_v26  ;;  %v16212_v25 = vsel %vm16196_vm9, %v15823_v42, %v23891_v29  ;;  %v15894_v34 = vsel %vm15662_vm3, %v15631_v6, 0.0 }
 0xb43   : > { %v16215_v16 = vsel %vm16188_vm5, %v15851_v3, %v16214_v22  ;;  %v15863_v48 = vadd.f32 %v15862_v50, %v15861_v9  ;;  %v15875_v24 = vadd.f32 %v15874_v40, %v15873_v1  ;;  %v15871_v10 = vrot.slane %v15870_v54, 1 }
 0xb44   : > { %v16216_v56 = vsel %vm16190_vm6, %v15858_v39, %v16215_v16  ;;  %v15883_v11 = vrot.slane %v15882_v30, 2  ;;  %v15895_v36 = vrot.slane %v15894_v34, 4  ;;  %v18670_v59 = vpop.f32.mrb[8].mxu1  ;;  %v15630_v53 = vmax.f32 %v15440_v7, 0.0 }
 0xb45   : > { %v15864_v52 = vrot.slane %v15863_v48, 1  ;;  %v15876_v41 = vrot.slane %v15875_v24, 2  ;;  %v16213_v31 = vsel %vm16198_vm10, %v15830_v20, %v16212_v25  ;;  %v15459_v47 = vpop.f32.mrb[9].mxu1  ;;  %v15455_v62 = vadd.f32 %v18667_v55, %v23810_v38 }
 0xb46   : > { %v15884_v19 = vadd.f32 %v15883_v11, %v15882_v30  ;;  %v15896_v29 = vadd.f32 %v15895_v36, %v15894_v34  ;;  %18721 = vmatprep.mubr.msk.f32.mxu0 %vm15662_vm3, %v16213_v31  ;;  %v15450_v35 = vadd.f32 %v23810_v38, %v15449_v44  ;;  %v15887_v5 = vsel %vm15662_vm3, %v15630_v53, 0.0 }
 0xb47   : > { %v15865_v42 = vadd.f32 %v15864_v52, %v15863_v48  ;;  %v15877_v49 = vadd.f32 %v15876_v41, %v15875_v24  ;;  %v15465_v46 = vadd.f32 %v18670_v59, %v23810_v38  ;;  %v15888_v14 = vrot.slane %v15887_v5, 4 }
 0xb48   : > { %v15885_v17 = vrot.slane %v15884_v19, 1  ;;  %v15897_v23 = vrot.slane %v15896_v29, 2  ;;  %v15633_v43 = vmax.f32 %v15455_v62, 0.0  ;;  %v18673_v0 = vpop.f32.mrb[10].mxu1  ;;  %v23917_v37 = vadd.f32 %v15871_v10, %v15870_v54 }
 0xb49   : > { %v23920_v51 = vsel %vm16192_vm7, %v15865_v42, %v16216_v56  ;;  %v15632_v21 = vmax.f32 %v15450_v35, 0.0  ;;  %v15635_v13 = vmax.f32 %v15465_v46, 0.0  ;;  %v15469_v63 = vpop.f32.mrb[11].mxu1  ;;  %v15878_v27 = vrot.slane %v15877_v49, 1 }
 0xb4a   : > { %v15898_v45 = vadd.f32 %v15897_v23, %v15896_v29  ;;  %v15889_v32 = vadd.f32 %v15888_v14, %v15887_v5  ;;  %v15908_v18 = vsel %vm15662_vm3, %v15633_v43, 0.0  ;;  %v23923_v33 = vadd.f32 %v15885_v17, %v15884_v19 }
 0xb4b   : > { %v15909_v57 = vrot.slane %v15908_v18, 4  ;;  %v15901_v61 = vsel %vm15662_vm3, %v15632_v21, 0.0  ;;  %v15922_v58 = vsel %vm15662_vm3, %v15635_v13, 0.0  ;;  %v15460_v22 = vadd.f32 %v23810_v38, %v15459_v47 }
 0xb4c   : > { %v15899_v26 = vrot.slane %v15898_v45, 1  ;;  %v15890_v12 = vrot.slane %v15889_v32, 2  ;;  %v15902_v4 = vrot.slane %v15901_v61, 4  ;;  %v15923_v60 = vrot.slane %v15922_v58, 4  ;;  %v18676_v2 = vpop.f32.mrb[12].mxu1 }
 0xb4d   : > { %v15910_v15 = vadd.f32 %v15909_v57, %v15908_v18  ;;  %v15475_v28 = vadd.f32 %v18673_v0, %v23810_v38  ;;  %v15470_v9 = vadd.f32 %v23810_v38, %v15469_v63  ;;  %v15479_v55 = vpop.f32.mrb[13].mxu1  ;;  %v15634_v50 = vmax.f32 %v15460_v22, 0.0 }
 0xb4e   : > { %v15900_v54 = vadd.f32 %v15899_v26, %v15898_v45  ;;  %v15891_v8 = vadd.f32 %v15890_v12, %v15889_v32  ;;  %v15903_v1 = vadd.f32 %v15902_v4, %v15901_v61  ;;  %v15924_v20 = vadd.f32 %v15923_v60, %v15922_v58 }
 0xb4f   : > { %v15911_v3 = vrot.slane %v15910_v15, 2  ;;  %v15637_v40 = vmax.f32 %v15475_v28, 0.0  ;;  %v15636_v6 = vmax.f32 %v15470_v9, 0.0  ;;  %v15485_v7 = vadd.f32 %v18676_v2, %v23810_v38 }
 0xb50   : > { %v15892_v44 = vrot.slane %v15891_v8, 1  ;;  %v15904_v39 = vrot.slane %v15903_v1, 2  ;;  %v15925_v30 = vrot.slane %v15924_v20, 2  ;;  %v15915_v16 = vsel %vm15662_vm3, %v15634_v50, 0.0 }
 0xb51   : > { %v15912_v25 = vadd.f32 %v15911_v3, %v15910_v15  ;;  %v15936_v48 = vsel %vm15662_vm3, %v15637_v40, 0.0  ;;  %v15929_v24 = vsel %vm15662_vm3, %v15636_v6, 0.0  ;;  %v15916_v11 = vrot.slane %v15915_v16, 4 }
 0xb52   : > { %v15893_v34 = vadd.f32 %v15892_v44, %v15891_v8  ;;  %v15905_v10 = vadd.f32 %v15904_v39, %v15903_v1  ;;  %v15926_v56 = vadd.f32 %v15925_v30, %v15924_v20  ;;  %v15937_v59 = vrot.slane %v15936_v48, 4 }
 0xb53   : > { %v15913_v36 = vrot.slane %v15912_v25, 1  ;;  %v15930_v52 = vrot.slane %v15929_v24, 4  ;;  %v15639_v41 = vmax.f32 %v15485_v7, 0.0  ;;  %v15879_v53 = vadd.f32 %v15878_v27, %v15877_v49 }
 0xb54   : > { %v16221_v31 = vsel %vm16186_vm4, %v15900_v54, %v15893_v34  ;;  %v15906_v47 = vrot.slane %v15905_v10, 1  ;;  %v15917_v19 = vadd.f32 %v15916_v11, %v15915_v16  ;;  %v15927_v29 = vrot.slane %v15926_v56, 1  ;;  %v18679_v5 = vpop.f32.mrb[14].mxu1 }
 0xb55   : > { %v15938_v62 = vadd.f32 %v15937_v59, %v15936_v48  ;;  %v15931_v35 = vadd.f32 %v15930_v52, %v15929_v24  ;;  %v15950_v42 = vsel %vm15662_vm3, %v15639_v41, 0.0  ;;  %v15914_v46 = vadd.f32 %v15913_v36, %v15912_v25  ;;  %v15489_v43 = vpop.f32.mrb[15].mxu1 }
 0xb56   : > { %v15907_v17 = vadd.f32 %v15906_v47, %v15905_v10  ;;  %v15918_v23 = vrot.slane %v15917_v19, 2  ;;  %v15951_v14 = vrot.slane %v15950_v42, 4  ;;  %v16218_v49 = vsel %vm16194_vm8, %v23917_v37, %v23920_v51 }
 0xb57   : > { %v15939_v0 = vrot.slane %v15938_v62, 2  ;;  %v15932_v21 = vrot.slane %v15931_v35, 2  ;;  %v15480_v13 = vadd.f32 %v23810_v38, %v15479_v55  ;;  %v16219_v32 = vsel %vm16196_vm9, %v15879_v53, %v16218_v49 }
 0xb58   : > { %v16222_v63 = vsel %vm16188_vm5, %v15907_v17, %v16221_v31  ;;  %v15919_v27 = vadd.f32 %v15918_v23, %v15917_v19  ;;  %v15952_v45 = vadd.f32 %v15951_v14, %v15950_v42  ;;  %v16220_v61 = vsel %vm16198_vm10, %v23923_v33, %v16219_v32 }
 0xb59   : > { %v15940_v18 = vadd.f32 %v15939_v0, %v15938_v62  ;;  %v15933_v57 = vadd.f32 %v15932_v21, %v15931_v35  ;;  %v15638_v58 = vmax.f32 %v15480_v13, 0.0  ;;  %18722 = vmatmul.mubr.msk.f32.gmra.mrb[30].mxu0 %vm15662_vm3, %v16220_v61  ;;  %v15495_v37 = vadd.f32 %v18679_v5, %v23810_v38 }
 0xb5a   : > { %v15920_v26 = vrot.slane %v15919_v27, 1  ;;  %v15953_v12 = vrot.slane %v15952_v45, 2  ;;  %v15490_v51 = vadd.f32 %v23810_v38, %v15489_v43  ;;  %v16223_v15 = vsel %vm16190_vm6, %v15914_v46, %v16222_v63 }
 0xb5b   : > { %v15934_v4 = vrot.slane %v15933_v57, 1  ;;  %v15943_v60 = vsel %vm15662_vm3, %v15638_v58, 0.0  ;;  %v15641_v2 = vmax.f32 %v15495_v37, 0.0  ;;  %v15928_v54 = vadd.f32 %v15927_v29, %v15926_v56 }
 0xb5c   : > { %v15921_v22 = vadd.f32 %v15920_v26, %v15919_v27  ;;  %v15954_v28 = vadd.f32 %v15953_v12, %v15952_v45  ;;  %v15944_v9 = vrot.slane %v15943_v60, 4  ;;  %v15941_v33 = vrot.slane %v15940_v18, 1  ;;  %v18682_v1 = vpop.f32.mrb[16].mxu1 }
 0xb5d   : > { %v15640_v8 = vmax.f32 %v15490_v51, 0.0  ;;  %v15935_v20 = vadd.f32 %v15934_v4, %v15933_v57  ;;  %v15964_v3 = vsel %vm15662_vm3, %v15641_v2, 0.0  ;;  %v15505_v50 = vadd.f32 %v18682_v1, %v23810_v38  ;;  %v15499_v40 = vpop.f32.mrb[17].mxu1 }
 0xb5e   : > { %v15945_v55 = vadd.f32 %v15944_v9, %v15943_v60  ;;  %v15965_v6 = vrot.slane %v15964_v3, 4  ;;  %v16224_v39 = vsel %vm16192_vm7, %v15921_v22, %v16223_v15  ;;  %v15500_v30 = vadd.f32 %v23810_v38, %v15499_v40 }
 0xb5f   : > { %v15957_v44 = vsel %vm15662_vm3, %v15640_v8, 0.0  ;;  %v15955_v7 = vrot.slane %v15954_v28, 1  ;;  %v15643_v48 = vmax.f32 %v15505_v50, 0.0  ;;  %v15942_v34 = vadd.f32 %v15941_v33, %v15940_v18  ;;  %v23970_v33 = vld [vmem:[%s24056_s12] ss:$0 sm:$0xff] }
 0xb60   : > { %v15946_v25 = vrot.slane %v15945_v55, 2  ;;  %v15958_v16 = vrot.slane %v15957_v44, 4  ;;  %v15966_v24 = vadd.f32 %v15965_v6, %v15964_v3  ;;  %v16225_v10 = vsel %vm16194_vm8, %v15928_v54, %v16224_v39 }
 0xb61   : > { %v15642_v56 = vmax.f32 %v15500_v30, 0.0  ;;  %v15978_v59 = vsel %vm15662_vm3, %v15643_v48, 0.0  ;;  %v16226_v52 = vsel %vm16196_vm9, %v15935_v20, %v16225_v10  ;;  %v15956_v19 = vadd.f32 %v15955_v7, %v15954_v28 }
 0xb62   : > { %v15947_v11 = vadd.f32 %v15946_v25, %v15945_v55  ;;  %v15959_v36 = vadd.f32 %v15958_v16, %v15957_v44  ;;  %v15967_v41 = vrot.slane %v15966_v24, 2  ;;  %v15979_v53 = vrot.slane %v15978_v59, 4 }
 0xb63   : > { %v16227_v31 = vsel %vm16198_vm10, %v15942_v34, %v16226_v52  ;;  %v15971_v47 = vsel %vm15662_vm3, %v15642_v56, 0.0 }
 0xb64   : > { %v15948_v29 = vrot.slane %v15947_v11, 1  ;;  %v15960_v62 = vrot.slane %v15959_v36, 2  ;;  %18724 = vmatprep.mubr.msk.f32.mxu0 %vm15662_vm3, %v16227_v31  ;;  %v15972_v35 = vrot.slane %v15971_v47, 4  ;;  %v15968_v42 = vadd.f32 %v15967_v41, %v15966_v24  ;;  %v18685_v46 = vpop.f32.mrb[18].mxu1 }
 0xb65   : > { %v15980_v5 = vadd.f32 %v15979_v53, %v15978_v59  ;;  %v15515_v43 = vadd.f32 %v18685_v46, %v23810_v38  ;;  %v15509_v0 = vpop.f32.mrb[19].mxu1 }
 0xb66   : > { %v15949_v17 = vadd.f32 %v15948_v29, %v15947_v11  ;;  %v15961_v23 = vadd.f32 %v15960_v62, %v15959_v36  ;;  %v15973_v14 = vadd.f32 %v15972_v35, %v15971_v47  ;;  %v15969_v21 = vrot.slane %v15968_v42, 1 }
 0xb67   : > { %v15981_v49 = vrot.slane %v15980_v5, 2  ;;  %v15510_v13 = vadd.f32 %v23810_v38, %v15509_v0  ;;  %v15645_v32 = vmax.f32 %v15515_v43, 0.0 }
 0xb68   : > { %v16228_v63 = vsel %vm16186_vm4, %v15956_v19, %v15949_v17  ;;  %v15962_v27 = vrot.slane %v15961_v23, 1  ;;  %v15974_v45 = vrot.slane %v15973_v14, 2  ;;  %v15970_v12 = vadd.f32 %v15969_v21, %v15968_v42 }
 0xb69   : > { %v15982_v18 = vadd.f32 %v15981_v49, %v15980_v5  ;;  %v15644_v57 = vmax.f32 %v15510_v13, 0.0  ;;  %v15992_v26 = vsel %vm15662_vm3, %v15645_v32, 0.0 }
 0xb6a   : > { %v15963_v61 = vadd.f32 %v15962_v27, %v15961_v23  ;;  %v15975_v58 = vadd.f32 %v15974_v45, %v15973_v14  ;;  %v15993_v51 = vrot.slane %v15992_v26, 4 }
 0xb6b   : > { %v15983_v37 = vrot.slane %v15982_v18, 1  ;;  %v15985_v4 = vsel %vm15662_vm3, %v15644_v57, 0.0 }
 0xb6c   : > { %v16229_v60 = vsel %vm16188_vm5, %v15963_v61, %v16228_v63  ;;  %v15976_v15 = vrot.slane %v15975_v58, 1  ;;  %v15986_v38 = vrot.slane %v15985_v4, 4  ;;  %v15994_v28 = vadd.f32 %v15993_v51, %v15992_v26  ;;  %v18688_v9 = vpop.f32.mrb[20].mxu1 }
 0xb6d   : > { %v16230_v22 = vsel %vm16190_vm6, %v15970_v12, %v16229_v60  ;;  %v15525_v8 = vadd.f32 %v23970_v33, %v18688_v9  ;;  %v15519_v1 = vpop.f32.mrb[21].mxu1  ;;  %v15984_v20 = vadd.f32 %v15983_v37, %v15982_v18 }
 0xb6e   : > { %v15977_v2 = vadd.f32 %v15976_v15, %v15975_v58  ;;  %v15987_v54 = vadd.f32 %v15986_v38, %v15985_v4  ;;  %v15995_v55 = vrot.slane %v15994_v28, 2  ;;  %v15520_v3 = vadd.f32 %v23970_v33, %v15519_v1 }
 0xb6f   : > { %v15647_v6 = vmax.f32 %v15525_v8, 0.0 }
 0xb70   : > { %v16231_v50 = vsel %vm16192_vm7, %v15977_v2, %v16230_v22  ;;  %v15988_v40 = vrot.slane %v15987_v54, 2  ;;  %v15996_v44 = vadd.f32 %v15995_v55, %v15994_v28  ;;  %v15646_v39 = vmax.f32 %v15520_v3, 0.0 }
 0xb71   : > { %v16232_v30 = vsel %vm16194_vm8, %v15984_v20, %v16231_v50  ;;  %v16006_v25 = vsel %vm15662_vm3, %v15647_v6, 0.0 }
 0xb72   : > { %v15989_v7 = vadd.f32 %v15988_v40, %v15987_v54  ;;  %v15997_v16 = vrot.slane %v15996_v44, 1  ;;  %v16007_v48 = vrot.slane %v16006_v25, 4  ;;  %v15999_v24 = vsel %vm15662_vm3, %v15646_v39, 0.0 }
 0xb73   : > { %v16000_v10 = vrot.slane %v15999_v24, 4 }
 0xb74   : > { %v15990_v34 = vrot.slane %v15989_v7, 1  ;;  %v16008_v56 = vadd.f32 %v16007_v48, %v16006_v25  ;;  %v18691_v11 = vpop.f32.mrb[22].mxu1  ;;  %v15998_v53 = vadd.f32 %v15997_v16, %v15996_v44 }
 0xb75   : > { %v16001_v59 = vadd.f32 %v16000_v10, %v15999_v24  ;;  %v15535_v52 = vadd.f32 %v23970_v33, %v18691_v11  ;;  %v15529_v41 = vpop.f32.mrb[23].mxu1 }
 0xb76   : > { %v15991_v36 = vadd.f32 %v15990_v34, %v15989_v7  ;;  %v16009_v31 = vrot.slane %v16008_v56, 2  ;;  %v15530_v47 = vadd.f32 %v23970_v33, %v15529_v41 }
 0xb77   : > { %v16002_v19 = vrot.slane %v16001_v59, 2  ;;  %v15649_v29 = vmax.f32 %v15535_v52, 0.0 }
 0xb78   : > { %v16233_v62 = vsel %vm16196_vm9, %v15991_v36, %v16232_v30  ;;  %v16010_v35 = vadd.f32 %v16009_v31, %v16008_v56  ;;  %v15648_v42 = vmax.f32 %v15530_v47, 0.0 }
 0xb79   : > { %v16234_v5 = vsel %vm16198_vm10, %v15998_v53, %v16233_v62  ;;  %v16003_v46 = vadd.f32 %v16002_v19, %v16001_v59  ;;  %v16020_v17 = vsel %vm15662_vm3, %v15649_v29, 0.0 }
 0xb7a   : > { %18725 = vmatmul.mubr.msk.f32.gmra.mrb[32].mxu0 %vm15662_vm3, %v16234_v5  ;;  %v16011_v23 = vrot.slane %v16010_v35, 1  ;;  %v16021_v14 = vrot.slane %v16020_v17, 4  ;;  %v16013_v43 = vsel %vm15662_vm3, %v15648_v42, 0.0 }
 0xb7b   : > { %v16004_v0 = vrot.slane %v16003_v46, 1  ;;  %v16014_v21 = vrot.slane %v16013_v43, 4 }
 0xb7c   : > { %v16012_v49 = vadd.f32 %v16011_v23, %v16010_v35  ;;  %v16022_v13 = vadd.f32 %v16021_v14, %v16020_v17  ;;  %v18694_v63 = vpop.f32.mrb[24].mxu1 }
 0xb7d   : > { %v16005_v27 = vadd.f32 %v16004_v0, %v16003_v46  ;;  %v16015_v45 = vadd.f32 %v16014_v21, %v16013_v43  ;;  %v15545_v32 = vadd.f32 %v23970_v33, %v18694_v63  ;;  %v15539_v18 = vpop.f32.mrb[25].mxu1 }
 0xb7e   : > { %v16023_v57 = vrot.slane %v16022_v13, 2  ;;  %v15540_v61 = vadd.f32 %v23970_v33, %v15539_v18 }
 0xb7f   : > { %v16235_v58 = vsel %vm16186_vm4, %v16012_v49, %v16005_v27  ;;  %v16016_v26 = vrot.slane %v16015_v45, 2  ;;  %v15651_v12 = vmax.f32 %v15545_v32, 0.0 }
 0xb80   : > { %v16024_v37 = vadd.f32 %v16023_v57, %v16022_v13  ;;  %v15650_v51 = vmax.f32 %v15540_v61, 0.0 }
 0xb81   : > { %v16017_v4 = vadd.f32 %v16016_v26, %v16015_v45  ;;  %v16034_v60 = vsel %vm15662_vm3, %v15651_v12, 0.0 }
 0xb82   : > { %v16025_v15 = vrot.slane %v16024_v37, 1  ;;  %v16035_v38 = vrot.slane %v16034_v60, 4  ;;  %v16027_v22 = vsel %vm15662_vm3, %v15650_v51, 0.0 }
 0xb83   : > { %v16018_v28 = vrot.slane %v16017_v4, 1  ;;  %v16028_v9 = vrot.slane %v16027_v22, 4 }
 0xb84   : > { %v16036_v2 = vadd.f32 %v16035_v38, %v16034_v60  ;;  %v18697_v54 = vpop.f32.mrb[26].mxu1  ;;  %v16026_v3 = vadd.f32 %v16025_v15, %v16024_v37 }
 0xb85   : > { %v16019_v8 = vadd.f32 %v16018_v28, %v16017_v4  ;;  %v16029_v1 = vadd.f32 %v16028_v9, %v16027_v22  ;;  %v15555_v20 = vadd.f32 %v23970_v33, %v18697_v54  ;;  %v15549_v55 = vpop.f32.mrb[27].mxu1 }
 0xb86   : > { %v16037_v50 = vrot.slane %v16036_v2, 2  ;;  %v15550_v40 = vadd.f32 %v23970_v33, %v15549_v55 }
 0xb87   : > { %v16236_v6 = vsel %vm16188_vm5, %v16019_v8, %v16235_v58  ;;  %v16030_v44 = vrot.slane %v16029_v1, 2  ;;  %v15653_v39 = vmax.f32 %v15555_v20, 0.0 }
 0xb88   : > { %v16038_v30 = vadd.f32 %v16037_v50, %v16036_v2  ;;  %v15652_v7 = vmax.f32 %v15550_v40, 0.0  ;;  %v16237_v25 = vsel %vm16190_vm6, %v16026_v3, %v16236_v6 }
 0xb89   : > { %v16031_v16 = vadd.f32 %v16030_v44, %v16029_v1  ;;  %v16048_v48 = vsel %vm15662_vm3, %v15653_v39, 0.0 }
 0xb8a   : > { %v16039_v24 = vrot.slane %v16038_v30, 1  ;;  %v16049_v34 = vrot.slane %v16048_v48, 4  ;;  %v16041_v10 = vsel %vm15662_vm3, %v15652_v7, 0.0 }
 0xb8b   : > { %v16032_v56 = vrot.slane %v16031_v16, 1  ;;  %v16042_v11 = vrot.slane %v16041_v10, 4 }
 0xb8c   : > { %v16050_v36 = vadd.f32 %v16049_v34, %v16048_v48  ;;  %v18700_v59 = vpop.f32.mrb[28].mxu1  ;;  %v16040_v47 = vadd.f32 %v16039_v24, %v16038_v30 }
 0xb8d   : > { %v16033_v52 = vadd.f32 %v16032_v56, %v16031_v16  ;;  %v16043_v41 = vadd.f32 %v16042_v11, %v16041_v10  ;;  %v15565_v53 = vadd.f32 %v23970_v33, %v18700_v59  ;;  %v15559_v31 = vpop.f32.mrb[29].mxu1 }
 0xb8e   : > { %v16051_v19 = vrot.slane %v16050_v36, 2  ;;  %v15560_v29 = vadd.f32 %v23970_v33, %v15559_v31 }
 0xb8f   : > { %v16044_v62 = vrot.slane %v16043_v41, 2  ;;  %v15655_v35 = vmax.f32 %v15565_v53, 0.0  ;;  %v16238_v42 = vsel %vm16192_vm7, %v16033_v52, %v16237_v25 }
 0xb90   : > { %v16052_v5 = vadd.f32 %v16051_v19, %v16050_v36  ;;  %v15654_v46 = vmax.f32 %v15560_v29, 0.0  ;;  %v16239_v17 = vsel %vm16194_vm8, %v16040_v47, %v16238_v42 }
 0xb91   : > { %v16045_v23 = vadd.f32 %v16044_v62, %v16043_v41  ;;  %v16062_v14 = vsel %vm15662_vm3, %v15655_v35, 0.0 }
 0xb92   : > { %v16053_v43 = vrot.slane %v16052_v5, 1  ;;  %v16063_v0 = vrot.slane %v16062_v14, 4  ;;  %v16055_v21 = vsel %vm15662_vm3, %v15654_v46, 0.0 }
 0xb93   : > { %v16046_v49 = vrot.slane %v16045_v23, 1  ;;  %v16056_v13 = vrot.slane %v16055_v21, 4 }
 0xb94   : > { %v16064_v63 = vadd.f32 %v16063_v0, %v16062_v14  ;;  %v18703_v27 = vpop.f32.mrb[30].mxu1  ;;  %v16054_v26 = vadd.f32 %v16053_v43, %v16052_v5 }
 0xb95   : > { %v16047_v45 = vadd.f32 %v16046_v49, %v16045_v23  ;;  %v16057_v32 = vadd.f32 %v16056_v13, %v16055_v21  ;;  %v15575_v18 = vadd.f32 %v23970_v33, %v18703_v27  ;;  %v15569_v57 = vpop.f32.mrb[31].mxu1 }
 0xb96   : > { %v16065_v61 = vrot.slane %v16064_v63, 2  ;;  %v15570_v58 = vadd.f32 %v23970_v33, %v15569_v57 }
 0xb97   : > { %v16058_v12 = vrot.slane %v16057_v32, 2  ;;  %v15657_v37 = vmax.f32 %v15575_v18, 0.0  ;;  %v16240_v51 = vsel %vm16196_vm9, %v16047_v45, %v16239_v17 }
 0xb98   : > { %v16066_v4 = vadd.f32 %v16065_v61, %v16064_v63  ;;  %v15656_v60 = vmax.f32 %v15570_v58, 0.0  ;;  %v16241_v15 = vsel %vm16198_vm10, %v16054_v26, %v16240_v51 }
 0xb99   : > { %v16059_v38 = vadd.f32 %v16058_v12, %v16057_v32  ;;  %v16076_v22 = vsel %vm15662_vm3, %v15657_v37, 0.0  ;;  %18727 = vmatprep.mubr.msk.f32.mxu0 %vm15662_vm3, %v16241_v15 }
 0xb9a   : > { %v16067_v28 = vrot.slane %v16066_v4, 1  ;;  %v16077_v9 = vrot.slane %v16076_v22, 4  ;;  %v16069_v2 = vsel %vm15662_vm3, %v15656_v60, 0.0 }
 0xb9b   : > { %v16060_v54 = vrot.slane %v16059_v38, 1  ;;  %v16070_v8 = vrot.slane %v16069_v2, 4 }
 0xb9c   : > { %v16068_v1 = vadd.f32 %v16067_v28, %v16066_v4  ;;  %v16078_v20 = vadd.f32 %v16077_v9, %v16076_v22  ;;  %v18706_v55 = vpop.f32.mrb[32].mxu1  ;;  %v16961_v28 = vld [vmem:[%s24058_s14] ss:$0 sm:$0xff] }
 0xb9d   : > { %v16061_v3 = vadd.f32 %v16060_v54, %v16059_v38  ;;  %v16071_v50 = vadd.f32 %v16070_v8, %v16069_v2  ;;  %v15585_v40 = vadd.f32 %v23970_v33, %v18706_v55  ;;  %v15579_v6 = vpop.f32.mrb[33].mxu1 }
 0xb9e   : > { %v16079_v44 = vrot.slane %v16078_v20, 2  ;;  %v15580_v39 = vadd.f32 %v23970_v33, %v15579_v6 }
 0xb9f   : > { %v16242_v30 = vsel %vm16186_vm4, %v16068_v1, %v16061_v3  ;;  %v16072_v7 = vrot.slane %v16071_v50, 2  ;;  %v15659_v25 = vmax.f32 %v15585_v40, 0.0 }
 0xba0   : > { %v16080_v16 = vadd.f32 %v16079_v44, %v16078_v20  ;;  %v15658_v48 = vmax.f32 %v15580_v39, 0.0 }
 0xba1   : > { %v16073_v24 = vadd.f32 %v16072_v7, %v16071_v50  ;;  %v16090_v34 = vsel %vm15662_vm3, %v15659_v25, 0.0 }
 0xba2   : > { %v16081_v10 = vrot.slane %v16080_v16, 1  ;;  %v16091_v56 = vrot.slane %v16090_v34, 4  ;;  %v16083_v11 = vsel %vm15662_vm3, %v15658_v48, 0.0 }
 0xba3   : > { %v16074_v36 = vrot.slane %v16073_v24, 1  ;;  %v16084_v59 = vrot.slane %v16083_v11, 4 }
 0xba4   : > { %v16092_v52 = vadd.f32 %v16091_v56, %v16090_v34  ;;  %v18709_v41 = vpop.f32.mrb[34].mxu1  ;;  %v16082_v29 = vadd.f32 %v16081_v10, %v16080_v16 }
 0xba5   : > { %v16075_v53 = vadd.f32 %v16074_v36, %v16073_v24  ;;  %v16085_v31 = vadd.f32 %v16084_v59, %v16083_v11  ;;  %v15595_v47 = vadd.f32 %v23970_v33, %v18709_v41  ;;  %v15589_v19 = vpop.f32.mrb[35].mxu1 }
 0xba6   : > { %v16093_v62 = vrot.slane %v16092_v52, 2  ;;  %v15590_v35 = vadd.f32 %v23970_v33, %v15589_v19 }
 0xba7   : > { %v16243_v42 = vsel %vm16188_vm5, %v16075_v53, %v16242_v30  ;;  %v16086_v5 = vrot.slane %v16085_v31, 2  ;;  %v15661_v46 = vmax.f32 %v15595_v47, 0.0 }
 0xba8   : > { %v16094_v17 = vadd.f32 %v16093_v62, %v16092_v52  ;;  %v16244_v23 = vsel %vm16190_vm6, %v16082_v29, %v16243_v42  ;;  %v15660_v14 = vmax.f32 %v15590_v35, 0.0 }
 0xba9   : > { %v16087_v43 = vadd.f32 %v16086_v5, %v16085_v31  ;;  %v16104_v0 = vsel %vm15662_vm3, %v15661_v46, 0.0 }
 0xbaa   : > { %v16095_v21 = vrot.slane %v16094_v17, 1  ;;  %v16105_v49 = vrot.slane %v16104_v0, 4  ;;  %v16097_v13 = vsel %vm15662_vm3, %v15660_v14, 0.0 }
 0xbab   : > { %v16088_v63 = vrot.slane %v16087_v43, 1  ;;  %v16098_v27 = vrot.slane %v16097_v13, 4 }
 0xbac   : > { %v16106_v45 = vadd.f32 %v16105_v49, %v16104_v0  ;;  %v16096_v18 = vadd.f32 %v16095_v21, %v16094_v17 }
 0xbad   : > { %v16089_v32 = vadd.f32 %v16088_v63, %v16087_v43  ;;  %v16099_v33 = vadd.f32 %v16098_v27, %v16097_v13 }
 0xbae   : > { %v16107_v57 = vrot.slane %v16106_v45, 2 }
 0xbaf   : > { %v16245_v61 = vsel %vm16192_vm7, %v16089_v32, %v16244_v23  ;;  %v16100_v58 = vrot.slane %v16099_v33, 2 }
 0xbb0   : > { %v16108_v26 = vadd.f32 %v16107_v57, %v16106_v45  ;;  %v16246_v12 = vsel %vm16194_vm8, %v16096_v18, %v16245_v61 }
 0xbb1   : > { %v16101_v37 = vadd.f32 %v16100_v58, %v16099_v33 }
 0xbb2   : > { %v16109_v51 = vrot.slane %v16108_v26, 1 }
 0xbb3   : > { %v16102_v4 = vrot.slane %v16101_v37, 1 }
 0xbb4   : > { %v16110_v15 = vadd.f32 %v16109_v51, %v16108_v26 }
 0xbb5   : > { %v16103_v60 = vadd.f32 %v16102_v4, %v16101_v37 }
 0xbb7   : > { %v16247_v38 = vsel %vm16196_vm9, %v16103_v60, %v16246_v12 }
 0xbb8   : > { %v16248_v22 = vsel %vm16198_vm10, %v16110_v15, %v16247_v38 }
 0xbb9   : > { %18728 = vmatmul.mubr.msk.f32.gmra.mrb[34].mxu0 %vm15662_vm3, %v16248_v22 }
 0xbf0   : > { %v18720_v9 = vpop.f32.mrb[28].mxu0 }
 0xbf1   : > { %v16337_v2 = vadd.f32 %v18720_v9, %v16961_v28  ;;  %v16331_v54 = vpop.f32.mrb[29].mxu0 }
 0xbf2   : > { %v16332_v8 = vadd.f32 %v16961_v28, %v16331_v54 }
 0xbf3   : > { %16371 = vst.msk [vmem:[%s496_s23 + $0x8] sm:$0xff] %vm15662_vm3, %v16337_v2 }
 0xbf4   : > { %16370 = vst.msk [vmem:[%s496_s23] sm:$0xff] %vm15662_vm3, %v16332_v8 }
 0xc2c   : > { %v18723_v1 = vpop.f32.mrb[30].mxu0 }
 0xc2d   : > { %v16347_v20 = vadd.f32 %v18723_v1, %v16961_v28  ;;  %v16341_v55 = vpop.f32.mrb[31].mxu0 }
 0xc2e   : > { %v16342_v3 = vadd.f32 %v16961_v28, %v16341_v55 }
 0xc2f   : > { %16373 = vst.msk [vmem:[%s496_s23 + $0x18] sm:$0xff] %vm15662_vm3, %v16347_v20 }
 0xc30   : > { %16372 = vst.msk [vmem:[%s496_s23 + $0x10] sm:$0xff] %vm15662_vm3, %v16342_v3 }
 0xc4d   : > { %v18726_v50 = vpop.f32.mrb[32].mxu0 }
 0xc4e   : > { %v16357_v40 = vadd.f32 %v18726_v50, %v16961_v28  ;;  %v16351_v6 = vpop.f32.mrb[33].mxu0 }
 0xc4f   : > { %v16352_v44 = vadd.f32 %v16961_v28, %v16351_v6 }
 0xc50   : > { %16375 = vst.msk [vmem:[%s496_s23 + $0x28] sm:$0xff] %vm15662_vm3, %v16357_v40 }
 0xc51   : > { %16374 = vst.msk [vmem:[%s496_s23 + $0x20] sm:$0xff] %vm15662_vm3, %v16352_v44 }
 0xc8c   : > { %v18729_v39 = vpop.f32.mrb[34].mxu0 }
 0xc8d   : > { %v16367_v30 = vadd.f32 %v18729_v39, %v16961_v28  ;;  %v16361_v7 = vpop.f32.mrb[35].mxu0 }
 0xc8e   : > { %v16362_v25 = vadd.f32 %v16961_v28, %v16361_v7 }
 0xc8f   : > { %16377 = vst.msk [vmem:[%s496_s23 + $0x38] sm:$0xff] %vm15662_vm3, %v16367_v30 }
 0xc90   : > { %16376 = vst.msk [vmem:[%s496_s23 + $0x30] sm:$0xff] %vm15662_vm3, %v16362_v25 }
 0xc91 PF: > { %s25_s18 = sadd.s32 1, %s19298_s18  }
 0xc92   : > { %p22_p5 = scmp.ge.s32.totalorder %s25_s18, 4  }
 0xc94   :  { %24 = sbr.rel (!%p22_p5) target bundleno = 1 (0x1), region = 110 }

</bundles_post_ra>
